<compile_context>
chip_gen: v7x
topology: tpu7x:2x2x1
jax: 0.10.0
libtpu: 0.0.40
codegen_flags: <defaults>
</compile_context>

<pallas_src>
import functools
import math

import jax
import jax.numpy as jnp
from jax.experimental import pallas as pl
from jax.experimental.pallas import tpu as pltpu

VOCAB = 256
TYPE_VOCAB = 2
H = 128            # hidden size (768 real)
NH = 2             # attention heads (12 real)
DH = H // NH
FFN = 256          # intermediate size (3072 real)
L = 2              # encoder layers (12 real)
S = 128            # sequence length (512 real)
B = 2
CLS_NUM = 103      # cls_num ctor arg of BERTLegalPretraining
QA_OUT = 2         # qa_outputs = Linear(768, 2)
LANE = 128
QA_PAD = LANE
CLS_PAD = ((CLS_NUM + LANE - 1) // LANE) * LANE   # 128


# --------------------------- Pallas kernels ---------------------------------

def _gelu(y):
    # TODO(synk): tanh-approx gelu; exact-erf gelu differs at ~1e-3 level.
    return 0.5 * y * (1.0 + jnp.tanh(
        0.7978845608028654 * (y + 0.044715 * y * y * y)))


def _fused_linear_kernel(*refs, act, ln, has_res):
    """y = act(x @ W + b) [+ residual] [-> LayerNorm].

    Single K step (full K per block), full N per block, bf16 MXU operands,
    f32 accumulation and f32 epilogue.
    """
    x_ref, w_ref, b_ref = refs[0], refs[1], refs[2]
    idx = 3
    res_ref = None
    if has_res:
        res_ref = refs[idx]
        idx += 1
    g_ref = bln_ref = None
    if ln:
        g_ref, bln_ref = refs[idx], refs[idx + 1]
        idx += 2
    o_ref = refs[idx]

    y = jnp.dot(x_ref[...].astype(jnp.bfloat16),
                w_ref[...].astype(jnp.bfloat16),
                preferred_element_type=jnp.float32)
    y = y + b_ref[...]
    if act == "gelu":
        y = _gelu(y)
    if has_res:
        y = y + res_ref[...]
    if ln:
        mu = jnp.mean(y, axis=-1, keepdims=True)
        var = jnp.mean(jnp.square(y - mu), axis=-1, keepdims=True)
        y = (y - mu) * jax.lax.rsqrt(var + 1e-12)
        y = y * g_ref[...] + bln_ref[...]
    o_ref[...] = y.astype(o_ref.dtype)


def pallas_linear(x, w, b, act="none", residual=None,
                  ln_gamma=None, ln_beta=None, tm=128):
    """Row-tiled fused linear: grid over M only; W/bias resident across steps."""
    M, K = x.shape
    K2, N = w.shape
    assert K == K2 and N % LANE == 0
    tm = min(tm, M)
    assert M % tm == 0

    ln = ln_gamma is not None
    has_res = residual is not None

    arrays = [x, w, b.reshape(1, N)]
    in_specs = [pl.BlockSpec((tm, K), lambda i: (i, 0)),
                pl.BlockSpec((K, N), lambda i: (0, 0)),
                pl.BlockSpec((1, N), lambda i: (0, 0))]
    if has_res:
        arrays.append(residual)
        in_specs.append(pl.BlockSpec((tm, N), lambda i: (i, 0)))
    if ln:
        arrays += [ln_gamma.reshape(1, N), ln_beta.reshape(1, N)]
        in_specs += [pl.BlockSpec((1, N), lambda i: (0, 0)),
                     pl.BlockSpec((1, N), lambda i: (0, 0))]

    return pl.pallas_call(
        functools.partial(_fused_linear_kernel, act=act, ln=ln,
                          has_res=has_res),
        out_shape=jax.ShapeDtypeStruct((M, N), jnp.float32),
        grid=(M // tm,),
        in_specs=in_specs,
        out_specs=pl.BlockSpec((tm, N), lambda i: (i, 0)),
        compiler_params=pltpu.CompilerParams(
            dimension_semantics=("parallel",)),
    )(*arrays)


def _layernorm_kernel(x_ref, g_ref, b_ref, o_ref):
    x = x_ref[...].astype(jnp.float32)
    mu = jnp.mean(x, axis=-1, keepdims=True)
    var = jnp.mean(jnp.square(x - mu), axis=-1, keepdims=True)
    y = (x - mu) * jax.lax.rsqrt(var + 1e-12)
    o_ref[...] = (y * g_ref[...] + b_ref[...]).astype(o_ref.dtype)


def pallas_layernorm(x, gamma, beta, tm=128):
    M, Hd = x.shape
    tm = min(tm, M)
    assert M % tm == 0
    return pl.pallas_call(
        _layernorm_kernel,
        out_shape=jax.ShapeDtypeStruct((M, Hd), x.dtype),
        grid=(M // tm,),
        in_specs=[pl.BlockSpec((tm, Hd), lambda i: (i, 0)),
                  pl.BlockSpec((1, Hd), lambda i: (0, 0)),
                  pl.BlockSpec((1, Hd), lambda i: (0, 0))],
        out_specs=pl.BlockSpec((tm, Hd), lambda i: (i, 0)),
        compiler_params=pltpu.CompilerParams(
            dimension_semantics=("parallel",)),
    )(x, gamma.reshape(1, Hd), beta.reshape(1, Hd))


def _attention_kernel(qkv_ref, m_ref, o_ref, *, nh, dh, scale):
    """Multi-head attention over the fused QKV slab for one batch element.

    Heads are unrolled in-kernel; output is one lane-dense (S, H) tile.
    """
    qkv = qkv_ref[0]          # (S, 3H) f32
    bias = m_ref[0]           # (1, S)  additive key-mask bias
    hh = nh * dh
    outs = []
    for h in range(nh):
        q = qkv[:, h * dh:(h + 1) * dh] * scale
        k = qkv[:, hh + h * dh: hh + (h + 1) * dh]
        v = qkv[:, 2 * hh + h * dh: 2 * hh + (h + 1) * dh]
        s = jax.lax.dot_general(
            q.astype(jnp.bfloat16), k.astype(jnp.bfloat16),
            (((1,), (1,)), ((), ())),
            preferred_element_type=jnp.float32)          # (S, S)
        s = s + bias
        s_max = jnp.max(s, axis=-1, keepdims=True)
        p = jnp.exp(s - s_max)
        l = jnp.sum(p, axis=-1, keepdims=True)
        ctx = jnp.dot(p.astype(jnp.bfloat16), v.astype(jnp.bfloat16),
                      preferred_element_type=jnp.float32)  # (S, dh)
        outs.append(ctx * pl.reciprocal(l, approx=True))
    o_ref[0] = jnp.concatenate(outs, axis=-1).astype(o_ref.dtype)


def pallas_attention(qkv, mask_bias, nh, dh):
    # qkv: (B, S, 3H) f32; mask_bias: (B, 1, S) f32 additive key bias.
    Bb, Ss, threeH = qkv.shape
    Hh = nh * dh
    assert threeH == 3 * Hh
    return pl.pallas_call(
        functools.partial(_attention_kernel, nh=nh, dh=dh,
                          scale=1.0 / math.sqrt(dh)),
        out_shape=jax.ShapeDtypeStruct((Bb, Ss, Hh), jnp.float32),
        grid=(Bb,),
        in_specs=[pl.BlockSpec((1, Ss, threeH), lambda b: (b, 0, 0)),
                  pl.BlockSpec((1, 1, Ss), lambda b: (b, 0, 0))],
        out_specs=pl.BlockSpec((1, Ss, Hh), lambda b: (b, 0, 0)),
        compiler_params=pltpu.CompilerParams(
            dimension_semantics=("parallel",)),
    )(qkv, mask_bias)


def _ce_kernel(logits_ref, labels_ref, loss_ref, cnt_ref, *, ignore_index):
    """Sum of per-row softmax cross-entropy + count of non-ignored rows."""
    logits = logits_ref[...].astype(jnp.float32)         # (M, C)
    labels = labels_ref[...]                             # (M, 1) int32
    m = jnp.max(logits, axis=-1, keepdims=True)
    lse = jnp.log(jnp.sum(jnp.exp(logits - m), axis=-1, keepdims=True)) + m
    cls_idx = jax.lax.broadcasted_iota(jnp.int32, logits.shape, 1)
    sel = jnp.sum(jnp.where(cls_idx == labels, logits, 0.0),
                  axis=-1, keepdims=True)                # (M, 1)
    valid = (labels != ignore_index).astype(jnp.float32)  # (M, 1)
    loss_ref[...] = jnp.sum((lse - sel) * valid, keepdims=True)
    cnt_ref[...] = jnp.sum(valid, keepdims=True)


def pallas_ce_mean(logits, labels, ignore_index):
    """CrossEntropyLoss(reduction='mean', ignore_index=...) on raw logits."""
    M, C = logits.shape
    labels2 = labels.reshape(M, 1).astype(jnp.int32)
    loss_sum, count = pl.pallas_call(
        functools.partial(_ce_kernel, ignore_index=ignore_index),
        out_shape=(jax.ShapeDtypeStruct((1, 1), jnp.float32),
                   jax.ShapeDtypeStruct((1, 1), jnp.float32)),
        grid=(1,),
        in_specs=[pl.BlockSpec((M, C), lambda i: (0, 0)),
                  pl.BlockSpec((M, 1), lambda i: (0, 0))],
        out_specs=(pl.BlockSpec((1, 1), lambda i: (0, 0)),
                   pl.BlockSpec((1, 1), lambda i: (0, 0))),
        compiler_params=pltpu.CompilerParams(
            dimension_semantics=("arbitrary",)),
    )(logits, labels2)
    return loss_sum[0, 0] / jnp.maximum(count[0, 0], 1.0)


# --------------------------- Model (JAX glue) --------------------------------

def bert_encoder(params, input_ids, token_type_ids, attention_mask):
    """Scaled-down BertModel encoder -> sequence_output (B*S, H) f32."""
    p = params["bert"]
    # TODO(synk): embedding-table gathers stay as XLA jnp.take (no Pallas gather).
    x = (jnp.take(p["word_emb"], input_ids, axis=0)
         + p["pos_emb"][None, :S, :]
         + jnp.take(p["type_emb"], token_type_ids, axis=0))        # (B, S, H)
    xf = pallas_layernorm(x.reshape(B * S, H), p["emb_ln_g"], p["emb_ln_b"])

    mask_bias = ((1.0 - attention_mask.astype(jnp.float32)) * -10000.0
                 ).reshape(B, 1, S)

    for layer in p["layers"]:
        # Fused QKV projection: one launch, lane-dense N = 3H.
        qkv = pallas_linear(xf, layer["w_qkv"], layer["b_qkv"])     # (B*S, 3H)
        ctx = pallas_attention(qkv.reshape(B, S, 3 * H), mask_bias,
                               nh=NH, dh=DH)                         # (B, S, H)
        # Output projection + residual + LayerNorm, fused.
        xf = pallas_linear(ctx.reshape(B * S, H), layer["wo"], layer["bo"],
                           residual=xf,
                           ln_gamma=layer["ln1_g"], ln_beta=layer["ln1_b"])
        # FFN: gelu fused into FFN1; residual+LN fused into FFN2.
        inter = pallas_linear(xf, layer["w_ff1"], layer["b_ff1"], act="gelu")
        xf = pallas_linear(inter, layer["w_ff2"], layer["b_ff2"],
                           residual=xf,
                           ln_gamma=layer["ln2_g"], ln_beta=layer["ln2_b"])
    return xf                                                        # (B*S, H)


def bert_legal_pretraining_forward(params, input_ids, token_type_ids,
                                   attention_mask, masked_lm_labels,
                                   start_positions, end_positions):
    seq_flat = bert_encoder(params, input_ids, token_type_ids, attention_mask)

    # ---- CustomBertModel MLM branch: prediction head + masked-LM loss ----
    h = pallas_linear(seq_flat, params["mlm_dense_w"], params["mlm_dense_b"],
                      act="gelu",
                      ln_gamma=params["mlm_ln_g"], ln_beta=params["mlm_ln_b"])
    prediction_scores = pallas_linear(h, params["mlm_decoder_w"],
                                      params["mlm_decoder_b"])       # (B*S, V)
    mlm_loss = pallas_ce_mean(prediction_scores,
                              masked_lm_labels.reshape(-1), ignore_index=-1)

    # ---- qa_outputs: Linear(H, 2), zero-padded to a 128-lane output ----
    qa = pallas_linear(seq_flat, params["qa_w"], params["qa_b"])     # (B*S, 128)
    start_logits = qa[:, 0].reshape(B, S)
    end_logits = qa[:, 1].reshape(B, S)
    ignored_index = S                                                # size(1)
    sp = jnp.clip(start_positions, 0, ignored_index)
    ep = jnp.clip(end_positions, 0, ignored_index)
    start_loss = pallas_ce_mean(start_logits, sp, ignore_index=ignored_index)
    end_loss = pallas_ce_mean(end_logits, ep, ignore_index=ignored_index)
    span_loss = (start_loss + end_loss) / 2.0

    # ---- cls head on the [CLS] token ----
    # TODO(synk): Dropout(p=0.1) treated as identity (inference mode).
    cls_tok = seq_flat.reshape(B, S, H)[:, 0, :]                     # (B, H)
    cls_logits_pad = pallas_linear(cls_tok, params["cls_w"], params["cls_b"],
                                   tm=B)                             # (B, 128)
    cls_logits = cls_logits_pad[:, :CLS_NUM]

    return cls_logits, mlm_loss, span_loss


# --------------------------- Deterministic init ------------------------------

def init_params(key):
    def normal(k, shape, std=0.02):
        return std * jax.random.normal(k, shape, dtype=jnp.float32)

    keys = iter(jax.random.split(key, 256))

    bert = dict(
        word_emb=normal(next(keys), (VOCAB, H)),
        pos_emb=normal(next(keys), (S, H)),
        type_emb=normal(next(keys), (TYPE_VOCAB, H)),
        emb_ln_g=jnp.ones((H,), jnp.float32),
        emb_ln_b=jnp.zeros((H,), jnp.float32),
        layers=[])
    for _ in range(L):
        wq = normal(next(keys), (H, H))
        wk = normal(next(keys), (H, H))
        wv = normal(next(keys), (H, H))
        bert["layers"].append(dict(
            w_qkv=jnp.concatenate([wq, wk, wv], axis=1).astype(jnp.bfloat16),
            b_qkv=jnp.zeros((3 * H,), jnp.float32),
            wo=normal(next(keys), (H, H)).astype(jnp.bfloat16),
            bo=jnp.zeros((H,), jnp.float32),
            ln1_g=jnp.ones((H,), jnp.float32),
            ln1_b=jnp.zeros((H,), jnp.float32),
            w_ff1=normal(next(keys), (H, FFN)).astype(jnp.bfloat16),
            b_ff1=jnp.zeros((FFN,), jnp.float32),
            w_ff2=normal(next(keys), (FFN, H)).astype(jnp.bfloat16),
            b_ff2=jnp.zeros((H,), jnp.float32),
            ln2_g=jnp.ones((H,), jnp.float32),
            ln2_b=jnp.zeros((H,), jnp.float32)))

    # MLM prediction head (decoder weight tied to word embeddings, pre-transposed).
    mlm_decoder_w = bert["word_emb"].T.astype(jnp.bfloat16)          # (H, VOCAB)

    # qa_outputs (H, 2) and cls (H, CLS_NUM), zero-padded to 128 lanes at init.
    qa_w = jnp.zeros((H, QA_PAD), jnp.float32)
    qa_w = qa_w.at[:, :QA_OUT].set(normal(next(keys), (H, QA_OUT)))
    cls_w = jnp.zeros((H, CLS_PAD), jnp.float32)
    cls_w = cls_w.at[:, :CLS_NUM].set(normal(next(keys), (H, CLS_NUM)))

    return dict(
        bert=bert,
        mlm_dense_w=normal(next(keys), (H, H)).astype(jnp.bfloat16),
        mlm_dense_b=jnp.zeros((H,), jnp.float32),
        mlm_ln_g=jnp.ones((H,), jnp.float32),
        mlm_ln_b=jnp.zeros((H,), jnp.float32),
        mlm_decoder_w=mlm_decoder_w,
        mlm_decoder_b=jnp.zeros((VOCAB,), jnp.float32),
        qa_w=qa_w.astype(jnp.bfloat16),
        qa_b=jnp.zeros((QA_PAD,), jnp.float32),
        cls_w=cls_w.astype(jnp.bfloat16),
        cls_b=jnp.zeros((CLS_PAD,), jnp.float32))


# --------------------------------- main ---------------------------------------

if __name__ == "__main__":
    key = jax.random.PRNGKey(0)
    pkey, dkey = jax.random.split(key)
    params = init_params(pkey)

    k1, k2, k3, k4, k5 = jax.random.split(dkey, 5)
    input_ids = jax.random.randint(k1, (B, S), 0, VOCAB, dtype=jnp.int32)
    token_type_ids = jnp.zeros((B, S), jnp.int32)
    attention_mask = jnp.ones((B, S), jnp.int32)
    masked = jax.random.uniform(k2, (B, S)) < 0.15
    masked_lm_labels = jnp.where(
        masked, jax.random.randint(k3, (B, S), 0, VOCAB, dtype=jnp.int32),
        -1).astype(jnp.int32)
    start_positions = jax.random.randint(k4, (B,), 0, S, dtype=jnp.int32)
    end_positions = jax.random.randint(k5, (B,), 0, S, dtype=jnp.int32)

    fwd = jax.jit(bert_legal_pretraining_forward)
    cls_logits, mlm_loss, span_loss = fwd(
        params, input_ids, token_type_ids, attention_mask,
        masked_lm_labels, start_positions, end_positions)
    jax.block_until_ready((cls_logits, mlm_loss, span_loss))

    assert cls_logits.shape == (B, CLS_NUM)
    assert mlm_loss.shape == () and span_loss.shape == ()
    assert bool(jnp.isfinite(mlm_loss)) and bool(jnp.isfinite(span_loss))
    print("KERNEL_OK")
</pallas_src>

<mosaic_0001>
module attributes {stable_mosaic.version = 11 : i64} {
  func.func @_layernorm_kernel(%arg0: i32, %arg1: memref<128x128xf32, #tpu.memory_space<vmem>>, %arg2: memref<1x128xf32, #tpu.memory_space<vmem>>, %arg3: memref<1x128xf32, #tpu.memory_space<vmem>>, %arg4: memref<128x128xf32, #tpu.memory_space<vmem>>) attributes {dimension_semantics = [#tpu.dimension_semantics<parallel>], iteration_bounds = array<i64: 2>, scalar_prefetch = 0 : i64, scratch_operands = 0 : i64, tpu.core_type = #tpu.core_type<tc>, window_params = [{transform_indices = @transform_0, window_bounds = array<i64: 128, 128>}, {pipeline_mode = #tpu.pipeline_mode<synchronous>, transform_indices = @transform_1, window_bounds = array<i64: 1, 128>}, {pipeline_mode = #tpu.pipeline_mode<synchronous>, transform_indices = @transform_2, window_bounds = array<i64: 1, 128>}, {transform_indices = @transform_3, window_bounds = array<i64: 128, 128>}]} {
    %c0 = arith.constant 0 : index
    %c0_0 = arith.constant 0 : index
    %0 = vector.load %arg1[%c0, %c0_0] : memref<128x128xf32, #tpu.memory_space<vmem>>, vector<128x128xf32>
    %cst = arith.constant dense<0.000000e+00> : vector<128xf32>
    %1 = vector.multi_reduction <add>, %0, %cst [1] : vector<128x128xf32> to vector<128xf32>
    %2 = vector.shape_cast %1 : vector<128xf32> to vector<128x1xf32>
    %cst_1 = arith.constant 1.280000e+02 : f32
    %3 = vector.broadcast %cst_1 : f32 to vector<128x1xf32>
    %4 = arith.divf %2, %3 : vector<128x1xf32>
    %5 = vector.broadcast %4 : vector<128x1xf32> to vector<128x128xf32>
    %6 = arith.subf %0, %5 : vector<128x128xf32>
    %7 = arith.mulf %6, %6 : vector<128x128xf32>
    %cst_2 = arith.constant dense<0.000000e+00> : vector<128xf32>
    %8 = vector.multi_reduction <add>, %7, %cst_2 [1] : vector<128x128xf32> to vector<128xf32>
    %9 = vector.shape_cast %8 : vector<128xf32> to vector<128x1xf32>
    %cst_3 = arith.constant 1.280000e+02 : f32
    %10 = vector.broadcast %cst_3 : f32 to vector<128x1xf32>
    %11 = arith.divf %9, %10 : vector<128x1xf32>
    %12 = vector.broadcast %4 : vector<128x1xf32> to vector<128x128xf32>
    %13 = arith.subf %0, %12 : vector<128x128xf32>
    %cst_4 = arith.constant 9.99999996E-13 : f32
    %14 = vector.broadcast %cst_4 : f32 to vector<128x1xf32>
    %15 = arith.addf %11, %14 : vector<128x1xf32>
    %16 = math.rsqrt %15 : vector<128x1xf32>
    %17 = vector.broadcast %16 : vector<128x1xf32> to vector<128x128xf32>
    %18 = arith.mulf %13, %17 : vector<128x128xf32>
    %c0_5 = arith.constant 0 : index
    %c0_6 = arith.constant 0 : index
    %19 = vector.load %arg2[%c0_5, %c0_6] : memref<1x128xf32, #tpu.memory_space<vmem>>, vector<1x128xf32>
    %20 = vector.broadcast %19 : vector<1x128xf32> to vector<128x128xf32>
    %21 = arith.mulf %18, %20 : vector<128x128xf32>
    %c0_7 = arith.constant 0 : index
    %c0_8 = arith.constant 0 : index
    %22 = vector.load %arg3[%c0_7, %c0_8] : memref<1x128xf32, #tpu.memory_space<vmem>>, vector<1x128xf32>
    %23 = vector.broadcast %22 : vector<1x128xf32> to vector<128x128xf32>
    %24 = arith.addf %21, %23 : vector<128x128xf32>
    %c0_9 = arith.constant 0 : index
    %c0_10 = arith.constant 0 : index
    %25 = vector.load %arg4[%c0_9, %c0_10] : memref<128x128xf32, #tpu.memory_space<vmem>>, vector<128x128xf32>
    tpu.vector_store %arg4[%c0_9, %c0_10], %24 {strides = array<i32>} : memref<128x128xf32, #tpu.memory_space<vmem>>, vector<128x128xf32>,
    return
  }
  func.func @transform_0(%arg0: i32) -> (i32, i32) {
    %c0_i32 = arith.constant 0 : i32
    %c0_i32_0 = arith.constant 0 : i32
    return %arg0, %c0_i32 : i32, i32
  }
  func.func @transform_1(%arg0: i32) -> (i32, i32) {
    %c0_i32 = arith.constant 0 : i32
    %c0_i32_0 = arith.constant 0 : i32
    %c0_i32_1 = arith.constant 0 : i32
    return %c0_i32, %c0_i32_0 : i32, i32
  }
  func.func @transform_2(%arg0: i32) -> (i32, i32) {
    %c0_i32 = arith.constant 0 : i32
    %c0_i32_0 = arith.constant 0 : i32
    %c0_i32_1 = arith.constant 0 : i32
    return %c0_i32, %c0_i32_0 : i32, i32
  }
  func.func @transform_3(%arg0: i32) -> (i32, i32) {
    %c0_i32 = arith.constant 0 : i32
    %c0_i32_0 = arith.constant 0 : i32
    return %arg0, %c0_i32 : i32, i32
  }
}

module attributes {stable_mosaic.version = 11 : i64} {
  func.func @_fused_linear_kernel(%arg0: i32, %arg1: memref<128x128xf32, #tpu.memory_space<vmem>>, %arg2: memref<128x384xbf16, #tpu.memory_space<vmem>>, %arg3: memref<1x384xf32, #tpu.memory_space<vmem>>, %arg4: memref<128x384xf32, #tpu.memory_space<vmem>>) attributes {dimension_semantics = [#tpu.dimension_semantics<parallel>], iteration_bounds = array<i64: 2>, scalar_prefetch = 0 : i64, scratch_operands = 0 : i64, tpu.core_type = #tpu.core_type<tc>, window_params = [{transform_indices = @transform_0, window_bounds = array<i64: 128, 128>}, {pipeline_mode = #tpu.pipeline_mode<synchronous>, transform_indices = @transform_1, window_bounds = array<i64: 128, 384>}, {pipeline_mode = #tpu.pipeline_mode<synchronous>, transform_indices = @transform_2, window_bounds = array<i64: 1, 384>}, {transform_indices = @transform_3, window_bounds = array<i64: 128, 384>}]} {
    %c0 = arith.constant 0 : index
    %c0_0 = arith.constant 0 : index
    %0 = vector.load %arg1[%c0, %c0_0] : memref<128x128xf32, #tpu.memory_space<vmem>>, vector<128x128xf32>
    %1 = arith.truncf %0 : vector<128x128xf32> to vector<128x128xbf16>
    %c0_1 = arith.constant 0 : index
    %c0_2 = arith.constant 0 : index
    %2 = vector.load %arg2[%c0_1, %c0_2] : memref<128x384xbf16, #tpu.memory_space<vmem>>, vector<128x384xbf16>
    %cst = arith.constant dense<0.000000e+00> : vector<128x384xf32>
    %3 = tpu.matmul %1, %2, %cst {dimension_numbers = #tpu.dot_dimension_numbers<[1], [0], [0], [1], [0, 0, 1, 1], [], []>} : vector<128x128xbf16>, vector<128x384xbf16>, vector<128x384xf32> -> vector<128x384xf32>
    %c0_3 = arith.constant 0 : index
    %c0_4 = arith.constant 0 : index
    %4 = vector.load %arg3[%c0_3, %c0_4] : memref<1x384xf32, #tpu.memory_space<vmem>>, vector<1x384xf32>
    %5 = vector.broadcast %4 : vector<1x384xf32> to vector<128x384xf32>
    %6 = arith.addf %3, %5 : vector<128x384xf32>
    %c0_5 = arith.constant 0 : index
    %c0_6 = arith.constant 0 : index
    %7 = vector.load %arg4[%c0_5, %c0_6] : memref<128x384xf32, #tpu.memory_space<vmem>>, vector<128x384xf32>
    tpu.vector_store %arg4[%c0_5, %c0_6], %6 {strides = array<i32>} : memref<128x384xf32, #tpu.memory_space<vmem>>, vector<128x384xf32>,
    return
  }
  func.func @transform_0(%arg0: i32) -> (i32, i32) {
    %c0_i32 = arith.constant 0 : i32
    %c0_i32_0 = arith.constant 0 : i32
    return %arg0, %c0_i32 : i32, i32
  }
  func.func @transform_1(%arg0: i32) -> (i32, i32) {
    %c0_i32 = arith.constant 0 : i32
    %c0_i32_0 = arith.constant 0 : i32
    %c0_i32_1 = arith.constant 0 : i32
    return %c0_i32, %c0_i32_0 : i32, i32
  }
  func.func @transform_2(%arg0: i32) -> (i32, i32) {
    %c0_i32 = arith.constant 0 : i32
    %c0_i32_0 = arith.constant 0 : i32
    %c0_i32_1 = arith.constant 0 : i32
    return %c0_i32, %c0_i32_0 : i32, i32
  }
  func.func @transform_3(%arg0: i32) -> (i32, i32) {
    %c0_i32 = arith.constant 0 : i32
    %c0_i32_0 = arith.constant 0 : i32
    return %arg0, %c0_i32 : i32, i32
  }
}

module attributes {stable_mosaic.version = 11 : i64} {
  func.func @_attention_kernel(%arg0: i32, %arg1: memref<1x128x384xf32, #tpu.memory_space<vmem>>, %arg2: memref<1x1x128xf32, #tpu.memory_space<vmem>>, %arg3: memref<1x128x128xf32, #tpu.memory_space<vmem>>) attributes {dimension_semantics = [#tpu.dimension_semantics<parallel>], iteration_bounds = array<i64: 2>, scalar_prefetch = 0 : i64, scratch_operands = 0 : i64, tpu.core_type = #tpu.core_type<tc>, window_params = [{transform_indices = @transform_0, window_bounds = array<i64: 1, 128, 384>}, {transform_indices = @transform_1, window_bounds = array<i64: 1, 1, 128>}, {transform_indices = @transform_2, window_bounds = array<i64: 1, 128, 128>}]} {
    %c0 = arith.constant 0 : index
    %c0_0 = arith.constant 0 : index
    %c0_1 = arith.constant 0 : index
    %0 = vector.load %arg1[%c0, %c0_0, %c0_1] : memref<1x128x384xf32, #tpu.memory_space<vmem>>, vector<1x128x384xf32>
    %1 = vector.shape_cast %0 : vector<1x128x384xf32> to vector<128x384xf32>
    %c0_2 = arith.constant 0 : index
    %c0_3 = arith.constant 0 : index
    %c0_4 = arith.constant 0 : index
    %2 = vector.load %arg2[%c0_2, %c0_3, %c0_4] : memref<1x1x128xf32, #tpu.memory_space<vmem>>, vector<1x1x128xf32>
    %3 = vector.shape_cast %2 : vector<1x1x128xf32> to vector<1x128xf32>
    %4 = vector.extract_strided_slice %1 {offsets = [0, 0], sizes = [128, 64], strides = [1, 1]} : vector<128x384xf32> to vector<128x64xf32>
    %cst = arith.constant 1.250000e-01 : f32
    %5 = vector.broadcast %cst : f32 to vector<128x64xf32>
    %6 = arith.mulf %4, %5 : vector<128x64xf32>
    %7 = vector.extract_strided_slice %1 {offsets = [0, 128], sizes = [128, 64], strides = [1, 1]} : vector<128x384xf32> to vector<128x64xf32>
    %8 = vector.extract_strided_slice %1 {offsets = [0, 256], sizes = [128, 64], strides = [1, 1]} : vector<128x384xf32> to vector<128x64xf32>
    %9 = arith.truncf %6 : vector<128x64xf32> to vector<128x64xbf16>
    %10 = arith.truncf %7 : vector<128x64xf32> to vector<128x64xbf16>
    %cst_5 = arith.constant dense<0.000000e+00> : vector<128x128xf32>
    %11 = tpu.matmul %9, %10, %cst_5 {dimension_numbers = #tpu.dot_dimension_numbers<[1], [1], [0], [0], [0, 0, 1, 0], [], []>} : vector<128x64xbf16>, vector<128x64xbf16>, vector<128x128xf32> -> vector<128x128xf32>
    %12 = vector.broadcast %3 : vector<1x128xf32> to vector<128x128xf32>
    %13 = arith.addf %11, %12 : vector<128x128xf32>
    %cst_6 = arith.constant dense<0xFF800000> : vector<128xf32>
    %14 = vector.multi_reduction <maximumf>, %13, %cst_6 [1] : vector<128x128xf32> to vector<128xf32>
    %15 = vector.shape_cast %14 : vector<128xf32> to vector<128x1xf32>
    %16 = vector.broadcast %15 : vector<128x1xf32> to vector<128x128xf32>
    %17 = arith.subf %13, %16 : vector<128x128xf32>
    %18 = math.exp %17 : vector<128x128xf32>
    %cst_7 = arith.constant dense<0.000000e+00> : vector<128xf32>
    %19 = vector.multi_reduction <add>, %18, %cst_7 [1] : vector<128x128xf32> to vector<128xf32>
    %20 = vector.shape_cast %19 : vector<128xf32> to vector<128x1xf32>
    %21 = arith.truncf %18 : vector<128x128xf32> to vector<128x128xbf16>
    %22 = arith.truncf %8 : vector<128x64xf32> to vector<128x64xbf16>
    %cst_8 = arith.constant dense<0.000000e+00> : vector<128x64xf32>
    %23 = tpu.matmul %21, %22, %cst_8 {dimension_numbers = #tpu.dot_dimension_numbers<[1], [0], [0], [1], [0, 0, 1, 1], [], []>} : vector<128x128xbf16>, vector<128x64xbf16>, vector<128x64xf32> -> vector<128x64xf32>
    %24 = tpu.reciprocal %20 {approx = true} : vector<128x1xf32> -> vector<128x1xf32>
    %25 = vector.broadcast %24 : vector<128x1xf32> to vector<128x64xf32>
    %26 = arith.mulf %23, %25 : vector<128x64xf32>
    %27 = vector.extract_strided_slice %1 {offsets = [0, 64], sizes = [128, 64], strides = [1, 1]} : vector<128x384xf32> to vector<128x64xf32>
    %cst_9 = arith.constant 1.250000e-01 : f32
    %28 = vector.broadcast %cst_9 : f32 to vector<128x64xf32>
    %29 = arith.mulf %27, %28 : vector<128x64xf32>
    %30 = vector.extract_strided_slice %1 {offsets = [0, 192], sizes = [128, 64], strides = [1, 1]} : vector<128x384xf32> to vector<128x64xf32>
    %31 = vector.extract_strided_slice %1 {offsets = [0, 320], sizes = [128, 64], strides = [1, 1]} : vector<128x384xf32> to vector<128x64xf32>
    %32 = arith.truncf %29 : vector<128x64xf32> to vector<128x64xbf16>
    %33 = arith.truncf %30 : vector<128x64xf32> to vector<128x64xbf16>
    %cst_10 = arith.constant dense<0.000000e+00> : vector<128x128xf32>
    %34 = tpu.matmul %32, %33, %cst_10 {dimension_numbers = #tpu.dot_dimension_numbers<[1], [1], [0], [0], [0, 0, 1, 0], [], []>} : vector<128x64xbf16>, vector<128x64xbf16>, vector<128x128xf32> -> vector<128x128xf32>
    %35 = vector.broadcast %3 : vector<1x128xf32> to vector<128x128xf32>
    %36 = arith.addf %34, %35 : vector<128x128xf32>
    %cst_11 = arith.constant dense<0xFF800000> : vector<128xf32>
    %37 = vector.multi_reduction <maximumf>, %36, %cst_11 [1] : vector<128x128xf32> to vector<128xf32>
    %38 = vector.shape_cast %37 : vector<128xf32> to vector<128x1xf32>
    %39 = vector.broadcast %38 : vector<128x1xf32> to vector<128x128xf32>
    %40 = arith.subf %36, %39 : vector<128x128xf32>
    %41 = math.exp %40 : vector<128x128xf32>
    %cst_12 = arith.constant dense<0.000000e+00> : vector<128xf32>
    %42 = vector.multi_reduction <add>, %41, %cst_12 [1] : vector<128x128xf32> to vector<128xf32>
    %43 = vector.shape_cast %42 : vector<128xf32> to vector<128x1xf32>
    %44 = arith.truncf %41 : vector<128x128xf32> to vector<128x128xbf16>
    %45 = arith.truncf %31 : vector<128x64xf32> to vector<128x64xbf16>
    %cst_13 = arith.constant dense<0.000000e+00> : vector<128x64xf32>
    %46 = tpu.matmul %44, %45, %cst_13 {dimension_numbers = #tpu.dot_dimension_numbers<[1], [0], [0], [1], [0, 0, 1, 1], [], []>} : vector<128x128xbf16>, vector<128x64xbf16>, vector<128x64xf32> -> vector<128x64xf32>
    %47 = tpu.reciprocal %43 {approx = true} : vector<128x1xf32> -> vector<128x1xf32>
    %48 = vector.broadcast %47 : vector<128x1xf32> to vector<128x64xf32>
    %49 = arith.mulf %46, %48 : vector<128x64xf32>
    %50 = tpu.concatenate %26, %49 in 1 : vector<128x64xf32>, vector<128x64xf32> -> vector<128x128xf32>
    %c0_14 = arith.constant 0 : index
    %c0_15 = arith.constant 0 : index
    %c0_16 = arith.constant 0 : index
    %51 = vector.load %arg3[%c0_14, %c0_15, %c0_16] : memref<1x128x128xf32, #tpu.memory_space<vmem>>, vector<1x128x128xf32>
    %52 = vector.shape_cast %51 : vector<1x128x128xf32> to vector<128x128xf32>
    %53 = vector.shape_cast %50 : vector<128x128xf32> to vector<1x128x128xf32>
    tpu.vector_store %arg3[%c0_14, %c0_15, %c0_16], %53 {strides = array<i32>} : memref<1x128x128xf32, #tpu.memory_space<vmem>>, vector<1x128x128xf32>,
    return
  }
  func.func @transform_0(%arg0: i32) -> (i32, i32, i32) {
    %c0_i32 = arith.constant 0 : i32
    %c0_i32_0 = arith.constant 0 : i32
    %c0_i32_1 = arith.constant 0 : i32
    return %arg0, %c0_i32, %c0_i32_0 : i32, i32, i32
  }
  func.func @transform_1(%arg0: i32) -> (i32, i32, i32) {
    %c0_i32 = arith.constant 0 : i32
    %c0_i32_0 = arith.constant 0 : i32
    %c0_i32_1 = arith.constant 0 : i32
    return %arg0, %c0_i32, %c0_i32_0 : i32, i32, i32
  }
  func.func @transform_2(%arg0: i32) -> (i32, i32, i32) {
    %c0_i32 = arith.constant 0 : i32
    %c0_i32_0 = arith.constant 0 : i32
    %c0_i32_1 = arith.constant 0 : i32
    return %arg0, %c0_i32, %c0_i32_0 : i32, i32, i32
  }
}

module attributes {stable_mosaic.version = 11 : i64} {
  func.func @_fused_linear_kernel(%arg0: i32, %arg1: memref<128x128xf32, #tpu.memory_space<vmem>>, %arg2: memref<128x128xbf16, #tpu.memory_space<vmem>>, %arg3: memref<1x128xf32, #tpu.memory_space<vmem>>, %arg4: memref<128x128xf32, #tpu.memory_space<vmem>>, %arg5: memref<1x128xf32, #tpu.memory_space<vmem>>, %arg6: memref<1x128xf32, #tpu.memory_space<vmem>>, %arg7: memref<128x128xf32, #tpu.memory_space<vmem>>) attributes {dimension_semantics = [#tpu.dimension_semantics<parallel>], iteration_bounds = array<i64: 2>, scalar_prefetch = 0 : i64, scratch_operands = 0 : i64, tpu.core_type = #tpu.core_type<tc>, window_params = [{transform_indices = @transform_0, window_bounds = array<i64: 128, 128>}, {pipeline_mode = #tpu.pipeline_mode<synchronous>, transform_indices = @transform_1, window_bounds = array<i64: 128, 128>}, {pipeline_mode = #tpu.pipeline_mode<synchronous>, transform_indices = @transform_2, window_bounds = array<i64: 1, 128>}, {transform_indices = @transform_3, window_bounds = array<i64: 128, 128>}, {pipeline_mode = #tpu.pipeline_mode<synchronous>, transform_indices = @transform_4, window_bounds = array<i64: 1, 128>}, {pipeline_mode = #tpu.pipeline_mode<synchronous>, transform_indices = @transform_5, window_bounds = array<i64: 1, 128>}, {transform_indices = @transform_6, window_bounds = array<i64: 128, 128>}]} {
    %c0 = arith.constant 0 : index
    %c0_0 = arith.constant 0 : index
    %0 = vector.load %arg1[%c0, %c0_0] : memref<128x128xf32, #tpu.memory_space<vmem>>, vector<128x128xf32>
    %1 = arith.truncf %0 : vector<128x128xf32> to vector<128x128xbf16>
    %c0_1 = arith.constant 0 : index
    %c0_2 = arith.constant 0 : index
    %2 = vector.load %arg2[%c0_1, %c0_2] : memref<128x128xbf16, #tpu.memory_space<vmem>>, vector<128x128xbf16>
    %cst = arith.constant dense<0.000000e+00> : vector<128x128xf32>
    %3 = tpu.matmul %1, %2, %cst {dimension_numbers = #tpu.dot_dimension_numbers<[1], [0], [0], [1], [0, 0, 1, 1], [], []>} : vector<128x128xbf16>, vector<128x128xbf16>, vector<128x128xf32> -> vector<128x128xf32>
    %c0_3 = arith.constant 0 : index
    %c0_4 = arith.constant 0 : index
    %4 = vector.load %arg3[%c0_3, %c0_4] : memref<1x128xf32, #tpu.memory_space<vmem>>, vector<1x128xf32>
    %5 = vector.broadcast %4 : vector<1x128xf32> to vector<128x128xf32>
    %6 = arith.addf %3, %5 : vector<128x128xf32>
    %c0_5 = arith.constant 0 : index
    %c0_6 = arith.constant 0 : index
    %7 = vector.load %arg4[%c0_5, %c0_6] : memref<128x128xf32, #tpu.memory_space<vmem>>, vector<128x128xf32>
    %8 = arith.addf %6, %7 : vector<128x128xf32>
    %cst_7 = arith.constant dense<0.000000e+00> : vector<128xf32>
    %9 = vector.multi_reduction <add>, %8, %cst_7 [1] : vector<128x128xf32> to vector<128xf32>
    %10 = vector.shape_cast %9 : vector<128xf32> to vector<128x1xf32>
    %cst_8 = arith.constant 1.280000e+02 : f32
    %11 = vector.broadcast %cst_8 : f32 to vector<128x1xf32>
    %12 = arith.divf %10, %11 : vector<128x1xf32>
    %13 = vector.broadcast %12 : vector<128x1xf32> to vector<128x128xf32>
    %14 = arith.subf %8, %13 : vector<128x128xf32>
    %15 = arith.mulf %14, %14 : vector<128x128xf32>
    %cst_9 = arith.constant dense<0.000000e+00> : vector<128xf32>
    %16 = vector.multi_reduction <add>, %15, %cst_9 [1] : vector<128x128xf32> to vector<128xf32>
    %17 = vector.shape_cast %16 : vector<128xf32> to vector<128x1xf32>
    %cst_10 = arith.constant 1.280000e+02 : f32
    %18 = vector.broadcast %cst_10 : f32 to vector<128x1xf32>
    %19 = arith.divf %17, %18 : vector<128x1xf32>
    %20 = vector.broadcast %12 : vector<128x1xf32> to vector<128x128xf32>
    %21 = arith.subf %8, %20 : vector<128x128xf32>
    %cst_11 = arith.constant 9.99999996E-13 : f32
    %22 = vector.broadcast %cst_11 : f32 to vector<128x1xf32>
    %23 = arith.addf %19, %22 : vector<128x1xf32>
    %24 = math.rsqrt %23 : vector<128x1xf32>
    %25 = vector.broadcast %24 : vector<128x1xf32> to vector<128x128xf32>
    %26 = arith.mulf %21, %25 : vector<128x128xf32>
    %c0_12 = arith.constant 0 : index
    %c0_13 = arith.constant 0 : index
    %27 = vector.load %arg5[%c0_12, %c0_13] : memref<1x128xf32, #tpu.memory_space<vmem>>, vector<1x128xf32>
    %28 = vector.broadcast %27 : vector<1x128xf32> to vector<128x128xf32>
    %29 = arith.mulf %26, %28 : vector<128x128xf32>
    %c0_14 = arith.constant 0 : index
    %c0_15 = arith.constant 0 : index
    %30 = vector.load %arg6[%c0_14, %c0_15] : memref<1x128xf32, #tpu.memory_space<vmem>>, vector<1x128xf32>
    %31 = vector.broadcast %30 : vector<1x128xf32> to vector<128x128xf32>
    %32 = arith.addf %29, %31 : vector<128x128xf32>
    %c0_16 = arith.constant 0 : index
    %c0_17 = arith.constant 0 : index
    %33 = vector.load %arg7[%c0_16, %c0_17] : memref<128x128xf32, #tpu.memory_space<vmem>>, vector<128x128xf32>
    tpu.vector_store %arg7[%c0_16, %c0_17], %32 {strides = array<i32>} : memref<128x128xf32, #tpu.memory_space<vmem>>, vector<128x128xf32>,
    return
  }
  func.func @transform_0(%arg0: i32) -> (i32, i32) {
    %c0_i32 = arith.constant 0 : i32
    %c0_i32_0 = arith.constant 0 : i32
    return %arg0, %c0_i32 : i32, i32
  }
  func.func @transform_1(%arg0: i32) -> (i32, i32) {
    %c0_i32 = arith.constant 0 : i32
    %c0_i32_0 = arith.constant 0 : i32
    %c0_i32_1 = arith.constant 0 : i32
    return %c0_i32, %c0_i32_0 : i32, i32
  }
  func.func @transform_2(%arg0: i32) -> (i32, i32) {
    %c0_i32 = arith.constant 0 : i32
    %c0_i32_0 = arith.constant 0 : i32
    %c0_i32_1 = arith.constant 0 : i32
    return %c0_i32, %c0_i32_0 : i32, i32
  }
  func.func @transform_3(%arg0: i32) -> (i32, i32) {
    %c0_i32 = arith.constant 0 : i32
    %c0_i32_0 = arith.constant 0 : i32
    return %arg0, %c0_i32 : i32, i32
  }
  func.func @transform_4(%arg0: i32) -> (i32, i32) {
    %c0_i32 = arith.constant 0 : i32
    %c0_i32_0 = arith.constant 0 : i32
    %c0_i32_1 = arith.constant 0 : i32
    return %c0_i32, %c0_i32_0 : i32, i32
  }
  func.func @transform_5(%arg0: i32) -> (i32, i32) {
    %c0_i32 = arith.constant 0 : i32
    %c0_i32_0 = arith.constant 0 : i32
    %c0_i32_1 = arith.constant 0 : i32
    return %c0_i32, %c0_i32_0 : i32, i32
  }
  func.func @transform_6(%arg0: i32) -> (i32, i32) {
    %c0_i32 = arith.constant 0 : i32
    %c0_i32_0 = arith.constant 0 : i32
    return %arg0, %c0_i32 : i32, i32
  }
}

module attributes {stable_mosaic.version = 11 : i64} {
  func.func @_fused_linear_kernel(%arg0: i32, %arg1: memref<128x128xf32, #tpu.memory_space<vmem>>, %arg2: memref<128x256xbf16, #tpu.memory_space<vmem>>, %arg3: memref<1x256xf32, #tpu.memory_space<vmem>>, %arg4: memref<128x256xf32, #tpu.memory_space<vmem>>) attributes {dimension_semantics = [#tpu.dimension_semantics<parallel>], iteration_bounds = array<i64: 2>, scalar_prefetch = 0 : i64, scratch_operands = 0 : i64, tpu.core_type = #tpu.core_type<tc>, window_params = [{transform_indices = @transform_0, window_bounds = array<i64: 128, 128>}, {pipeline_mode = #tpu.pipeline_mode<synchronous>, transform_indices = @transform_1, window_bounds = array<i64: 128, 256>}, {pipeline_mode = #tpu.pipeline_mode<synchronous>, transform_indices = @transform_2, window_bounds = array<i64: 1, 256>}, {transform_indices = @transform_3, window_bounds = array<i64: 128, 256>}]} {
    %c0 = arith.constant 0 : index
    %c0_0 = arith.constant 0 : index
    %0 = vector.load %arg1[%c0, %c0_0] : memref<128x128xf32, #tpu.memory_space<vmem>>, vector<128x128xf32>
    %1 = arith.truncf %0 : vector<128x128xf32> to vector<128x128xbf16>
    %c0_1 = arith.constant 0 : index
    %c0_2 = arith.constant 0 : index
    %2 = vector.load %arg2[%c0_1, %c0_2] : memref<128x256xbf16, #tpu.memory_space<vmem>>, vector<128x256xbf16>
    %cst = arith.constant dense<0.000000e+00> : vector<128x256xf32>
    %3 = tpu.matmul %1, %2, %cst {dimension_numbers = #tpu.dot_dimension_numbers<[1], [0], [0], [1], [0, 0, 1, 1], [], []>} : vector<128x128xbf16>, vector<128x256xbf16>, vector<128x256xf32> -> vector<128x256xf32>
    %c0_3 = arith.constant 0 : index
    %c0_4 = arith.constant 0 : index
    %4 = vector.load %arg3[%c0_3, %c0_4] : memref<1x256xf32, #tpu.memory_space<vmem>>, vector<1x256xf32>
    %5 = vector.broadcast %4 : vector<1x256xf32> to vector<128x256xf32>
    %6 = arith.addf %3, %5 : vector<128x256xf32>
    %cst_5 = arith.constant 5.000000e-01 : f32
    %7 = vector.broadcast %cst_5 : f32 to vector<128x256xf32>
    %8 = arith.mulf %7, %6 : vector<128x256xf32>
    %cst_6 = arith.constant 4.471500e-02 : f32
    %9 = vector.broadcast %cst_6 : f32 to vector<128x256xf32>
    %10 = arith.mulf %9, %6 : vector<128x256xf32>
    %11 = arith.mulf %10, %6 : vector<128x256xf32>
    %12 = arith.mulf %11, %6 : vector<128x256xf32>
    %13 = arith.addf %6, %12 : vector<128x256xf32>
    %cst_7 = arith.constant 0.797884583 : f32
    %14 = vector.broadcast %cst_7 : f32 to vector<128x256xf32>
    %15 = arith.mulf %14, %13 : vector<128x256xf32>
    %16 = math.tanh %15 : vector<128x256xf32>
    %cst_8 = arith.constant 1.000000e+00 : f32
    %17 = vector.broadcast %cst_8 : f32 to vector<128x256xf32>
    %18 = arith.addf %17, %16 : vector<128x256xf32>
    %19 = arith.mulf %8, %18 : vector<128x256xf32>
    %c0_9 = arith.constant 0 : index
    %c0_10 = arith.constant 0 : index
    %20 = vector.load %arg4[%c0_9, %c0_10] : memref<128x256xf32, #tpu.memory_space<vmem>>, vector<128x256xf32>
    tpu.vector_store %arg4[%c0_9, %c0_10], %19 {strides = array<i32>} : memref<128x256xf32, #tpu.memory_space<vmem>>, vector<128x256xf32>,
    return
  }
  func.func @transform_0(%arg0: i32) -> (i32, i32) {
    %c0_i32 = arith.constant 0 : i32
    %c0_i32_0 = arith.constant 0 : i32
    return %arg0, %c0_i32 : i32, i32
  }
  func.func @transform_1(%arg0: i32) -> (i32, i32) {
    %c0_i32 = arith.constant 0 : i32
    %c0_i32_0 = arith.constant 0 : i32
    %c0_i32_1 = arith.constant 0 : i32
    return %c0_i32, %c0_i32_0 : i32, i32
  }
  func.func @transform_2(%arg0: i32) -> (i32, i32) {
    %c0_i32 = arith.constant 0 : i32
    %c0_i32_0 = arith.constant 0 : i32
    %c0_i32_1 = arith.constant 0 : i32
    return %c0_i32, %c0_i32_0 : i32, i32
  }
  func.func @transform_3(%arg0: i32) -> (i32, i32) {
    %c0_i32 = arith.constant 0 : i32
    %c0_i32_0 = arith.constant 0 : i32
    return %arg0, %c0_i32 : i32, i32
  }
}

module attributes {stable_mosaic.version = 11 : i64} {
  func.func @_fused_linear_kernel(%arg0: i32, %arg1: memref<128x256xf32, #tpu.memory_space<vmem>>, %arg2: memref<256x128xbf16, #tpu.memory_space<vmem>>, %arg3: memref<1x128xf32, #tpu.memory_space<vmem>>, %arg4: memref<128x128xf32, #tpu.memory_space<vmem>>, %arg5: memref<1x128xf32, #tpu.memory_space<vmem>>, %arg6: memref<1x128xf32, #tpu.memory_space<vmem>>, %arg7: memref<128x128xf32, #tpu.memory_space<vmem>>) attributes {dimension_semantics = [#tpu.dimension_semantics<parallel>], iteration_bounds = array<i64: 2>, scalar_prefetch = 0 : i64, scratch_operands = 0 : i64, tpu.core_type = #tpu.core_type<tc>, window_params = [{transform_indices = @transform_0, window_bounds = array<i64: 128, 256>}, {pipeline_mode = #tpu.pipeline_mode<synchronous>, transform_indices = @transform_1, window_bounds = array<i64: 256, 128>}, {pipeline_mode = #tpu.pipeline_mode<synchronous>, transform_indices = @transform_2, window_bounds = array<i64: 1, 128>}, {transform_indices = @transform_3, window_bounds = array<i64: 128, 128>}, {pipeline_mode = #tpu.pipeline_mode<synchronous>, transform_indices = @transform_4, window_bounds = array<i64: 1, 128>}, {pipeline_mode = #tpu.pipeline_mode<synchronous>, transform_indices = @transform_5, window_bounds = array<i64: 1, 128>}, {transform_indices = @transform_6, window_bounds = array<i64: 128, 128>}]} {
    %c0 = arith.constant 0 : index
    %c0_0 = arith.constant 0 : index
    %0 = vector.load %arg1[%c0, %c0_0] : memref<128x256xf32, #tpu.memory_space<vmem>>, vector<128x256xf32>
    %1 = arith.truncf %0 : vector<128x256xf32> to vector<128x256xbf16>
    %c0_1 = arith.constant 0 : index
    %c0_2 = arith.constant 0 : index
    %2 = vector.load %arg2[%c0_1, %c0_2] : memref<256x128xbf16, #tpu.memory_space<vmem>>, vector<256x128xbf16>
    %cst = arith.constant dense<0.000000e+00> : vector<128x128xf32>
    %3 = tpu.matmul %1, %2, %cst {dimension_numbers = #tpu.dot_dimension_numbers<[1], [0], [0], [1], [0, 0, 1, 1], [], []>} : vector<128x256xbf16>, vector<256x128xbf16>, vector<128x128xf32> -> vector<128x128xf32>
    %c0_3 = arith.constant 0 : index
    %c0_4 = arith.constant 0 : index
    %4 = vector.load %arg3[%c0_3, %c0_4] : memref<1x128xf32, #tpu.memory_space<vmem>>, vector<1x128xf32>
    %5 = vector.broadcast %4 : vector<1x128xf32> to vector<128x128xf32>
    %6 = arith.addf %3, %5 : vector<128x128xf32>
    %c0_5 = arith.constant 0 : index
    %c0_6 = arith.constant 0 : index
    %7 = vector.load %arg4[%c0_5, %c0_6] : memref<128x128xf32, #tpu.memory_space<vmem>>, vector<128x128xf32>
    %8 = arith.addf %6, %7 : vector<128x128xf32>
    %cst_7 = arith.constant dense<0.000000e+00> : vector<128xf32>
    %9 = vector.multi_reduction <add>, %8, %cst_7 [1] : vector<128x128xf32> to vector<128xf32>
    %10 = vector.shape_cast %9 : vector<128xf32> to vector<128x1xf32>
    %cst_8 = arith.constant 1.280000e+02 : f32
    %11 = vector.broadcast %cst_8 : f32 to vector<128x1xf32>
    %12 = arith.divf %10, %11 : vector<128x1xf32>
    %13 = vector.broadcast %12 : vector<128x1xf32> to vector<128x128xf32>
    %14 = arith.subf %8, %13 : vector<128x128xf32>
    %15 = arith.mulf %14, %14 : vector<128x128xf32>
    %cst_9 = arith.constant dense<0.000000e+00> : vector<128xf32>
    %16 = vector.multi_reduction <add>, %15, %cst_9 [1] : vector<128x128xf32> to vector<128xf32>
    %17 = vector.shape_cast %16 : vector<128xf32> to vector<128x1xf32>
    %cst_10 = arith.constant 1.280000e+02 : f32
    %18 = vector.broadcast %cst_10 : f32 to vector<128x1xf32>
    %19 = arith.divf %17, %18 : vector<128x1xf32>
    %20 = vector.broadcast %12 : vector<128x1xf32> to vector<128x128xf32>
    %21 = arith.subf %8, %20 : vector<128x128xf32>
    %cst_11 = arith.constant 9.99999996E-13 : f32
    %22 = vector.broadcast %cst_11 : f32 to vector<128x1xf32>
    %23 = arith.addf %19, %22 : vector<128x1xf32>
    %24 = math.rsqrt %23 : vector<128x1xf32>
    %25 = vector.broadcast %24 : vector<128x1xf32> to vector<128x128xf32>
    %26 = arith.mulf %21, %25 : vector<128x128xf32>
    %c0_12 = arith.constant 0 : index
    %c0_13 = arith.constant 0 : index
    %27 = vector.load %arg5[%c0_12, %c0_13] : memref<1x128xf32, #tpu.memory_space<vmem>>, vector<1x128xf32>
    %28 = vector.broadcast %27 : vector<1x128xf32> to vector<128x128xf32>
    %29 = arith.mulf %26, %28 : vector<128x128xf32>
    %c0_14 = arith.constant 0 : index
    %c0_15 = arith.constant 0 : index
    %30 = vector.load %arg6[%c0_14, %c0_15] : memref<1x128xf32, #tpu.memory_space<vmem>>, vector<1x128xf32>
    %31 = vector.broadcast %30 : vector<1x128xf32> to vector<128x128xf32>
    %32 = arith.addf %29, %31 : vector<128x128xf32>
    %c0_16 = arith.constant 0 : index
    %c0_17 = arith.constant 0 : index
    %33 = vector.load %arg7[%c0_16, %c0_17] : memref<128x128xf32, #tpu.memory_space<vmem>>, vector<128x128xf32>
    tpu.vector_store %arg7[%c0_16, %c0_17], %32 {strides = array<i32>} : memref<128x128xf32, #tpu.memory_space<vmem>>, vector<128x128xf32>,
    return
  }
  func.func @transform_0(%arg0: i32) -> (i32, i32) {
    %c0_i32 = arith.constant 0 : i32
    %c0_i32_0 = arith.constant 0 : i32
    return %arg0, %c0_i32 : i32, i32
  }
  func.func @transform_1(%arg0: i32) -> (i32, i32) {
    %c0_i32 = arith.constant 0 : i32
    %c0_i32_0 = arith.constant 0 : i32
    %c0_i32_1 = arith.constant 0 : i32
    return %c0_i32, %c0_i32_0 : i32, i32
  }
  func.func @transform_2(%arg0: i32) -> (i32, i32) {
    %c0_i32 = arith.constant 0 : i32
    %c0_i32_0 = arith.constant 0 : i32
    %c0_i32_1 = arith.constant 0 : i32
    return %c0_i32, %c0_i32_0 : i32, i32
  }
  func.func @transform_3(%arg0: i32) -> (i32, i32) {
    %c0_i32 = arith.constant 0 : i32
    %c0_i32_0 = arith.constant 0 : i32
    return %arg0, %c0_i32 : i32, i32
  }
  func.func @transform_4(%arg0: i32) -> (i32, i32) {
    %c0_i32 = arith.constant 0 : i32
    %c0_i32_0 = arith.constant 0 : i32
    %c0_i32_1 = arith.constant 0 : i32
    return %c0_i32, %c0_i32_0 : i32, i32
  }
  func.func @transform_5(%arg0: i32) -> (i32, i32) {
    %c0_i32 = arith.constant 0 : i32
    %c0_i32_0 = arith.constant 0 : i32
    %c0_i32_1 = arith.constant 0 : i32
    return %c0_i32, %c0_i32_0 : i32, i32
  }
  func.func @transform_6(%arg0: i32) -> (i32, i32) {
    %c0_i32 = arith.constant 0 : i32
    %c0_i32_0 = arith.constant 0 : i32
    return %arg0, %c0_i32 : i32, i32
  }
}

module attributes {stable_mosaic.version = 11 : i64} {
  func.func @_fused_linear_kernel(%arg0: i32, %arg1: memref<128x128xf32, #tpu.memory_space<vmem>>, %arg2: memref<128x128xbf16, #tpu.memory_space<vmem>>, %arg3: memref<1x128xf32, #tpu.memory_space<vmem>>, %arg4: memref<128x128xf32, #tpu.memory_space<vmem>>) attributes {dimension_semantics = [#tpu.dimension_semantics<parallel>], iteration_bounds = array<i64: 2>, scalar_prefetch = 0 : i64, scratch_operands = 0 : i64, tpu.core_type = #tpu.core_type<tc>, window_params = [{transform_indices = @transform_0, window_bounds = array<i64: 128, 128>}, {pipeline_mode = #tpu.pipeline_mode<synchronous>, transform_indices = @transform_1, window_bounds = array<i64: 128, 128>}, {pipeline_mode = #tpu.pipeline_mode<synchronous>, transform_indices = @transform_2, window_bounds = array<i64: 1, 128>}, {transform_indices = @transform_3, window_bounds = array<i64: 128, 128>}]} {
    %c0 = arith.constant 0 : index
    %c0_0 = arith.constant 0 : index
    %0 = vector.load %arg1[%c0, %c0_0] : memref<128x128xf32, #tpu.memory_space<vmem>>, vector<128x128xf32>
    %1 = arith.truncf %0 : vector<128x128xf32> to vector<128x128xbf16>
    %c0_1 = arith.constant 0 : index
    %c0_2 = arith.constant 0 : index
    %2 = vector.load %arg2[%c0_1, %c0_2] : memref<128x128xbf16, #tpu.memory_space<vmem>>, vector<128x128xbf16>
    %cst = arith.constant dense<0.000000e+00> : vector<128x128xf32>
    %3 = tpu.matmul %1, %2, %cst {dimension_numbers = #tpu.dot_dimension_numbers<[1], [0], [0], [1], [0, 0, 1, 1], [], []>} : vector<128x128xbf16>, vector<128x128xbf16>, vector<128x128xf32> -> vector<128x128xf32>
    %c0_3 = arith.constant 0 : index
    %c0_4 = arith.constant 0 : index
    %4 = vector.load %arg3[%c0_3, %c0_4] : memref<1x128xf32, #tpu.memory_space<vmem>>, vector<1x128xf32>
    %5 = vector.broadcast %4 : vector<1x128xf32> to vector<128x128xf32>
    %6 = arith.addf %3, %5 : vector<128x128xf32>
    %c0_5 = arith.constant 0 : index
    %c0_6 = arith.constant 0 : index
    %7 = vector.load %arg4[%c0_5, %c0_6] : memref<128x128xf32, #tpu.memory_space<vmem>>, vector<128x128xf32>
    tpu.vector_store %arg4[%c0_5, %c0_6], %6 {strides = array<i32>} : memref<128x128xf32, #tpu.memory_space<vmem>>, vector<128x128xf32>,
    return
  }
  func.func @transform_0(%arg0: i32) -> (i32, i32) {
    %c0_i32 = arith.constant 0 : i32
    %c0_i32_0 = arith.constant 0 : i32
    return %arg0, %c0_i32 : i32, i32
  }
  func.func @transform_1(%arg0: i32) -> (i32, i32) {
    %c0_i32 = arith.constant 0 : i32
    %c0_i32_0 = arith.constant 0 : i32
    %c0_i32_1 = arith.constant 0 : i32
    return %c0_i32, %c0_i32_0 : i32, i32
  }
  func.func @transform_2(%arg0: i32) -> (i32, i32) {
    %c0_i32 = arith.constant 0 : i32
    %c0_i32_0 = arith.constant 0 : i32
    %c0_i32_1 = arith.constant 0 : i32
    return %c0_i32, %c0_i32_0 : i32, i32
  }
  func.func @transform_3(%arg0: i32) -> (i32, i32) {
    %c0_i32 = arith.constant 0 : i32
    %c0_i32_0 = arith.constant 0 : i32
    return %arg0, %c0_i32 : i32, i32
  }
}

module attributes {stable_mosaic.version = 11 : i64} {
  func.func @_ce_kernel(%arg0: i32, %arg1: memref<2x128xf32, #tpu.memory_space<vmem>>, %arg2: memref<2x1xi32, #tpu.memory_space<vmem>>, %arg3: memref<1x1xf32, #tpu.memory_space<vmem>>, %arg4: memref<1x1xf32, #tpu.memory_space<vmem>>) attributes {dimension_semantics = [#tpu.dimension_semantics<arbitrary>], iteration_bounds = array<i64: 1>, scalar_prefetch = 0 : i64, scratch_operands = 0 : i64, tpu.core_type = #tpu.core_type<tc>, window_params = [{pipeline_mode = #tpu.pipeline_mode<synchronous>, transform_indices = @transform_0, window_bounds = array<i64: 2, 128>}, {pipeline_mode = #tpu.pipeline_mode<synchronous>, transform_indices = @transform_1, window_bounds = array<i64: 2, 1>}, {pipeline_mode = #tpu.pipeline_mode<synchronous>, transform_indices = @transform_2, window_bounds = array<i64: 1, 1>}, {pipeline_mode = #tpu.pipeline_mode<synchronous>, transform_indices = @transform_3, window_bounds = array<i64: 1, 1>}]} {
    %c0 = arith.constant 0 : index
    %c0_0 = arith.constant 0 : index
    %0 = vector.load %arg1[%c0, %c0_0] : memref<2x128xf32, #tpu.memory_space<vmem>>, vector<2x128xf32>
    %c0_1 = arith.constant 0 : index
    %c0_2 = arith.constant 0 : index
    %1 = vector.load %arg2[%c0_1, %c0_2] : memref<2x1xi32, #tpu.memory_space<vmem>>, vector<2x1xi32>
    %cst = arith.constant dense<0xFF800000> : vector<2xf32>
    %2 = vector.multi_reduction <maximumf>, %0, %cst [1] : vector<2x128xf32> to vector<2xf32>
    %3 = vector.shape_cast %2 : vector<2xf32> to vector<2x1xf32>
    %4 = vector.broadcast %3 : vector<2x1xf32> to vector<2x128xf32>
    %5 = arith.subf %0, %4 : vector<2x128xf32>
    %6 = math.exp %5 : vector<2x128xf32>
    %cst_3 = arith.constant dense<0.000000e+00> : vector<2xf32>
    %7 = vector.multi_reduction <add>, %6, %cst_3 [1] : vector<2x128xf32> to vector<2xf32>
    %8 = vector.shape_cast %7 : vector<2xf32> to vector<2x1xf32>
    %9 = math.log %8 : vector<2x1xf32>
    %10 = arith.addf %9, %3 : vector<2x1xf32>
    %11 = tpu.iota {dimensions = array<i32: 1>} : vector<2x128xi32>
    %12 = vector.broadcast %1 : vector<2x1xi32> to vector<2x128xi32>
    %13 = arith.cmpi eq, %11, %12 : vector<2x128xi32>
    %cst_4 = arith.constant 0.000000e+00 : f32
    %14 = vector.broadcast %cst_4 : f32 to vector<2x128xf32>
    %15 = arith.select %13, %0, %14 : vector<2x128xi1>, vector<2x128xf32>
    %cst_5 = arith.constant dense<0.000000e+00> : vector<2xf32>
    %16 = vector.multi_reduction <add>, %15, %cst_5 [1] : vector<2x128xf32> to vector<2xf32>
    %17 = vector.shape_cast %16 : vector<2xf32> to vector<2x1xf32>
    %c128_i32 = arith.constant 128 : i32
    %18 = vector.broadcast %c128_i32 : i32 to vector<2x1xi32>
    %19 = arith.cmpi ne, %1, %18 : vector<2x1xi32>
    %20 = arith.extui %19 : vector<2x1xi1> to vector<2x1xi32>
    %21 = arith.sitofp %20 : vector<2x1xi32> to vector<2x1xf32>
    %22 = arith.subf %10, %17 : vector<2x1xf32>
    %23 = arith.mulf %22, %21 : vector<2x1xf32>
    %24 = vector.shape_cast %23 : vector<2x1xf32> to vector<1x2x1xf32>
    %cst_6 = arith.constant dense<0.000000e+00> : vector<1xf32>
    %25 = vector.multi_reduction <add>, %24, %cst_6 [1, 2] : vector<1x2x1xf32> to vector<1xf32>
    %26 = vector.shape_cast %25 : vector<1xf32> to vector<1x1x1xf32>
    %27 = vector.extract %26[0, 0, 0] : f32 from vector<1x1x1xf32>
    %28 = vector.broadcast %27 : f32 to vector<1x1xf32>
    %c0_7 = arith.constant 0 : index
    %c0_8 = arith.constant 0 : index
    %29 = vector.load %arg3[%c0_7, %c0_8] : memref<1x1xf32, #tpu.memory_space<vmem>>, vector<1x1xf32>
    tpu.vector_store %arg3[%c0_7, %c0_8], %28 {strides = array<i32>} : memref<1x1xf32, #tpu.memory_space<vmem>>, vector<1x1xf32>,
    %30 = vector.shape_cast %21 : vector<2x1xf32> to vector<1x2x1xf32>
    %cst_9 = arith.constant dense<0.000000e+00> : vector<1xf32>
    %31 = vector.multi_reduction <add>, %30, %cst_9 [1, 2] : vector<1x2x1xf32> to vector<1xf32>
    %32 = vector.shape_cast %31 : vector<1xf32> to vector<1x1x1xf32>
    %33 = vector.extract %32[0, 0, 0] : f32 from vector<1x1x1xf32>
    %34 = vector.broadcast %33 : f32 to vector<1x1xf32>
    %c0_10 = arith.constant 0 : index
    %c0_11 = arith.constant 0 : index
    %35 = vector.load %arg4[%c0_10, %c0_11] : memref<1x1xf32, #tpu.memory_space<vmem>>, vector<1x1xf32>
    tpu.vector_store %arg4[%c0_10, %c0_11], %34 {strides = array<i32>} : memref<1x1xf32, #tpu.memory_space<vmem>>, vector<1x1xf32>,
    return
  }
  func.func @transform_0(%arg0: i32) -> (i32, i32) {
    %c0_i32 = arith.constant 0 : i32
    %c0_i32_0 = arith.constant 0 : i32
    %c0_i32_1 = arith.constant 0 : i32
    return %c0_i32, %c0_i32_0 : i32, i32
  }
  func.func @transform_1(%arg0: i32) -> (i32, i32) {
    %c0_i32 = arith.constant 0 : i32
    %c0_i32_0 = arith.constant 0 : i32
    %c0_i32_1 = arith.constant 0 : i32
    return %c0_i32, %c0_i32_0 : i32, i32
  }
  func.func @transform_2(%arg0: i32) -> (i32, i32) {
    %c0_i32 = arith.constant 0 : i32
    %c0_i32_0 = arith.constant 0 : i32
    %c0_i32_1 = arith.constant 0 : i32
    return %c0_i32, %c0_i32_0 : i32, i32
  }
  func.func @transform_3(%arg0: i32) -> (i32, i32) {
    %c0_i32 = arith.constant 0 : i32
    %c0_i32_0 = arith.constant 0 : i32
    %c0_i32_1 = arith.constant 0 : i32
    return %c0_i32, %c0_i32_0 : i32, i32
  }
}

module attributes {stable_mosaic.version = 11 : i64} {
  func.func @_fused_linear_kernel(%arg0: i32, %arg1: memref<128x128xf32, #tpu.memory_space<vmem>>, %arg2: memref<128x128xbf16, #tpu.memory_space<vmem>>, %arg3: memref<1x128xf32, #tpu.memory_space<vmem>>, %arg4: memref<1x128xf32, #tpu.memory_space<vmem>>, %arg5: memref<1x128xf32, #tpu.memory_space<vmem>>, %arg6: memref<128x128xf32, #tpu.memory_space<vmem>>) attributes {dimension_semantics = [#tpu.dimension_semantics<parallel>], iteration_bounds = array<i64: 2>, scalar_prefetch = 0 : i64, scratch_operands = 0 : i64, tpu.core_type = #tpu.core_type<tc>, window_params = [{transform_indices = @transform_0, window_bounds = array<i64: 128, 128>}, {pipeline_mode = #tpu.pipeline_mode<synchronous>, transform_indices = @transform_1, window_bounds = array<i64: 128, 128>}, {pipeline_mode = #tpu.pipeline_mode<synchronous>, transform_indices = @transform_2, window_bounds = array<i64: 1, 128>}, {pipeline_mode = #tpu.pipeline_mode<synchronous>, transform_indices = @transform_3, window_bounds = array<i64: 1, 128>}, {pipeline_mode = #tpu.pipeline_mode<synchronous>, transform_indices = @transform_4, window_bounds = array<i64: 1, 128>}, {transform_indices = @transform_5, window_bounds = array<i64: 128, 128>}]} {
    %c0 = arith.constant 0 : index
    %c0_0 = arith.constant 0 : index
    %0 = vector.load %arg1[%c0, %c0_0] : memref<128x128xf32, #tpu.memory_space<vmem>>, vector<128x128xf32>
    %1 = arith.truncf %0 : vector<128x128xf32> to vector<128x128xbf16>
    %c0_1 = arith.constant 0 : index
    %c0_2 = arith.constant 0 : index
    %2 = vector.load %arg2[%c0_1, %c0_2] : memref<128x128xbf16, #tpu.memory_space<vmem>>, vector<128x128xbf16>
    %cst = arith.constant dense<0.000000e+00> : vector<128x128xf32>
    %3 = tpu.matmul %1, %2, %cst {dimension_numbers = #tpu.dot_dimension_numbers<[1], [0], [0], [1], [0, 0, 1, 1], [], []>} : vector<128x128xbf16>, vector<128x128xbf16>, vector<128x128xf32> -> vector<128x128xf32>
    %c0_3 = arith.constant 0 : index
    %c0_4 = arith.constant 0 : index
    %4 = vector.load %arg3[%c0_3, %c0_4] : memref<1x128xf32, #tpu.memory_space<vmem>>, vector<1x128xf32>
    %5 = vector.broadcast %4 : vector<1x128xf32> to vector<128x128xf32>
    %6 = arith.addf %3, %5 : vector<128x128xf32>
    %cst_5 = arith.constant 5.000000e-01 : f32
    %7 = vector.broadcast %cst_5 : f32 to vector<128x128xf32>
    %8 = arith.mulf %7, %6 : vector<128x128xf32>
    %cst_6 = arith.constant 4.471500e-02 : f32
    %9 = vector.broadcast %cst_6 : f32 to vector<128x128xf32>
    %10 = arith.mulf %9, %6 : vector<128x128xf32>
    %11 = arith.mulf %10, %6 : vector<128x128xf32>
    %12 = arith.mulf %11, %6 : vector<128x128xf32>
    %13 = arith.addf %6, %12 : vector<128x128xf32>
    %cst_7 = arith.constant 0.797884583 : f32
    %14 = vector.broadcast %cst_7 : f32 to vector<128x128xf32>
    %15 = arith.mulf %14, %13 : vector<128x128xf32>
    %16 = math.tanh %15 : vector<128x128xf32>
    %cst_8 = arith.constant 1.000000e+00 : f32
    %17 = vector.broadcast %cst_8 : f32 to vector<128x128xf32>
    %18 = arith.addf %17, %16 : vector<128x128xf32>
    %19 = arith.mulf %8, %18 : vector<128x128xf32>
    %cst_9 = arith.constant dense<0.000000e+00> : vector<128xf32>
    %20 = vector.multi_reduction <add>, %19, %cst_9 [1] : vector<128x128xf32> to vector<128xf32>
    %21 = vector.shape_cast %20 : vector<128xf32> to vector<128x1xf32>
    %cst_10 = arith.constant 1.280000e+02 : f32
    %22 = vector.broadcast %cst_10 : f32 to vector<128x1xf32>
    %23 = arith.divf %21, %22 : vector<128x1xf32>
    %24 = vector.broadcast %23 : vector<128x1xf32> to vector<128x128xf32>
    %25 = arith.subf %19, %24 : vector<128x128xf32>
    %26 = arith.mulf %25, %25 : vector<128x128xf32>
    %cst_11 = arith.constant dense<0.000000e+00> : vector<128xf32>
    %27 = vector.multi_reduction <add>, %26, %cst_11 [1] : vector<128x128xf32> to vector<128xf32>
    %28 = vector.shape_cast %27 : vector<128xf32> to vector<128x1xf32>
    %cst_12 = arith.constant 1.280000e+02 : f32
    %29 = vector.broadcast %cst_12 : f32 to vector<128x1xf32>
    %30 = arith.divf %28, %29 : vector<128x1xf32>
    %31 = vector.broadcast %23 : vector<128x1xf32> to vector<128x128xf32>
    %32 = arith.subf %19, %31 : vector<128x128xf32>
    %cst_13 = arith.constant 9.99999996E-13 : f32
    %33 = vector.broadcast %cst_13 : f32 to vector<128x1xf32>
    %34 = arith.addf %30, %33 : vector<128x1xf32>
    %35 = math.rsqrt %34 : vector<128x1xf32>
    %36 = vector.broadcast %35 : vector<128x1xf32> to vector<128x128xf32>
    %37 = arith.mulf %32, %36 : vector<128x128xf32>
    %c0_14 = arith.constant 0 : index
    %c0_15 = arith.constant 0 : index
    %38 = vector.load %arg4[%c0_14, %c0_15] : memref<1x128xf32, #tpu.memory_space<vmem>>, vector<1x128xf32>
    %39 = vector.broadcast %38 : vector<1x128xf32> to vector<128x128xf32>
    %40 = arith.mulf %37, %39 : vector<128x128xf32>
    %c0_16 = arith.constant 0 : index
    %c0_17 = arith.constant 0 : index
    %41 = vector.load %arg5[%c0_16, %c0_17] : memref<1x128xf32, #tpu.memory_space<vmem>>, vector<1x128xf32>
    %42 = vector.broadcast %41 : vector<1x128xf32> to vector<128x128xf32>
    %43 = arith.addf %40, %42 : vector<128x128xf32>
    %c0_18 = arith.constant 0 : index
    %c0_19 = arith.constant 0 : index
    %44 = vector.load %arg6[%c0_18, %c0_19] : memref<128x128xf32, #tpu.memory_space<vmem>>, vector<128x128xf32>
    tpu.vector_store %arg6[%c0_18, %c0_19], %43 {strides = array<i32>} : memref<128x128xf32, #tpu.memory_space<vmem>>, vector<128x128xf32>,
    return
  }
  func.func @transform_0(%arg0: i32) -> (i32, i32) {
    %c0_i32 = arith.constant 0 : i32
    %c0_i32_0 = arith.constant 0 : i32
    return %arg0, %c0_i32 : i32, i32
  }
  func.func @transform_1(%arg0: i32) -> (i32, i32) {
    %c0_i32 = arith.constant 0 : i32
    %c0_i32_0 = arith.constant 0 : i32
    %c0_i32_1 = arith.constant 0 : i32
    return %c0_i32, %c0_i32_0 : i32, i32
  }
  func.func @transform_2(%arg0: i32) -> (i32, i32) {
    %c0_i32 = arith.constant 0 : i32
    %c0_i32_0 = arith.constant 0 : i32
    %c0_i32_1 = arith.constant 0 : i32
    return %c0_i32, %c0_i32_0 : i32, i32
  }
  func.func @transform_3(%arg0: i32) -> (i32, i32) {
    %c0_i32 = arith.constant 0 : i32
    %c0_i32_0 = arith.constant 0 : i32
    %c0_i32_1 = arith.constant 0 : i32
    return %c0_i32, %c0_i32_0 : i32, i32
  }
  func.func @transform_4(%arg0: i32) -> (i32, i32) {
    %c0_i32 = arith.constant 0 : i32
    %c0_i32_0 = arith.constant 0 : i32
    %c0_i32_1 = arith.constant 0 : i32
    return %c0_i32, %c0_i32_0 : i32, i32
  }
  func.func @transform_5(%arg0: i32) -> (i32, i32) {
    %c0_i32 = arith.constant 0 : i32
    %c0_i32_0 = arith.constant 0 : i32
    return %arg0, %c0_i32 : i32, i32
  }
}

module attributes {stable_mosaic.version = 11 : i64} {
  func.func @_fused_linear_kernel(%arg0: i32, %arg1: memref<128x128xf32, #tpu.memory_space<vmem>>, %arg2: memref<128x256xbf16, #tpu.memory_space<vmem>>, %arg3: memref<1x256xf32, #tpu.memory_space<vmem>>, %arg4: memref<128x256xf32, #tpu.memory_space<vmem>>) attributes {dimension_semantics = [#tpu.dimension_semantics<parallel>], iteration_bounds = array<i64: 2>, scalar_prefetch = 0 : i64, scratch_operands = 0 : i64, tpu.core_type = #tpu.core_type<tc>, window_params = [{transform_indices = @transform_0, window_bounds = array<i64: 128, 128>}, {pipeline_mode = #tpu.pipeline_mode<synchronous>, transform_indices = @transform_1, window_bounds = array<i64: 128, 256>}, {pipeline_mode = #tpu.pipeline_mode<synchronous>, transform_indices = @transform_2, window_bounds = array<i64: 1, 256>}, {transform_indices = @transform_3, window_bounds = array<i64: 128, 256>}]} {
    %c0 = arith.constant 0 : index
    %c0_0 = arith.constant 0 : index
    %0 = vector.load %arg1[%c0, %c0_0] : memref<128x128xf32, #tpu.memory_space<vmem>>, vector<128x128xf32>
    %1 = arith.truncf %0 : vector<128x128xf32> to vector<128x128xbf16>
    %c0_1 = arith.constant 0 : index
    %c0_2 = arith.constant 0 : index
    %2 = vector.load %arg2[%c0_1, %c0_2] : memref<128x256xbf16, #tpu.memory_space<vmem>>, vector<128x256xbf16>
    %cst = arith.constant dense<0.000000e+00> : vector<128x256xf32>
    %3 = tpu.matmul %1, %2, %cst {dimension_numbers = #tpu.dot_dimension_numbers<[1], [0], [0], [1], [0, 0, 1, 1], [], []>} : vector<128x128xbf16>, vector<128x256xbf16>, vector<128x256xf32> -> vector<128x256xf32>
    %c0_3 = arith.constant 0 : index
    %c0_4 = arith.constant 0 : index
    %4 = vector.load %arg3[%c0_3, %c0_4] : memref<1x256xf32, #tpu.memory_space<vmem>>, vector<1x256xf32>
    %5 = vector.broadcast %4 : vector<1x256xf32> to vector<128x256xf32>
    %6 = arith.addf %3, %5 : vector<128x256xf32>
    %c0_5 = arith.constant 0 : index
    %c0_6 = arith.constant 0 : index
    %7 = vector.load %arg4[%c0_5, %c0_6] : memref<128x256xf32, #tpu.memory_space<vmem>>, vector<128x256xf32>
    tpu.vector_store %arg4[%c0_5, %c0_6], %6 {strides = array<i32>} : memref<128x256xf32, #tpu.memory_space<vmem>>, vector<128x256xf32>,
    return
  }
  func.func @transform_0(%arg0: i32) -> (i32, i32) {
    %c0_i32 = arith.constant 0 : i32
    %c0_i32_0 = arith.constant 0 : i32
    return %arg0, %c0_i32 : i32, i32
  }
  func.func @transform_1(%arg0: i32) -> (i32, i32) {
    %c0_i32 = arith.constant 0 : i32
    %c0_i32_0 = arith.constant 0 : i32
    %c0_i32_1 = arith.constant 0 : i32
    return %c0_i32, %c0_i32_0 : i32, i32
  }
  func.func @transform_2(%arg0: i32) -> (i32, i32) {
    %c0_i32 = arith.constant 0 : i32
    %c0_i32_0 = arith.constant 0 : i32
    %c0_i32_1 = arith.constant 0 : i32
    return %c0_i32, %c0_i32_0 : i32, i32
  }
  func.func @transform_3(%arg0: i32) -> (i32, i32) {
    %c0_i32 = arith.constant 0 : i32
    %c0_i32_0 = arith.constant 0 : i32
    return %arg0, %c0_i32 : i32, i32
  }
}

module attributes {stable_mosaic.version = 11 : i64} {
  func.func @_ce_kernel(%arg0: i32, %arg1: memref<256x256xf32, #tpu.memory_space<vmem>>, %arg2: memref<256x1xi32, #tpu.memory_space<vmem>>, %arg3: memref<1x1xf32, #tpu.memory_space<vmem>>, %arg4: memref<1x1xf32, #tpu.memory_space<vmem>>) attributes {dimension_semantics = [#tpu.dimension_semantics<arbitrary>], iteration_bounds = array<i64: 1>, scalar_prefetch = 0 : i64, scratch_operands = 0 : i64, tpu.core_type = #tpu.core_type<tc>, window_params = [{pipeline_mode = #tpu.pipeline_mode<synchronous>, transform_indices = @transform_0, window_bounds = array<i64: 256, 256>}, {pipeline_mode = #tpu.pipeline_mode<synchronous>, transform_indices = @transform_1, window_bounds = array<i64: 256, 1>}, {pipeline_mode = #tpu.pipeline_mode<synchronous>, transform_indices = @transform_2, window_bounds = array<i64: 1, 1>}, {pipeline_mode = #tpu.pipeline_mode<synchronous>, transform_indices = @transform_3, window_bounds = array<i64: 1, 1>}]} {
    %c0 = arith.constant 0 : index
    %c0_0 = arith.constant 0 : index
    %0 = vector.load %arg1[%c0, %c0_0] : memref<256x256xf32, #tpu.memory_space<vmem>>, vector<256x256xf32>
    %c0_1 = arith.constant 0 : index
    %c0_2 = arith.constant 0 : index
    %1 = vector.load %arg2[%c0_1, %c0_2] : memref<256x1xi32, #tpu.memory_space<vmem>>, vector<256x1xi32>
    %cst = arith.constant dense<0xFF800000> : vector<256xf32>
    %2 = vector.multi_reduction <maximumf>, %0, %cst [1] : vector<256x256xf32> to vector<256xf32>
    %3 = vector.shape_cast %2 : vector<256xf32> to vector<256x1xf32>
    %4 = vector.broadcast %3 : vector<256x1xf32> to vector<256x256xf32>
    %5 = arith.subf %0, %4 : vector<256x256xf32>
    %6 = math.exp %5 : vector<256x256xf32>
    %cst_3 = arith.constant dense<0.000000e+00> : vector<256xf32>
    %7 = vector.multi_reduction <add>, %6, %cst_3 [1] : vector<256x256xf32> to vector<256xf32>
    %8 = vector.shape_cast %7 : vector<256xf32> to vector<256x1xf32>
    %9 = math.log %8 : vector<256x1xf32>
    %10 = arith.addf %9, %3 : vector<256x1xf32>
    %11 = tpu.iota {dimensions = array<i32: 1>} : vector<256x256xi32>
    %12 = vector.broadcast %1 : vector<256x1xi32> to vector<256x256xi32>
    %13 = arith.cmpi eq, %11, %12 : vector<256x256xi32>
    %cst_4 = arith.constant 0.000000e+00 : f32
    %14 = vector.broadcast %cst_4 : f32 to vector<256x256xf32>
    %15 = arith.select %13, %0, %14 : vector<256x256xi1>, vector<256x256xf32>
    %cst_5 = arith.constant dense<0.000000e+00> : vector<256xf32>
    %16 = vector.multi_reduction <add>, %15, %cst_5 [1] : vector<256x256xf32> to vector<256xf32>
    %17 = vector.shape_cast %16 : vector<256xf32> to vector<256x1xf32>
    %c-1_i32 = arith.constant -1 : i32
    %18 = vector.broadcast %c-1_i32 : i32 to vector<256x1xi32>
    %19 = arith.cmpi ne, %1, %18 : vector<256x1xi32>
    %20 = arith.extui %19 : vector<256x1xi1> to vector<256x1xi32>
    %21 = arith.sitofp %20 : vector<256x1xi32> to vector<256x1xf32>
    %22 = arith.subf %10, %17 : vector<256x1xf32>
    %23 = arith.mulf %22, %21 : vector<256x1xf32>
    %24 = vector.shape_cast %23 : vector<256x1xf32> to vector<1x256x1xf32>
    %cst_6 = arith.constant dense<0.000000e+00> : vector<1xf32>
    %25 = vector.multi_reduction <add>, %24, %cst_6 [1, 2] : vector<1x256x1xf32> to vector<1xf32>
    %26 = vector.shape_cast %25 : vector<1xf32> to vector<1x1x1xf32>
    %27 = vector.extract %26[0, 0, 0] : f32 from vector<1x1x1xf32>
    %28 = vector.broadcast %27 : f32 to vector<1x1xf32>
    %c0_7 = arith.constant 0 : index
    %c0_8 = arith.constant 0 : index
    %29 = vector.load %arg3[%c0_7, %c0_8] : memref<1x1xf32, #tpu.memory_space<vmem>>, vector<1x1xf32>
    tpu.vector_store %arg3[%c0_7, %c0_8], %28 {strides = array<i32>} : memref<1x1xf32, #tpu.memory_space<vmem>>, vector<1x1xf32>,
    %30 = vector.shape_cast %21 : vector<256x1xf32> to vector<1x256x1xf32>
    %cst_9 = arith.constant dense<0.000000e+00> : vector<1xf32>
    %31 = vector.multi_reduction <add>, %30, %cst_9 [1, 2] : vector<1x256x1xf32> to vector<1xf32>
    %32 = vector.shape_cast %31 : vector<1xf32> to vector<1x1x1xf32>
    %33 = vector.extract %32[0, 0, 0] : f32 from vector<1x1x1xf32>
    %34 = vector.broadcast %33 : f32 to vector<1x1xf32>
    %c0_10 = arith.constant 0 : index
    %c0_11 = arith.constant 0 : index
    %35 = vector.load %arg4[%c0_10, %c0_11] : memref<1x1xf32, #tpu.memory_space<vmem>>, vector<1x1xf32>
    tpu.vector_store %arg4[%c0_10, %c0_11], %34 {strides = array<i32>} : memref<1x1xf32, #tpu.memory_space<vmem>>, vector<1x1xf32>,
    return
  }
  func.func @transform_0(%arg0: i32) -> (i32, i32) {
    %c0_i32 = arith.constant 0 : i32
    %c0_i32_0 = arith.constant 0 : i32
    %c0_i32_1 = arith.constant 0 : i32
    return %c0_i32, %c0_i32_0 : i32, i32
  }
  func.func @transform_1(%arg0: i32) -> (i32, i32) {
    %c0_i32 = arith.constant 0 : i32
    %c0_i32_0 = arith.constant 0 : i32
    %c0_i32_1 = arith.constant 0 : i32
    return %c0_i32, %c0_i32_0 : i32, i32
  }
  func.func @transform_2(%arg0: i32) -> (i32, i32) {
    %c0_i32 = arith.constant 0 : i32
    %c0_i32_0 = arith.constant 0 : i32
    %c0_i32_1 = arith.constant 0 : i32
    return %c0_i32, %c0_i32_0 : i32, i32
  }
  func.func @transform_3(%arg0: i32) -> (i32, i32) {
    %c0_i32 = arith.constant 0 : i32
    %c0_i32_0 = arith.constant 0 : i32
    %c0_i32_1 = arith.constant 0 : i32
    return %c0_i32, %c0_i32_0 : i32, i32
  }
}

module attributes {stable_mosaic.version = 11 : i64} {
  func.func @_fused_linear_kernel(%arg0: i32, %arg1: memref<2x128xf32, #tpu.memory_space<vmem>>, %arg2: memref<128x128xbf16, #tpu.memory_space<vmem>>, %arg3: memref<1x128xf32, #tpu.memory_space<vmem>>, %arg4: memref<2x128xf32, #tpu.memory_space<vmem>>) attributes {dimension_semantics = [#tpu.dimension_semantics<parallel>], iteration_bounds = array<i64: 1>, scalar_prefetch = 0 : i64, scratch_operands = 0 : i64, tpu.core_type = #tpu.core_type<tc>, window_params = [{transform_indices = @transform_0, window_bounds = array<i64: 2, 128>}, {pipeline_mode = #tpu.pipeline_mode<synchronous>, transform_indices = @transform_1, window_bounds = array<i64: 128, 128>}, {pipeline_mode = #tpu.pipeline_mode<synchronous>, transform_indices = @transform_2, window_bounds = array<i64: 1, 128>}, {transform_indices = @transform_3, window_bounds = array<i64: 2, 128>}]} {
    %c0 = arith.constant 0 : index
    %c0_0 = arith.constant 0 : index
    %0 = vector.load %arg1[%c0, %c0_0] : memref<2x128xf32, #tpu.memory_space<vmem>>, vector<2x128xf32>
    %1 = arith.truncf %0 : vector<2x128xf32> to vector<2x128xbf16>
    %c0_1 = arith.constant 0 : index
    %c0_2 = arith.constant 0 : index
    %2 = vector.load %arg2[%c0_1, %c0_2] : memref<128x128xbf16, #tpu.memory_space<vmem>>, vector<128x128xbf16>
    %cst = arith.constant dense<0.000000e+00> : vector<2x128xf32>
    %3 = tpu.matmul %1, %2, %cst {dimension_numbers = #tpu.dot_dimension_numbers<[1], [0], [0], [1], [0, 0, 1, 1], [], []>} : vector<2x128xbf16>, vector<128x128xbf16>, vector<2x128xf32> -> vector<2x128xf32>
    %c0_3 = arith.constant 0 : index
    %c0_4 = arith.constant 0 : index
    %4 = vector.load %arg3[%c0_3, %c0_4] : memref<1x128xf32, #tpu.memory_space<vmem>>, vector<1x128xf32>
    %5 = vector.broadcast %4 : vector<1x128xf32> to vector<2x128xf32>
    %6 = arith.addf %3, %5 : vector<2x128xf32>
    %c0_5 = arith.constant 0 : index
    %c0_6 = arith.constant 0 : index
    %7 = vector.load %arg4[%c0_5, %c0_6] : memref<2x128xf32, #tpu.memory_space<vmem>>, vector<2x128xf32>
    tpu.vector_store %arg4[%c0_5, %c0_6], %6 {strides = array<i32>} : memref<2x128xf32, #tpu.memory_space<vmem>>, vector<2x128xf32>,
    return
  }
  func.func @transform_0(%arg0: i32) -> (i32, i32) {
    %c0_i32 = arith.constant 0 : i32
    %c0_i32_0 = arith.constant 0 : i32
    return %arg0, %c0_i32 : i32, i32
  }
  func.func @transform_1(%arg0: i32) -> (i32, i32) {
    %c0_i32 = arith.constant 0 : i32
    %c0_i32_0 = arith.constant 0 : i32
    %c0_i32_1 = arith.constant 0 : i32
    return %c0_i32, %c0_i32_0 : i32, i32
  }
  func.func @transform_2(%arg0: i32) -> (i32, i32) {
    %c0_i32 = arith.constant 0 : i32
    %c0_i32_0 = arith.constant 0 : i32
    %c0_i32_1 = arith.constant 0 : i32
    return %c0_i32, %c0_i32_0 : i32, i32
  }
  func.func @transform_3(%arg0: i32) -> (i32, i32) {
    %c0_i32 = arith.constant 0 : i32
    %c0_i32_0 = arith.constant 0 : i32
    return %arg0, %c0_i32 : i32, i32
  }
}

</mosaic_0001>

<bundles_post_ra>
// kernel: bert_legal_pretraining_forward.18
= control target key start
LH: loop header
LB: loop body
LE: loop exit
PB: predicated region body
PF: predicated region fallthrough
CT: control target
= control target key end

     0   :  { %s566_s12 = smov 0   ;;  %s750_s0 = inlined_call_operand.vmem [shape: f32[256,128], index: 0, kind: input, shape index: {}]   ;;  %s751_s1 = inlined_call_operand.vmem [shape: f32[1,128], index: 1, kind: input, shape index: {}]   ;;  %s752_s2 = inlined_call_operand.vmem [shape: f32[1,128], index: 2, kind: input, shape index: {}]   ;;  %s753_s3 = inlined_call_operand.vmem [shape: f32[256,128], index: 3, kind: output, shape index: {}]  }
   0x1 LB: > { %s485_s13 = sadd.s32 4294967295, %s544_s12   ;;  %p489_p0 = scmp.ge.s32.totalorder %s544_s12, 1  ;;  %s544_s12 = sphi %s566_s12, %s13_s12  }
   0x2   : > { %p138_p1 = scmp.lt.s32.totalorder %s544_s12, 3 }
   0x4   : > { %p139_p2 = pnand %p489_p0, %p138_p1 }
   0x5   : > { %s490_s14 = sshll.u32 (!%p139_p2), %s485_s13, 4 }
   0x6   : > { %142 = sbr.rel (%p139_p2) target bundleno = 361 (0x169), region = 32  ;;  %p163_p3 = scmp.lt.s32.totalorder (!%p139_p2), %s490_s14, 31 }
   0xd   : > { %s755_s14 = smov (!%p163_p3, %s490_s14), 31 }
   0xe   : > { %s491_s15 = sshll.u32 %s755_s14, 3 }
   0xf   : > { %s166_s18 = scalar_lea.vmem %s750_s0, %s491_s15  ;;  %s683_s25 = scalar_lea.vmem %s753_s3, %s491_s15 }
  0x10   : > { %v174_v0 = vld [vmem:[%s166_s18] sm:$0xff]  ;;  %v176_v1 = vld [vmem:[%s166_s18 + $0x10] sm:$0xff]  ;;  %v175_v2 = vld [vmem:[%s166_s18 + $0x8] sm:$0xff] }
  0x11   : > { %190 = vadd.xlane.f32.xlu0 %v174_v0  ;;  %194 = vadd.xlane.f32.xlu1 %v176_v1  ;;  %v177_v3 = vld [vmem:[%s166_s18 + $0x18] sm:$0xff]  ;;  %v178_v4 = vld [vmem:[%s166_s18 + $0x20] sm:$0xff]  ;;  %v179_v5 = vld [vmem:[%s166_s18 + $0x28] sm:$0xff] }
  0x12   : > { %v180_v6 = vld [vmem:[%s166_s18 + $0x30] sm:$0xff]  ;;  %v181_v7 = vld [vmem:[%s166_s18 + $0x38] sm:$0xff]  ;;  %v182_v8 = vld [vmem:[%s166_s18 + $0x40] sm:$0xff] }
  0x13   : > { %v183_v9 = vld [vmem:[%s166_s18 + $0x48] sm:$0xff]  ;;  %v184_v10 = vld [vmem:[%s166_s18 + $0x50] sm:$0xff]  ;;  %v582_v11 = vld [vmem:[%s166_s18 + $0x58] sm:$0xff] }
  0x14   : > { %v585_v12 = vld [vmem:[%s166_s18 + $0x60] sm:$0xff]  ;;  %v587_v13 = vld [vmem:[%s166_s18 + $0x68] sm:$0xff]  ;;  %v591_v14 = vld [vmem:[%s166_s18 + $0x70] sm:$0xff] }
  0x15   : > { %192 = vadd.xlane.f32.xlu0 %v175_v2  ;;  %196 = vadd.xlane.f32.xlu1 %v177_v3  ;;  %v593_v15 = vld [vmem:[%s166_s18 + $0x78] sm:$0xff] }
  0x19   : > { %198 = vadd.xlane.f32.xlu0 %v178_v4  ;;  %200 = vadd.xlane.f32.xlu1 %v179_v5 }
  0x1d   : > { %202 = vadd.xlane.f32.xlu0 %v180_v6  ;;  %204 = vadd.xlane.f32.xlu1 %v181_v7 }
  0x21   : > { %206 = vadd.xlane.f32.xlu0 %v182_v8  ;;  %208 = vadd.xlane.f32.xlu1 %v183_v9 }
  0x25   : > { %210 = vadd.xlane.f32.xlu0 %v184_v10  ;;  %212 = vadd.xlane.f32.xlu1 %v582_v11 }
  0x29   : > { %214 = vadd.xlane.f32.xlu0 %v585_v12  ;;  %216 = vadd.xlane.f32.xlu1 %v587_v13 }
  0x2d   : > { %218 = vadd.xlane.f32.xlu0 %v591_v14  ;;  %220 = vadd.xlane.f32.xlu1 %v593_v15 }
  0x9e   : > { %v191_v16 = vpop.xlane.xlu0 %190  ;;  %v195_v17 = vpop.xlane.xlu1 %194 }
  0x9f   : > { %v223_v18 = vmul.f32 0.0078125, %v191_v16  ;;  %v225_v19 = vmul.f32 0.0078125, %v195_v17 }
  0xa1   : > { %v597_v20 = vsub.f32 %v174_v0, %v223_v18  ;;  %v599_v21 = vsub.f32 %v176_v1, %v225_v19 }
  0xa2   : > { %v193_v22 = vpop.xlane.xlu0 %192  ;;  %v197_v23 = vpop.xlane.xlu1 %196 }
  0xa3   : > { %v224_v24 = vmul.f32 0.0078125, %v193_v22  ;;  %v255_v25 = vmul.f32 %v597_v20, %v597_v20  ;;  %v226_v26 = vmul.f32 0.0078125, %v197_v23  ;;  %v257_v29 = vmul.f32 %v599_v21, %v599_v21 }
  0xa5   : > { %v603_v27 = vsub.f32 %v175_v2, %v224_v24  ;;  %271 = vadd.xlane.f32.xlu0 %v255_v25  ;;  %v605_v28 = vsub.f32 %v177_v3, %v226_v26 }
  0xa6   : > { %v199_v30 = vpop.xlane.xlu0 %198  ;;  %v201_v31 = vpop.xlane.xlu1 %200 }
  0xa7   : > { %v227_v32 = vmul.f32 0.0078125, %v199_v30  ;;  %v256_v33 = vmul.f32 %v603_v27, %v603_v27  ;;  %v228_v34 = vmul.f32 0.0078125, %v201_v31  ;;  %v258_v37 = vmul.f32 %v605_v28, %v605_v28 }
  0xa9   : > { %v611_v35 = vsub.f32 %v178_v4, %v227_v32  ;;  %275 = vadd.xlane.f32.xlu0 %v257_v29  ;;  %273 = vadd.xlane.f32.xlu1 %v256_v33  ;;  %v613_v36 = vsub.f32 %v179_v5, %v228_v34 }
  0xaa   : > { %v203_v38 = vpop.xlane.xlu0 %202  ;;  %v205_v39 = vpop.xlane.xlu1 %204 }
  0xab   : > { %v229_v40 = vmul.f32 0.0078125, %v203_v38  ;;  %v259_v41 = vmul.f32 %v611_v35, %v611_v35  ;;  %v230_v42 = vmul.f32 0.0078125, %v205_v39  ;;  %v260_v45 = vmul.f32 %v613_v36, %v613_v36 }
  0xad   : > { %v619_v43 = vsub.f32 %v180_v6, %v229_v40  ;;  %277 = vadd.xlane.f32.xlu1 %v258_v37  ;;  %279 = vadd.xlane.f32.xlu0 %v259_v41  ;;  %v621_v44 = vsub.f32 %v181_v7, %v230_v42  ;;  %v669_v42 = vld [vmem:[%s751_s1] ss:$0 sm:$0xff] }
  0xae   : > { %v207_v46 = vpop.xlane.xlu0 %206  ;;  %v209_v47 = vpop.xlane.xlu1 %208 }
  0xaf   : > { %v231_v48 = vmul.f32 0.0078125, %v207_v46  ;;  %v261_v49 = vmul.f32 %v619_v43, %v619_v43  ;;  %v232_v50 = vmul.f32 0.0078125, %v209_v47  ;;  %v262_v53 = vmul.f32 %v621_v44, %v621_v44 }
  0xb1   : > { %v627_v51 = vsub.f32 %v182_v8, %v231_v48  ;;  %281 = vadd.xlane.f32.xlu1 %v260_v45  ;;  %283 = vadd.xlane.f32.xlu0 %v261_v49  ;;  %v629_v52 = vsub.f32 %v183_v9, %v232_v50  ;;  %v675_v50 = vld [vmem:[%s752_s2] ss:$0 sm:$0xff] }
  0xb2   : > { %v211_v54 = vpop.xlane.xlu0 %210  ;;  %v213_v55 = vpop.xlane.xlu1 %212 }
  0xb3   : > { %v233_v56 = vmul.f32 0.0078125, %v211_v54  ;;  %v263_v57 = vmul.f32 %v627_v51, %v627_v51  ;;  %v234_v58 = vmul.f32 0.0078125, %v213_v55  ;;  %v264_v61 = vmul.f32 %v629_v52, %v629_v52 }
  0xb5   : > { %v635_v59 = vsub.f32 %v184_v10, %v233_v56  ;;  %285 = vadd.xlane.f32.xlu1 %v262_v53  ;;  %287 = vadd.xlane.f32.xlu0 %v263_v57  ;;  %v638_v60 = vsub.f32 %v582_v11, %v234_v58 }
  0xb6   : > { %v215_v62 = vpop.xlane.xlu0 %214  ;;  %v217_v63 = vpop.xlane.xlu1 %216 }
  0xb7   : > { %v235_v0 = vmul.f32 0.0078125, %v215_v62  ;;  %v265_v1 = vmul.f32 %v635_v59, %v635_v59  ;;  %v236_v2 = vmul.f32 0.0078125, %v217_v63  ;;  %v266_v5 = vmul.f32 %v638_v60, %v638_v60 }
  0xb9   : > { %v645_v3 = vsub.f32 %v585_v12, %v235_v0  ;;  %289 = vadd.xlane.f32.xlu1 %v264_v61  ;;  %291 = vadd.xlane.f32.xlu0 %v265_v1  ;;  %v648_v4 = vsub.f32 %v587_v13, %v236_v2 }
  0xba   : > { %v219_v6 = vpop.xlane.xlu0 %218  ;;  %v221_v7 = vpop.xlane.xlu1 %220 }
  0xbb   : > { %v237_v8 = vmul.f32 0.0078125, %v219_v6  ;;  %v267_v9 = vmul.f32 %v645_v3, %v645_v3  ;;  %v238_v10 = vmul.f32 0.0078125, %v221_v7  ;;  %v268_v13 = vmul.f32 %v648_v4, %v648_v4 }
  0xbd   : > { %v655_v11 = vsub.f32 %v591_v14, %v237_v8  ;;  %293 = vadd.xlane.f32.xlu1 %v266_v5  ;;  %295 = vadd.xlane.f32.xlu0 %v267_v9  ;;  %v658_v12 = vsub.f32 %v593_v15, %v238_v10 }
  0xbf   : > { %v269_v16 = vmul.f32 %v655_v11, %v655_v11  ;;  %v270_v17 = vmul.f32 %v658_v12, %v658_v12 }
  0xc1   : > { %297 = vadd.xlane.f32.xlu1 %v268_v13  ;;  %299 = vadd.xlane.f32.xlu0 %v269_v16 }
  0xc5   : > { %301 = vadd.xlane.f32.xlu1 %v270_v17 }
 0x132   : > { %v272_v18 = vpop.xlane.xlu0 %271 }
 0x133   : > { %v303_v14 = vmul.f32 0.0078125, %v272_v18 }
 0x135   : > { %v319_v19 = vadd.f32 1e-12, %v303_v14 }
 0x136   : > { %v274_v22 = vpop.xlane.xlu1 %273  ;;  %v276_v23 = vpop.xlane.xlu0 %275 }
 0x137   : > { %506 = vrsqrt.f32 %v319_v19  ;;  %v304_v15 = vmul.f32 0.0078125, %v274_v22  ;;  %v305_v24 = vmul.f32 0.0078125, %v276_v23 }
 0x139   : > { %v320_v25 = vadd.f32 1e-12, %v304_v15  ;;  %v321_v26 = vadd.f32 1e-12, %v305_v24 }
 0x13a   : > { %v278_v29 = vpop.xlane.xlu1 %277  ;;  %v280_v30 = vpop.xlane.xlu0 %279 }
 0x13b   : > { %508 = vrsqrt.f32 %v320_v25  ;;  %v306_v31 = vmul.f32 0.0078125, %v278_v29  ;;  %v307_v32 = vmul.f32 0.0078125, %v280_v30 }
 0x13c   : > { %510 = vrsqrt.f32 %v321_v26 }
 0x13d   : > { %v322_v33 = vadd.f32 1e-12, %v306_v31  ;;  %v323_v34 = vadd.f32 1e-12, %v307_v32 }
 0x13e   : > { %v282_v37 = vpop.xlane.xlu1 %281  ;;  %v284_v38 = vpop.xlane.xlu0 %283 }
 0x13f   : > { %512 = vrsqrt.f32 %v322_v33  ;;  %v308_v39 = vmul.f32 0.0078125, %v282_v37  ;;  %v309_v40 = vmul.f32 0.0078125, %v284_v38 }
 0x140   : > { %514 = vrsqrt.f32 %v323_v34 }
 0x141   : > { %v507_v41 = vpop.eup %506  ;;  %v324_v45 = vadd.f32 1e-12, %v308_v39  ;;  %v325_v46 = vadd.f32 1e-12, %v309_v40 }
 0x142   : > { %v351_v47 = vmul.f32 %v507_v41, %v597_v20  ;;  %v286_v48 = vpop.xlane.xlu1 %285  ;;  %v288_v49 = vpop.xlane.xlu0 %287 }
 0x143   : > { %516 = vrsqrt.f32 %v324_v45  ;;  %v310_v53 = vmul.f32 0.0078125, %v286_v48  ;;  %v311_v54 = vmul.f32 0.0078125, %v288_v49 }
 0x144   : > { %v374_v55 = vmul.f32 %v669_v42, %v351_v47  ;;  %518 = vrsqrt.f32 %v325_v46 }
 0x145   : > { %v509_v56 = vpop.eup %508  ;;  %v326_v20 = vadd.f32 1e-12, %v310_v53  ;;  %v327_v57 = vadd.f32 1e-12, %v311_v54 }
 0x146   : > { %v511_v58 = vpop.eup %510  ;;  %v397_v61 = vadd.f32 %v675_v50, %v374_v55  ;;  %v352_v62 = vmul.f32 %v509_v56, %v603_v27  ;;  %v290_v63 = vpop.xlane.xlu1 %289 }
 0x147   : > { %v292_v0 = vpop.xlane.xlu0 %291  ;;  %v353_v1 = vmul.f32 %v511_v58, %v599_v21  ;;  %520 = vrsqrt.f32 %v326_v20  ;;  %v312_v2 = vmul.f32 0.0078125, %v290_v63 }
 0x148   : > { %v313_v5 = vmul.f32 0.0078125, %v292_v0  ;;  %413 = vst [vmem:[%s683_s25] sm:$0xff] %v397_v61  ;;  %v375_v6 = vmul.f32 %v669_v42, %v352_v62  ;;  %522 = vrsqrt.f32 %v327_v57 }
 0x149   : > { %v513_v7 = vpop.eup %512  ;;  %v376_v8 = vmul.f32 %v669_v42, %v353_v1  ;;  %v328_v9 = vadd.f32 1e-12, %v312_v2 }
 0x14a   : > { %v329_v10 = vadd.f32 1e-12, %v313_v5  ;;  %v515_v13 = vpop.eup %514  ;;  %v398_v27 = vadd.f32 %v675_v50, %v375_v6  ;;  %v354_v16 = vmul.f32 %v513_v7, %v605_v28  ;;  %v294_v21 = vpop.xlane.xlu1 %293 }
 0x14b   : > { %v296_v17 = vpop.xlane.xlu0 %295  ;;  %v399_v18 = vadd.f32 %v675_v50, %v376_v8  ;;  %v355_v14 = vmul.f32 %v515_v13, %v611_v35  ;;  %524 = vrsqrt.f32 %v328_v9  ;;  %v314_v19 = vmul.f32 0.0078125, %v294_v21 }
 0x14c   : > { %414 = vst [vmem:[%s683_s25 + $0x8] sm:$0xff] %v398_v27  ;;  %v377_v22 = vmul.f32 %v669_v42, %v354_v16  ;;  %526 = vrsqrt.f32 %v329_v10  ;;  %v315_v23 = vmul.f32 0.0078125, %v296_v17 }
 0x14d   : > { %v517_v15 = vpop.eup %516  ;;  %415 = vst [vmem:[%s683_s25 + $0x10] sm:$0xff] %v399_v18  ;;  %v378_v24 = vmul.f32 %v669_v42, %v355_v14  ;;  %v330_v25 = vadd.f32 1e-12, %v314_v19 }
 0x14e   : > { %v519_v28 = vpop.eup %518  ;;  %v400_v26 = vadd.f32 %v675_v50, %v377_v22  ;;  %v356_v29 = vmul.f32 %v517_v15, %v613_v36  ;;  %v331_v35 = vadd.f32 1e-12, %v315_v23  ;;  %v298_v30 = vpop.xlane.xlu1 %297 }
 0x14f   : > { %v300_v31 = vpop.xlane.xlu0 %299  ;;  %v401_v32 = vadd.f32 %v675_v50, %v378_v24  ;;  %v357_v33 = vmul.f32 %v519_v28, %v619_v43  ;;  %528 = vrsqrt.f32 %v330_v25  ;;  %v316_v34 = vmul.f32 0.0078125, %v298_v30 }
 0x150   : > { %416 = vst [vmem:[%s683_s25 + $0x18] sm:$0xff] %v400_v26  ;;  %v379_v37 = vmul.f32 %v669_v42, %v356_v29  ;;  %530 = vrsqrt.f32 %v331_v35  ;;  %v317_v38 = vmul.f32 0.0078125, %v300_v31 }
 0x151   : > { %v521_v39 = vpop.eup %520  ;;  %417 = vst [vmem:[%s683_s25 + $0x20] sm:$0xff] %v401_v32  ;;  %v380_v36 = vmul.f32 %v669_v42, %v357_v33  ;;  %v332_v40 = vadd.f32 1e-12, %v316_v34 }
 0x152   : > { %v523_v41 = vpop.eup %522  ;;  %v402_v45 = vadd.f32 %v675_v50, %v379_v37  ;;  %v358_v46 = vmul.f32 %v521_v39, %v621_v44  ;;  %v333_v43 = vadd.f32 1e-12, %v317_v38  ;;  %v302_v47 = vpop.xlane.xlu1 %301 }
 0x153   : > { %v403_v48 = vadd.f32 %v675_v50, %v380_v36  ;;  %v359_v49 = vmul.f32 %v523_v41, %v627_v51  ;;  %532 = vrsqrt.f32 %v332_v40  ;;  %v318_v53 = vmul.f32 0.0078125, %v302_v47 }
 0x154   : > { %418 = vst [vmem:[%s683_s25 + $0x28] sm:$0xff] %v402_v45  ;;  %v381_v54 = vmul.f32 %v669_v42, %v358_v46  ;;  %534 = vrsqrt.f32 %v333_v43 }
 0x155   : > { %v525_v55 = vpop.eup %524  ;;  %419 = vst [vmem:[%s683_s25 + $0x30] sm:$0xff] %v403_v48  ;;  %v382_v56 = vmul.f32 %v669_v42, %v359_v49  ;;  %v334_v20 = vadd.f32 1e-12, %v318_v53 }
 0x156   : > { %v527_v44 = vpop.eup %526  ;;  %v404_v57 = vadd.f32 %v675_v50, %v381_v54  ;;  %v360_v58 = vmul.f32 %v525_v55, %v629_v52 }
 0x157   : > { %v405_v51 = vadd.f32 %v675_v50, %v382_v56  ;;  %v361_v61 = vmul.f32 %v527_v44, %v635_v59  ;;  %536 = vrsqrt.f32 %v334_v20 }
 0x158   : > { %420 = vst [vmem:[%s683_s25 + $0x38] sm:$0xff] %v404_v57  ;;  %v383_v62 = vmul.f32 %v669_v42, %v360_v58 }
 0x159   : > { %v529_v63 = vpop.eup %528  ;;  %421 = vst [vmem:[%s683_s25 + $0x40] sm:$0xff] %v405_v51  ;;  %v384_v0 = vmul.f32 %v669_v42, %v361_v61 }
 0x15a   : > { %v531_v1 = vpop.eup %530  ;;  %v406_v2 = vadd.f32 %v675_v50, %v383_v62  ;;  %v362_v5 = vmul.f32 %v529_v63, %v638_v60 }
 0x15b   : > { %v407_v52 = vadd.f32 %v675_v50, %v384_v0  ;;  %v363_v6 = vmul.f32 %v531_v1, %v645_v3 }
 0x15c   : > { %422 = vst [vmem:[%s683_s25 + $0x48] sm:$0xff] %v406_v2  ;;  %v385_v59 = vmul.f32 %v669_v42, %v362_v5 }
 0x15d   : > { %v533_v7 = vpop.eup %532  ;;  %423 = vst [vmem:[%s683_s25 + $0x50] sm:$0xff] %v407_v52  ;;  %v386_v8 = vmul.f32 %v669_v42, %v363_v6 }
 0x15e   : > { %v535_v9 = vpop.eup %534  ;;  %v408_v10 = vadd.f32 %v675_v50, %v385_v59  ;;  %v364_v60 = vmul.f32 %v533_v7, %v648_v4 }
 0x15f   : > { %v409_v13 = vadd.f32 %v675_v50, %v386_v8  ;;  %v365_v27 = vmul.f32 %v535_v9, %v655_v11 }
 0x160   : > { %424 = vst [vmem:[%s683_s25 + $0x58] sm:$0xff] %v408_v10  ;;  %v387_v3 = vmul.f32 %v669_v42, %v364_v60 }
 0x161   : > { %v537_v16 = vpop.eup %536  ;;  %425 = vst [vmem:[%s683_s25 + $0x60] sm:$0xff] %v409_v13  ;;  %v388_v21 = vmul.f32 %v669_v42, %v365_v27 }
 0x162   : > { %v410_v17 = vadd.f32 %v675_v50, %v387_v3  ;;  %v366_v18 = vmul.f32 %v537_v16, %v658_v12 }
 0x163   : > { %v411_v14 = vadd.f32 %v675_v50, %v388_v21 }
 0x164   : > { %426 = vst [vmem:[%s683_s25 + $0x68] sm:$0xff] %v410_v17  ;;  %v389_v4 = vmul.f32 %v669_v42, %v366_v18 }
 0x165   : > { %427 = vst [vmem:[%s683_s25 + $0x70] sm:$0xff] %v411_v14 }
 0x166   : > { %v412_v19 = vadd.f32 %v675_v50, %v389_v4 }
 0x168   : > { %428 = vst [vmem:[%s683_s25 + $0x78] sm:$0xff] %v412_v19 }
 0x169 PF: > { %s13_s12 = sadd.s32 1, %s544_s12  }
 0x16a   : > { %p10_p4 = scmp.ge.s32.totalorder %s13_s12, 4  }
 0x16c   :  { %12 = sbr.rel (!%p10_p4) target bundleno = 1 (0x1), region = 62 }

// kernel: bert_legal_pretraining_forward.19
= control target key start
LH: loop header
LB: loop body
LE: loop exit
PB: predicated region body
PF: predicated region fallthrough
CT: control target
= control target key end

     0   :  { %s848_s12 = smov 0   ;;  %s1074_s0 = inlined_call_operand.vmem [shape: f32[256,128], index: 0, kind: input, shape index: {}]   ;;  %s1075_s1 = inlined_call_operand.vmem [shape: bf16[128,384], index: 1, kind: input, shape index: {}]   ;;  %s1076_s2 = inlined_call_operand.vmem [shape: f32[1,384], index: 2, kind: input, shape index: {}]   ;;  %s1077_s3 = inlined_call_operand.vmem [shape: f32[256,384], index: 3, kind: output, shape index: {}]  }
   0x1 LB: > { %s694_s13 = sadd.s32 4294967295, %s825_s12   ;;  %p698_p0 = scmp.ge.s32.totalorder %s825_s12, 1  ;;  %s825_s12 = sphi %s848_s12, %s13_s12  }
   0x2   : > { %p138_p1 = scmp.lt.s32.totalorder %s825_s12, 3 }
   0x4   : > { %p139_p2 = pnand %p698_p0, %p138_p1 }
   0x5   : > { %v787_v0 = vld [vmem:[%s1075_s1 + $0x4] ss:$12 sps:$4 sm:$0xff] (!%p139_p2)   ;;  %s699_s16 = sshll.u32 (!%p139_p2), %s694_s13, 4  ;;  %v789_v1 = vld [vmem:[%s1075_s1] ss:$12 sps:$4 sm:$0xff] (!%p139_p2)   ;;  %v827_v2 = vmov (!%p139_p2), 0   ;;  %v235_v49 = vlaneseq (!%p139_p2) }
   0x6   : > { %142 = sbr.rel (%p139_p2) target bundleno = 312 (0x138), region = 32  ;;  %410 = vmatprep.mubr.bf16.mxu0 (!%p139_p2), %v827_v2  ;;  %p164_p3 = scmp.lt.s32.totalorder (!%p139_p2), %s699_s16, 31  ;;  %378 = vmatprep.subr.bf16.mxu0 (!%p139_p2), %v787_v0  ;;  %v790_v3 = vld [vmem:[%s1075_s1 + $0x1c] ss:$12 sps:$4 sm:$0xff] (!%p139_p2)   ;;  %v792_v4 = vld [vmem:[%s1075_s1 + $0x18] ss:$12 sps:$4 sm:$0xff] (!%p139_p2)  }
   0x7   : > { %379 = vmatpush1.bf16.msra.mxu0 (!%p139_p2), %v789_v1  ;;  %v793_v5 = vld [vmem:[%s1075_s1 + $0x34] ss:$12 sps:$4 sm:$0xff] (!%p139_p2)   ;;  %v795_v6 = vld [vmem:[%s1075_s1 + $0x30] ss:$12 sps:$4 sm:$0xff] (!%p139_p2)   ;;  %v796_v7 = vld [vmem:[%s1075_s1 + $0x4c] ss:$12 sps:$4 sm:$0xff] (!%p139_p2)  }
   0x8   : > { %380 = vmatprep.subr.bf16.mxu0 (!%p139_p2), %v790_v3  ;;  %v798_v8 = vld [vmem:[%s1075_s1 + $0x48] ss:$12 sps:$4 sm:$0xff] (!%p139_p2)   ;;  %v799_v9 = vld [vmem:[%s1075_s1 + $0x64] ss:$12 sps:$4 sm:$0xff] (!%p139_p2)   ;;  %v812_v13 = vld [vmem:[%s1075_s1 + $0x20] ss:$12 sps:$4 sm:$0xff] (!%p139_p2)  }
   0x9   : > { %v811_v10 = vld [vmem:[%s1075_s1 + $0x8] ss:$12 sps:$4 sm:$0xff] (!%p139_p2)   ;;  %v801_v14 = vld [vmem:[%s1075_s1 + $0x60] ss:$12 sps:$4 sm:$0xff] (!%p139_p2)   ;;  %v813_v16 = vld [vmem:[%s1075_s1 + $0x38] ss:$12 sps:$4 sm:$0xff] (!%p139_p2)  }
   0xa   : > { %745 = vmatprep.subr.bf16.mxu1 (!%p139_p2), %v811_v10  ;;  %v802_v17 = vld [vmem:[%s1075_s1 + $0x7c] ss:$12 sps:$4 sm:$0xff] (!%p139_p2)   ;;  %v804_v18 = vld [vmem:[%s1075_s1 + $0x78] ss:$12 sps:$4 sm:$0xff] (!%p139_p2)   ;;  %v805_v20 = vld [vmem:[%s1075_s1 + $0x94] ss:$12 sps:$4 sm:$0xff] (!%p139_p2)  }
   0xb   : > { %381 = vmatpush1.bf16.msra.mxu0 (!%p139_p2), %v792_v4  ;;  %746 = vmatpush3.bf16.msra.mxu1 (!%p139_p2), %v811_v10  ;;  %v814_v19 = vld [vmem:[%s1075_s1 + $0x50] ss:$12 sps:$4 sm:$0xff] (!%p139_p2)   ;;  %v815_v22 = vld [vmem:[%s1075_s1 + $0x68] ss:$12 sps:$4 sm:$0xff] (!%p139_p2)   ;;  %v808_v23 = vld [vmem:[%s1075_s1 + $0xac] ss:$12 sps:$4 sm:$0xff] (!%p139_p2)  }
   0xc   : > { %382 = vmatprep.subr.bf16.mxu0 (!%p139_p2), %v793_v5  ;;  %747 = vmatprep.subr.bf16.mxu1 (!%p139_p2), %v812_v13  ;;  %v807_v21 = vld [vmem:[%s1075_s1 + $0x90] ss:$12 sps:$4 sm:$0xff] (!%p139_p2)   ;;  %v810_v24 = vld [vmem:[%s1075_s1 + $0xa8] ss:$12 sps:$4 sm:$0xff] (!%p139_p2)   ;;  %v816_v25 = vld [vmem:[%s1075_s1 + $0x80] ss:$12 sps:$4 sm:$0xff] (!%p139_p2)  }
   0xd   : > { %s1079_s16 = smov (!%p164_p3, %s699_s16), 31  ;;  %v817_v26 = vld [vmem:[%s1075_s1 + $0x98] ss:$12 sps:$4 sm:$0xff]   ;;  %v818_v29 = vld [vmem:[%s1075_s1 + $0xb0] ss:$12 sps:$4 sm:$0xff]   ;;  %v236_v50 = vshrl.u32 %v235_v49, 7 }
   0xe   : > { %s700_s25 = sshll.u32 %s1079_s16, 3  ;;  %v233_v52 = vld [vmem:[%s1076_s2] sm:$0x7] }
   0xf   : > { %s884_s5 = scalar_lea.vmem %s1074_s0, %s700_s25  ;;  %383 = vmatpush1.bf16.msra.mxu0 %v795_v6  ;;  %748 = vmatpush3.bf16.msra.mxu1 %v812_v13  ;;  %v237_v51 = vsub.s32 0, %v236_v50  ;;  %v241_v53 = vsub.s32 1, %v236_v50  ;;  %v245_v0 = vsub.s32 2, %v236_v50 }
  0x10   : > { %v177_v11 = vld [vmem:[%s884_s5] sm:$0xff]  ;;  %384 = vmatprep.subr.bf16.mxu0 %v796_v7  ;;  %v178_v12 = vld [vmem:[%s884_s5 + $0x8] sm:$0xff]  ;;  %749 = vmatprep.subr.bf16.mxu1 %v813_v16  ;;  %v179_v27 = vld [vmem:[%s884_s5 + $0x10] sm:$0xff] }
  0x11   : > { %v193_v15 = vpack.c.bf16 %v178_v12, %v177_v11  ;;  %v180_v28 = vld [vmem:[%s884_s5 + $0x18] sm:$0xff]  ;;  %v181_v31 = vld [vmem:[%s884_s5 + $0x20] sm:$0xff]  ;;  %v182_v32 = vld [vmem:[%s884_s5 + $0x28] sm:$0xff]  ;;  %v964_v54 = vrot.slane %v233_v52, %v237_v51  ;;  %v966_v55 = vrot.slane %v233_v52, %v241_v53 }
  0x12   : > { %v194_v30 = vpack.c.bf16 %v180_v28, %v179_v27  ;;  %v195_v33 = vpack.c.bf16 %v182_v32, %v181_v31  ;;  %v183_v34 = vld [vmem:[%s884_s5 + $0x30] sm:$0xff]  ;;  %v184_v35 = vld [vmem:[%s884_s5 + $0x38] sm:$0xff]  ;;  %v185_v36 = vld [vmem:[%s884_s5 + $0x40] sm:$0xff] }
  0x13   : > { %385 = vmatpush1.bf16.msra.mxu0 %v798_v8  ;;  %761 = vmatprep.mubr.bf16.mxu1 %v193_v15  ;;  %v186_v37 = vld [vmem:[%s884_s5 + $0x48] sm:$0xff]  ;;  %v196_v38 = vpack.c.bf16 %v184_v35, %v183_v34  ;;  %v187_v40 = vld [vmem:[%s884_s5 + $0x50] sm:$0xff]  ;;  %v188_v41 = vld [vmem:[%s884_s5 + $0x58] sm:$0xff] }
  0x14   : > { %386 = vmatprep.subr.bf16.mxu0 %v799_v9  ;;  %750 = vmatpush3.bf16.msra.mxu1 %v813_v16  ;;  %v197_v39 = vpack.c.bf16 %v186_v37, %v185_v36  ;;  %v189_v42 = vld [vmem:[%s884_s5 + $0x60] sm:$0xff]  ;;  %v190_v43 = vld [vmem:[%s884_s5 + $0x68] sm:$0xff]  ;;  %v198_v44 = vpack.c.bf16 %v188_v41, %v187_v40  ;;  %v191_v46 = vld [vmem:[%s884_s5 + $0x70] sm:$0xff] }
  0x15   : > { %751 = vmatprep.subr.bf16.mxu1 %v814_v19  ;;  %v199_v45 = vpack.c.bf16 %v190_v43, %v189_v42  ;;  %v192_v47 = vld [vmem:[%s884_s5 + $0x78] sm:$0xff]  ;;  %s777_s5 = smul.u32 24, %s1079_s16 }
  0x16   : > { %v200_v48 = vpack.c.bf16 %v192_v47, %v191_v46 }
  0x17   : > { %387 = vmatpush1.bf16.msra.mxu0 %v801_v14  ;;  %s971_s22 = scalar_lea.vmem %s1077_s3, %s777_s5 }
  0x18   : > { %388 = vmatprep.subr.bf16.mxu0 %v802_v17  ;;  %752 = vmatpush3.bf16.msra.mxu1 %v814_v19 }
  0x19   : > { %753 = vmatprep.subr.bf16.mxu1 %v815_v22 }
  0x1b   : > { %389 = vmatpush1.bf16.msra.mxu0 %v804_v18 }
  0x1c   : > { %390 = vmatprep.subr.bf16.mxu0 %v805_v20  ;;  %754 = vmatpush3.bf16.msra.mxu1 %v815_v22 }
  0x1d   : > { %755 = vmatprep.subr.bf16.mxu1 %v816_v25 }
  0x1f   : > { %391 = vmatpush1.bf16.msra.mxu0 %v807_v21 }
  0x20   : > { %392 = vmatprep.subr.bf16.mxu0 %v808_v23  ;;  %756 = vmatpush3.bf16.msra.mxu1 %v816_v25 }
  0x21   : > { %757 = vmatprep.subr.bf16.mxu1 %v817_v26 }
  0x23   : > { %393 = vmatpush1.bf16.msra.mxu0 %v810_v24 }
  0x24   : > { %758 = vmatpush3.bf16.msra.mxu1 %v817_v26 }
  0x25   : > { %759 = vmatprep.subr.bf16.mxu1 %v818_v29 }
  0x26   : > { %411 = vmatmul.mubr.bf16.vlgmr.msra.gmra.mrb[0].mxu0 %v193_v15 }
  0x27   : > { %420 = vmatprep.mubr.bf16.mxu0 %v827_v2 }
  0x28   : > { %760 = vmatpush3.bf16.msra.mxu1 %v818_v29 }
  0x2b   : > { %762 = vmatmul.mubr.bf16.vlgmr.msra.gmra.mrb[0].mxu1 %v194_v30 }
  0x2c   : > { %765 = vmatprep.mubr.bf16.mxu1 %v195_v33 }
  0x2e   : > { %421 = vmatmul.mubr.bf16.gmra.mrb[4].mxu0 %v194_v30 }
  0x2f   : > { %430 = vmatprep.mubr.bf16.mxu0 %v827_v2 }
  0x33   : > { %766 = vmatmul.mubr.bf16.gmra.mrb[4].mxu1 %v196_v38 }
  0x34   : > { %769 = vmatprep.mubr.bf16.mxu1 %v197_v39 }
  0x36   : > { %431 = vmatmul.mubr.bf16.gmra.mrb[8].mxu0 %v195_v33 }
  0x37   : > { %440 = vmatprep.mubr.bf16.mxu0 %v827_v2 }
  0x3b   : > { %770 = vmatmul.mubr.bf16.gmra.mrb[8].mxu1 %v198_v44 }
  0x3c   : > { %773 = vmatprep.mubr.bf16.mxu1 %v199_v45 }
  0x3e   : > { %441 = vmatmul.mubr.bf16.gmra.mrb[12].mxu0 %v196_v38 }
  0x3f   : > { %450 = vmatprep.mubr.bf16.mxu0 %v827_v2 }
  0x43   : > { %774 = vmatmul.mubr.bf16.gmra.mrb[12].mxu1 %v200_v48 }
  0x46   : > { %451 = vmatmul.mubr.bf16.gmra.mrb[16].mxu0 %v197_v39 }
  0x47   : > { %460 = vmatprep.mubr.bf16.mxu0 %v827_v2 }
  0x4e   : > { %461 = vmatmul.mubr.bf16.gmra.mrb[20].mxu0 %v198_v44 }
  0x4f   : > { %470 = vmatprep.mubr.bf16.mxu0 %v827_v2 }
  0x56   : > { %471 = vmatmul.mubr.bf16.gmra.mrb[24].mxu0 %v199_v45 }
  0x57   : > { %480 = vmatprep.mubr.bf16.mxu0 %v827_v2  ;;  %v981_v2 = vrot.slane %v233_v52, %v245_v0 }
  0x5e   : > { %481 = vmatmul.mubr.bf16.gmra.mrb[28].mxu0 %v200_v48 }
  0xf9   : > { %v412_v56 = vpop.f32.mrb[0].mxu0 }
  0xfa   : > { %v413_v57 = vadd.f32 %v412_v56, %v964_v54  ;;  %v414_v58 = vpop.f32.mrb[1].mxu0 }
  0xfb   : > { %v415_v59 = vadd.f32 %v414_v58, %v966_v55  ;;  %v416_v60 = vpop.f32.mrb[2].mxu0 }
  0xfc   : > { %588 = vst [vmem:[%s971_s22] sm:$0xff] %v413_v57  ;;  %v417_v61 = vadd.f32 %v416_v60, %v964_v54  ;;  %v418_v62 = vpop.f32.mrb[3].mxu0 }
  0xfd   : > { %589 = vst [vmem:[%s971_s22 + $0x8] sm:$0xff] %v415_v59  ;;  %v419_v63 = vadd.f32 %v418_v62, %v966_v55 }
  0xfe   : > { %591 = vst [vmem:[%s971_s22 + $0x18] sm:$0xff] %v417_v61  ;;  %v763_v9 = vpop.f32.mrb[0].mxu1 }
  0xff   : > { %592 = vst [vmem:[%s971_s22 + $0x20] sm:$0xff] %v419_v63  ;;  %v534_v11 = vadd.f32 %v763_v9, %v981_v2  ;;  %v525_v12 = vpop.f32.mrb[1].mxu1 }
 0x100   : > { %v526_v13 = vadd.f32 %v525_v12, %v981_v2  ;;  %v764_v14 = vpop.f32.mrb[2].mxu1 }
 0x101   : > { %v422_v1 = vpop.f32.mrb[4].mxu0  ;;  %596 = vst [vmem:[%s971_s22 + $0x40] sm:$0xff] %v534_v11  ;;  %v537_v15 = vadd.f32 %v764_v14, %v981_v2  ;;  %v528_v16 = vpop.f32.mrb[3].mxu1 }
 0x102   : > { %v423_v3 = vadd.f32 %v422_v1, %v964_v54  ;;  %v424_v4 = vpop.f32.mrb[5].mxu0  ;;  %590 = vst [vmem:[%s971_s22 + $0x10] sm:$0xff] %v526_v13  ;;  %v529_v17 = vadd.f32 %v528_v16, %v981_v2 }
 0x103   : > { %v425_v5 = vadd.f32 %v424_v4, %v966_v55  ;;  %v426_v6 = vpop.f32.mrb[6].mxu0  ;;  %599 = vst [vmem:[%s971_s22 + $0x58] sm:$0xff] %v537_v15 }
 0x104   : > { %594 = vst [vmem:[%s971_s22 + $0x30] sm:$0xff] %v423_v3  ;;  %v427_v7 = vadd.f32 %v426_v6, %v964_v54  ;;  %v428_v8 = vpop.f32.mrb[7].mxu0  ;;  %593 = vst [vmem:[%s971_s22 + $0x28] sm:$0xff] %v529_v17 }
 0x105   : > { %595 = vst [vmem:[%s971_s22 + $0x38] sm:$0xff] %v425_v5  ;;  %v429_v10 = vadd.f32 %v428_v8, %v966_v55 }
 0x106   : > { %597 = vst [vmem:[%s971_s22 + $0x48] sm:$0xff] %v427_v7  ;;  %v767_v25 = vpop.f32.mrb[4].mxu1 }
 0x107   : > { %598 = vst [vmem:[%s971_s22 + $0x50] sm:$0xff] %v429_v10  ;;  %v550_v27 = vadd.f32 %v767_v25, %v981_v2  ;;  %v541_v28 = vpop.f32.mrb[5].mxu1 }
 0x108   : > { %v542_v29 = vadd.f32 %v541_v28, %v981_v2  ;;  %v768_v30 = vpop.f32.mrb[6].mxu1 }
 0x109   : > { %v432_v18 = vpop.f32.mrb[8].mxu0  ;;  %608 = vst [vmem:[%s971_s22 + $0xa0] sm:$0xff] %v550_v27  ;;  %v553_v31 = vadd.f32 %v768_v30, %v981_v2  ;;  %v544_v32 = vpop.f32.mrb[7].mxu1 }
 0x10a   : > { %v433_v19 = vadd.f32 %v432_v18, %v964_v54  ;;  %v434_v20 = vpop.f32.mrb[9].mxu0  ;;  %602 = vst [vmem:[%s971_s22 + $0x70] sm:$0xff] %v542_v29  ;;  %v545_v33 = vadd.f32 %v544_v32, %v981_v2 }
 0x10b   : > { %v435_v21 = vadd.f32 %v434_v20, %v966_v55  ;;  %v436_v22 = vpop.f32.mrb[10].mxu0  ;;  %611 = vst [vmem:[%s971_s22 + $0xb8] sm:$0xff] %v553_v31 }
 0x10c   : > { %600 = vst [vmem:[%s971_s22 + $0x60] sm:$0xff] %v433_v19  ;;  %v437_v23 = vadd.f32 %v436_v22, %v964_v54  ;;  %v438_v24 = vpop.f32.mrb[11].mxu0  ;;  %605 = vst [vmem:[%s971_s22 + $0x88] sm:$0xff] %v545_v33 }
 0x10d   : > { %601 = vst [vmem:[%s971_s22 + $0x68] sm:$0xff] %v435_v21  ;;  %v439_v26 = vadd.f32 %v438_v24, %v966_v55 }
 0x10e   : > { %603 = vst [vmem:[%s971_s22 + $0x78] sm:$0xff] %v437_v23  ;;  %v771_v41 = vpop.f32.mrb[8].mxu1 }
 0x10f   : > { %604 = vst [vmem:[%s971_s22 + $0x80] sm:$0xff] %v439_v26  ;;  %v566_v43 = vadd.f32 %v771_v41, %v981_v2  ;;  %v557_v44 = vpop.f32.mrb[9].mxu1 }
 0x110   : > { %v558_v45 = vadd.f32 %v557_v44, %v981_v2  ;;  %v772_v46 = vpop.f32.mrb[10].mxu1 }
 0x111   : > { %v442_v34 = vpop.f32.mrb[12].mxu0  ;;  %620 = vst [vmem:[%s971_s22 + $0x100] sm:$0xff] %v566_v43  ;;  %v569_v47 = vadd.f32 %v772_v46, %v981_v2  ;;  %v560_v48 = vpop.f32.mrb[11].mxu1 }
 0x112   : > { %v443_v35 = vadd.f32 %v442_v34, %v964_v54  ;;  %v444_v36 = vpop.f32.mrb[13].mxu0  ;;  %614 = vst [vmem:[%s971_s22 + $0xd0] sm:$0xff] %v558_v45  ;;  %v561_v49 = vadd.f32 %v560_v48, %v981_v2 }
 0x113   : > { %v445_v37 = vadd.f32 %v444_v36, %v966_v55  ;;  %v446_v38 = vpop.f32.mrb[14].mxu0  ;;  %623 = vst [vmem:[%s971_s22 + $0x118] sm:$0xff] %v569_v47 }
 0x114   : > { %606 = vst [vmem:[%s971_s22 + $0x90] sm:$0xff] %v443_v35  ;;  %v447_v39 = vadd.f32 %v446_v38, %v964_v54  ;;  %v448_v40 = vpop.f32.mrb[15].mxu0  ;;  %617 = vst [vmem:[%s971_s22 + $0xe8] sm:$0xff] %v561_v49 }
 0x115   : > { %607 = vst [vmem:[%s971_s22 + $0x98] sm:$0xff] %v445_v37  ;;  %v449_v42 = vadd.f32 %v448_v40, %v966_v55 }
 0x116   : > { %609 = vst [vmem:[%s971_s22 + $0xa8] sm:$0xff] %v447_v39  ;;  %v775_v59 = vpop.f32.mrb[12].mxu1 }
 0x117   : > { %610 = vst [vmem:[%s971_s22 + $0xb0] sm:$0xff] %v449_v42  ;;  %v582_v61 = vadd.f32 %v775_v59, %v981_v2  ;;  %v573_v62 = vpop.f32.mrb[13].mxu1 }
 0x118   : > { %v574_v63 = vadd.f32 %v573_v62, %v981_v2  ;;  %v776_v0 = vpop.f32.mrb[14].mxu1 }
 0x119   : > { %v452_v50 = vpop.f32.mrb[16].mxu0  ;;  %632 = vst [vmem:[%s971_s22 + $0x160] sm:$0xff] %v582_v61  ;;  %v585_v1 = vadd.f32 %v776_v0, %v981_v2  ;;  %v576_v3 = vpop.f32.mrb[15].mxu1 }
 0x11a   : > { %v453_v51 = vadd.f32 %v452_v50, %v964_v54  ;;  %v454_v52 = vpop.f32.mrb[17].mxu0  ;;  %626 = vst [vmem:[%s971_s22 + $0x130] sm:$0xff] %v574_v63  ;;  %v577_v4 = vadd.f32 %v576_v3, %v981_v2 }
 0x11b   : > { %v455_v53 = vadd.f32 %v454_v52, %v966_v55  ;;  %v456_v56 = vpop.f32.mrb[18].mxu0  ;;  %635 = vst [vmem:[%s971_s22 + $0x178] sm:$0xff] %v585_v1 }
 0x11c   : > { %612 = vst [vmem:[%s971_s22 + $0xc0] sm:$0xff] %v453_v51  ;;  %v457_v57 = vadd.f32 %v456_v56, %v964_v54  ;;  %v458_v58 = vpop.f32.mrb[19].mxu0  ;;  %629 = vst [vmem:[%s971_s22 + $0x148] sm:$0xff] %v577_v4 }
 0x11d   : > { %613 = vst [vmem:[%s971_s22 + $0xc8] sm:$0xff] %v455_v53  ;;  %v459_v60 = vadd.f32 %v458_v58, %v966_v55 }
 0x11e   : > { %615 = vst [vmem:[%s971_s22 + $0xd8] sm:$0xff] %v457_v57 }
 0x11f   : > { %616 = vst [vmem:[%s971_s22 + $0xe0] sm:$0xff] %v459_v60 }
 0x121   : > { %v462_v5 = vpop.f32.mrb[20].mxu0 }
 0x122   : > { %v463_v6 = vadd.f32 %v462_v5, %v964_v54  ;;  %v464_v7 = vpop.f32.mrb[21].mxu0 }
 0x123   : > { %v465_v8 = vadd.f32 %v464_v7, %v966_v55  ;;  %v466_v9 = vpop.f32.mrb[22].mxu0 }
 0x124   : > { %618 = vst [vmem:[%s971_s22 + $0xf0] sm:$0xff] %v463_v6  ;;  %v467_v10 = vadd.f32 %v466_v9, %v964_v54  ;;  %v468_v11 = vpop.f32.mrb[23].mxu0 }
 0x125   : > { %619 = vst [vmem:[%s971_s22 + $0xf8] sm:$0xff] %v465_v8  ;;  %v469_v2 = vadd.f32 %v468_v11, %v966_v55 }
 0x126   : > { %621 = vst [vmem:[%s971_s22 + $0x108] sm:$0xff] %v467_v10 }
 0x127   : > { %622 = vst [vmem:[%s971_s22 + $0x110] sm:$0xff] %v469_v2 }
 0x129   : > { %v472_v12 = vpop.f32.mrb[24].mxu0 }
 0x12a   : > { %v473_v13 = vadd.f32 %v472_v12, %v964_v54  ;;  %v474_v14 = vpop.f32.mrb[25].mxu0 }
 0x12b   : > { %v475_v15 = vadd.f32 %v474_v14, %v966_v55  ;;  %v476_v16 = vpop.f32.mrb[26].mxu0 }
 0x12c   : > { %624 = vst [vmem:[%s971_s22 + $0x120] sm:$0xff] %v473_v13  ;;  %v477_v17 = vadd.f32 %v476_v16, %v964_v54  ;;  %v478_v18 = vpop.f32.mrb[27].mxu0 }
 0x12d   : > { %625 = vst [vmem:[%s971_s22 + $0x128] sm:$0xff] %v475_v15  ;;  %v479_v19 = vadd.f32 %v478_v18, %v966_v55 }
 0x12e   : > { %627 = vst [vmem:[%s971_s22 + $0x138] sm:$0xff] %v477_v17 }
 0x12f   : > { %628 = vst [vmem:[%s971_s22 + $0x140] sm:$0xff] %v479_v19 }
 0x131   : > { %v482_v20 = vpop.f32.mrb[28].mxu0 }
 0x132   : > { %v483_v21 = vadd.f32 %v482_v20, %v964_v54  ;;  %v484_v22 = vpop.f32.mrb[29].mxu0 }
 0x133   : > { %v485_v23 = vadd.f32 %v484_v22, %v966_v55  ;;  %v486_v24 = vpop.f32.mrb[30].mxu0 }
 0x134   : > { %630 = vst [vmem:[%s971_s22 + $0x150] sm:$0xff] %v483_v21  ;;  %v487_v25 = vadd.f32 %v486_v24, %v964_v54  ;;  %v488_v26 = vpop.f32.mrb[31].mxu0 }
 0x135   : > { %631 = vst [vmem:[%s971_s22 + $0x158] sm:$0xff] %v485_v23  ;;  %v489_v27 = vadd.f32 %v488_v26, %v966_v55 }
 0x136   : > { %633 = vst [vmem:[%s971_s22 + $0x168] sm:$0xff] %v487_v25 }
 0x137   : > { %634 = vst [vmem:[%s971_s22 + $0x170] sm:$0xff] %v489_v27 }
 0x138 PF: > { %s13_s12 = sadd.s32 1, %s825_s12  }
 0x139   : > { %p10_p4 = scmp.ge.s32.totalorder %s13_s12, 4  }
 0x13b   :  { %12 = sbr.rel (!%p10_p4) target bundleno = 1 (0x1), region = 62 }

// kernel: bert_legal_pretraining_forward.21
= control target key start
LH: loop header
LB: loop body
LE: loop exit
PB: predicated region body
PF: predicated region fallthrough
CT: control target
= control target key end

     0   :  { %s988_s21 = smov 0   ;;  %s1294_s0 = inlined_call_operand.vmem [shape: f32[256,128], index: 0, kind: input, shape index: {}]   ;;  %s1295_s1 = inlined_call_operand.vmem [shape: bf16[128,128], index: 1, kind: input, shape index: {}]   ;;  %s1296_s2 = inlined_call_operand.vmem [shape: f32[1,128], index: 2, kind: input, shape index: {}]   ;;  %s1297_s3 = inlined_call_operand.vmem [shape: f32[256,128], index: 3, kind: input, shape index: {}]   ;;  %s1298_s4 = inlined_call_operand.vmem [shape: f32[1,128], index: 4, kind: input, shape index: {}]   ;;  %s1299_s5 = inlined_call_operand.vmem [shape: f32[1,128], index: 5, kind: input, shape index: {}]   ;;  %s1300_s6 = inlined_call_operand.vmem [shape: f32[256,128], index: 6, kind: output, shape index: {}]  }
   0x1 LB: > { %s809_s22 = sadd.s32 4294967295, %s951_s21   ;;  %p813_p0 = scmp.ge.s32.totalorder %s951_s21, 1  ;;  %s951_s21 = sphi %s988_s21, %s16_s21  }
   0x2   : > { %p224_p1 = scmp.lt.s32.totalorder %s951_s21, 3 }
   0x4   : > { %p225_p2 = pnand %p813_p0, %p224_p1 }
   0x5   : > { %v905_v0 = vld [vmem:[%s1295_s1] sm:$0xff] (!%p225_p2)   ;;  %s814_s25 = sshll.u32 (!%p225_p2), %s809_s22, 4  ;;  %v906_v1 = vld [vmem:[%s1295_s1 + $0x8] sm:$0xff] (!%p225_p2)   ;;  %v907_v2 = vld [vmem:[%s1295_s1 + $0x10] sm:$0xff] (!%p225_p2)  }
   0x6   : > { %228 = sbr.rel (%p225_p2) target bundleno = 599 (0x257), region = 44  ;;  %p260_p3 = scmp.lt.s32.totalorder (!%p225_p2), %s814_s25, 31  ;;  %849 = vmatprep.subr.bf16.mxu0 (!%p225_p2), %v905_v0  ;;  %881 = vmatprep.subr.bf16.mxu1 (!%p225_p2), %v905_v0  ;;  %v908_v3 = vld [vmem:[%s1295_s1 + $0x18] sm:$0xff] (!%p225_p2)   ;;  %v909_v10 = vld [vmem:[%s1295_s1 + $0x20] sm:$0xff] (!%p225_p2)   ;;  %v910_v11 = vld [vmem:[%s1295_s1 + $0x28] sm:$0xff] (!%p225_p2)  }
   0x7   : > { %850 = vmatpush3.bf16.msra.mxu0 (!%p225_p2), %v905_v0  ;;  %889 = vmatpush3.bf16.msra.mxu1 (!%p225_p2), %v905_v0  ;;  %v911_v12 = vld [vmem:[%s1295_s1 + $0x30] sm:$0xff] (!%p225_p2)   ;;  %v912_v13 = vld [vmem:[%s1295_s1 + $0x38] sm:$0xff] (!%p225_p2)   ;;  %v1053_v32 = vld [vmem:[%s1296_s2] ss:$0 sm:$0xff] (!%p225_p2) }
   0x8   : > { %851 = vmatprep.subr.bf16.mxu0 (!%p225_p2), %v906_v1  ;;  %882 = vmatprep.subr.bf16.mxu1 (!%p225_p2), %v906_v1 }
   0xb   : > { %852 = vmatpush3.bf16.msra.mxu0 (!%p225_p2), %v906_v1  ;;  %890 = vmatpush3.bf16.msra.mxu1 (!%p225_p2), %v906_v1 }
   0xc   : > { %853 = vmatprep.subr.bf16.mxu0 (!%p225_p2), %v907_v2  ;;  %883 = vmatprep.subr.bf16.mxu1 (!%p225_p2), %v907_v2 }
   0xd   : > { %s1302_s25 = smov (!%p260_p3, %s814_s25), 31 }
   0xe   : > { %s1005_s30 = sshll.u32 %s1302_s25, 3 }
   0xf   : > { %s1011_s9 = scalar_lea.vmem %s1294_s0, %s1005_s30  ;;  %854 = vmatpush3.bf16.msra.mxu0 %v907_v2  ;;  %891 = vmatpush3.bf16.msra.mxu1 %v907_v2  ;;  %s1048_s23 = scalar_lea.vmem %s1297_s3, %s1005_s30 }
  0x10   : > { %v278_v4 = vld [vmem:[%s1011_s9] sm:$0xff]  ;;  %v279_v5 = vld [vmem:[%s1011_s9 + $0x8] sm:$0xff]  ;;  %855 = vmatprep.subr.bf16.mxu0 %v908_v3  ;;  %884 = vmatprep.subr.bf16.mxu1 %v908_v3  ;;  %v280_v14 = vld [vmem:[%s1011_s9 + $0x10] sm:$0xff] }
  0x11   : > { %v286_v6 = vld [vmem:[%s1011_s9 + $0x40] sm:$0xff]  ;;  %v294_v7 = vpack.c.bf16 %v279_v5, %v278_v4  ;;  %v287_v8 = vld [vmem:[%s1011_s9 + $0x48] sm:$0xff]  ;;  %v281_v15 = vld [vmem:[%s1011_s9 + $0x18] sm:$0xff] }
  0x12   : > { %v298_v9 = vpack.c.bf16 %v287_v8, %v286_v6  ;;  %v288_v16 = vld [vmem:[%s1011_s9 + $0x50] sm:$0xff]  ;;  %v289_v17 = vld [vmem:[%s1011_s9 + $0x58] sm:$0xff]  ;;  %v282_v18 = vld [vmem:[%s1011_s9 + $0x20] sm:$0xff]  ;;  %v295_v22 = vpack.c.bf16 %v281_v15, %v280_v14 }
  0x13   : > { %865 = vmatprep.mubr.bf16.mxu0 %v294_v7  ;;  %856 = vmatpush3.bf16.msra.mxu0 %v908_v3  ;;  %v283_v19 = vld [vmem:[%s1011_s9 + $0x28] sm:$0xff]  ;;  %v290_v20 = vld [vmem:[%s1011_s9 + $0x60] sm:$0xff]  ;;  %v299_v23 = vpack.c.bf16 %v289_v17, %v288_v16  ;;  %v284_v26 = vld [vmem:[%s1011_s9 + $0x30] sm:$0xff] }
  0x14   : > { %873 = vmatprep.mubr.bf16.mxu1 %v298_v9  ;;  %892 = vmatpush3.bf16.msra.mxu1 %v908_v3  ;;  %v291_v21 = vld [vmem:[%s1011_s9 + $0x68] sm:$0xff]  ;;  %v296_v24 = vpack.c.bf16 %v283_v19, %v282_v18  ;;  %v285_v27 = vld [vmem:[%s1011_s9 + $0x38] sm:$0xff]  ;;  %v292_v28 = vld [vmem:[%s1011_s9 + $0x70] sm:$0xff] }
  0x15   : > { %857 = vmatprep.subr.bf16.mxu0 %v909_v10  ;;  %885 = vmatprep.subr.bf16.mxu1 %v909_v10  ;;  %v300_v25 = vpack.c.bf16 %v291_v21, %v290_v20  ;;  %v293_v29 = vld [vmem:[%s1011_s9 + $0x78] sm:$0xff]  ;;  %v297_v30 = vpack.c.bf16 %v285_v27, %v284_v26  ;;  %v480_v35 = vld [vmem:[%s1048_s23 + $0x50] sm:$0xff]  ;;  %v470_v50 = vld [vmem:[%s1048_s23] sm:$0xff]  ;;  %s1227_s9 = scalar_lea.vmem %s1300_s6, %s1005_s30 }
  0x16   : > { %v301_v31 = vpack.c.bf16 %v293_v29, %v292_v28  ;;  %v472_v36 = vld [vmem:[%s1048_s23 + $0x10] sm:$0xff]  ;;  %v473_v49 = vld [vmem:[%s1048_s23 + $0x18] sm:$0xff]  ;;  %v478_v56 = vld [vmem:[%s1048_s23 + $0x40] sm:$0xff] }
  0x17   : > { %858 = vmatpush3.bf16.msra.mxu0 %v909_v10  ;;  %v481_v55 = vld [vmem:[%s1048_s23 + $0x58] sm:$0xff]  ;;  %v479_v5 = vld [vmem:[%s1048_s23 + $0x48] sm:$0xff]  ;;  %v474_v18 = vld [vmem:[%s1048_s23 + $0x20] sm:$0xff] }
  0x18   : > { %893 = vmatpush3.bf16.msra.mxu1 %v909_v10  ;;  %859 = vmatprep.subr.bf16.mxu0 %v910_v11  ;;  %v471_v6 = vld [vmem:[%s1048_s23 + $0x8] sm:$0xff]  ;;  %v477_v9 = vld [vmem:[%s1048_s23 + $0x38] sm:$0xff]  ;;  %v476_v10 = vld [vmem:[%s1048_s23 + $0x30] sm:$0xff] }
  0x19   : > { %886 = vmatprep.subr.bf16.mxu1 %v910_v11  ;;  %v475_v17 = vld [vmem:[%s1048_s23 + $0x28] sm:$0xff]  ;;  %v485_v29 = vld [vmem:[%s1048_s23 + $0x78] sm:$0xff] }
  0x1a   : > { %v483_v21 = vld [vmem:[%s1048_s23 + $0x68] sm:$0xff] }
  0x1b   : > { %860 = vmatpush3.bf16.msra.mxu0 %v910_v11 }
  0x1c   : > { %894 = vmatpush3.bf16.msra.mxu1 %v910_v11  ;;  %861 = vmatprep.subr.bf16.mxu0 %v911_v12 }
  0x1d   : > { %887 = vmatprep.subr.bf16.mxu1 %v911_v12 }
  0x1f   : > { %862 = vmatpush3.bf16.msra.mxu0 %v911_v12 }
  0x20   : > { %895 = vmatpush3.bf16.msra.mxu1 %v911_v12  ;;  %863 = vmatprep.subr.bf16.mxu0 %v912_v13 }
  0x21   : > { %888 = vmatprep.subr.bf16.mxu1 %v912_v13 }
  0x23   : > { %864 = vmatpush3.bf16.msra.mxu0 %v912_v13 }
  0x24   : > { %896 = vmatpush3.bf16.msra.mxu1 %v912_v13 }
  0x26   : > { %866 = vmatmul.mubr.bf16.vlgmr.msra.gmra.mrb[0].mxu0 %v295_v22  ;;  %v482_v22 = vld [vmem:[%s1048_s23 + $0x60] sm:$0xff] }
  0x27   : > { %874 = vmatmul.mubr.bf16.vlgmr.msra.gmra.mrb[0].mxu1 %v299_v23  ;;  %869 = vmatprep.mubr.bf16.mxu0 %v296_v24 }
  0x28   : > { %877 = vmatprep.mubr.bf16.mxu1 %v300_v25 }
  0x2e   : > { %870 = vmatmul.mubr.bf16.gmra.mrb[4].mxu0 %v297_v30  ;;  %v484_v30 = vld [vmem:[%s1048_s23 + $0x70] sm:$0xff] }
  0x2f   : > { %878 = vmatmul.mubr.bf16.gmra.mrb[4].mxu1 %v301_v31 }
  0xf9   : > { %v867_v33 = vpop.f32.mrb[0].mxu0 }
  0xfa   : > { %v875_v34 = vpop.f32.mrb[0].mxu1  ;;  %v416_v37 = vadd.f32 %v867_v33, %v1053_v32  ;;  %v407_v39 = vpop.f32.mrb[1].mxu0 }
  0xfb   : > { %v448_v38 = vadd.f32 %v875_v34, %v1053_v32  ;;  %v439_v40 = vpop.f32.mrb[1].mxu1  ;;  %v868_v41 = vpop.f32.mrb[2].mxu0  ;;  %v408_v43 = vadd.f32 %v1053_v32, %v407_v39 }
  0xfc   : > { %v876_v42 = vpop.f32.mrb[2].mxu1  ;;  %v419_v44 = vadd.f32 %v868_v41, %v1053_v32  ;;  %v410_v45 = vpop.f32.mrb[3].mxu0  ;;  %v1063_v48 = vadd.f32 %v472_v36, %v416_v37  ;;  %v440_v51 = vadd.f32 %v1053_v32, %v439_v40 }
  0xfd   : > { %v442_v46 = vpop.f32.mrb[3].mxu1  ;;  %v1061_v47 = vadd.f32 %v480_v35, %v448_v38  ;;  %v451_v52 = vadd.f32 %v876_v42, %v1053_v32  ;;  %v1073_v54 = vadd.f32 %v470_v50, %v408_v43  ;;  %v411_v63 = vadd.f32 %v1053_v32, %v410_v45 }
  0xfe   : > { %506 = vadd.xlane.f32.xlu1 %v1063_v48  ;;  %v1071_v53 = vadd.f32 %v473_v49, %v419_v44  ;;  %v443_v0 = vadd.f32 %v1053_v32, %v442_v46  ;;  %v1083_v2 = vadd.f32 %v478_v56, %v440_v51 }
  0xff   : > { %522 = vadd.xlane.f32.xlu0 %v1061_v47  ;;  %v1081_v1 = vadd.f32 %v481_v55, %v451_v52  ;;  %v487_v12 = vadd.f32 %v471_v6, %v411_v63 }
 0x100   : > { %v1093_v11 = vadd.f32 %v479_v5, %v443_v0 }
 0x101   : > { %v871_v57 = vpop.f32.mrb[4].mxu0 }
 0x102   : > { %v879_v58 = vpop.f32.mrb[4].mxu1  ;;  %508 = vadd.xlane.f32.xlu1 %v1071_v53  ;;  %v423_v59 = vpop.f32.mrb[5].mxu0  ;;  %v432_v7 = vadd.f32 %v871_v57, %v1053_v32 }
 0x103   : > { %502 = vadd.xlane.f32.xlu0 %v1073_v54  ;;  %v455_v60 = vpop.f32.mrb[5].mxu1  ;;  %v872_v61 = vpop.f32.mrb[6].mxu0  ;;  %v424_v15 = vadd.f32 %v1053_v32, %v423_v59  ;;  %v464_v27 = vadd.f32 %v879_v58, %v1053_v32 }
 0x104   : > { %v880_v62 = vpop.f32.mrb[6].mxu1  ;;  %v426_v3 = vpop.f32.mrb[7].mxu0  ;;  %v435_v8 = vadd.f32 %v872_v61, %v1053_v32  ;;  %v1098_v14 = vadd.f32 %v476_v10, %v432_v7  ;;  %v456_v19 = vadd.f32 %v1053_v32, %v455_v60 }
 0x105   : > { %v458_v4 = vpop.f32.mrb[7].mxu1  ;;  %v427_v16 = vadd.f32 %v1053_v32, %v426_v3  ;;  %v1112_v24 = vadd.f32 %v474_v18, %v424_v15  ;;  %v467_v28 = vadd.f32 %v880_v62, %v1053_v32  ;;  %v1128_v33 = vadd.f32 %v484_v30, %v464_v27 }
 0x106   : > { %524 = vadd.xlane.f32.xlu1 %v1081_v1  ;;  %v1096_v13 = vadd.f32 %v477_v9, %v435_v8  ;;  %v459_v20 = vadd.f32 %v1053_v32, %v458_v4  ;;  %v1118_v26 = vadd.f32 %v482_v22, %v456_v19 }
 0x107   : > { %518 = vadd.xlane.f32.xlu0 %v1083_v2  ;;  %v1110_v23 = vadd.f32 %v475_v17, %v427_v16  ;;  %v1126_v31 = vadd.f32 %v485_v29, %v467_v28 }
 0x108   : > { %v1116_v25 = vadd.f32 %v483_v21, %v459_v20 }
 0x10a   : > { %520 = vadd.xlane.f32.xlu1 %v1093_v11 }
 0x10b   : > { %504 = vadd.xlane.f32.xlu0 %v487_v12 }
 0x10e   : > { %516 = vadd.xlane.f32.xlu1 %v1096_v13 }
 0x10f   : > { %514 = vadd.xlane.f32.xlu0 %v1098_v14 }
 0x112   : > { %512 = vadd.xlane.f32.xlu1 %v1110_v23 }
 0x113   : > { %510 = vadd.xlane.f32.xlu0 %v1112_v24 }
 0x116   : > { %528 = vadd.xlane.f32.xlu1 %v1116_v25 }
 0x117   : > { %526 = vadd.xlane.f32.xlu0 %v1118_v26 }
 0x11a   : > { %532 = vadd.xlane.f32.xlu1 %v1126_v31 }
 0x11b   : > { %530 = vadd.xlane.f32.xlu0 %v1128_v33 }
 0x18b   : > { %v507_v35 = vpop.xlane.xlu1 %506 }
 0x18c   : > { %v523_v34 = vpop.xlane.xlu0 %522  ;;  %v537_v37 = vmul.f32 0.0078125, %v507_v35 }
 0x18d   : > { %v545_v36 = vmul.f32 0.0078125, %v523_v34 }
 0x18e   : > { %v1133_v32 = vsub.f32 %v1063_v48, %v537_v37 }
 0x18f   : > { %v509_v38 = vpop.xlane.xlu1 %508  ;;  %v1136_v40 = vsub.f32 %v1061_v47, %v545_v36 }
 0x190   : > { %v503_v39 = vpop.xlane.xlu0 %502  ;;  %v538_v41 = vmul.f32 0.0078125, %v509_v38  ;;  %v569_v43 = vmul.f32 %v1133_v32, %v1133_v32 }
 0x191   : > { %v535_v42 = vmul.f32 0.0078125, %v503_v39  ;;  %v577_v51 = vmul.f32 %v1136_v40, %v1136_v40 }
 0x192   : > { %v1141_v44 = vsub.f32 %v1071_v53, %v538_v41  ;;  %587 = vadd.xlane.f32.xlu0 %v569_v43 }
 0x193   : > { %v1144_v45 = vsub.f32 %v1073_v54, %v535_v42  ;;  %v525_v46 = vpop.xlane.xlu1 %524 }
 0x194   : > { %v519_v48 = vpop.xlane.xlu0 %518  ;;  %v546_v49 = vmul.f32 0.0078125, %v525_v46  ;;  %v570_v47 = vmul.f32 %v1141_v44, %v1141_v44 }
 0x195   : > { %v543_v50 = vmul.f32 0.0078125, %v519_v48  ;;  %v567_v54 = vmul.f32 %v1144_v45, %v1144_v45 }
 0x196   : > { %v1151_v52 = vsub.f32 %v1081_v1, %v546_v49  ;;  %589 = vadd.xlane.f32.xlu1 %v570_v47  ;;  %603 = vadd.xlane.f32.xlu0 %v577_v51 }
 0x197   : > { %v521_v53 = vpop.xlane.xlu1 %520  ;;  %v1156_v56 = vsub.f32 %v1083_v2, %v543_v50 }
 0x198   : > { %v505_v55 = vpop.xlane.xlu0 %504  ;;  %v544_v57 = vmul.f32 0.0078125, %v521_v53  ;;  %v578_v59 = vmul.f32 %v1151_v52, %v1151_v52 }
 0x199   : > { %v536_v58 = vmul.f32 0.0078125, %v505_v55  ;;  %v575_v2 = vmul.f32 %v1156_v56, %v1156_v56 }
 0x19a   : > { %605 = vadd.xlane.f32.xlu1 %v578_v59  ;;  %583 = vadd.xlane.f32.xlu0 %v567_v54  ;;  %v1163_v61 = vsub.f32 %v1093_v11, %v544_v57  ;;  %v1214_v59 = vld [vmem:[%s1298_s4] ss:$0 sm:$0xff] }
 0x19b   : > { %v1160_v60 = vsub.f32 %v487_v12, %v536_v58  ;;  %v517_v62 = vpop.xlane.xlu1 %516 }
 0x19c   : > { %v515_v63 = vpop.xlane.xlu0 %514  ;;  %v542_v0 = vmul.f32 0.0078125, %v517_v62  ;;  %v576_v7 = vmul.f32 %v1163_v61, %v1163_v61 }
 0x19d   : > { %v541_v1 = vmul.f32 0.0078125, %v515_v63  ;;  %v568_v3 = vmul.f32 %v1160_v60, %v1160_v60 }
 0x19e   : > { %599 = vadd.xlane.f32.xlu0 %v575_v2  ;;  %v1175_v8 = vsub.f32 %v1096_v13, %v542_v0 }
 0x19f   : > { %v1170_v4 = vsub.f32 %v1098_v14, %v541_v1  ;;  %585 = vadd.xlane.f32.xlu1 %v568_v3  ;;  %v513_v5 = vpop.xlane.xlu1 %512  ;;  %v1220_v3 = vld [vmem:[%s1299_s5] ss:$0 sm:$0xff] }
 0x1a0   : > { %v511_v6 = vpop.xlane.xlu0 %510  ;;  %v540_v9 = vmul.f32 0.0078125, %v513_v5  ;;  %v574_v13 = vmul.f32 %v1175_v8, %v1175_v8 }
 0x1a1   : > { %v539_v10 = vmul.f32 0.0078125, %v511_v6  ;;  %v573_v11 = vmul.f32 %v1170_v4, %v1170_v4 }
 0x1a2   : > { %v1183_v14 = vsub.f32 %v1110_v23, %v540_v9 }
 0x1a3   : > { %v1180_v12 = vsub.f32 %v1112_v24, %v539_v10  ;;  %601 = vadd.xlane.f32.xlu1 %v576_v7  ;;  %595 = vadd.xlane.f32.xlu0 %v573_v11  ;;  %v529_v15 = vpop.xlane.xlu1 %528 }
 0x1a4   : > { %v527_v16 = vpop.xlane.xlu0 %526  ;;  %v548_v17 = vmul.f32 0.0078125, %v529_v15  ;;  %v572_v23 = vmul.f32 %v1183_v14, %v1183_v14 }
 0x1a5   : > { %v547_v18 = vmul.f32 0.0078125, %v527_v16  ;;  %v571_v19 = vmul.f32 %v1180_v12, %v1180_v12 }
 0x1a6   : > { %v1195_v24 = vsub.f32 %v1116_v25, %v548_v17 }
 0x1a7   : > { %v1190_v20 = vsub.f32 %v1118_v26, %v547_v18  ;;  %597 = vadd.xlane.f32.xlu1 %v574_v13  ;;  %591 = vadd.xlane.f32.xlu0 %v571_v19  ;;  %v533_v21 = vpop.xlane.xlu1 %532 }
 0x1a8   : > { %v531_v22 = vpop.xlane.xlu0 %530  ;;  %v550_v27 = vmul.f32 0.0078125, %v533_v21  ;;  %v580_v34 = vmul.f32 %v1195_v24, %v1195_v24 }
 0x1a9   : > { %v549_v28 = vmul.f32 0.0078125, %v531_v22  ;;  %v579_v29 = vmul.f32 %v1190_v20, %v1190_v20 }
 0x1aa   : > { %v1203_v26 = vsub.f32 %v1126_v31, %v550_v27 }
 0x1ab   : > { %v1200_v30 = vsub.f32 %v1128_v33, %v549_v28  ;;  %593 = vadd.xlane.f32.xlu1 %v572_v23  ;;  %607 = vadd.xlane.f32.xlu0 %v579_v29 }
 0x1ac   : > { %v582_v35 = vmul.f32 %v1203_v26, %v1203_v26 }
 0x1ad   : > { %v581_v25 = vmul.f32 %v1200_v30, %v1200_v30 }
 0x1af   : > { %609 = vadd.xlane.f32.xlu1 %v580_v34  ;;  %611 = vadd.xlane.f32.xlu0 %v581_v25 }
 0x1b3   : > { %613 = vadd.xlane.f32.xlu1 %v582_v35 }
 0x21f   : > { %v588_v36 = vpop.xlane.xlu0 %587 }
 0x220   : > { %v617_v33 = vmul.f32 0.0078125, %v588_v36 }
 0x222   : > { %v633_v37 = vadd.f32 1e-12, %v617_v33 }
 0x223   : > { %v590_v38 = vpop.xlane.xlu1 %589  ;;  %v604_v39 = vpop.xlane.xlu0 %603 }
 0x224   : > { %913 = vrsqrt.f32 %v633_v37  ;;  %v618_v31 = vmul.f32 0.0078125, %v590_v38  ;;  %v625_v41 = vmul.f32 0.0078125, %v604_v39 }
 0x226   : > { %v634_v42 = vadd.f32 1e-12, %v618_v31  ;;  %v641_v43 = vadd.f32 1e-12, %v625_v41 }
 0x227   : > { %v606_v46 = vpop.xlane.xlu1 %605  ;;  %v584_v48 = vpop.xlane.xlu0 %583 }
 0x228   : > { %915 = vrsqrt.f32 %v634_v42  ;;  %v626_v49 = vmul.f32 0.0078125, %v606_v46  ;;  %v615_v50 = vmul.f32 0.0078125, %v584_v48 }
 0x229   : > { %917 = vrsqrt.f32 %v641_v43 }
 0x22a   : > { %v642_v47 = vadd.f32 1e-12, %v626_v49  ;;  %v631_v51 = vadd.f32 1e-12, %v615_v50 }
 0x22b   : > { %v600_v55 = vpop.xlane.xlu0 %599 }
 0x22c   : > { %v586_v53 = vpop.xlane.xlu1 %585  ;;  %919 = vrsqrt.f32 %v642_v47  ;;  %v623_v57 = vmul.f32 0.0078125, %v600_v55 }
 0x22d   : > { %v616_v54 = vmul.f32 0.0078125, %v586_v53  ;;  %921 = vrsqrt.f32 %v631_v51 }
 0x22e   : > { %v914_v58 = vpop.eup %913  ;;  %v639_v63 = vadd.f32 1e-12, %v623_v57 }
 0x22f   : > { %v632_v62 = vadd.f32 1e-12, %v616_v54  ;;  %v665_v0 = vmul.f32 %v914_v58, %v1133_v32 }
 0x230   : > { %v602_v1 = vpop.xlane.xlu1 %601  ;;  %v596_v2 = vpop.xlane.xlu0 %595 }
 0x231   : > { %923 = vrsqrt.f32 %v632_v62  ;;  %v624_v5 = vmul.f32 0.0078125, %v602_v1  ;;  %v621_v6 = vmul.f32 0.0078125, %v596_v2  ;;  %v688_v7 = vmul.f32 %v1214_v59, %v665_v0 }
 0x232   : > { %925 = vrsqrt.f32 %v639_v63  ;;  %v916_v9 = vpop.eup %915 }
 0x233   : > { %v640_v32 = vadd.f32 1e-12, %v624_v5  ;;  %v637_v10 = vadd.f32 1e-12, %v621_v6  ;;  %v918_v11 = vpop.eup %917  ;;  %v711_v15 = vadd.f32 %v1220_v3, %v688_v7  ;;  %v666_v16 = vmul.f32 %v916_v9, %v1141_v44 }
 0x234   : > { %v598_v17 = vpop.xlane.xlu1 %597  ;;  %v592_v18 = vpop.xlane.xlu0 %591  ;;  %v673_v13 = vmul.f32 %v918_v11, %v1136_v40 }
 0x235   : > { %927 = vrsqrt.f32 %v640_v32  ;;  %v622_v19 = vmul.f32 0.0078125, %v598_v17  ;;  %v619_v21 = vmul.f32 0.0078125, %v592_v18  ;;  %727 = vst [vmem:[%s1227_s9 + $0x10] sm:$0xff] %v711_v15  ;;  %v689_v22 = vmul.f32 %v1214_v59, %v666_v16 }
 0x236   : > { %929 = vrsqrt.f32 %v637_v10  ;;  %v920_v23 = vpop.eup %919  ;;  %v696_v27 = vmul.f32 %v1214_v59, %v673_v13 }
 0x237   : > { %v638_v28 = vadd.f32 1e-12, %v622_v19  ;;  %v635_v29 = vadd.f32 1e-12, %v619_v21  ;;  %v922_v34 = vpop.eup %921  ;;  %v712_v44 = vadd.f32 %v1220_v3, %v689_v22  ;;  %v674_v25 = vmul.f32 %v920_v23, %v1151_v52 }
 0x238   : > { %v594_v40 = vpop.xlane.xlu1 %593  ;;  %v608_v35 = vpop.xlane.xlu0 %607  ;;  %v719_v36 = vadd.f32 %v1220_v3, %v696_v27  ;;  %v663_v33 = vmul.f32 %v922_v34, %v1144_v45 }
 0x239   : > { %931 = vrsqrt.f32 %v638_v28  ;;  %v620_v37 = vmul.f32 0.0078125, %v594_v40  ;;  %728 = vst [vmem:[%s1227_s9 + $0x18] sm:$0xff] %v712_v44  ;;  %v697_v38 = vmul.f32 %v1214_v59, %v674_v25  ;;  %v627_v39 = vmul.f32 0.0078125, %v608_v35 }
 0x23a   : > { %933 = vrsqrt.f32 %v635_v29  ;;  %735 = vst [vmem:[%s1227_s9 + $0x50] sm:$0xff] %v719_v36  ;;  %v686_v41 = vmul.f32 %v1214_v59, %v663_v33 }
 0x23b   : > { %v924_v31 = vpop.eup %923  ;;  %v636_v42 = vadd.f32 1e-12, %v620_v37  ;;  %v720_v43 = vadd.f32 %v1220_v3, %v697_v38  ;;  %v643_v45 = vadd.f32 1e-12, %v627_v39 }
 0x23c   : > { %v926_v52 = vpop.eup %925  ;;  %v664_v46 = vmul.f32 %v924_v31, %v1160_v60  ;;  %v610_v48 = vpop.xlane.xlu1 %609  ;;  %v709_v50 = vadd.f32 %v1220_v3, %v686_v41 }
 0x23d   : > { %v612_v49 = vpop.xlane.xlu0 %611  ;;  %v671_v47 = vmul.f32 %v926_v52, %v1156_v56  ;;  %935 = vrsqrt.f32 %v636_v42  ;;  %v628_v51 = vmul.f32 0.0078125, %v610_v48  ;;  %736 = vst [vmem:[%s1227_s9 + $0x58] sm:$0xff] %v720_v43 }
 0x23e   : > { %v687_v53 = vmul.f32 %v1214_v59, %v664_v46  ;;  %937 = vrsqrt.f32 %v643_v45  ;;  %v629_v55 = vmul.f32 0.0078125, %v612_v49  ;;  %725 = vst [vmem:[%s1227_s9] sm:$0xff] %v709_v50 }
 0x23f   : > { %v928_v54 = vpop.eup %927  ;;  %v694_v60 = vmul.f32 %v1214_v59, %v671_v47  ;;  %v644_v57 = vadd.f32 1e-12, %v628_v51 }
 0x240   : > { %v930_v58 = vpop.eup %929  ;;  %v710_v62 = vadd.f32 %v1220_v3, %v687_v53  ;;  %v672_v63 = vmul.f32 %v928_v54, %v1163_v61  ;;  %v645_v56 = vadd.f32 1e-12, %v629_v55  ;;  %v614_v0 = vpop.xlane.xlu1 %613 }
 0x241   : > { %v717_v1 = vadd.f32 %v1220_v3, %v694_v60  ;;  %v669_v2 = vmul.f32 %v930_v58, %v1170_v4  ;;  %939 = vrsqrt.f32 %v644_v57  ;;  %v630_v5 = vmul.f32 0.0078125, %v614_v0 }
 0x242   : > { %726 = vst [vmem:[%s1227_s9 + $0x8] sm:$0xff] %v710_v62  ;;  %v695_v6 = vmul.f32 %v1214_v59, %v672_v63  ;;  %941 = vrsqrt.f32 %v645_v56 }
 0x243   : > { %v932_v7 = vpop.eup %931  ;;  %733 = vst [vmem:[%s1227_s9 + $0x40] sm:$0xff] %v717_v1  ;;  %v692_v9 = vmul.f32 %v1214_v59, %v669_v2  ;;  %v646_v32 = vadd.f32 1e-12, %v630_v5 }
 0x244   : > { %v934_v61 = vpop.eup %933  ;;  %v718_v10 = vadd.f32 %v1220_v3, %v695_v6  ;;  %v670_v11 = vmul.f32 %v932_v7, %v1175_v8 }
 0x245   : > { %v715_v4 = vadd.f32 %v1220_v3, %v692_v9  ;;  %v667_v15 = vmul.f32 %v934_v61, %v1180_v12  ;;  %943 = vrsqrt.f32 %v646_v32 }
 0x246   : > { %734 = vst [vmem:[%s1227_s9 + $0x48] sm:$0xff] %v718_v10  ;;  %v693_v16 = vmul.f32 %v1214_v59, %v670_v11 }
 0x247   : > { %v936_v17 = vpop.eup %935  ;;  %731 = vst [vmem:[%s1227_s9 + $0x30] sm:$0xff] %v715_v4  ;;  %v690_v18 = vmul.f32 %v1214_v59, %v667_v15 }
 0x248   : > { %v938_v13 = vpop.eup %937  ;;  %v716_v19 = vadd.f32 %v1220_v3, %v693_v16  ;;  %v668_v21 = vmul.f32 %v936_v17, %v1183_v14 }
 0x249   : > { %v713_v8 = vadd.f32 %v1220_v3, %v690_v18  ;;  %v675_v22 = vmul.f32 %v938_v13, %v1190_v20 }
 0x24a   : > { %732 = vst [vmem:[%s1227_s9 + $0x38] sm:$0xff] %v716_v19  ;;  %v691_v12 = vmul.f32 %v1214_v59, %v668_v21 }
 0x24b   : > { %v940_v23 = vpop.eup %939  ;;  %729 = vst [vmem:[%s1227_s9 + $0x20] sm:$0xff] %v713_v8  ;;  %v698_v27 = vmul.f32 %v1214_v59, %v675_v22 }
 0x24c   : > { %v942_v28 = vpop.eup %941  ;;  %v714_v29 = vadd.f32 %v1220_v3, %v691_v12  ;;  %v676_v14 = vmul.f32 %v940_v23, %v1195_v24 }
 0x24d   : > { %v721_v34 = vadd.f32 %v1220_v3, %v698_v27  ;;  %v677_v44 = vmul.f32 %v942_v28, %v1200_v30 }
 0x24e   : > { %730 = vst [vmem:[%s1227_s9 + $0x28] sm:$0xff] %v714_v29  ;;  %v699_v20 = vmul.f32 %v1214_v59, %v676_v14 }
 0x24f   : > { %v944_v25 = vpop.eup %943  ;;  %737 = vst [vmem:[%s1227_s9 + $0x60] sm:$0xff] %v721_v34  ;;  %v700_v40 = vmul.f32 %v1214_v59, %v677_v44 }
 0x250   : > { %v722_v35 = vadd.f32 %v1220_v3, %v699_v20  ;;  %v678_v36 = vmul.f32 %v944_v25, %v1203_v26 }
 0x251   : > { %v723_v33 = vadd.f32 %v1220_v3, %v700_v40 }
 0x252   : > { %738 = vst [vmem:[%s1227_s9 + $0x68] sm:$0xff] %v722_v35  ;;  %v701_v24 = vmul.f32 %v1214_v59, %v678_v36 }
 0x253   : > { %739 = vst [vmem:[%s1227_s9 + $0x70] sm:$0xff] %v723_v33 }
 0x254   : > { %v724_v37 = vadd.f32 %v1220_v3, %v701_v24 }
 0x256   : > { %740 = vst [vmem:[%s1227_s9 + $0x78] sm:$0xff] %v724_v37 }
 0x257 PF: > { %s16_s21 = sadd.s32 1, %s951_s21  }
 0x258   : > { %p13_p4 = scmp.ge.s32.totalorder %s16_s21, 4  }
 0x25a   :  { %15 = sbr.rel (!%p13_p4) target bundleno = 1 (0x1), region = 77 }

// kernel: bert_legal_pretraining_forward.20
= control target key start
LH: loop header
LB: loop body
LE: loop exit
PB: predicated region body
PF: predicated region fallthrough
CT: control target
= control target key end

     0   :  { %s1681_s9 = smov 0   ;;  %s2247_s0 = inlined_call_operand.vmem [shape: f32[2,128,384], index: 0, kind: input, shape index: {}]   ;;  %s2248_s1 = inlined_call_operand.vmem [shape: f32[2,1,128], index: 1, kind: input, shape index: {}]   ;;  %s2249_s2 = inlined_call_operand.vmem [shape: f32[2,128,128], index: 2, kind: output, shape index: {}]  }
   0x1 LB: > { %s1283_s10 = sadd.s32 4294967295, %s1663_s9   ;;  %p1287_p0 = scmp.ge.s32.totalorder %s1663_s9, 1  ;;  %s1663_s9 = sphi %s1681_s9, %s12_s9  }
   0x2   : > { %p120_p1 = scmp.lt.s32.totalorder %s1663_s9, 3 }
   0x4   : > { %p121_p2 = pnand %p1287_p0, %p120_p1 }
   0x5   : > { %p145_p3 = scmp.lt.s32.totalorder (!%p121_p2), %s1283_s10, 1  ;;  %vm246_vm0 = vcmask (!%p121_p2), 523264   ;;  %s1665_s15 = smov (!%p121_p2), 64  }
   0x6   : > { %124 = sbr.rel (%p121_p2) target bundleno = 1349 (0x545), region = 28 }
   0xd   : > { %s2251_s10 = smov (!%p145_p3, %s1283_s10), 1 }
   0xe   : > { %s1519_s11 = smul.u32 384, %s2251_s10  ;;  %s152_s18 = scalar_lea.vmem %s2248_s1, %s2251_s10 }
   0xf   : > { %s1310_s19 = sshll.u32 %s2251_s10, 7 }
  0x10   : > { %s1695_s14 = scalar_lea.vmem %s2247_s0, %s1519_s11  ;;  %s2190_s22 = scalar_lea.vmem %s2249_s2, %s1310_s19 }
  0x11   : > { %v160_v0 = vld [vmem:[%s1695_s14 + $0x8] sm:$0xff]  ;;  %v163_v1 = vld [vmem:[%s1695_s14 + $0x20] sm:$0xff]  ;;  %v166_v2 = vld [vmem:[%s1695_s14 + $0x38] sm:$0xff] }
  0x12   : > { %v232_v3 = vpack.c.bf16 %v163_v1, %v160_v0  ;;  %v169_v4 = vld [vmem:[%s1695_s14 + $0x50] sm:$0xff]  ;;  %v172_v6 = vld [vmem:[%s1695_s14 + $0x68] sm:$0xff]  ;;  %v175_v7 = vld [vmem:[%s1695_s14 + $0x80] sm:$0xff] }
  0x13   : > { %v233_v5 = vpack.c.bf16 %v169_v4, %v166_v2  ;;  %v234_v9 = vpack.c.bf16 %v175_v7, %v172_v6  ;;  %v159_v10 = vld [vmem:[%s1695_s14] sm:$0xff]  ;;  %v162_v11 = vld [vmem:[%s1695_s14 + $0x18] sm:$0xff]  ;;  %v181_v17 = vld [vmem:[%s1695_s14 + $0xb0] sm:$0xff] }
  0x14   : > { %1503 = vmatprep.subr.msk.bf16.mxu0 %vm246_vm0, %v232_v3  ;;  %v272_v8 = vsel %vm246_vm0, %v232_v3, 0  ;;  %681 = vrot.lane.b32.xlu0 %v232_v3, %s1665_s15  ;;  %v208_v12 = vmul.f32 0.125, %v159_v10  ;;  %v209_v13 = vmul.f32 0.125, %v162_v11  ;;  %v178_v16 = vld [vmem:[%s1695_s14 + $0x98] sm:$0xff]  ;;  %v184_v20 = vld [vmem:[%s1695_s14 + $0xc8] sm:$0xff]  ;;  %v187_v21 = vld [vmem:[%s1695_s14 + $0xe0] sm:$0xff] }
  0x15   : > { %1376 = vmatpush3.bf16.xpose.msra.mxu0 %v272_v8  ;;  %683 = vrot.lane.b32.xlu1 %v233_v5, %s1665_s15  ;;  %v275_v14 = vsel %vm246_vm0, %v233_v5, 0  ;;  %v278_v18 = vsel %vm246_vm0, %v234_v9, 0  ;;  %v1720_v19 = vpack.c.bf16 %v181_v17, %v178_v16  ;;  %v1728_v23 = vpack.c.bf16 %v187_v21, %v184_v20  ;;  %v190_v24 = vld [vmem:[%s1695_s14 + $0xf8] sm:$0xff]  ;;  %v193_v25 = vld [vmem:[%s1695_s14 + $0x110] sm:$0xff]  ;;  %v196_v28 = vld [vmem:[%s1695_s14 + $0x128] sm:$0xff] }
  0x16   : > { %1504 = vmatprep.subr.msk.bf16.mxu0 %vm246_vm0, %v233_v5  ;;  %v1712_v15 = vpack.c.bf16 %v209_v13, %v208_v12  ;;  %v1736_v27 = vpack.c.bf16 %v193_v25, %v190_v24  ;;  %v199_v29 = vld [vmem:[%s1695_s14 + $0x140] sm:$0xff]  ;;  %v202_v32 = vld [vmem:[%s1695_s14 + $0x158] sm:$0xff]  ;;  %v205_v33 = vld [vmem:[%s1695_s14 + $0x170] sm:$0xff] }
  0x17   : > { %v281_v22 = vsel %vm246_vm0, %v1720_v19, 0  ;;  %v284_v26 = vsel %vm246_vm0, %v1728_v23, 0  ;;  %v1744_v31 = vpack.c.bf16 %v199_v29, %v196_v28  ;;  %v1752_v35 = vpack.c.bf16 %v205_v33, %v202_v32  ;;  %v165_v36 = vld [vmem:[%s1695_s14 + $0x30] sm:$0xff]  ;;  %v168_v37 = vld [vmem:[%s1695_s14 + $0x48] sm:$0xff]  ;;  %v171_v39 = vld [vmem:[%s1695_s14 + $0x60] sm:$0xff] }
  0x18   : > { %685 = vrot.lane.b32.xlu0 %v234_v9, %s1665_s15  ;;  %1391 = vmatprep.mubr.msk.bf16.mxu0 %vm246_vm0, %v1712_v15  ;;  %v287_v30 = vsel %vm246_vm0, %v1736_v27, 0  ;;  %v174_v40 = vld [vmem:[%s1695_s14 + $0x78] sm:$0xff]  ;;  %v210_v41 = vmul.f32 0.125, %v165_v36  ;;  %v211_v42 = vmul.f32 0.125, %v168_v37  ;;  %v212_v43 = vmul.f32 0.125, %v171_v39  ;;  %v177_v47 = vld [vmem:[%s1695_s14 + $0x90] sm:$0xff] }
  0x19   : > { %v290_v34 = vsel %vm246_vm0, %v1744_v31, 0  ;;  %v293_v38 = vsel %vm246_vm0, %v1752_v35, 0  ;;  %v213_v44 = vmul.f32 0.125, %v174_v40  ;;  %v180_v48 = vld [vmem:[%s1695_s14 + $0xa8] sm:$0xff]  ;;  %v183_v49 = vld [vmem:[%s1695_s14 + $0xc0] sm:$0xff]  ;;  %v186_v50 = vld [vmem:[%s1695_s14 + $0xd8] sm:$0xff] }
  0x1a   : > { %v1762_v45 = vpack.c.bf16 %v211_v42, %v210_v41  ;;  %v214_v51 = vmul.f32 0.125, %v177_v47  ;;  %v215_v52 = vmul.f32 0.125, %v180_v48  ;;  %v216_v53 = vmul.f32 0.125, %v183_v49  ;;  %v189_v57 = vld [vmem:[%s1695_s14 + $0xf0] sm:$0xff]  ;;  %v192_v58 = vld [vmem:[%s1695_s14 + $0x108] sm:$0xff]  ;;  %v195_v59 = vld [vmem:[%s1695_s14 + $0x120] sm:$0xff] }
  0x1b   : > { %v1764_v46 = vpack.c.bf16 %v213_v44, %v212_v43  ;;  %v217_v54 = vmul.f32 0.125, %v186_v50  ;;  %v198_v60 = vld [vmem:[%s1695_s14 + $0x138] sm:$0xff]  ;;  %v218_v61 = vmul.f32 0.125, %v189_v57  ;;  %v219_v62 = vmul.f32 0.125, %v192_v58  ;;  %v201_v3 = vld [vmem:[%s1695_s14 + $0x150] sm:$0xff]  ;;  %v204_v4 = vld [vmem:[%s1695_s14 + $0x168] sm:$0xff] }
  0x1c   : > { %v1774_v55 = vpack.c.bf16 %v215_v52, %v214_v51  ;;  %v220_v63 = vmul.f32 0.125, %v195_v59  ;;  %v221_v0 = vmul.f32 0.125, %v198_v60  ;;  %v222_v5 = vmul.f32 0.125, %v201_v3  ;;  %v161_v8 = vld [vmem:[%s1695_s14 + $0x10] sm:$0xff]  ;;  %v167_v11 = vld [vmem:[%s1695_s14 + $0x40] sm:$0xff]  ;;  %v170_v12 = vld [vmem:[%s1695_s14 + $0x58] sm:$0xff] }
  0x1d   : > { %1378 = vmatpush3.bf16.xpose.msra.mxu0 %v275_v14  ;;  %v1776_v56 = vpack.c.bf16 %v217_v54, %v216_v53  ;;  %v1786_v1 = vpack.c.bf16 %v219_v62, %v218_v61  ;;  %v223_v6 = vmul.f32 0.125, %v204_v4  ;;  %v1808_v13 = vpack.c.bf16 %v170_v12, %v167_v11  ;;  %v173_v14 = vld [vmem:[%s1695_s14 + $0x70] sm:$0xff]  ;;  %v176_v16 = vld [vmem:[%s1695_s14 + $0x88] sm:$0xff]  ;;  %v182_v20 = vld [vmem:[%s1695_s14 + $0xb8] sm:$0xff] }
  0x1e   : > { %1505 = vmatprep.subr.msk.bf16.mxu0 %vm246_vm0, %v234_v9  ;;  %v1788_v2 = vpack.c.bf16 %v221_v0, %v220_v63  ;;  %v164_v9 = vld [vmem:[%s1695_s14 + $0x28] sm:$0xff]  ;;  %v1814_v17 = vpack.c.bf16 %v176_v16, %v173_v14  ;;  %v194_v28 = vld [vmem:[%s1695_s14 + $0x118] sm:$0xff]  ;;  %v203_v33 = vld [vmem:[%s1695_s14 + $0x160] sm:$0xff] }
  0x1f   : > { %v1796_v7 = vpack.c.bf16 %v223_v6, %v222_v5  ;;  %v1802_v10 = vpack.c.bf16 %v164_v9, %v161_v8  ;;  %v188_v24 = vld [vmem:[%s1695_s14 + $0xe8] sm:$0xff]  ;;  %v206_v36 = vld [vmem:[%s1695_s14 + $0x178] sm:$0xff]  ;;  %v1856_v39 = vld [vmem:[%s152_s18] ss:$0 sm:$0xff] }
  0x20   : > { %v200_v32 = vld [vmem:[%s1695_s14 + $0x148] sm:$0xff]  ;;  %v1842_v37 = vpack.c.bf16 %v206_v36, %v203_v33 }
  0x21   : > { %1407 = vmatprep.subr.bf16.mxu1 %v1802_v10 }
  0x22   : > { %1408 = vmatpush3.bf16.msra.mxu1 %v1802_v10 }
  0x23   : > { %1409 = vmatprep.subr.bf16.mxu1 %v1808_v13 }
  0x25   : > { %1380 = vmatpush3.bf16.xpose.msra.mxu0 %v278_v18  ;;  %v179_v18 = vld [vmem:[%s1695_s14 + $0xa0] sm:$0xff] }
  0x26   : > { %1506 = vmatprep.subr.msk.bf16.mxu0 %vm246_vm0, %v1720_v19  ;;  %1410 = vmatpush3.bf16.msra.mxu1 %v1808_v13  ;;  %v1820_v21 = vpack.c.bf16 %v182_v20, %v179_v18 }
  0x27   : > { %1411 = vmatprep.subr.bf16.mxu1 %v1814_v17 }
  0x2a   : > { %1412 = vmatpush3.bf16.msra.mxu1 %v1814_v17 }
  0x2b   : > { %1413 = vmatprep.subr.bf16.mxu1 %v1820_v21 }
  0x2d   : > { %1382 = vmatpush3.bf16.xpose.msra.mxu0 %v281_v22  ;;  %v185_v22 = vld [vmem:[%s1695_s14 + $0xd0] sm:$0xff] }
  0x2e   : > { %1507 = vmatprep.subr.msk.bf16.mxu0 %vm246_vm0, %v1728_v23  ;;  %1414 = vmatpush3.bf16.msra.mxu1 %v1820_v21  ;;  %v1826_v25 = vpack.c.bf16 %v188_v24, %v185_v22 }
  0x30   : > { %1415 = vmatprep.subr.bf16.mxu1 %v1826_v25 }
  0x32   : > { %1416 = vmatpush3.bf16.msra.mxu1 %v1826_v25 }
  0x35   : > { %1384 = vmatpush3.bf16.xpose.msra.mxu0 %v284_v26  ;;  %v191_v26 = vld [vmem:[%s1695_s14 + $0x100] sm:$0xff] }
  0x36   : > { %1508 = vmatprep.subr.msk.bf16.mxu0 %vm246_vm0, %v1736_v27  ;;  %v1832_v29 = vpack.c.bf16 %v194_v28, %v191_v26 }
  0x38   : > { %1417 = vmatprep.subr.bf16.mxu1 %v1832_v29 }
  0x39   : > { %1418 = vmatpush3.bf16.msra.mxu1 %v1832_v29 }
  0x3d   : > { %1386 = vmatpush3.bf16.xpose.msra.mxu0 %v287_v30  ;;  %v197_v30 = vld [vmem:[%s1695_s14 + $0x130] sm:$0xff] }
  0x3e   : > { %1509 = vmatprep.subr.msk.bf16.mxu0 %vm246_vm0, %v1744_v31 }
  0x45   : > { %1388 = vmatpush3.bf16.xpose.msra.mxu0 %v290_v34  ;;  %v1839_v34 = vpack.c.bf16 %v200_v32, %v197_v30 }
  0x46   : > { %1510 = vmatprep.subr.msk.bf16.mxu0 %vm246_vm0, %v1752_v35 }
  0x47   : > { %1419 = vmatprep.subr.bf16.mxu1 %v1839_v34 }
  0x48   : > { %1420 = vmatpush3.bf16.msra.mxu1 %v1839_v34 }
  0x49   : > { %1421 = vmatprep.subr.bf16.mxu1 %v1842_v37 }
  0x4c   : > { %1422 = vmatpush3.bf16.msra.mxu1 %v1842_v37 }
  0x4d   : > { %1390 = vmatpush3.bf16.xpose.msra.mxu0 %v293_v38 }
  0x54   : > { %1392 = vmatmul.mubr.msk.bf16.vlgmr.msra.gmra.mrb[0].mxu0 %vm246_vm0, %v1762_v45 }
  0x55   : > { %1395 = vmatprep.mubr.msk.bf16.mxu0 %vm246_vm0, %v1764_v46 }
  0x5c   : > { %1396 = vmatmul.mubr.msk.bf16.gmra.mrb[4].mxu0 %vm246_vm0, %v1774_v55 }
  0x5d   : > { %1399 = vmatprep.mubr.msk.bf16.mxu0 %vm246_vm0, %v1776_v56 }
  0x64   : > { %1400 = vmatmul.mubr.msk.bf16.gmra.mrb[8].mxu0 %vm246_vm0, %v1786_v1 }
  0x65   : > { %1403 = vmatprep.mubr.msk.bf16.mxu0 %vm246_vm0, %v1788_v2 }
  0x6c   : > { %1404 = vmatmul.mubr.msk.bf16.gmra.mrb[12].mxu0 %vm246_vm0, %v1796_v7 }
  0x86   : > { %v1847_v38 = vpop.permute.xlu0 %681 }
  0x87   : > { %1511 = vmatprep.subr.msk.bf16.mxu1 %vm246_vm0, %v1847_v38 }
 0x127   : > { %v1393_v40 = vpop.f32.mrb[0].mxu0 }
 0x128   : > { %v1859_v41 = vadd.f32 %v1393_v40, %v1856_v39  ;;  %v329_v42 = vpop.f32.mrb[1].mxu0 }
 0x129   : > { %v1862_v43 = vadd.f32 %v1856_v39, %v329_v42  ;;  %v1394_v44 = vpop.f32.mrb[2].mxu0 }
 0x12a   : > { %396 = vmax.xlane.f32.xlu1 %v1859_v41  ;;  %v332_v47 = vpop.f32.mrb[3].mxu0  ;;  %v1867_v48 = vadd.f32 %v1394_v44, %v1856_v39 }
 0x12b   : > { %392 = vmax.xlane.f32.xlu0 %v1862_v43  ;;  %v1870_v49 = vadd.f32 %v1856_v39, %v332_v47 }
 0x12e   : > { %398 = vmax.xlane.f32.xlu1 %v1867_v48 }
 0x12f   : > { %394 = vmax.xlane.f32.xlu0 %v1870_v49  ;;  %v1397_v50 = vpop.f32.mrb[4].mxu0 }
 0x130   : > { %v345_v51 = vpop.f32.mrb[5].mxu0  ;;  %v1882_v3 = vadd.f32 %v1397_v50, %v1856_v39 }
 0x131   : > { %v1398_v52 = vpop.f32.mrb[6].mxu0  ;;  %v1879_v0 = vadd.f32 %v1856_v39, %v345_v51 }
 0x132   : > { %v348_v53 = vpop.f32.mrb[7].mxu0 }
 0x133   : > { %v1898_v5 = vadd.f32 %v1856_v39, %v348_v53 }
 0x137   : > { %v1401_v54 = vpop.f32.mrb[8].mxu0 }
 0x138   : > { %v361_v57 = vpop.f32.mrb[9].mxu0  ;;  %v1901_v6 = vadd.f32 %v1401_v54, %v1856_v39 }
 0x139   : > { %v1402_v58 = vpop.f32.mrb[10].mxu0  ;;  %v1887_v4 = vadd.f32 %v1856_v39, %v361_v57 }
 0x13a   : > { %v364_v59 = vpop.f32.mrb[11].mxu0  ;;  %v1911_v9 = vadd.f32 %v1402_v58, %v1856_v39 }
 0x13f   : > { %687 = vrot.lane.b32.xlu1 %v1720_v19, %s1665_s15  ;;  %v1405_v60 = vpop.f32.mrb[12].mxu0  ;;  %v1890_v19 = vadd.f32 %v1398_v52, %v1856_v39 }
 0x140   : > { %v377_v61 = vpop.f32.mrb[13].mxu0  ;;  %v1906_v8 = vadd.f32 %v1405_v60, %v1856_v39 }
 0x141   : > { %v1406_v62 = vpop.f32.mrb[14].mxu0  ;;  %v1914_v11 = vadd.f32 %v1856_v39, %v377_v61 }
 0x142   : > { %v380_v63 = vpop.f32.mrb[15].mxu0  ;;  %v1919_v12 = vadd.f32 %v1406_v62, %v1856_v39 }
 0x143   : > { %v1923_v14 = vadd.f32 %v1856_v39, %v380_v63 }
 0x145   : > { %689 = vrot.lane.b32.xlu0 %v1728_v23, %s1665_s15  ;;  %v1895_v23 = vadd.f32 %v1856_v39, %v364_v59 }
 0x163   : > { %400 = vmax.xlane.f32.xlu1 %v1879_v0 }
 0x164   : > { %404 = vmax.xlane.f32.xlu0 %v1882_v3 }
 0x167   : > { %406 = vmax.xlane.f32.xlu1 %v1890_v19 }
 0x168   : > { %408 = vmax.xlane.f32.xlu0 %v1887_v4 }
 0x16b   : > { %402 = vmax.xlane.f32.xlu1 %v1898_v5 }
 0x16c   : > { %410 = vmax.xlane.f32.xlu0 %v1895_v23 }
 0x16f   : > { %412 = vmax.xlane.f32.xlu1 %v1901_v6 }
 0x170   : > { %420 = vmax.xlane.f32.xlu0 %v1906_v8 }
 0x173   : > { %414 = vmax.xlane.f32.xlu1 %v1911_v9 }
 0x177   : > { %416 = vmax.xlane.f32.xlu1 %v1914_v11 }
 0x17b   : > { %422 = vmax.xlane.f32.xlu1 %v1919_v12 }
 0x17f   : > { %418 = vmax.xlane.f32.xlu1 %v1923_v14 }
 0x186   : > { %693 = vrot.lane.b32.xlu0 %v1744_v31, %s1665_s15 }
 0x18a   : > { %695 = vrot.lane.b32.xlu0 %v1752_v35, %s1665_s15 }
 0x18e   : > { %657 = vrot.lane.b32.xlu0 %v1712_v15, %s1665_s15  ;;  %v684_v15 = vpop.permute.xlu1 %683 }
 0x18f   : > { %v725_v26 = vsel %vm246_vm0, %v684_v15, 0 }
 0x190   : > { %691 = vrot.lane.b32.xlu1 %v1736_v27, %s1665_s15  ;;  %v686_v27 = vpop.permute.xlu0 %685 }
 0x191   : > { %v728_v28 = vsel %vm246_vm0, %v686_v27, 0 }
 0x192   : > { %661 = vrot.lane.b32.xlu0 %v1764_v46, %s1665_s15 }
 0x194   : > { %659 = vrot.lane.b32.xlu1 %v1762_v45, %s1665_s15 }
 0x196   : > { %665 = vrot.lane.b32.xlu0 %v1776_v56, %s1665_s15 }
 0x198   : > { %663 = vrot.lane.b32.xlu1 %v1774_v55, %s1665_s15 }
 0x19a   : > { %669 = vrot.lane.b32.xlu0 %v1788_v2, %s1665_s15 }
 0x19c   : > { %667 = vrot.lane.b32.xlu1 %v1786_v1, %s1665_s15 }
 0x19e   : > { %970 = vrot.lane.b32.xlu0 %v1802_v10, %s1665_s15 }
 0x1a0   : > { %671 = vrot.lane.b32.xlu1 %v1796_v7, %s1665_s15 }
 0x1a2   : > { %974 = vrot.lane.b32.xlu0 %v1814_v17, %s1665_s15 }
 0x1a4   : > { %972 = vrot.lane.b32.xlu1 %v1808_v13, %s1665_s15 }
 0x1a6   : > { %976 = vrot.lane.b32.xlu0 %v1820_v21, %s1665_s15 }
 0x1a8   : > { %978 = vrot.lane.b32.xlu1 %v1826_v25, %s1665_s15  ;;  %v722_v25 = vsel %vm246_vm0, %v1847_v38, 0 }
 0x1aa   : > { %980 = vrot.lane.b32.xlu0 %v1832_v29, %s1665_s15 }
 0x1b7   : > { %v397_v31 = vpop.xlane.xlu1 %396 }
 0x1b8   : > { %v393_v35 = vpop.xlane.xlu0 %392  ;;  %v426_v46 = vsub.f32 %v1859_v41, %v397_v31 }
 0x1b9   : > { %v424_v45 = vsub.f32 %v1862_v43, %v393_v35 }
 0x1ba   : > { %v444_v10 = vmul.f32 1.442695, %v426_v46 }
 0x1bb   : > { %v440_v55 = vmul.f32 1.442695, %v424_v45  ;;  %v399_v56 = vpop.xlane.xlu1 %398 }
 0x1bc   : > { %v427_v1 = vsub.f32 %v1867_v48, %v399_v56  ;;  %v395_v2 = vpop.xlane.xlu0 %394 }
 0x1bd   : > { %v425_v7 = vsub.f32 %v1870_v49, %v395_v2  ;;  %1529 = vpow2.f32 %v440_v55 }
 0x1be   : > { %v446_v13 = vmul.f32 1.442695, %v427_v1 }
 0x1bf   : > { %v442_v16 = vmul.f32 1.442695, %v425_v7  ;;  %v688_v29 = vpop.permute.xlu1 %687 }
 0x1c0   : > { %1531 = vpow2.f32 %v446_v13  ;;  %v731_v30 = vsel %vm246_vm0, %v688_v29, 0  ;;  %v690_v32 = vpop.permute.xlu0 %689 }
 0x1c1   : > { %1533 = vpow2.f32 %v442_v16  ;;  %v734_v33 = vsel %vm246_vm0, %v690_v32, 0 }
 0x1c2   : > { %1535 = vpow2.f32 %v444_v10 }
 0x1c7   : > { %v1964_v17 = vpop.eup %1529 }
 0x1ca   : > { %v1966_v18 = vpop.eup %1531 }
 0x1cb   : > { %v1968_v20 = vpop.eup %1533 }
 0x1cc   : > { %v1970_v21 = vpop.eup %1535  ;;  %v504_v22 = vpack.c.bf16 %v1968_v20, %v1964_v17 }
 0x1cd   : > { %v505_v24 = vpack.c.bf16 %v1966_v18, %v1970_v21 }
 0x1ce   : > { %1423 = vmatprep.mubr.bf16.mxu1 %v504_v22 }
 0x1cf   : > { %1424 = vmatmul.mubr.bf16.vlgmr.msra.gmra.mrb[0].mxu1 %v505_v24 }
 0x1d0   : > { %1440 = vmatpush3.bf16.xpose.msra.mxu1 %v722_v25 }
 0x1d1   : > { %1512 = vmatprep.subr.msk.bf16.mxu1 %vm246_vm0, %v684_v15 }
 0x1d8   : > { %1442 = vmatpush3.bf16.xpose.msra.mxu1 %v725_v26 }
 0x1d9   : > { %1513 = vmatprep.subr.msk.bf16.mxu1 %vm246_vm0, %v686_v27 }
 0x1e0   : > { %1444 = vmatpush3.bf16.xpose.msra.mxu1 %v728_v28 }
 0x1e1   : > { %1514 = vmatprep.subr.msk.bf16.mxu1 %vm246_vm0, %v688_v29 }
 0x1e8   : > { %1446 = vmatpush3.bf16.xpose.msra.mxu1 %v731_v30 }
 0x1e9   : > { %1515 = vmatprep.subr.msk.bf16.mxu1 %vm246_vm0, %v690_v32 }
 0x1f0   : > { %1448 = vmatpush3.bf16.xpose.msra.mxu1 %v734_v33  ;;  %v401_v36 = vpop.xlane.xlu1 %400 }
 0x1f1   : > { %v428_v38 = vsub.f32 %v1879_v0, %v401_v36  ;;  %v405_v40 = vpop.xlane.xlu0 %404 }
 0x1f2   : > { %v430_v41 = vsub.f32 %v1882_v3, %v405_v40 }
 0x1f3   : > { %v448_v43 = vmul.f32 1.442695, %v428_v38 }
 0x1f4   : > { %v407_v42 = vpop.xlane.xlu1 %406  ;;  %v452_v48 = vmul.f32 1.442695, %v430_v41 }
 0x1f5   : > { %v431_v44 = vsub.f32 %v1890_v19, %v407_v42  ;;  %v409_v47 = vpop.xlane.xlu0 %408  ;;  %1537 = vpow2.f32 %v448_v43 }
 0x1f6   : > { %v432_v49 = vsub.f32 %v1887_v4, %v409_v47  ;;  %1539 = vpow2.f32 %v452_v48 }
 0x1f7   : > { %v454_v50 = vmul.f32 1.442695, %v431_v44 }
 0x1f8   : > { %v456_v51 = vmul.f32 1.442695, %v432_v49  ;;  %v403_v52 = vpop.xlane.xlu1 %402 }
 0x1f9   : > { %v429_v53 = vsub.f32 %v1898_v5, %v403_v52  ;;  %v411_v54 = vpop.xlane.xlu0 %410  ;;  %1541 = vpow2.f32 %v454_v50 }
 0x1fa   : > { %v433_v57 = vsub.f32 %v1895_v23, %v411_v54  ;;  %1543 = vpow2.f32 %v456_v51 }
 0x1fb   : > { %v450_v58 = vmul.f32 1.442695, %v429_v53 }
 0x1fc   : > { %v458_v59 = vmul.f32 1.442695, %v433_v57  ;;  %v413_v60 = vpop.xlane.xlu1 %412 }
 0x1fd   : > { %1545 = vpow2.f32 %v450_v58  ;;  %v434_v61 = vsub.f32 %v1901_v6, %v413_v60  ;;  %v421_v6 = vpop.xlane.xlu0 %420 }
 0x1fe   : > { %1547 = vpow2.f32 %v458_v59  ;;  %v438_v1 = vsub.f32 %v1906_v8, %v421_v6 }
 0x1ff   : > { %v460_v62 = vmul.f32 1.442695, %v434_v61  ;;  %v1994_v3 = vpop.eup %1537 }
 0x200   : > { %v415_v63 = vpop.xlane.xlu1 %414  ;;  %v1996_v19 = vpop.eup %1539  ;;  %v468_v16 = vmul.f32 1.442695, %v438_v1 }
 0x201   : > { %v435_v0 = vsub.f32 %v1911_v9, %v415_v63  ;;  %1549 = vpow2.f32 %v460_v62  ;;  %v694_v25 = vpop.permute.xlu0 %693 }
 0x203   : > { %v462_v4 = vmul.f32 1.442695, %v435_v0  ;;  %v1998_v5 = vpop.eup %1541 }
 0x204   : > { %v417_v23 = vpop.xlane.xlu1 %416  ;;  %v2000_v15 = vpop.eup %1543  ;;  %v507_v55 = vpack.c.bf16 %v1998_v5, %v1996_v19 }
 0x205   : > { %1551 = vpow2.f32 %v462_v4  ;;  %v436_v31 = vsub.f32 %v1914_v11, %v417_v23  ;;  %v696_v28 = vpop.permute.xlu0 %695 }
 0x206   : > { %v743_v41 = vsel %vm246_vm0, %v696_v28, 0 }
 0x207   : > { %v2002_v27 = vpop.eup %1545  ;;  %v464_v2 = vmul.f32 1.442695, %v436_v31 }
 0x208   : > { %v2005_v35 = vpop.eup %1547  ;;  %v423_v9 = vpop.xlane.xlu1 %422  ;;  %v506_v45 = vpack.c.bf16 %v2002_v27, %v1994_v3 }
 0x209   : > { %v439_v46 = vsub.f32 %v1919_v12, %v423_v9  ;;  %v508_v56 = vpack.c.bf16 %v2005_v35, %v2000_v15  ;;  %1553 = vpow2.f32 %v464_v2  ;;  %v658_v40 = vpop.permute.xlu0 %657 }
 0x20a   : > { %1427 = vmatprep.mubr.bf16.mxu1 %v506_v45 }
 0x20b   : > { %1428 = vmatmul.mubr.bf16.gmra.mrb[4].mxu1 %v507_v55  ;;  %v470_v11 = vmul.f32 1.442695, %v439_v46  ;;  %v2016_v13 = vpop.eup %1549 }
 0x20c   : > { %v419_v7 = vpop.xlane.xlu1 %418  ;;  %1431 = vmatprep.mubr.bf16.mxu1 %v508_v56 }
 0x20d   : > { %v437_v10 = vsub.f32 %v1923_v14, %v419_v7  ;;  %1555 = vpow2.f32 %v470_v11  ;;  %v740_v14 = vsel %vm246_vm0, %v694_v25, 0  ;;  %v662_v43 = vpop.permute.xlu0 %661 }
 0x20f   : > { %v2018_v12 = vpop.eup %1551  ;;  %v466_v22 = vmul.f32 1.442695, %v437_v10 }
 0x210   : > { %v692_v24 = vpop.permute.xlu1 %691  ;;  %v509_v8 = vpack.c.bf16 %v2018_v12, %v2016_v13 }
 0x211   : > { %1557 = vpow2.f32 %v466_v22  ;;  %v737_v26 = vsel %vm246_vm0, %v692_v24, 0  ;;  %1516 = vmatprep.subr.msk.bf16.mxu1 %vm246_vm0, %v692_v24  ;;  %v666_v47 = vpop.permute.xlu0 %665 }
 0x212   : > { %1559 = vpow2.f32 %v468_v16  ;;  %1450 = vmatpush3.bf16.xpose.msra.mxu1 %v737_v26 }
 0x213   : > { %1432 = vmatmul.mubr.bf16.gmra.mrb[8].mxu1 %v509_v8  ;;  %1517 = vmatprep.subr.msk.bf16.mxu1 %vm246_vm0, %v694_v25  ;;  %v2026_v29 = vpop.eup %1553 }
 0x214   : > { %v660_v42 = vpop.permute.xlu1 %659 }
 0x215   : > { %v670_v49 = vpop.permute.xlu0 %669 }
 0x217   : > { %v2028_v30 = vpop.eup %1555 }
 0x218   : > { %v664_v44 = vpop.permute.xlu1 %663 }
 0x219   : > { %v971_v57 = vpop.permute.xlu0 %970 }
 0x21a   : > { %1452 = vmatpush3.bf16.xpose.msra.mxu1 %v740_v14  ;;  %1471 = vmatprep.subr.bf16.mxu0 %v971_v57 }
 0x21b   : > { %v2030_v32 = vpop.eup %1557  ;;  %1518 = vmatprep.subr.msk.bf16.mxu1 %vm246_vm0, %v696_v28  ;;  %1472 = vmatpush3.bf16.msra.mxu0 %v971_v57 }
 0x21c   : > { %v2033_v33 = vpop.eup %1559  ;;  %v510_v36 = vpack.c.bf16 %v2030_v32, %v2026_v29  ;;  %v668_v48 = vpop.permute.xlu1 %667 }
 0x21d   : > { %v511_v38 = vpack.c.bf16 %v2028_v30, %v2033_v33  ;;  %v975_v59 = vpop.permute.xlu0 %974 }
 0x21e   : > { %1435 = vmatprep.mubr.bf16.mxu1 %v510_v36 }
 0x21f   : > { %1436 = vmatmul.mubr.bf16.gmra.mrb[12].mxu1 %v511_v38 }
 0x220   : > { %1455 = vmatprep.mubr.msk.bf16.mxu1 %vm246_vm0, %v658_v40  ;;  %v672_v50 = vpop.permute.xlu1 %671 }
 0x221   : > { %v977_v60 = vpop.permute.xlu0 %976 }
 0x222   : > { %1454 = vmatpush3.bf16.xpose.msra.mxu1 %v743_v41 }
 0x224   : > { %v973_v58 = vpop.permute.xlu1 %972 }
 0x225   : > { %1473 = vmatprep.subr.bf16.mxu0 %v973_v58  ;;  %v981_v62 = vpop.permute.xlu0 %980 }
 0x226   : > { %1474 = vmatpush3.bf16.msra.mxu0 %v973_v58 }
 0x227   : > { %1475 = vmatprep.subr.bf16.mxu0 %v975_v59 }
 0x228   : > { %v979_v61 = vpop.permute.xlu1 %978 }
 0x229   : > { %1456 = vmatmul.mubr.msk.bf16.vlgmr.msra.gmra.mrb[16].mxu1 %vm246_vm0, %v660_v42 }
 0x22a   : > { %1459 = vmatprep.mubr.msk.bf16.mxu1 %vm246_vm0, %v662_v43  ;;  %1476 = vmatpush3.bf16.msra.mxu0 %v975_v59 }
 0x22b   : > { %1477 = vmatprep.subr.bf16.mxu0 %v977_v60 }
 0x22e   : > { %1478 = vmatpush3.bf16.msra.mxu0 %v977_v60 }
 0x22f   : > { %1479 = vmatprep.subr.bf16.mxu0 %v979_v61 }
 0x231   : > { %1460 = vmatmul.mubr.msk.bf16.gmra.mrb[20].mxu1 %vm246_vm0, %v664_v44 }
 0x232   : > { %1463 = vmatprep.mubr.msk.bf16.mxu1 %vm246_vm0, %v666_v47  ;;  %1480 = vmatpush3.bf16.msra.mxu0 %v979_v61 }
 0x233   : > { %1481 = vmatprep.subr.bf16.mxu0 %v981_v62 }
 0x236   : > { %1482 = vmatpush3.bf16.msra.mxu0 %v981_v62 }
 0x239   : > { %1464 = vmatmul.mubr.msk.bf16.gmra.mrb[24].mxu1 %vm246_vm0, %v668_v48 }
 0x23a   : > { %1467 = vmatprep.mubr.msk.bf16.mxu1 %vm246_vm0, %v670_v49 }
 0x241   : > { %1468 = vmatmul.mubr.msk.bf16.gmra.mrb[28].mxu1 %vm246_vm0, %v672_v50 }
 0x2a2   : > { %v2048_v51 = vpop.f32.mrb[0].mxu1 }
 0x2a3   : > { %v2050_v52 = vpop.f32.mrb[1].mxu1 }
 0x2a4   : > { %v2052_v53 = vpop.f32.mrb[2].mxu1 }
 0x2a5   : > { %v2054_v54 = vpop.f32.mrb[3].mxu1 }
 0x2de   : > { %v2056_v63 = vpop.f32.mrb[4].mxu1 }
 0x2df   : > { %v2058_v0 = vpop.f32.mrb[5].mxu1 }
 0x2e0   : > { %v2060_v4 = vpop.f32.mrb[6].mxu1 }
 0x2e1   : > { %v2062_v23 = vpop.f32.mrb[7].mxu1 }
 0x2e6   : > { %v2064_v6 = vpop.f32.mrb[8].mxu1 }
 0x2e7   : > { %v2066_v31 = vpop.f32.mrb[9].mxu1 }
 0x2e8   : > { %v2068_v9 = vpop.f32.mrb[10].mxu1 }
 0x2e9   : > { %v2070_v45 = vpop.f32.mrb[11].mxu1 }
 0x2f2   : > { %v2072_v46 = vpop.f32.mrb[12].mxu1 }
 0x2f3   : > { %v2074_v55 = vpop.f32.mrb[13].mxu1 }
 0x2f4   : > { %v2076_v56 = vpop.f32.mrb[14].mxu1 }
 0x2f5   : > { %v2078_v1 = vpop.f32.mrb[15].mxu1 }
 0x2fc   : > { %v1457_v2 = vpop.f32.mrb[16].mxu1 }
 0x2fd   : > { %v788_v11 = vadd.f32 %v1457_v2, %v1856_v39  ;;  %v779_v7 = vpop.f32.mrb[17].mxu1 }
 0x2fe   : > { %v780_v10 = vadd.f32 %v1856_v39, %v779_v7  ;;  %v1458_v16 = vpop.f32.mrb[18].mxu1 }
 0x2ff   : > { %846 = vmax.xlane.f32.xlu1 %v788_v11  ;;  %v782_v22 = vpop.f32.mrb[19].mxu1  ;;  %v791_v24 = vadd.f32 %v1458_v16, %v1856_v39 }
 0x300   : > { %842 = vmax.xlane.f32.xlu0 %v780_v10  ;;  %v783_v25 = vadd.f32 %v1856_v39, %v782_v22 }
 0x303   : > { %848 = vmax.xlane.f32.xlu1 %v791_v24 }
 0x304   : > { %v1461_v8 = vpop.f32.mrb[20].mxu1 }
 0x305   : > { %v795_v26 = vpop.f32.mrb[21].mxu1  ;;  %v804_v36 = vadd.f32 %v1461_v8, %v1856_v39 }
 0x306   : > { %v2085_v14 = vadd.f32 %v1856_v39, %v795_v26  ;;  %v1462_v28 = vpop.f32.mrb[22].mxu1 }
 0x307   : > { %844 = vmax.xlane.f32.xlu1 %v783_v25  ;;  %v798_v38 = vpop.f32.mrb[23].mxu1  ;;  %v2090_v41 = vadd.f32 %v1462_v28, %v1856_v39 }
 0x308   : > { %850 = vmax.xlane.f32.xlu0 %v2085_v14  ;;  %v799_v48 = vadd.f32 %v1856_v39, %v798_v38 }
 0x30b   : > { %854 = vmax.xlane.f32.xlu1 %v804_v36 }
 0x30c   : > { %v1465_v40 = vpop.f32.mrb[24].mxu1 }
 0x30d   : > { %v811_v42 = vpop.f32.mrb[25].mxu1  ;;  %v2102_v50 = vadd.f32 %v1465_v40, %v1856_v39 }
 0x30e   : > { %v1466_v43 = vpop.f32.mrb[26].mxu1  ;;  %v2110_v62 = vadd.f32 %v1856_v39, %v811_v42 }
 0x30f   : > { %v2093_v44 = vadd.f32 %v1466_v43, %v1856_v39  ;;  %856 = vmax.xlane.f32.xlu1 %v2090_v41  ;;  %v814_v47 = vpop.f32.mrb[27].mxu1 }
 0x310   : > { %v2099_v49 = vadd.f32 %v1856_v39, %v814_v47 }
 0x311   : > { %864 = vmax.xlane.f32.xlu0 %v2093_v44 }
 0x313   : > { %852 = vmax.xlane.f32.xlu1 %v799_v48 }
 0x314   : > { %v1469_v57 = vpop.f32.mrb[28].mxu1 }
 0x315   : > { %860 = vmax.xlane.f32.xlu0 %v2099_v49  ;;  %v827_v58 = vpop.f32.mrb[29].mxu1  ;;  %v2127_v16 = vadd.f32 %v1469_v57, %v1856_v39 }
 0x316   : > { %v1470_v59 = vpop.f32.mrb[30].mxu1  ;;  %v2123_v7 = vadd.f32 %v1856_v39, %v827_v58 }
 0x317   : > { %v2106_v60 = vadd.f32 %v1470_v59, %v1856_v39  ;;  %862 = vmax.xlane.f32.xlu1 %v2102_v50  ;;  %v830_v61 = vpop.f32.mrb[31].mxu1 }
 0x318   : > { %v2114_v2 = vadd.f32 %v1856_v39, %v830_v61 }
 0x319   : > { %872 = vmax.xlane.f32.xlu0 %v2106_v60 }
 0x31b   : > { %858 = vmax.xlane.f32.xlu1 %v2110_v62 }
 0x31d   : > { %868 = vmax.xlane.f32.xlu0 %v2114_v2 }
 0x32c   : > { %982 = vrot.lane.b32.xlu1 %v1839_v34, %s1665_s15 }
 0x333   : > { %984 = vrot.lane.b32.xlu0 %v1842_v37, %s1665_s15 }
 0x350   : > { %866 = vmax.xlane.f32.xlu1 %v2123_v7 }
 0x352   : > { %472 = vadd.xlane.f32.xlu0 %v1964_v17 }
 0x354   : > { %870 = vmax.xlane.f32.xlu1 %v2127_v16 }
 0x358   : > { %474 = vadd.xlane.f32.xlu1 %v1968_v20 }
 0x38c   : > { %v847_v22 = vpop.xlane.xlu1 %846 }
 0x38d   : > { %v876_v8 = vsub.f32 %v788_v11, %v847_v22  ;;  %v843_v34 = vpop.xlane.xlu0 %842 }
 0x38e   : > { %v874_v26 = vsub.f32 %v780_v10, %v843_v34 }
 0x38f   : > { %v894_v28 = vmul.f32 1.442695, %v876_v8 }
 0x390   : > { %v849_v37 = vpop.xlane.xlu1 %848  ;;  %v890_v38 = vmul.f32 1.442695, %v874_v26 }
 0x391   : > { %1561 = vpow2.f32 %v894_v28  ;;  %v877_v40 = vsub.f32 %v791_v24, %v849_v37 }
 0x392   : > { %1563 = vpow2.f32 %v890_v38 }
 0x393   : > { %v896_v42 = vmul.f32 1.442695, %v877_v40 }
 0x394   : > { %v845_v43 = vpop.xlane.xlu1 %844 }
 0x395   : > { %v875_v39 = vsub.f32 %v783_v25, %v845_v43  ;;  %v851_v47 = vpop.xlane.xlu0 %850  ;;  %1565 = vpow2.f32 %v896_v42 }
 0x396   : > { %v878_v20 = vsub.f32 %v2085_v14, %v851_v47 }
 0x397   : > { %v892_v57 = vmul.f32 1.442695, %v875_v39 }
 0x398   : > { %v855_v17 = vpop.xlane.xlu1 %854  ;;  %v898_v61 = vmul.f32 1.442695, %v878_v20 }
 0x399   : > { %1567 = vpow2.f32 %v892_v57  ;;  %v880_v58 = vsub.f32 %v804_v36, %v855_v17 }
 0x39b   : > { %v1562_v11 = vpop.eup %1561  ;;  %v902_v59 = vmul.f32 1.442695, %v880_v58 }
 0x39c   : > { %v857_v10 = vpop.xlane.xlu1 %856  ;;  %926 = vadd.xlane.f32.xlu1 %v1562_v11  ;;  %v1564_v8 = vpop.eup %1563 }
 0x39d   : > { %1569 = vpow2.f32 %v902_v59  ;;  %v881_v24 = vsub.f32 %v2090_v41, %v857_v10 }
 0x39e   : > { %v865_v22 = vpop.xlane.xlu0 %864  ;;  %1571 = vpow2.f32 %v898_v61 }
 0x39f   : > { %v904_v25 = vmul.f32 1.442695, %v881_v24  ;;  %v1566_v28 = vpop.eup %1565  ;;  %v885_v47 = vsub.f32 %v2093_v44, %v865_v22 }
 0x3a0   : > { %v853_v34 = vpop.xlane.xlu1 %852  ;;  %922 = vadd.xlane.f32.xlu1 %v1564_v8 }
 0x3a1   : > { %v879_v26 = vsub.f32 %v799_v48, %v853_v34  ;;  %1573 = vpow2.f32 %v904_v25  ;;  %v912_v10 = vmul.f32 1.442695, %v885_v47 }
 0x3a2   : > { %v861_v37 = vpop.xlane.xlu0 %860 }
 0x3a3   : > { %v1568_v38 = vpop.eup %1567  ;;  %v900_v14 = vmul.f32 1.442695, %v879_v26  ;;  %v883_v48 = vsub.f32 %v2099_v49, %v861_v37 }
 0x3a4   : > { %v863_v36 = vpop.xlane.xlu1 %862  ;;  %924 = vadd.xlane.f32.xlu0 %v1568_v38  ;;  %928 = vadd.xlane.f32.xlu1 %v1566_v28  ;;  %v954_v40 = vpack.c.bf16 %v1568_v38, %v1564_v8 }
 0x3a5   : > { %v884_v42 = vsub.f32 %v2102_v50, %v863_v36  ;;  %1575 = vpow2.f32 %v900_v14  ;;  %v908_v50 = vmul.f32 1.442695, %v883_v48 }
 0x3a6   : > { %1487 = vmatprep.mubr.bf16.mxu0 %v954_v40  ;;  %v873_v41 = vpop.xlane.xlu0 %872 }
 0x3a7   : > { %v1570_v43 = vpop.eup %1569  ;;  %v910_v39 = vmul.f32 1.442695, %v884_v42  ;;  %v889_v34 = vsub.f32 %v2106_v60, %v873_v41 }
 0x3a8   : > { %v859_v57 = vpop.xlane.xlu1 %858  ;;  %934 = vadd.xlane.f32.xlu1 %v1570_v43  ;;  %v1572_v58 = vpop.eup %1571 }
 0x3a9   : > { %1577 = vpow2.f32 %v910_v39  ;;  %v882_v17 = vsub.f32 %v2110_v62, %v859_v57  ;;  %v955_v62 = vpack.c.bf16 %v1566_v28, %v1562_v11  ;;  %v920_v26 = vmul.f32 1.442695, %v889_v34 }
 0x3aa   : > { %v869_v20 = vpop.xlane.xlu0 %868 }
 0x3ab   : > { %v906_v59 = vmul.f32 1.442695, %v882_v17  ;;  %v1574_v8 = vpop.eup %1573  ;;  %v887_v37 = vsub.f32 %v2114_v2, %v869_v20 }
 0x3ac   : > { %v983_v61 = vpop.permute.xlu1 %982  ;;  %930 = vadd.xlane.f32.xlu1 %v1572_v58  ;;  %v957_v36 = vpack.c.bf16 %v1574_v8, %v1570_v43 }
 0x3ad   : > { %1579 = vpow2.f32 %v906_v59  ;;  %1483 = vmatprep.subr.bf16.mxu0 %v983_v61  ;;  %v916_v42 = vmul.f32 1.442695, %v887_v37 }
 0x3ae   : > { %1484 = vmatpush3.bf16.msra.mxu0 %v983_v61  ;;  %v985_v24 = vpop.permute.xlu0 %984  ;;  %1581 = vpow2.f32 %v912_v10 }
 0x3af   : > { %1485 = vmatprep.subr.bf16.mxu0 %v985_v24  ;;  %v1576_v44 = vpop.eup %1575  ;;  %1583 = vpow2.f32 %v908_v50 }
 0x3b0   : > { %936 = vadd.xlane.f32.xlu1 %v1574_v8  ;;  %v956_v22 = vpack.c.bf16 %v1576_v44, %v1572_v58  ;;  %1585 = vpow2.f32 %v920_v26 }
 0x3b1   : > { %1587 = vpow2.f32 %v916_v42 }
 0x3b2   : > { %1486 = vmatpush3.bf16.msra.mxu0 %v985_v24 }
 0x3b3   : > { %v1578_v49 = vpop.eup %1577 }
 0x3b4   : > { %942 = vadd.xlane.f32.xlu0 %v1578_v49  ;;  %932 = vadd.xlane.f32.xlu1 %v1576_v44 }
 0x3b5   : > { %1488 = vmatmul.mubr.bf16.vlgmr.msra.gmra.mrb[16].mxu0 %v955_v62 }
 0x3b6   : > { %1491 = vmatprep.mubr.bf16.mxu0 %v956_v22 }
 0x3b7   : > { %v1580_v25 = vpop.eup %1579 }
 0x3b8   : > { %938 = vadd.xlane.f32.xlu1 %v1580_v25  ;;  %v1582_v38 = vpop.eup %1581 }
 0x3b9   : > { %v1584_v14 = vpop.eup %1583  ;;  %v959_v11 = vpack.c.bf16 %v1582_v38, %v1578_v49 }
 0x3ba   : > { %v958_v40 = vpack.c.bf16 %v1584_v14, %v1580_v25  ;;  %v1586_v60 = vpop.eup %1585 }
 0x3bb   : > { %v1588_v28 = vpop.eup %1587 }
 0x3bc   : > { %944 = vadd.xlane.f32.xlu1 %v1582_v38 }
 0x3bd   : > { %1492 = vmatmul.mubr.bf16.gmra.mrb[20].mxu0 %v957_v36 }
 0x3be   : > { %1495 = vmatprep.mubr.bf16.mxu0 %v958_v40 }
 0x3c0   : > { %940 = vadd.xlane.f32.xlu1 %v1584_v14 }
 0x3c4   : > { %478 = vadd.xlane.f32.xlu1 %v1966_v18 }
 0x3c5   : > { %1496 = vmatmul.mubr.bf16.gmra.mrb[24].mxu0 %v959_v11 }
 0x3c8   : > { %952 = vadd.xlane.f32.xlu1 %v1586_v60 }
 0x3cc   : > { %948 = vadd.xlane.f32.xlu1 %v1588_v28 }
 0x3d0   : > { %482 = vadd.xlane.f32.xlu1 %v2002_v27 }
 0x3d4   : > { %486 = vadd.xlane.f32.xlu1 %v1998_v5 }
 0x3d8   : > { %490 = vadd.xlane.f32.xlu1 %v2005_v35 }
 0x3dc   : > { %494 = vadd.xlane.f32.xlu1 %v2018_v12 }
 0x3dd   : > { %v867_v2 = vpop.xlane.xlu1 %866 }
 0x3de   : > { %v886_v41 = vsub.f32 %v2123_v7, %v867_v2 }
 0x3df   : > { %v2158_v17 = vpop.xlane.xlu0 %472 }
 0x3e0   : > { %v914_v43 = vmul.f32 1.442695, %v886_v41  ;;  %498 = vadd.xlane.f32.xlu1 %v2030_v32 }
 0x3e1   : > { %v871_v18 = vpop.xlane.xlu1 %870 }
 0x3e2   : > { %1589 = vpow2.f32 %v914_v43  ;;  %v888_v39 = vsub.f32 %v2127_v16, %v871_v18 }
 0x3e4   : > { %v918_v47 = vmul.f32 1.442695, %v888_v39  ;;  %502 = vadd.xlane.f32.xlu1 %v2028_v30 }
 0x3e5   : > { %v2156_v30 = vpop.xlane.xlu1 %474 }
 0x3e6   : > { %1591 = vpow2.f32 %v918_v47 }
 0x3ec   : > { %v1590_v27 = vpop.eup %1589 }
 0x3ed   : > { %v960_v5 = vpack.c.bf16 %v1588_v28, %v1590_v27 }
 0x3ef   : > { %1499 = vmatprep.mubr.bf16.mxu0 %v960_v5 }
 0x3f0   : > { %v1592_v35 = vpop.eup %1591 }
 0x3f1   : > { %950 = vadd.xlane.f32.xlu0 %v1592_v35  ;;  %v961_v12 = vpack.c.bf16 %v1586_v60, %v1592_v35 }
 0x3f3   : > { %1500 = vmatmul.mubr.bf16.gmra.mrb[28].mxu0 %v961_v12 }
 0x3f5   : > { %946 = vadd.xlane.f32.xlu0 %v1590_v27 }
 0x3f9   : > { %476 = vadd.xlane.f32.xlu0 %v1970_v21 }
 0x3fd   : > { %480 = vadd.xlane.f32.xlu0 %v1994_v3 }
 0x401   : > { %484 = vadd.xlane.f32.xlu0 %v1996_v19 }
 0x405   : > { %488 = vadd.xlane.f32.xlu0 %v2000_v15 }
 0x409   : > { %492 = vadd.xlane.f32.xlu0 %v2016_v13 }
 0x40d   : > { %496 = vadd.xlane.f32.xlu0 %v2026_v29 }
 0x411   : > { %500 = vadd.xlane.f32.xlu0 %v2033_v33 }
 0x429   : > { %v927_v32 = vpop.xlane.xlu1 %926 }
 0x42a   : > { %1593 = vrcp.f32 %v927_v32 }
 0x42d   : > { %v923_v7 = vpop.xlane.xlu1 %922 }
 0x42e   : > { %1595 = vrcp.f32 %v923_v7 }
 0x431   : > { %v929_v16 = vpop.xlane.xlu1 %928  ;;  %v925_v3 = vpop.xlane.xlu0 %924 }
 0x432   : > { %1597 = vrcp.f32 %v925_v3 }
 0x433   : > { %1599 = vrcp.f32 %v929_v16 }
 0x434   : > { %v1594_v13 = vpop.eup %1593 }
 0x435   : > { %v935_v57 = vpop.xlane.xlu1 %934 }
 0x436   : > { %1601 = vrcp.f32 %v935_v57 }
 0x438   : > { %v1596_v33 = vpop.eup %1595 }
 0x439   : > { %v931_v48 = vpop.xlane.xlu1 %930 }
 0x43c   : > { %v1598_v50 = vpop.eup %1597 }
 0x43d   : > { %v937_v21 = vpop.xlane.xlu1 %936  ;;  %v1600_v49 = vpop.eup %1599 }
 0x43e   : > { %1603 = vrcp.f32 %v937_v21 }
 0x43f   : > { %1605 = vrcp.f32 %v931_v48 }
 0x440   : > { %v1602_v22 = vpop.eup %1601 }
 0x441   : > { %v933_v19 = vpop.xlane.xlu1 %932  ;;  %v943_v59 = vpop.xlane.xlu0 %942 }
 0x442   : > { %1607 = vrcp.f32 %v933_v19 }
 0x443   : > { %1609 = vrcp.f32 %v943_v59 }
 0x445   : > { %v939_v15 = vpop.xlane.xlu1 %938 }
 0x448   : > { %v1604_v38 = vpop.eup %1603 }
 0x449   : > { %v945_v24 = vpop.xlane.xlu1 %944  ;;  %v1606_v42 = vpop.eup %1605 }
 0x44a   : > { %1611 = vrcp.f32 %v945_v24 }
 0x44b   : > { %1613 = vrcp.f32 %v939_v15 }
 0x44c   : > { %v1608_v60 = vpop.eup %1607 }
 0x44d   : > { %v941_v25 = vpop.xlane.xlu1 %940  ;;  %v1610_v2 = vpop.eup %1609 }
 0x44e   : > { %1615 = vrcp.f32 %v941_v25 }
 0x451   : > { %v479_v16 = vpop.xlane.xlu1 %478 }
 0x454   : > { %v1612_v39 = vpop.eup %1611 }
 0x455   : > { %v1614_v35 = vpop.eup %1613  ;;  %v953_v48 = vpop.xlane.xlu1 %952 }
 0x458   : > { %v1616_v32 = vpop.eup %1615 }
 0x459   : > { %v949_v3 = vpop.xlane.xlu1 %948 }
 0x47e   : > { %v951_v57 = vpop.xlane.xlu0 %950 }
 0x482   : > { %v947_v21 = vpop.xlane.xlu0 %946 }
 0x483   : > { %1617 = vrcp.f32 %v947_v21 }
 0x484   : > { %1619 = vrcp.f32 %v949_v3 }
 0x485   : > { %1621 = vrcp.f32 %v951_v57 }
 0x486   : > { %1623 = vrcp.f32 %v953_v48 }
 0x488   : > { %v1489_v29 = vpop.f32.mrb[16].mxu0 }
 0x489   : > { %v1109_v20 = vmul.f32 %v1594_v13, %v1489_v29  ;;  %v1028_v58 = vpop.f32.mrb[17].mxu0 }
 0x48a   : > { %v1107_v10 = vmul.f32 %v1596_v33, %v1028_v58  ;;  %v1490_v61 = vpop.f32.mrb[18].mxu0 }
 0x48b   : > { %1143 = vrot.lane.b32.xlu1 %v1109_v20, %s1665_s15  ;;  %v1031_v8 = vpop.f32.mrb[19].mxu0  ;;  %v1110_v62 = vmul.f32 %v1600_v49, %v1490_v61 }
 0x48c   : > { %v1108_v44 = vmul.f32 %v1598_v50, %v1031_v8  ;;  %1139 = vrot.lane.b32.xlu0 %v1107_v10, %s1665_s15  ;;  %v477_v8 = vpop.xlane.xlu0 %476 }
 0x48d   : > { %v1618_v15 = vpop.eup %1617  ;;  %1625 = vrcp.f32 %v477_v8 }
 0x48e   : > { %v1620_v20 = vpop.eup %1619  ;;  %1627 = vrcp.f32 %v2158_v17 }
 0x48f   : > { %1141 = vrot.lane.b32.xlu1 %v1108_v44, %s1665_s15  ;;  %v1622_v10 = vpop.eup %1621  ;;  %v483_v44 = vpop.xlane.xlu1 %482  ;;  %1629 = vrcp.f32 %v2156_v30 }
 0x490   : > { %1145 = vrot.lane.b32.xlu0 %v1110_v62, %s1665_s15  ;;  %v1493_v34 = vpop.f32.mrb[20].mxu0  ;;  %v1624_v50 = vpop.eup %1623  ;;  %1631 = vrcp.f32 %v479_v16 }
 0x491   : > { %v1113_v26 = vmul.f32 %v1602_v22, %v1493_v34  ;;  %v1044_v37 = vpop.f32.mrb[21].mxu0  ;;  %v481_v49 = vpop.xlane.xlu0 %480 }
 0x492   : > { %v1494_v14 = vpop.f32.mrb[22].mxu0  ;;  %v1111_v11 = vmul.f32 %v1606_v42, %v1044_v37 }
 0x493   : > { %v1114_v36 = vmul.f32 %v1604_v38, %v1494_v14  ;;  %v1047_v40 = vpop.f32.mrb[23].mxu0  ;;  %1151 = vrot.lane.b32.xlu1 %v1113_v26, %s1665_s15  ;;  %v487_v62 = vpop.xlane.xlu1 %486 }
 0x494   : > { %v1112_v28 = vmul.f32 %v1608_v60, %v1047_v40 }
 0x495   : > { %1153 = vrot.lane.b32.xlu0 %v1114_v36, %s1665_s15  ;;  %v485_v22 = vpop.xlane.xlu0 %484 }
 0x496   : > { %1633 = vrcp.f32 %v485_v22 }
 0x497   : > { %1147 = vrot.lane.b32.xlu1 %v1111_v11, %s1665_s15  ;;  %v491_v34 = vpop.xlane.xlu1 %490  ;;  %v1626_v36 = vpop.eup %1625  ;;  %1635 = vrcp.f32 %v487_v62 }
 0x498   : > { %v1497_v41 = vpop.f32.mrb[24].mxu0  ;;  %v1628_v42 = vpop.eup %1627  ;;  %1637 = vrcp.f32 %v481_v49  ;;  %v635_v30 = vmul.f32 %v1626_v36, %v2048_v51 }
 0x499   : > { %v1117_v43 = vmul.f32 %v1610_v2, %v1497_v41  ;;  %1149 = vrot.lane.b32.xlu0 %v1112_v28, %s1665_s15  ;;  %v1060_v18 = vpop.f32.mrb[25].mxu0  ;;  %v489_v25 = vpop.xlane.xlu0 %488  ;;  %1639 = vrcp.f32 %v483_v44  ;;  %v633_v28 = vmul.f32 %v1628_v42, %v2050_v52 }
 0x49a   : > { %v1498_v47 = vpop.f32.mrb[26].mxu0  ;;  %v1115_v12 = vmul.f32 %v1614_v35, %v1060_v18  ;;  %v1630_v17 = vpop.eup %1629 }
 0x49b   : > { %v1118_v27 = vmul.f32 %v1612_v39, %v1498_v47  ;;  %v1063_v5 = vpop.f32.mrb[27].mxu0  ;;  %1159 = vrot.lane.b32.xlu1 %v1117_v43, %s1665_s15  ;;  %v495_v26 = vpop.xlane.xlu1 %494  ;;  %v634_v39 = vmul.f32 %v1630_v17, %v2054_v54 }
 0x49c   : > { %v1116_v7 = vmul.f32 %v1616_v32, %v1063_v5  ;;  %v1632_v2 = vpop.eup %1631 }
 0x49d   : > { %1161 = vrot.lane.b32.xlu0 %v1118_v27, %s1665_s15  ;;  %v493_v37 = vpop.xlane.xlu0 %492  ;;  %v636_v27 = vmul.f32 %v1632_v2, %v2052_v53 }
 0x49e   : > { %1641 = vrcp.f32 %v493_v37 }
 0x49f   : > { %1155 = vrot.lane.b32.xlu1 %v1115_v12, %s1665_s15  ;;  %v2178_v38 = vpop.xlane.xlu1 %498  ;;  %1643 = vrcp.f32 %v495_v26 }
 0x4a0   : > { %v1634_v47 = vpop.eup %1633  ;;  %1645 = vrcp.f32 %v489_v25 }
 0x4a1   : > { %1157 = vrot.lane.b32.xlu0 %v1116_v7, %s1665_s15  ;;  %v2180_v14 = vpop.xlane.xlu0 %496  ;;  %v1636_v35 = vpop.eup %1635  ;;  %v639_v32 = vmul.f32 %v1634_v47, %v2056_v63  ;;  %1647 = vrcp.f32 %v491_v34 }
 0x4a2   : > { %v1638_v7 = vpop.eup %1637  ;;  %v640_v53 = vmul.f32 %v1636_v35, %v2060_v4  ;;  %1649 = vrcp.f32 %v2180_v14 }
 0x4a3   : > { %v2182_v40 = vpop.xlane.xlu1 %502  ;;  %v1640_v57 = vpop.eup %1639  ;;  %v637_v3 = vmul.f32 %v1638_v7, %v2058_v0  ;;  %1651 = vrcp.f32 %v2178_v38 }
 0x4a5   : > { %v2185_v11 = vpop.xlane.xlu0 %500 }
 0x4a6   : > { %1653 = vrcp.f32 %v2185_v11 }
 0x4a7   : > { %1655 = vrcp.f32 %v2182_v40 }
 0x4c6   : > { %v1501_v19 = vpop.f32.mrb[28].mxu0 }
 0x4c7   : > { %v1076_v13 = vpop.f32.mrb[29].mxu0  ;;  %v1121_v61 = vmul.f32 %v1622_v10, %v1501_v19  ;;  %v1642_v19 = vpop.eup %1641 }
 0x4c8   : > { %v1119_v29 = vmul.f32 %v1618_v15, %v1076_v13  ;;  %v1502_v33 = vpop.f32.mrb[30].mxu0  ;;  %v638_v13 = vmul.f32 %v1640_v57, %v2062_v23 }
 0x4c9   : > { %v1079_v58 = vpop.f32.mrb[31].mxu0  ;;  %v1122_v24 = vmul.f32 %v1624_v50, %v1502_v33 }
 0x4ca   : > { %v1120_v59 = vmul.f32 %v1620_v20, %v1079_v58  ;;  %1163 = vrot.lane.b32.xlu1 %v1119_v29, %s1665_s15  ;;  %v1644_v29 = vpop.eup %1643  ;;  %v643_v20 = vmul.f32 %v1642_v19, %v2064_v6 }
 0x4cb   : > { %v1646_v58 = vpop.eup %1645  ;;  %v644_v10 = vmul.f32 %v1644_v29, %v2068_v9 }
 0x4cc   : > { %1165 = vrot.lane.b32.xlu0 %v1120_v59, %s1665_s15 }
 0x4ce   : > { %1167 = vrot.lane.b32.xlu1 %v1121_v61, %s1665_s15  ;;  %v1648_v61 = vpop.eup %1647 }
 0x4cf   : > { %v642_v6 = vmul.f32 %v1648_v61, %v2070_v45 }
 0x4d0   : > { %1169 = vrot.lane.b32.xlu0 %v1122_v24, %s1665_s15  ;;  %v641_v24 = vmul.f32 %v1646_v58, %v2066_v31  ;;  %v1650_v31 = vpop.eup %1649 }
 0x4d1   : > { %v1652_v9 = vpop.eup %1651  ;;  %v645_v45 = vmul.f32 %v1650_v31, %v2074_v55 }
 0x4d2   : > { %v1654_v22 = vpop.eup %1653  ;;  %v646_v26 = vmul.f32 %v1652_v9, %v2078_v1 }
 0x4d3   : > { %v1656_v37 = vpop.eup %1655  ;;  %v647_v36 = vmul.f32 %v1654_v22, %v2072_v46 }
 0x4d4   : > { %v648_v55 = vmul.f32 %v1656_v37, %v2076_v56 }
 0x4fd   : > { %v1144_v60 = vpop.permute.xlu1 %1143 }
 0x4fe   : > { %v1189_v41 = vsel %vm246_vm0, %v635_v30, %v1144_v60  ;;  %v1140_v43 = vpop.permute.xlu0 %1139 }
 0x4ff   : > { %1205 = vst [vmem:[%s2190_s22 + $0x10] sm:$0xff] %v1189_v41  ;;  %v1187_v18 = vsel %vm246_vm0, %v633_v28, %v1140_v43 }
 0x500   : > { %1203 = vst [vmem:[%s2190_s22] sm:$0xff] %v1187_v18 }
 0x501   : > { %v1142_v51 = vpop.permute.xlu1 %1141 }
 0x502   : > { %v1188_v52 = vsel %vm246_vm0, %v634_v39, %v1142_v51  ;;  %v1146_v5 = vpop.permute.xlu0 %1145 }
 0x503   : > { %1204 = vst [vmem:[%s2190_s22 + $0x8] sm:$0xff] %v1188_v52  ;;  %v1190_v12 = vsel %vm246_vm0, %v636_v27, %v1146_v5 }
 0x504   : > { %1206 = vst [vmem:[%s2190_s22 + $0x18] sm:$0xff] %v1190_v12 }
 0x505   : > { %v1152_v54 = vpop.permute.xlu1 %1151 }
 0x506   : > { %v1193_v16 = vsel %vm246_vm0, %v639_v32, %v1152_v54 }
 0x507   : > { %1209 = vst [vmem:[%s2190_s22 + $0x30] sm:$0xff] %v1193_v16  ;;  %v1154_v48 = vpop.permute.xlu0 %1153 }
 0x508   : > { %v1194_v21 = vsel %vm246_vm0, %v640_v53, %v1154_v48 }
 0x509   : > { %1210 = vst [vmem:[%s2190_s22 + $0x38] sm:$0xff] %v1194_v21  ;;  %v1148_v63 = vpop.permute.xlu1 %1147 }
 0x50a   : > { %v1191_v15 = vsel %vm246_vm0, %v637_v3, %v1148_v63 }
 0x50b   : > { %1207 = vst [vmem:[%s2190_s22 + $0x20] sm:$0xff] %v1191_v15  ;;  %v1150_v4 = vpop.permute.xlu0 %1149 }
 0x50c   : > { %v1192_v33 = vsel %vm246_vm0, %v638_v13, %v1150_v4 }
 0x50d   : > { %1208 = vst [vmem:[%s2190_s22 + $0x28] sm:$0xff] %v1192_v33  ;;  %v1160_v0 = vpop.permute.xlu1 %1159 }
 0x50e   : > { %v1197_v59 = vsel %vm246_vm0, %v643_v20, %v1160_v0 }
 0x50f   : > { %1213 = vst [vmem:[%s2190_s22 + $0x50] sm:$0xff] %v1197_v59  ;;  %v1162_v23 = vpop.permute.xlu0 %1161 }
 0x510   : > { %v1198_v50 = vsel %vm246_vm0, %v644_v10, %v1162_v23 }
 0x511   : > { %1214 = vst [vmem:[%s2190_s22 + $0x58] sm:$0xff] %v1198_v50  ;;  %v1156_v8 = vpop.permute.xlu1 %1155 }
 0x512   : > { %v1195_v44 = vsel %vm246_vm0, %v641_v24, %v1156_v8 }
 0x513   : > { %1211 = vst [vmem:[%s2190_s22 + $0x40] sm:$0xff] %v1195_v44  ;;  %v1158_v49 = vpop.permute.xlu0 %1157 }
 0x514   : > { %v1196_v62 = vsel %vm246_vm0, %v642_v6, %v1158_v49 }
 0x515   : > { %1212 = vst [vmem:[%s2190_s22 + $0x48] sm:$0xff] %v1196_v62 }
 0x53c   : > { %v1164_v34 = vpop.permute.xlu1 %1163 }
 0x53d   : > { %v1199_v25 = vsel %vm246_vm0, %v645_v45, %v1164_v34 }
 0x53e   : > { %1215 = vst [vmem:[%s2190_s22 + $0x60] sm:$0xff] %v1199_v25  ;;  %v1166_v14 = vpop.permute.xlu0 %1165 }
 0x53f   : > { %v1200_v38 = vsel %vm246_vm0, %v646_v26, %v1166_v14 }
 0x540   : > { %1216 = vst [vmem:[%s2190_s22 + $0x68] sm:$0xff] %v1200_v38  ;;  %v1168_v40 = vpop.permute.xlu1 %1167 }
 0x541   : > { %v1201_v42 = vsel %vm246_vm0, %v647_v36, %v1168_v40 }
 0x542   : > { %1217 = vst [vmem:[%s2190_s22 + $0x70] sm:$0xff] %v1201_v42  ;;  %v1170_v11 = vpop.permute.xlu0 %1169 }
 0x543   : > { %v1202_v30 = vsel %vm246_vm0, %v648_v55, %v1170_v11 }
 0x544   : > { %1218 = vst [vmem:[%s2190_s22 + $0x78] sm:$0xff] %v1202_v30 }
 0x545 PF: > { %s12_s9 = sadd.s32 1, %s1663_s9  }
 0x546   : > { %p9_p4 = scmp.ge.s32.totalorder %s12_s9, 4  }
 0x548   :  { %11 = sbr.rel (!%p9_p4) target bundleno = 1 (0x1), region = 61 }

// kernel: bert_legal_pretraining_forward.22
= control target key start
LH: loop header
LB: loop body
LE: loop exit
PB: predicated region body
PF: predicated region fallthrough
CT: control target
= control target key end

     0   :  { %s971_s12 = smov 0   ;;  %s1408_s0 = inlined_call_operand.vmem [shape: f32[256,128], index: 0, kind: input, shape index: {}]   ;;  %s1409_s1 = inlined_call_operand.vmem [shape: bf16[128,256], index: 1, kind: input, shape index: {}]   ;;  %s1410_s2 = inlined_call_operand.vmem [shape: f32[1,256], index: 2, kind: input, shape index: {}]   ;;  %s1411_s3 = inlined_call_operand.vmem [shape: f32[256,256], index: 3, kind: output, shape index: {}]  }
   0x1 LB: > { %s800_s13 = sadd.s32 4294967295, %s948_s12   ;;  %p804_p0 = scmp.ge.s32.totalorder %s948_s12, 1  ;;  %s948_s12 = sphi %s971_s12, %s13_s12  }
   0x2   : > { %p138_p1 = scmp.lt.s32.totalorder %s948_s12, 3 }
   0x4   : > { %p139_p2 = pnand %p804_p0, %p138_p1 }
   0x5   : > { %v854_v0 = vld [vmem:[%s1409_s1 + $0x4] ss:$8 sps:$4 sm:$0xff] (!%p139_p2)   ;;  %v856_v1 = vld [vmem:[%s1409_s1] ss:$8 sps:$4 sm:$0xff] (!%p139_p2)   ;;  %v950_v2 = vmov (!%p139_p2), 0   ;;  %s805_s28 = sshll.u32 (!%p139_p2), %s800_s13, 4  ;;  %v219_v41 = vlaneseq (!%p139_p2) }
   0x6   : > { %142 = sbr.rel (%p139_p2) target bundleno = 349 (0x15d), region = 32  ;;  %341 = vmatprep.mubr.bf16.mxu0 (!%p139_p2), %v950_v2  ;;  %381 = vmatprep.mubr.bf16.mxu1 (!%p139_p2), %v950_v2  ;;  %v857_v3 = vld [vmem:[%s1409_s1 + $0x14] ss:$8 sps:$4 sm:$0xff] (!%p139_p2)   ;;  %v859_v4 = vld [vmem:[%s1409_s1 + $0x10] ss:$8 sps:$4 sm:$0xff] (!%p139_p2)   ;;  %p164_p3 = scmp.lt.s32.totalorder (!%p139_p2), %s805_s28, 31 }
   0x7   : > { %309 = vmatprep.subr.bf16.mxu0 (!%p139_p2), %v854_v0  ;;  %829 = vmatprep.subr.bf16.mxu1 (!%p139_p2), %v854_v0  ;;  %v860_v5 = vld [vmem:[%s1409_s1 + $0x24] ss:$8 sps:$4 sm:$0xff] (!%p139_p2)   ;;  %v862_v6 = vld [vmem:[%s1409_s1 + $0x20] ss:$8 sps:$4 sm:$0xff] (!%p139_p2)   ;;  %v863_v7 = vld [vmem:[%s1409_s1 + $0x34] ss:$8 sps:$4 sm:$0xff] (!%p139_p2)  }
   0x8   : > { %310 = vmatpush1.bf16.msra.mxu0 (!%p139_p2), %v856_v1  ;;  %837 = vmatpush1.bf16.msra.mxu1 (!%p139_p2), %v856_v1  ;;  %v865_v8 = vld [vmem:[%s1409_s1 + $0x30] ss:$8 sps:$4 sm:$0xff] (!%p139_p2)   ;;  %v866_v9 = vld [vmem:[%s1409_s1 + $0x44] ss:$8 sps:$4 sm:$0xff] (!%p139_p2)   ;;  %v868_v10 = vld [vmem:[%s1409_s1 + $0x40] ss:$8 sps:$4 sm:$0xff] (!%p139_p2)  }
   0x9   : > { %311 = vmatprep.subr.bf16.mxu0 (!%p139_p2), %v857_v3  ;;  %830 = vmatprep.subr.bf16.mxu1 (!%p139_p2), %v857_v3  ;;  %v869_v11 = vld [vmem:[%s1409_s1 + $0x54] ss:$8 sps:$4 sm:$0xff] (!%p139_p2)   ;;  %v871_v12 = vld [vmem:[%s1409_s1 + $0x50] ss:$8 sps:$4 sm:$0xff] (!%p139_p2)   ;;  %v872_v13 = vld [vmem:[%s1409_s1 + $0x64] ss:$8 sps:$4 sm:$0xff] (!%p139_p2)  }
   0xa   : > { %v874_v14 = vld [vmem:[%s1409_s1 + $0x60] ss:$8 sps:$4 sm:$0xff] (!%p139_p2)   ;;  %v875_v15 = vld [vmem:[%s1409_s1 + $0x74] ss:$8 sps:$4 sm:$0xff] (!%p139_p2)   ;;  %v877_v16 = vld [vmem:[%s1409_s1 + $0x70] ss:$8 sps:$4 sm:$0xff] (!%p139_p2)  }
   0xb   : > { %v220_v42 = vshrl.u32 (!%p139_p2), %v219_v41, 7  ;;  %v217_v44 = vld [vmem:[%s1410_s2] sm:$0x3] (!%p139_p2) }
   0xc   : > { %312 = vmatpush1.bf16.msra.mxu0 (!%p139_p2), %v859_v4  ;;  %838 = vmatpush1.bf16.msra.mxu1 (!%p139_p2), %v859_v4 }
   0xd   : > { %313 = vmatprep.subr.bf16.mxu0 %v860_v5  ;;  %831 = vmatprep.subr.bf16.mxu1 %v860_v5  ;;  %s1413_s28 = smov (!%p164_p3, %s805_s28), 31  ;;  %v221_v43 = vsub.s32 0, %v220_v42  ;;  %v225_v45 = vsub.s32 1, %v220_v42 }
   0xe   : > { %s806_s15 = sshll.u32 %s1413_s28, 3  ;;  %s828_s27 = sshll.u32 %s1413_s28, 4 }
   0xf   : > { %s1029_s20 = scalar_lea.vmem %s1408_s0, %s806_s15  ;;  %v1062_v46 = vrot.slane %v217_v44, %v221_v43  ;;  %v1064_v47 = vrot.slane %v217_v44, %v225_v45  ;;  %s1181_s30 = scalar_lea.vmem %s1411_s3, %s828_s27 }
  0x10   : > { %314 = vmatpush1.bf16.msra.mxu0 %v862_v6  ;;  %839 = vmatpush1.bf16.msra.mxu1 %v862_v6  ;;  %v177_v17 = vld [vmem:[%s1029_s20] sm:$0xff]  ;;  %v178_v18 = vld [vmem:[%s1029_s20 + $0x8] sm:$0xff]  ;;  %v179_v23 = vld [vmem:[%s1029_s20 + $0x10] sm:$0xff] }
  0x11   : > { %315 = vmatprep.subr.bf16.mxu0 %v863_v7  ;;  %832 = vmatprep.subr.bf16.mxu1 %v863_v7  ;;  %v185_v19 = vld [vmem:[%s1029_s20 + $0x40] sm:$0xff]  ;;  %v186_v20 = vld [vmem:[%s1029_s20 + $0x48] sm:$0xff]  ;;  %v193_v21 = vpack.c.bf16 %v178_v18, %v177_v17  ;;  %v180_v24 = vld [vmem:[%s1029_s20 + $0x18] sm:$0xff] }
  0x12   : > { %v197_v22 = vpack.c.bf16 %v186_v20, %v185_v19  ;;  %v187_v25 = vld [vmem:[%s1029_s20 + $0x50] sm:$0xff]  ;;  %v188_v26 = vld [vmem:[%s1029_s20 + $0x58] sm:$0xff]  ;;  %v194_v27 = vpack.c.bf16 %v180_v24, %v179_v23  ;;  %v181_v29 = vld [vmem:[%s1029_s20 + $0x20] sm:$0xff] }
  0x13   : > { %v198_v28 = vpack.c.bf16 %v188_v26, %v187_v25  ;;  %v182_v30 = vld [vmem:[%s1029_s20 + $0x28] sm:$0xff]  ;;  %v189_v31 = vld [vmem:[%s1029_s20 + $0x60] sm:$0xff]  ;;  %v183_v35 = vld [vmem:[%s1029_s20 + $0x30] sm:$0xff] }
  0x14   : > { %316 = vmatpush1.bf16.msra.mxu0 %v865_v8  ;;  %840 = vmatpush1.bf16.msra.mxu1 %v865_v8  ;;  %v190_v32 = vld [vmem:[%s1029_s20 + $0x68] sm:$0xff]  ;;  %v195_v33 = vpack.c.bf16 %v182_v30, %v181_v29  ;;  %v184_v36 = vld [vmem:[%s1029_s20 + $0x38] sm:$0xff]  ;;  %v191_v37 = vld [vmem:[%s1029_s20 + $0x70] sm:$0xff] }
  0x15   : > { %317 = vmatprep.subr.bf16.mxu0 %v866_v9  ;;  %833 = vmatprep.subr.bf16.mxu1 %v866_v9  ;;  %v199_v34 = vpack.c.bf16 %v190_v32, %v189_v31  ;;  %v192_v38 = vld [vmem:[%s1029_s20 + $0x78] sm:$0xff]  ;;  %v196_v39 = vpack.c.bf16 %v184_v36, %v183_v35 }
  0x16   : > { %v200_v40 = vpack.c.bf16 %v192_v38, %v191_v37 }
  0x18   : > { %318 = vmatpush1.bf16.msra.mxu0 %v868_v10  ;;  %841 = vmatpush1.bf16.msra.mxu1 %v868_v10 }
  0x19   : > { %319 = vmatprep.subr.bf16.mxu0 %v869_v11  ;;  %834 = vmatprep.subr.bf16.mxu1 %v869_v11 }
  0x1c   : > { %320 = vmatpush1.bf16.msra.mxu0 %v871_v12  ;;  %842 = vmatpush1.bf16.msra.mxu1 %v871_v12 }
  0x1d   : > { %321 = vmatprep.subr.bf16.mxu0 %v872_v13  ;;  %835 = vmatprep.subr.bf16.mxu1 %v872_v13 }
  0x20   : > { %322 = vmatpush1.bf16.msra.mxu0 %v874_v14  ;;  %843 = vmatpush1.bf16.msra.mxu1 %v874_v14 }
  0x21   : > { %323 = vmatprep.subr.bf16.mxu0 %v875_v15  ;;  %836 = vmatprep.subr.bf16.mxu1 %v875_v15 }
  0x24   : > { %324 = vmatpush1.bf16.msra.mxu0 %v877_v16  ;;  %844 = vmatpush1.bf16.msra.mxu1 %v877_v16 }
  0x27   : > { %342 = vmatmul.mubr.bf16.vlgmr.msra.gmra.mrb[0].mxu0 %v193_v21  ;;  %382 = vmatmul.mubr.bf16.vlgmr.msra.gmra.mrb[0].mxu1 %v197_v22 }
  0x28   : > { %351 = vmatprep.mubr.bf16.mxu0 %v950_v2  ;;  %391 = vmatprep.mubr.bf16.mxu1 %v950_v2 }
  0x2f   : > { %352 = vmatmul.mubr.bf16.gmra.mrb[4].mxu0 %v194_v27  ;;  %392 = vmatmul.mubr.bf16.gmra.mrb[4].mxu1 %v198_v28 }
  0x30   : > { %361 = vmatprep.mubr.bf16.mxu0 %v950_v2  ;;  %401 = vmatprep.mubr.bf16.mxu1 %v950_v2 }
  0x37   : > { %362 = vmatmul.mubr.bf16.gmra.mrb[8].mxu0 %v195_v33  ;;  %402 = vmatmul.mubr.bf16.gmra.mrb[8].mxu1 %v199_v34 }
  0x38   : > { %371 = vmatprep.mubr.bf16.mxu0 %v950_v2  ;;  %411 = vmatprep.mubr.bf16.mxu1 %v950_v2 }
  0x3f   : > { %372 = vmatmul.mubr.bf16.gmra.mrb[12].mxu0 %v196_v39  ;;  %412 = vmatmul.mubr.bf16.gmra.mrb[12].mxu1 %v200_v40 }
  0xfa   : > { %v343_v48 = vpop.f32.mrb[0].mxu0  ;;  %v383_v49 = vpop.f32.mrb[0].mxu1 }
  0xfb   : > { %v344_v50 = vadd.f32 %v343_v48, %v1062_v46  ;;  %v384_v51 = vadd.f32 %v383_v49, %v1062_v46  ;;  %v345_v52 = vpop.f32.mrb[1].mxu0  ;;  %v385_v53 = vpop.f32.mrb[1].mxu1 }
  0xfc   : > { %v1069_v54 = vadd.f32 %v345_v52, %v1064_v47  ;;  %v1072_v55 = vadd.f32 %v385_v53, %v1064_v47  ;;  %v347_v56 = vpop.f32.mrb[2].mxu0  ;;  %v387_v57 = vpop.f32.mrb[2].mxu1 }
  0xfd   : > { %v454_v58 = vmul.f32 0.044715, %v344_v50  ;;  %v470_v59 = vmul.f32 0.044715, %v384_v51  ;;  %v1077_v0 = vadd.f32 %v347_v56, %v1062_v46  ;;  %v1080_v1 = vadd.f32 %v387_v57, %v1062_v46  ;;  %v349_v2 = vpop.f32.mrb[3].mxu0  ;;  %v389_v3 = vpop.f32.mrb[3].mxu1 }
  0xfe   : > { %v455_v60 = vmul.f32 0.044715, %v1069_v54  ;;  %v471_v61 = vmul.f32 0.044715, %v1072_v55  ;;  %v1085_v6 = vadd.f32 %v349_v2, %v1064_v47  ;;  %v1093_v18 = vadd.f32 %v389_v3, %v1064_v47 }
  0xff   : > { %v486_v62 = vmul.f32 %v454_v58, %v344_v50  ;;  %v502_v63 = vmul.f32 %v470_v59, %v384_v51  ;;  %v456_v9 = vmul.f32 0.044715, %v1077_v0  ;;  %v472_v12 = vmul.f32 0.044715, %v1080_v1 }
 0x100   : > { %v487_v4 = vmul.f32 %v455_v60, %v1069_v54  ;;  %v503_v5 = vmul.f32 %v471_v61, %v1072_v55  ;;  %v457_v24 = vmul.f32 0.044715, %v1085_v6  ;;  %v1101_v27 = vmul.f32 0.5, %v344_v50 }
 0x101   : > { %v518_v7 = vmul.f32 %v486_v62, %v344_v50  ;;  %v534_v8 = vmul.f32 %v502_v63, %v384_v51  ;;  %v488_v17 = vmul.f32 %v456_v9, %v1077_v0  ;;  %v504_v23 = vmul.f32 %v472_v12, %v1080_v1 }
 0x102   : > { %v519_v10 = vmul.f32 %v487_v4, %v1069_v54  ;;  %v535_v11 = vmul.f32 %v503_v5, %v1072_v55  ;;  %v353_v13 = vpop.f32.mrb[4].mxu0  ;;  %v393_v14 = vpop.f32.mrb[4].mxu1  ;;  %v489_v35 = vmul.f32 %v457_v24, %v1085_v6  ;;  %v473_v38 = vmul.f32 0.044715, %v1093_v18 }
 0x103   : > { %v550_v15 = vadd.f32 %v518_v7, %v344_v50  ;;  %v566_v16 = vadd.f32 %v534_v8, %v384_v51  ;;  %v355_v19 = vpop.f32.mrb[5].mxu0  ;;  %v395_v20 = vpop.f32.mrb[5].mxu1  ;;  %v520_v30 = vmul.f32 %v488_v17, %v1077_v0  ;;  %v536_v34 = vmul.f32 %v504_v23, %v1080_v1 }
 0x104   : > { %v551_v21 = vadd.f32 %v519_v10, %v1069_v54  ;;  %v567_v22 = vadd.f32 %v535_v11, %v1072_v55  ;;  %v357_v25 = vpop.f32.mrb[6].mxu0  ;;  %v1099_v26 = vpop.f32.mrb[6].mxu1  ;;  %v1113_v39 = vadd.f32 %v353_v13, %v1062_v46  ;;  %v521_v41 = vmul.f32 %v489_v35, %v1085_v6 }
 0x105   : > { %v582_v28 = vmul.f32 0.7978846, %v550_v15  ;;  %v598_v29 = vmul.f32 0.7978846, %v566_v16  ;;  %v1104_v31 = vpop.f32.mrb[7].mxu0  ;;  %v1108_v36 = vpop.f32.mrb[7].mxu1  ;;  %v552_v37 = vadd.f32 %v520_v30, %v1077_v0  ;;  %v568_v40 = vadd.f32 %v536_v34, %v1080_v1 }
 0x106   : > { %v583_v32 = vmul.f32 0.7978846, %v551_v21  ;;  %v599_v33 = vmul.f32 0.7978846, %v567_v22  ;;  %v1118_v42 = vadd.f32 %v393_v14, %v1062_v46  ;;  %v1120_v43 = vmul.f32 0.5, %v384_v51 }
 0x107   : > { %878 = vtanh.f32 %v582_v28  ;;  %v584_v44 = vmul.f32 0.7978846, %v552_v37  ;;  %v505_v45 = vmul.f32 %v473_v38, %v1093_v18  ;;  %v600_v48 = vmul.f32 0.7978846, %v568_v40 }
 0x108   : > { %880 = vtanh.f32 %v598_v29  ;;  %v553_v49 = vadd.f32 %v521_v41, %v1085_v6  ;;  %v458_v50 = vmul.f32 0.044715, %v1113_v39  ;;  %v1130_v56 = vmul.f32 0.5, %v1069_v54 }
 0x109   : > { %882 = vtanh.f32 %v583_v32  ;;  %v537_v51 = vmul.f32 %v505_v45, %v1093_v18  ;;  %v474_v57 = vmul.f32 0.044715, %v1118_v42  ;;  %v1140_v62 = vadd.f32 %v355_v19, %v1064_v47 }
 0x10a   : > { %884 = vtanh.f32 %v599_v33  ;;  %v1125_v52 = vpop.f32.mrb[8].mxu0  ;;  %v1127_v53 = vpop.f32.mrb[8].mxu1  ;;  %v585_v60 = vmul.f32 0.7978846, %v553_v49  ;;  %v490_v61 = vmul.f32 %v458_v50, %v1113_v39  ;;  %v1149_v4 = vadd.f32 %v395_v20, %v1064_v47 }
 0x10b   : > { %886 = vtanh.f32 %v584_v44  ;;  %v1134_v58 = vpop.f32.mrb[9].mxu0  ;;  %v1136_v59 = vpop.f32.mrb[9].mxu1  ;;  %v569_v2 = vadd.f32 %v537_v51, %v1093_v18  ;;  %v506_v3 = vmul.f32 %v474_v57, %v1118_v42  ;;  %v1152_v5 = vadd.f32 %v357_v25, %v1062_v46 }
 0x10c   : > { %888 = vtanh.f32 %v600_v48  ;;  %v1142_v63 = vpop.f32.mrb[10].mxu0  ;;  %v1144_v54 = vpop.f32.mrb[10].mxu1  ;;  %v439_v9 = vmul.f32 0.5, %v1072_v55  ;;  %v522_v10 = vmul.f32 %v490_v61, %v1113_v39  ;;  %v459_v11 = vmul.f32 0.044715, %v1140_v62 }
 0x10d   : > { %v1154_v7 = vpop.f32.mrb[11].mxu0  ;;  %v1156_v8 = vpop.f32.mrb[11].mxu1  ;;  %890 = vtanh.f32 %v585_v60  ;;  %v424_v12 = vmul.f32 0.5, %v1077_v0  ;;  %v601_v13 = vmul.f32 0.7978846, %v569_v2  ;;  %v538_v14 = vmul.f32 %v506_v3, %v1118_v42 }
 0x10e   : > { %v475_v15 = vmul.f32 0.044715, %v1149_v4  ;;  %v440_v16 = vmul.f32 0.5, %v1080_v1  ;;  %v554_v17 = vadd.f32 %v522_v10, %v1113_v39  ;;  %v491_v19 = vmul.f32 %v459_v11, %v1140_v62 }
 0x10f   : > { %v460_v55 = vmul.f32 0.044715, %v1152_v5  ;;  %v425_v21 = vmul.f32 0.5, %v1085_v6  ;;  %892 = vtanh.f32 %v601_v13  ;;  %v570_v0 = vadd.f32 %v538_v14, %v1118_v42 }
 0x110   : > { %v507_v22 = vmul.f32 %v475_v15, %v1149_v4  ;;  %v586_v25 = vmul.f32 0.7978846, %v554_v17  ;;  %v523_v28 = vmul.f32 %v491_v19, %v1140_v62  ;;  %v1186_v35 = vadd.f32 %v1099_v26, %v1062_v46 }
 0x111   : > { %v879_v20 = vpop.eup %878  ;;  %v492_v1 = vmul.f32 %v460_v55, %v1152_v5  ;;  %v602_v33 = vmul.f32 0.7978846, %v570_v0 }
 0x112   : > { %v881_v23 = vpop.eup %880  ;;  %v646_v24 = vadd.f32 1.0, %v879_v20  ;;  %v1174_v29 = vpop.f32.mrb[12].mxu0  ;;  %v539_v34 = vmul.f32 %v507_v22, %v1149_v4  ;;  %894 = vtanh.f32 %v586_v25  ;;  %v555_v45 = vadd.f32 %v523_v28, %v1140_v62 }
 0x113   : > { %v1176_v30 = vpop.f32.mrb[12].mxu1  ;;  %v883_v32 = vpop.eup %882  ;;  %v662_v6 = vadd.f32 1.0, %v881_v23  ;;  %896 = vtanh.f32 %v602_v33  ;;  %v524_v11 = vmul.f32 %v492_v1, %v1152_v5  ;;  %v476_v15 = vmul.f32 0.044715, %v1186_v35 }
 0x114   : > { %v1188_v37 = vpop.f32.mrb[13].mxu0  ;;  %v1190_v38 = vpop.f32.mrb[13].mxu1  ;;  %v678_v41 = vmul.f32 %v646_v24, %v1101_v27  ;;  %v647_v44 = vadd.f32 1.0, %v883_v32  ;;  %v571_v57 = vadd.f32 %v539_v34, %v1149_v4  ;;  %v587_v10 = vmul.f32 0.7978846, %v555_v45 }
 0x115   : > { %v885_v40 = vpop.eup %884  ;;  %v1194_v48 = vpop.f32.mrb[14].mxu0  ;;  %v694_v26 = vmul.f32 %v662_v6, %v1120_v43  ;;  %v556_v55 = vadd.f32 %v524_v11, %v1152_v5  ;;  %v441_v22 = vmul.f32 0.5, %v1093_v18  ;;  %v1222_v24 = vadd.f32 %v1108_v36, %v1064_v47 }
 0x116   : > { %v1196_v49 = vpop.f32.mrb[14].mxu1  ;;  %v887_v50 = vpop.eup %886  ;;  %v663_v51 = vadd.f32 1.0, %v885_v40  ;;  %710 = vst [vmem:[%s1181_s30] sm:$0xff] %v678_v41  ;;  %v679_v2 = vmul.f32 %v647_v44, %v1130_v56  ;;  %v603_v14 = vmul.f32 0.7978846, %v571_v57  ;;  %898 = vtanh.f32 %v587_v10 }
 0x117   : > { %v1200_v60 = vpop.f32.mrb[15].mxu0  ;;  %v1202_v27 = vpop.f32.mrb[15].mxu1  ;;  %v648_v3 = vadd.f32 1.0, %v887_v50  ;;  %726 = vst [vmem:[%s1181_s30 + $0x80] sm:$0xff] %v694_v26  ;;  %v1213_v56 = vadd.f32 %v1104_v31, %v1064_v47  ;;  %v588_v23 = vmul.f32 0.7978846, %v556_v55  ;;  %v1228_v28 = vadd.f32 %v1125_v52, %v1062_v46 }
 0x118   : > { %v889_v61 = vpop.eup %888  ;;  %v695_v43 = vmul.f32 %v663_v51, %v439_v9  ;;  %711 = vst [vmem:[%s1181_s30 + $0x8] sm:$0xff] %v679_v2  ;;  %900 = vtanh.f32 %v603_v14  ;;  %v508_v9 = vmul.f32 %v476_v15, %v1186_v35  ;;  %v1232_v1 = vadd.f32 %v1127_v53, %v1062_v46 }
 0x119   : > { %v664_v13 = vadd.f32 1.0, %v889_v61  ;;  %v891_v17 = vpop.eup %890  ;;  %v680_v19 = vmul.f32 %v648_v3, %v424_v12  ;;  %v461_v12 = vmul.f32 0.044715, %v1213_v56  ;;  %v426_v32 = vmul.f32 0.5, %v1113_v39 }
 0x11a   : > { %727 = vst [vmem:[%s1181_s30 + $0x88] sm:$0xff] %v695_v43  ;;  %v649_v0 = vadd.f32 1.0, %v891_v17  ;;  %v893_v25 = vpop.eup %892  ;;  %902 = vtanh.f32 %v588_v23  ;;  %v477_v33 = vmul.f32 0.044715, %v1222_v24  ;;  %v462_v52 = vmul.f32 0.044715, %v1228_v28 }
 0x11b   : > { %v696_v20 = vmul.f32 %v664_v13, %v440_v16  ;;  %712 = vst [vmem:[%s1181_s30 + $0x10] sm:$0xff] %v680_v19  ;;  %v540_v16 = vmul.f32 %v508_v9, %v1186_v35  ;;  %v665_v18 = vadd.f32 1.0, %v893_v25  ;;  %v493_v36 = vmul.f32 %v461_v12, %v1213_v56 }
 0x11c   : > { %v681_v31 = vmul.f32 %v649_v0, %v425_v21  ;;  %v442_v21 = vmul.f32 0.5, %v1118_v42  ;;  %v895_v34 = vpop.eup %894  ;;  %v427_v53 = vmul.f32 0.5, %v1140_v62  ;;  %v478_v39 = vmul.f32 0.044715, %v1232_v1 }
 0x11d   : > { %728 = vst [vmem:[%s1181_s30 + $0x90] sm:$0xff] %v696_v20  ;;  %v572_v6 = vadd.f32 %v540_v16, %v1186_v35  ;;  %v697_v40 = vmul.f32 %v665_v18, %v441_v22  ;;  %v525_v41 = vmul.f32 %v493_v36, %v1213_v56  ;;  %v897_v44 = vpop.eup %896  ;;  %v650_v45 = vadd.f32 1.0, %v895_v34 }
 0x11e   : > { %713 = vst [vmem:[%s1181_s30 + $0x18] sm:$0xff] %v681_v31  ;;  %v509_v26 = vmul.f32 %v477_v33, %v1222_v24  ;;  %v494_v42 = vmul.f32 %v462_v52, %v1228_v28  ;;  %v666_v51 = vadd.f32 1.0, %v897_v44  ;;  %v510_v61 = vmul.f32 %v478_v39, %v1232_v1 }
 0x11f   : > { %v604_v50 = vmul.f32 0.7978846, %v572_v6  ;;  %729 = vst [vmem:[%s1181_s30 + $0x98] sm:$0xff] %v697_v40  ;;  %v557_v57 = vadd.f32 %v525_v41, %v1213_v56  ;;  %v1251_v62 = vadd.f32 %v1134_v58, %v1064_v47  ;;  %v682_v2 = vmul.f32 %v650_v45, %v426_v32 }
 0x120   : > { %v541_v3 = vmul.f32 %v509_v26, %v1222_v24  ;;  %v526_v10 = vmul.f32 %v494_v42, %v1228_v28  ;;  %v899_v11 = vpop.eup %898  ;;  %v698_v43 = vmul.f32 %v666_v51, %v442_v21  ;;  %v443_v13 = vmul.f32 0.5, %v1149_v4 }
 0x121   : > { %904 = vtanh.f32 %v604_v50  ;;  %v589_v14 = vmul.f32 0.7978846, %v557_v57  ;;  %v542_v15 = vmul.f32 %v510_v61, %v1232_v1  ;;  %714 = vst [vmem:[%s1181_s30 + $0x20] sm:$0xff] %v682_v2  ;;  %v651_v19 = vadd.f32 1.0, %v899_v11 }
 0x122   : > { %v901_v17 = vpop.eup %900  ;;  %v573_v58 = vadd.f32 %v541_v3, %v1222_v24  ;;  %v558_v55 = vadd.f32 %v526_v10, %v1228_v28  ;;  %v463_v20 = vmul.f32 0.044715, %v1251_v62  ;;  %730 = vst [vmem:[%s1181_s30 + $0xa0] sm:$0xff] %v698_v43  ;;  %v1265_v4 = vadd.f32 %v1136_v59, %v1064_v47 }
 0x123   : > { %v667_v0 = vadd.f32 1.0, %v901_v17  ;;  %906 = vtanh.f32 %v589_v14  ;;  %v574_v9 = vadd.f32 %v542_v15, %v1232_v1  ;;  %v683_v22 = vmul.f32 %v651_v19, %v427_v53 }
 0x124   : > { %v605_v23 = vmul.f32 0.7978846, %v573_v58  ;;  %v590_v12 = vmul.f32 0.7978846, %v558_v55  ;;  %v495_v25 = vmul.f32 %v463_v20, %v1251_v62  ;;  %v903_v31 = vpop.eup %902  ;;  %v428_v18 = vmul.f32 0.5, %v1152_v5 }
 0x125   : > { %v699_v16 = vmul.f32 %v667_v0, %v443_v13  ;;  %v606_v32 = vmul.f32 0.7978846, %v574_v9  ;;  %v479_v36 = vmul.f32 0.044715, %v1265_v4  ;;  %715 = vst [vmem:[%s1181_s30 + $0x28] sm:$0xff] %v683_v22  ;;  %v652_v21 = vadd.f32 1.0, %v903_v31 }
 0x126   : > { %908 = vtanh.f32 %v605_v23  ;;  %v527_v6 = vmul.f32 %v495_v25, %v1251_v62  ;;  %v1274_v59 = vadd.f32 %v1142_v63, %v1062_v46  ;;  %v1280_v5 = vadd.f32 %v1144_v54, %v1062_v46 }
 0x127   : > { %731 = vst [vmem:[%s1181_s30 + $0xa8] sm:$0xff] %v699_v16  ;;  %910 = vtanh.f32 %v590_v12  ;;  %v511_v33 = vmul.f32 %v479_v36, %v1265_v4  ;;  %v1284_v52 = vadd.f32 %v1154_v7, %v1064_v47  ;;  %v684_v34 = vmul.f32 %v652_v21, %v428_v18 }
 0x128   : > { %v444_v40 = vmul.f32 0.5, %v1186_v35  ;;  %912 = vtanh.f32 %v606_v32  ;;  %v559_v53 = vadd.f32 %v527_v6, %v1251_v62  ;;  %v429_v63 = vmul.f32 0.5, %v1213_v56 }
 0x129   : > { %v543_v41 = vmul.f32 %v511_v33, %v1265_v4  ;;  %v464_v39 = vmul.f32 0.044715, %v1274_v59  ;;  %v480_v44 = vmul.f32 0.044715, %v1280_v5  ;;  %716 = vst [vmem:[%s1181_s30 + $0x30] sm:$0xff] %v684_v34  ;;  %v445_v45 = vmul.f32 0.5, %v1222_v24 }
 0x12a   : > { %v591_v7 = vmul.f32 0.7978846, %v559_v53  ;;  %v465_v50 = vmul.f32 0.044715, %v1284_v52  ;;  %v1297_v35 = vadd.f32 %v1156_v8, %v1064_v47  ;;  %v430_v57 = vmul.f32 0.5, %v1228_v28 }
 0x12b   : > { %v905_v54 = vpop.eup %904  ;;  %v575_v56 = vadd.f32 %v543_v41, %v1265_v4  ;;  %v496_v42 = vmul.f32 %v464_v39, %v1274_v59  ;;  %v512_v51 = vmul.f32 %v480_v44, %v1280_v5  ;;  %v1311_v28 = vadd.f32 %v1174_v29, %v1062_v46 }
 0x12c   : > { %v668_v26 = vadd.f32 1.0, %v905_v54  ;;  %914 = vtanh.f32 %v591_v7  ;;  %v497_v24 = vmul.f32 %v465_v50, %v1284_v52  ;;  %v481_v61 = vmul.f32 0.044715, %v1297_v35 }
 0x12d   : > { %v907_v2 = vpop.eup %906  ;;  %v607_v10 = vmul.f32 0.7978846, %v575_v56  ;;  %v528_v8 = vmul.f32 %v496_v42, %v1274_v59  ;;  %v544_v11 = vmul.f32 %v512_v51, %v1280_v5  ;;  %v1318_v19 = vadd.f32 %v1176_v30, %v1062_v46 }
 0x12e   : > { %v700_v3 = vmul.f32 %v668_v26, %v444_v40  ;;  %v653_v43 = vadd.f32 1.0, %v907_v2  ;;  %v529_v13 = vmul.f32 %v497_v24, %v1284_v52  ;;  %v513_v14 = vmul.f32 %v481_v61, %v1297_v35 }
 0x12f   : > { %916 = vtanh.f32 %v607_v10  ;;  %v560_v15 = vadd.f32 %v528_v8, %v1274_v59  ;;  %v576_v17 = vadd.f32 %v544_v11, %v1280_v5  ;;  %v446_v20 = vmul.f32 0.5, %v1232_v1 }
 0x130   : > { %732 = vst [vmem:[%s1181_s30 + $0xb0] sm:$0xff] %v700_v3  ;;  %v909_v58 = vpop.eup %908  ;;  %v685_v55 = vmul.f32 %v653_v43, %v429_v63  ;;  %v561_v0 = vadd.f32 %v529_v13, %v1284_v52  ;;  %v545_v29 = vmul.f32 %v513_v14, %v1297_v35  ;;  %v431_v23 = vmul.f32 0.5, %v1251_v62 }
 0x131   : > { %v911_v9 = vpop.eup %910  ;;  %v669_v22 = vadd.f32 1.0, %v909_v58  ;;  %v592_v12 = vmul.f32 0.7978846, %v560_v15  ;;  %v608_v25 = vmul.f32 0.7978846, %v576_v17  ;;  %v1333_v53 = vadd.f32 %v1188_v37, %v1064_v47 }
 0x132   : > { %v913_v31 = vpop.eup %912  ;;  %717 = vst [vmem:[%s1181_s30 + $0x38] sm:$0xff] %v685_v55  ;;  %v654_v16 = vadd.f32 1.0, %v911_v9  ;;  %v593_v30 = vmul.f32 0.7978846, %v561_v0  ;;  %v577_v18 = vadd.f32 %v545_v29, %v1297_v35  ;;  %v466_v1 = vmul.f32 0.044715, %v1311_v28 }
 0x133   : > { %v701_v32 = vmul.f32 %v669_v22, %v445_v45  ;;  %v670_v36 = vadd.f32 1.0, %v913_v31  ;;  %918 = vtanh.f32 %v592_v12  ;;  %v482_v21 = vmul.f32 0.044715, %v1318_v19 }
 0x134   : > { %v686_v6 = vmul.f32 %v654_v16, %v430_v57  ;;  %920 = vtanh.f32 %v608_v25  ;;  %v609_v62 = vmul.f32 0.7978846, %v577_v18  ;;  %v498_v33 = vmul.f32 %v466_v1, %v1311_v28 }
 0x135   : > { %733 = vst [vmem:[%s1181_s30 + $0xb8] sm:$0xff] %v701_v32  ;;  %v702_v34 = vmul.f32 %v670_v36, %v446_v20  ;;  %922 = vtanh.f32 %v593_v30  ;;  %v514_v40 = vmul.f32 %v482_v21, %v1318_v19  ;;  %v1339_v39 = vadd.f32 %v1190_v38, %v1064_v47 }
 0x136   : > { %v915_v63 = vpop.eup %914  ;;  %718 = vst [vmem:[%s1181_s30 + $0x40] sm:$0xff] %v686_v6  ;;  %924 = vtanh.f32 %v609_v62  ;;  %v530_v41 = vmul.f32 %v498_v33, %v1311_v28  ;;  %v1343_v44 = vadd.f32 %v1194_v48, %v1062_v46  ;;  %v447_v45 = vmul.f32 0.5, %v1265_v4 }
 0x137   : > { %734 = vst [vmem:[%s1181_s30 + $0xc0] sm:$0xff] %v702_v34  ;;  %v655_v54 = vadd.f32 1.0, %v915_v63  ;;  %v546_v37 = vmul.f32 %v514_v40, %v1318_v19  ;;  %v467_v7 = vmul.f32 0.044715, %v1333_v53  ;;  %v432_v50 = vmul.f32 0.5, %v1274_v59 }
 0x138   : > { %v448_v26 = vmul.f32 0.5, %v1280_v5  ;;  %v562_v38 = vadd.f32 %v530_v41, %v1311_v28  ;;  %v483_v56 = vmul.f32 0.044715, %v1339_v39  ;;  %v468_v4 = vmul.f32 0.044715, %v1343_v44 }
 0x139   : > { %v917_v42 = vpop.eup %916  ;;  %v687_v48 = vmul.f32 %v655_v54, %v431_v23  ;;  %v578_v51 = vadd.f32 %v546_v37, %v1318_v19  ;;  %v499_v57 = vmul.f32 %v467_v7, %v1333_v53  ;;  %v1359_v59 = vadd.f32 %v1196_v49, %v1062_v46 }
 0x13a   : > { %v671_v24 = vadd.f32 1.0, %v917_v42  ;;  %v594_v61 = vmul.f32 0.7978846, %v562_v38  ;;  %v515_v2 = vmul.f32 %v483_v56, %v1339_v39  ;;  %v500_v10 = vmul.f32 %v468_v4, %v1343_v44 }
 0x13b   : > { %719 = vst [vmem:[%s1181_s30 + $0x48] sm:$0xff] %v687_v48  ;;  %v610_v5 = vmul.f32 0.7978846, %v578_v51  ;;  %v531_v3 = vmul.f32 %v499_v57, %v1333_v53  ;;  %v1366_v8 = vadd.f32 %v1200_v60, %v1064_v47  ;;  %v433_v43 = vmul.f32 0.5, %v1284_v52 }
 0x13c   : > { %v703_v11 = vmul.f32 %v671_v24, %v447_v45  ;;  %926 = vtanh.f32 %v594_v61  ;;  %v547_v13 = vmul.f32 %v515_v2, %v1339_v39  ;;  %v532_v49 = vmul.f32 %v500_v10, %v1343_v44 }
 0x13d   : > { %v919_v14 = vpop.eup %918  ;;  %928 = vtanh.f32 %v610_v5  ;;  %v563_v46 = vadd.f32 %v531_v3, %v1333_v53  ;;  %v484_v15 = vmul.f32 0.044715, %v1359_v59  ;;  %v449_v60 = vmul.f32 0.5, %v1297_v35 }
 0x13e   : > { %v921_v17 = vpop.eup %920  ;;  %735 = vst [vmem:[%s1181_s30 + $0xc8] sm:$0xff] %v703_v11  ;;  %v656_v58 = vadd.f32 1.0, %v919_v14  ;;  %v579_v55 = vadd.f32 %v547_v13, %v1339_v39  ;;  %v469_v52 = vmul.f32 0.044715, %v1366_v8  ;;  %v564_v9 = vadd.f32 %v532_v49, %v1343_v44 }
 0x13f   : > { %v923_v20 = vpop.eup %922  ;;  %v672_v0 = vadd.f32 1.0, %v921_v17  ;;  %v595_v29 = vmul.f32 0.7978846, %v563_v46  ;;  %v516_v22 = vmul.f32 %v484_v15, %v1359_v59  ;;  %v420_v6 = vadd.f32 %v1202_v27, %v1064_v47 }
 0x140   : > { %v925_v23 = vpop.eup %924  ;;  %v688_v12 = vmul.f32 %v656_v58, %v432_v50  ;;  %v657_v25 = vadd.f32 1.0, %v923_v20  ;;  %v611_v31 = vmul.f32 0.7978846, %v579_v55  ;;  %v501_v35 = vmul.f32 %v469_v52, %v1366_v8 }
 0x141   : > { %v704_v16 = vmul.f32 %v672_v0, %v448_v26  ;;  %v673_v30 = vadd.f32 1.0, %v925_v23  ;;  %930 = vtanh.f32 %v595_v29  ;;  %v596_v18 = vmul.f32 0.7978846, %v564_v9 }
 0x142   : > { %720 = vst [vmem:[%s1181_s30 + $0x50] sm:$0xff] %v688_v12  ;;  %v689_v1 = vmul.f32 %v657_v25, %v433_v43  ;;  %932 = vtanh.f32 %v611_v31  ;;  %v548_v32 = vmul.f32 %v516_v22, %v1359_v59  ;;  %v533_v36 = vmul.f32 %v501_v35, %v1366_v8 }
 0x143   : > { %736 = vst [vmem:[%s1181_s30 + $0xd0] sm:$0xff] %v704_v16  ;;  %v705_v21 = vmul.f32 %v673_v30, %v449_v60  ;;  %934 = vtanh.f32 %v596_v18  ;;  %v485_v34 = vmul.f32 0.044715, %v420_v6  ;;  %v434_v45 = vmul.f32 0.5, %v1311_v28 }
 0x144   : > { %721 = vst [vmem:[%s1181_s30 + $0x58] sm:$0xff] %v689_v1  ;;  %v580_v62 = vadd.f32 %v548_v32, %v1359_v59  ;;  %v565_v33 = vadd.f32 %v533_v36, %v1366_v8  ;;  %v450_v50 = vmul.f32 0.5, %v1318_v19  ;;  %v435_v28 = vmul.f32 0.5, %v1333_v53 }
 0x145   : > { %737 = vst [vmem:[%s1181_s30 + $0xd8] sm:$0xff] %v705_v21  ;;  %v517_v7 = vmul.f32 %v485_v34, %v420_v6  ;;  %v451_v19 = vmul.f32 0.5, %v1339_v39  ;;  %v436_v2 = vmul.f32 0.5, %v1343_v44  ;;  %v452_v43 = vmul.f32 0.5, %v1359_v59 }
 0x146   : > { %v927_v40 = vpop.eup %926  ;;  %v612_v63 = vmul.f32 0.7978846, %v580_v62  ;;  %v597_v41 = vmul.f32 0.7978846, %v565_v33  ;;  %v437_v13 = vmul.f32 0.5, %v1366_v8  ;;  %v453_v15 = vmul.f32 0.5, %v420_v6 }
 0x147   : > { %v929_v54 = vpop.eup %928  ;;  %v658_v37 = vadd.f32 1.0, %v927_v40  ;;  %v549_v26 = vmul.f32 %v517_v7, %v420_v6 }
 0x148   : > { %v674_v47 = vadd.f32 1.0, %v929_v54  ;;  %936 = vtanh.f32 %v612_v63 }
 0x149   : > { %v690_v27 = vmul.f32 %v658_v37, %v434_v45  ;;  %938 = vtanh.f32 %v597_v41  ;;  %v581_v42 = vadd.f32 %v549_v26, %v420_v6 }
 0x14a   : > { %v706_v38 = vmul.f32 %v674_v47, %v450_v50 }
 0x14b   : > { %v931_v56 = vpop.eup %930  ;;  %722 = vst [vmem:[%s1181_s30 + $0x60] sm:$0xff] %v690_v27  ;;  %v613_v24 = vmul.f32 0.7978846, %v581_v42 }
 0x14c   : > { %v933_v48 = vpop.eup %932  ;;  %738 = vst [vmem:[%s1181_s30 + $0xe0] sm:$0xff] %v706_v38  ;;  %v659_v51 = vadd.f32 1.0, %v931_v56 }
 0x14d   : > { %v935_v57 = vpop.eup %934  ;;  %v675_v4 = vadd.f32 1.0, %v933_v48  ;;  %940 = vtanh.f32 %v613_v24 }
 0x14e   : > { %v691_v61 = vmul.f32 %v659_v51, %v435_v28  ;;  %v660_v5 = vadd.f32 1.0, %v935_v57 }
 0x14f   : > { %v707_v3 = vmul.f32 %v675_v4, %v451_v19 }
 0x150   : > { %723 = vst [vmem:[%s1181_s30 + $0x68] sm:$0xff] %v691_v61  ;;  %v692_v10 = vmul.f32 %v660_v5, %v436_v2 }
 0x151   : > { %739 = vst [vmem:[%s1181_s30 + $0xe8] sm:$0xff] %v707_v3 }
 0x152   : > { %v937_v11 = vpop.eup %936  ;;  %724 = vst [vmem:[%s1181_s30 + $0x70] sm:$0xff] %v692_v10 }
 0x153   : > { %v939_v53 = vpop.eup %938  ;;  %v676_v39 = vadd.f32 1.0, %v937_v11 }
 0x154   : > { %v661_v14 = vadd.f32 1.0, %v939_v53 }
 0x155   : > { %v708_v46 = vmul.f32 %v676_v39, %v452_v43 }
 0x156   : > { %v693_v44 = vmul.f32 %v661_v14, %v437_v13 }
 0x157   : > { %740 = vst [vmem:[%s1181_s30 + $0xf0] sm:$0xff] %v708_v46  ;;  %v941_v49 = vpop.eup %940 }
 0x158   : > { %725 = vst [vmem:[%s1181_s30 + $0x78] sm:$0xff] %v693_v44  ;;  %v677_v17 = vadd.f32 1.0, %v941_v49 }
 0x15a   : > { %v709_v58 = vmul.f32 %v677_v17, %v453_v15 }
 0x15c   : > { %741 = vst [vmem:[%s1181_s30 + $0xf8] sm:$0xff] %v709_v58 }
 0x15d PF: > { %s13_s12 = sadd.s32 1, %s948_s12  }
 0x15e   : > { %p10_p4 = scmp.ge.s32.totalorder %s13_s12, 4  }
 0x160   :  { %12 = sbr.rel (!%p10_p4) target bundleno = 1 (0x1), region = 62 }

// kernel: bert_legal_pretraining_forward.32
= control target key start
LH: loop header
LB: loop body
LE: loop exit
PB: predicated region body
PF: predicated region fallthrough
CT: control target
= control target key end

     0   :  { %s567_s12 = smov 0   ;;  %s654_s0 = inlined_call_operand.vmem [shape: f32[256,128], index: 0, kind: input, shape index: {}]   ;;  %s655_s1 = inlined_call_operand.vmem [shape: bf16[128,128], index: 1, kind: input, shape index: {}]   ;;  %s656_s2 = inlined_call_operand.vmem [shape: f32[1,128], index: 2, kind: input, shape index: {}]   ;;  %s657_s3 = inlined_call_operand.vmem [shape: f32[256,128], index: 3, kind: output, shape index: {}]  }
   0x1 LB: > { %s439_s13 = sadd.s32 4294967295, %s545_s12   ;;  %p443_p0 = scmp.ge.s32.totalorder %s545_s12, 1  ;;  %s545_s12 = sphi %s567_s12, %s13_s12  }
   0x2   : > { %p138_p1 = scmp.lt.s32.totalorder %s545_s12, 3 }
   0x4   : > { %p139_p2 = pnand %p443_p0, %p138_p1 }
   0x5   : > { %v531_v0 = vld [vmem:[%s655_s1] sm:$0xff] (!%p139_p2)   ;;  %s444_s16 = sshll.u32 (!%p139_p2), %s439_s13, 4  ;;  %v532_v1 = vld [vmem:[%s655_s1 + $0x8] sm:$0xff] (!%p139_p2)   ;;  %v533_v2 = vld [vmem:[%s655_s1 + $0x10] sm:$0xff] (!%p139_p2)  }
   0x6   : > { %142 = sbr.rel (%p139_p2) target bundleno = 265 (0x109), region = 32  ;;  %p163_p3 = scmp.lt.s32.totalorder (!%p139_p2), %s444_s16, 31  ;;  %475 = vmatprep.subr.bf16.mxu0 (!%p139_p2), %v531_v0  ;;  %507 = vmatprep.subr.bf16.mxu1 (!%p139_p2), %v531_v0  ;;  %v534_v3 = vld [vmem:[%s655_s1 + $0x18] sm:$0xff] (!%p139_p2)   ;;  %v535_v10 = vld [vmem:[%s655_s1 + $0x20] sm:$0xff] (!%p139_p2)   ;;  %v536_v11 = vld [vmem:[%s655_s1 + $0x28] sm:$0xff] (!%p139_p2)  }
   0x7   : > { %476 = vmatpush3.bf16.msra.mxu0 (!%p139_p2), %v531_v0  ;;  %515 = vmatpush3.bf16.msra.mxu1 (!%p139_p2), %v531_v0  ;;  %v537_v12 = vld [vmem:[%s655_s1 + $0x30] sm:$0xff] (!%p139_p2)   ;;  %v538_v13 = vld [vmem:[%s655_s1 + $0x38] sm:$0xff] (!%p139_p2)   ;;  %v448_v32 = vld [vmem:[%s656_s2] ss:$0 sm:$0xff] (!%p139_p2) }
   0x8   : > { %477 = vmatprep.subr.bf16.mxu0 (!%p139_p2), %v532_v1  ;;  %508 = vmatprep.subr.bf16.mxu1 (!%p139_p2), %v532_v1 }
   0xb   : > { %478 = vmatpush3.bf16.msra.mxu0 (!%p139_p2), %v532_v1  ;;  %516 = vmatpush3.bf16.msra.mxu1 (!%p139_p2), %v532_v1 }
   0xc   : > { %479 = vmatprep.subr.bf16.mxu0 (!%p139_p2), %v533_v2  ;;  %509 = vmatprep.subr.bf16.mxu1 (!%p139_p2), %v533_v2 }
   0xd   : > { %s659_s16 = smov (!%p163_p3, %s444_s16), 31 }
   0xe   : > { %s445_s21 = sshll.u32 %s659_s16, 3 }
   0xf   : > { %s592_s24 = scalar_lea.vmem %s654_s0, %s445_s21  ;;  %480 = vmatpush3.bf16.msra.mxu0 %v533_v2  ;;  %517 = vmatpush3.bf16.msra.mxu1 %v533_v2  ;;  %s633_s13 = scalar_lea.vmem %s657_s3, %s445_s21 }
  0x10   : > { %v175_v4 = vld [vmem:[%s592_s24] sm:$0xff]  ;;  %v176_v5 = vld [vmem:[%s592_s24 + $0x8] sm:$0xff]  ;;  %481 = vmatprep.subr.bf16.mxu0 %v534_v3  ;;  %510 = vmatprep.subr.bf16.mxu1 %v534_v3  ;;  %v177_v14 = vld [vmem:[%s592_s24 + $0x10] sm:$0xff] }
  0x11   : > { %v183_v6 = vld [vmem:[%s592_s24 + $0x40] sm:$0xff]  ;;  %v191_v7 = vpack.c.bf16 %v176_v5, %v175_v4  ;;  %v184_v8 = vld [vmem:[%s592_s24 + $0x48] sm:$0xff]  ;;  %v178_v15 = vld [vmem:[%s592_s24 + $0x18] sm:$0xff] }
  0x12   : > { %v195_v9 = vpack.c.bf16 %v184_v8, %v183_v6  ;;  %v185_v16 = vld [vmem:[%s592_s24 + $0x50] sm:$0xff]  ;;  %v186_v17 = vld [vmem:[%s592_s24 + $0x58] sm:$0xff]  ;;  %v179_v18 = vld [vmem:[%s592_s24 + $0x20] sm:$0xff]  ;;  %v192_v22 = vpack.c.bf16 %v178_v15, %v177_v14 }
  0x13   : > { %491 = vmatprep.mubr.bf16.mxu0 %v191_v7  ;;  %482 = vmatpush3.bf16.msra.mxu0 %v534_v3  ;;  %v180_v19 = vld [vmem:[%s592_s24 + $0x28] sm:$0xff]  ;;  %v187_v20 = vld [vmem:[%s592_s24 + $0x60] sm:$0xff]  ;;  %v196_v23 = vpack.c.bf16 %v186_v17, %v185_v16  ;;  %v181_v26 = vld [vmem:[%s592_s24 + $0x30] sm:$0xff] }
  0x14   : > { %499 = vmatprep.mubr.bf16.mxu1 %v195_v9  ;;  %518 = vmatpush3.bf16.msra.mxu1 %v534_v3  ;;  %v188_v21 = vld [vmem:[%s592_s24 + $0x68] sm:$0xff]  ;;  %v193_v24 = vpack.c.bf16 %v180_v19, %v179_v18  ;;  %v182_v27 = vld [vmem:[%s592_s24 + $0x38] sm:$0xff]  ;;  %v189_v28 = vld [vmem:[%s592_s24 + $0x70] sm:$0xff] }
  0x15   : > { %483 = vmatprep.subr.bf16.mxu0 %v535_v10  ;;  %511 = vmatprep.subr.bf16.mxu1 %v535_v10  ;;  %v197_v25 = vpack.c.bf16 %v188_v21, %v187_v20  ;;  %v190_v29 = vld [vmem:[%s592_s24 + $0x78] sm:$0xff]  ;;  %v194_v30 = vpack.c.bf16 %v182_v27, %v181_v26 }
  0x16   : > { %v198_v31 = vpack.c.bf16 %v190_v29, %v189_v28 }
  0x17   : > { %484 = vmatpush3.bf16.msra.mxu0 %v535_v10 }
  0x18   : > { %519 = vmatpush3.bf16.msra.mxu1 %v535_v10  ;;  %485 = vmatprep.subr.bf16.mxu0 %v536_v11 }
  0x19   : > { %512 = vmatprep.subr.bf16.mxu1 %v536_v11 }
  0x1b   : > { %486 = vmatpush3.bf16.msra.mxu0 %v536_v11 }
  0x1c   : > { %520 = vmatpush3.bf16.msra.mxu1 %v536_v11  ;;  %487 = vmatprep.subr.bf16.mxu0 %v537_v12 }
  0x1d   : > { %513 = vmatprep.subr.bf16.mxu1 %v537_v12 }
  0x1f   : > { %488 = vmatpush3.bf16.msra.mxu0 %v537_v12 }
  0x20   : > { %521 = vmatpush3.bf16.msra.mxu1 %v537_v12  ;;  %489 = vmatprep.subr.bf16.mxu0 %v538_v13 }
  0x21   : > { %514 = vmatprep.subr.bf16.mxu1 %v538_v13 }
  0x23   : > { %490 = vmatpush3.bf16.msra.mxu0 %v538_v13 }
  0x24   : > { %522 = vmatpush3.bf16.msra.mxu1 %v538_v13 }
  0x26   : > { %492 = vmatmul.mubr.bf16.vlgmr.msra.gmra.mrb[0].mxu0 %v192_v22 }
  0x27   : > { %500 = vmatmul.mubr.bf16.vlgmr.msra.gmra.mrb[0].mxu1 %v196_v23  ;;  %495 = vmatprep.mubr.bf16.mxu0 %v193_v24 }
  0x28   : > { %503 = vmatprep.mubr.bf16.mxu1 %v197_v25 }
  0x2e   : > { %496 = vmatmul.mubr.bf16.gmra.mrb[4].mxu0 %v194_v30 }
  0x2f   : > { %504 = vmatmul.mubr.bf16.gmra.mrb[4].mxu1 %v198_v31 }
  0xf9   : > { %v493_v33 = vpop.f32.mrb[0].mxu0 }
  0xfa   : > { %v501_v34 = vpop.f32.mrb[0].mxu1  ;;  %v313_v35 = vadd.f32 %v493_v33, %v448_v32  ;;  %v304_v37 = vpop.f32.mrb[1].mxu0 }
  0xfb   : > { %v345_v36 = vadd.f32 %v501_v34, %v448_v32  ;;  %v336_v38 = vpop.f32.mrb[1].mxu1  ;;  %v305_v39 = vadd.f32 %v448_v32, %v304_v37  ;;  %v494_v41 = vpop.f32.mrb[2].mxu0 }
  0xfc   : > { %v337_v40 = vadd.f32 %v448_v32, %v336_v38  ;;  %v502_v42 = vpop.f32.mrb[2].mxu1  ;;  %369 = vst [vmem:[%s633_s13 + $0x10] sm:$0xff] %v313_v35  ;;  %v316_v43 = vadd.f32 %v494_v41, %v448_v32  ;;  %v307_v45 = vpop.f32.mrb[3].mxu0 }
  0xfd   : > { %377 = vst [vmem:[%s633_s13 + $0x50] sm:$0xff] %v345_v36  ;;  %v348_v44 = vadd.f32 %v502_v42, %v448_v32  ;;  %v339_v46 = vpop.f32.mrb[3].mxu1  ;;  %367 = vst [vmem:[%s633_s13] sm:$0xff] %v305_v39  ;;  %v308_v47 = vadd.f32 %v448_v32, %v307_v45 }
  0xfe   : > { %375 = vst [vmem:[%s633_s13 + $0x40] sm:$0xff] %v337_v40  ;;  %v340_v48 = vadd.f32 %v448_v32, %v339_v46  ;;  %370 = vst [vmem:[%s633_s13 + $0x18] sm:$0xff] %v316_v43 }
  0xff   : > { %378 = vst [vmem:[%s633_s13 + $0x58] sm:$0xff] %v348_v44  ;;  %368 = vst [vmem:[%s633_s13 + $0x8] sm:$0xff] %v308_v47 }
 0x100   : > { %376 = vst [vmem:[%s633_s13 + $0x48] sm:$0xff] %v340_v48 }
 0x101   : > { %v497_v49 = vpop.f32.mrb[4].mxu0 }
 0x102   : > { %v505_v50 = vpop.f32.mrb[4].mxu1  ;;  %v329_v51 = vadd.f32 %v497_v49, %v448_v32  ;;  %v320_v53 = vpop.f32.mrb[5].mxu0 }
 0x103   : > { %v361_v52 = vadd.f32 %v505_v50, %v448_v32  ;;  %v352_v54 = vpop.f32.mrb[5].mxu1  ;;  %v321_v55 = vadd.f32 %v448_v32, %v320_v53  ;;  %v498_v57 = vpop.f32.mrb[6].mxu0 }
 0x104   : > { %v353_v56 = vadd.f32 %v448_v32, %v352_v54  ;;  %v506_v58 = vpop.f32.mrb[6].mxu1  ;;  %373 = vst [vmem:[%s633_s13 + $0x30] sm:$0xff] %v329_v51  ;;  %v332_v59 = vadd.f32 %v498_v57, %v448_v32  ;;  %v323_v61 = vpop.f32.mrb[7].mxu0 }
 0x105   : > { %381 = vst [vmem:[%s633_s13 + $0x70] sm:$0xff] %v361_v52  ;;  %v364_v60 = vadd.f32 %v506_v58, %v448_v32  ;;  %v355_v62 = vpop.f32.mrb[7].mxu1  ;;  %371 = vst [vmem:[%s633_s13 + $0x20] sm:$0xff] %v321_v55  ;;  %v324_v63 = vadd.f32 %v448_v32, %v323_v61 }
 0x106   : > { %379 = vst [vmem:[%s633_s13 + $0x60] sm:$0xff] %v353_v56  ;;  %v356_v0 = vadd.f32 %v448_v32, %v355_v62  ;;  %374 = vst [vmem:[%s633_s13 + $0x38] sm:$0xff] %v332_v59 }
 0x107   : > { %382 = vst [vmem:[%s633_s13 + $0x78] sm:$0xff] %v364_v60  ;;  %372 = vst [vmem:[%s633_s13 + $0x28] sm:$0xff] %v324_v63 }
 0x108   : > { %380 = vst [vmem:[%s633_s13 + $0x68] sm:$0xff] %v356_v0 }
 0x109 PF: > { %s13_s12 = sadd.s32 1, %s545_s12  }
 0x10a   : > { %p10_p4 = scmp.ge.s32.totalorder %s13_s12, 4  }
 0x10c   :  { %12 = sbr.rel (!%p10_p4) target bundleno = 1 (0x1), region = 62 }

// kernel: bert_legal_pretraining_forward.23
= control target key start
LH: loop header
LB: loop body
LE: loop exit
PB: predicated region body
PF: predicated region fallthrough
CT: control target
= control target key end

     0   :  { %s1113_s21 = smov 0   ;;  %s1466_s0 = inlined_call_operand.vmem [shape: f32[256,256], index: 0, kind: input, shape index: {}]   ;;  %s1467_s1 = inlined_call_operand.vmem [shape: bf16[256,128], index: 1, kind: input, shape index: {}]   ;;  %s1468_s2 = inlined_call_operand.vmem [shape: f32[1,128], index: 2, kind: input, shape index: {}]   ;;  %s1469_s3 = inlined_call_operand.vmem [shape: f32[256,128], index: 3, kind: input, shape index: {}]   ;;  %s1470_s4 = inlined_call_operand.vmem [shape: f32[1,128], index: 4, kind: input, shape index: {}]   ;;  %s1471_s5 = inlined_call_operand.vmem [shape: f32[1,128], index: 5, kind: input, shape index: {}]   ;;  %s1472_s6 = inlined_call_operand.vmem [shape: f32[256,128], index: 6, kind: output, shape index: {}]  }
   0x1 LB: > { %s900_s22 = sadd.s32 4294967295, %s1076_s21   ;;  %p904_p0 = scmp.ge.s32.totalorder %s1076_s21, 1  ;;  %s1076_s21 = sphi %s1113_s21, %s16_s21  }
   0x2   : > { %p225_p1 = scmp.lt.s32.totalorder %s1076_s21, 3 }
   0x4   : > { %p226_p2 = pnand %p904_p0, %p225_p1 }
   0x5   : > { %v1022_v0 = vld [vmem:[%s1467_s1 + $0x40] sm:$0xff] (!%p226_p2)   ;;  %s905_s25 = sshll.u32 (!%p226_p2), %s900_s22, 4  ;;  %v1024_v2 = vld [vmem:[%s1467_s1 + $0x48] sm:$0xff] (!%p226_p2)   ;;  %v1026_v4 = vld [vmem:[%s1467_s1 + $0x50] sm:$0xff] (!%p226_p2)  }
   0x6   : > { %229 = sbr.rel (%p226_p2) target bundleno = 605 (0x25d), region = 44  ;;  %v1023_v1 = vld [vmem:[%s1467_s1] sm:$0xff] (!%p226_p2)   ;;  %934 = vmatprep.subr.bf16.mxu0 (!%p226_p2), %v1022_v0  ;;  %998 = vmatprep.subr.bf16.mxu1 (!%p226_p2), %v1022_v0  ;;  %p262_p3 = scmp.lt.s32.totalorder (!%p226_p2), %s905_s25, 31  ;;  %v1025_v3 = vld [vmem:[%s1467_s1 + $0x8] sm:$0xff] (!%p226_p2)   ;;  %v1027_v5 = vld [vmem:[%s1467_s1 + $0x10] sm:$0xff] (!%p226_p2)  }
   0x7   : > { %935 = vmatpush3.bf16.msra.mxu0 (!%p226_p2), %v1023_v1  ;;  %1006 = vmatpush3.bf16.msra.mxu1 (!%p226_p2), %v1023_v1  ;;  %v1028_v6 = vld [vmem:[%s1467_s1 + $0x58] sm:$0xff] (!%p226_p2)   ;;  %v1030_v8 = vld [vmem:[%s1467_s1 + $0x60] sm:$0xff] (!%p226_p2)   ;;  %v1032_v10 = vld [vmem:[%s1467_s1 + $0x68] sm:$0xff] (!%p226_p2)  }
   0x8   : > { %936 = vmatprep.subr.bf16.mxu0 (!%p226_p2), %v1024_v2  ;;  %999 = vmatprep.subr.bf16.mxu1 (!%p226_p2), %v1024_v2  ;;  %v1029_v7 = vld [vmem:[%s1467_s1 + $0x18] sm:$0xff] (!%p226_p2)   ;;  %v1031_v9 = vld [vmem:[%s1467_s1 + $0x20] sm:$0xff] (!%p226_p2)   ;;  %v1033_v17 = vld [vmem:[%s1467_s1 + $0x28] sm:$0xff] (!%p226_p2)  }
   0x9   : > { %v1034_v18 = vld [vmem:[%s1467_s1 + $0x70] sm:$0xff] (!%p226_p2)   ;;  %v1036_v20 = vld [vmem:[%s1467_s1 + $0x78] sm:$0xff] (!%p226_p2)   ;;  %v1220_v2 = vld [vmem:[%s1468_s2] ss:$0 sm:$0xff] (!%p226_p2) }
   0xa   : > { %v1035_v19 = vld [vmem:[%s1467_s1 + $0x30] sm:$0xff] (!%p226_p2)   ;;  %v1037_v21 = vld [vmem:[%s1467_s1 + $0x38] sm:$0xff] (!%p226_p2)  }
   0xb   : > { %937 = vmatpush3.bf16.msra.mxu0 (!%p226_p2), %v1025_v3  ;;  %1007 = vmatpush3.bf16.msra.mxu1 (!%p226_p2), %v1025_v3 }
   0xc   : > { %938 = vmatprep.subr.bf16.mxu0 (!%p226_p2), %v1026_v4  ;;  %1000 = vmatprep.subr.bf16.mxu1 (!%p226_p2), %v1026_v4 }
   0xd   : > { %s1474_s25 = smov (!%p262_p3, %s905_s25), 31 }
   0xe   : > { %s933_s14 = sshll.u32 %s1474_s25, 4 }
   0xf   : > { %939 = vmatpush3.bf16.msra.mxu0 %v1027_v5  ;;  %1008 = vmatpush3.bf16.msra.mxu1 %v1027_v5  ;;  %s1154_s22 = scalar_lea.vmem %s1466_s0, %s933_s14  ;;  %s909_s14 = sshll.u32 %s1474_s25, 3 }
  0x10   : > { %940 = vmatprep.subr.bf16.mxu0 %v1028_v6  ;;  %1001 = vmatprep.subr.bf16.mxu1 %v1028_v6  ;;  %v282_v11 = vld [vmem:[%s1154_s22 + $0x8] sm:$0xff]  ;;  %v284_v12 = vld [vmem:[%s1154_s22 + $0x18] sm:$0xff]  ;;  %v281_v22 = vld [vmem:[%s1154_s22] sm:$0xff]  ;;  %s1215_s17 = scalar_lea.vmem %s1469_s3, %s909_s14  ;;  %s1399_s28 = scalar_lea.vmem %s1472_s6, %s909_s14 }
  0x11   : > { %v298_v13 = vld [vmem:[%s1154_s22 + $0x88] sm:$0xff]  ;;  %v314_v14 = vpack.c.bf16 %v284_v12, %v282_v11  ;;  %v300_v15 = vld [vmem:[%s1154_s22 + $0x98] sm:$0xff]  ;;  %v283_v23 = vld [vmem:[%s1154_s22 + $0x10] sm:$0xff] }
  0x12   : > { %v322_v16 = vpack.c.bf16 %v300_v15, %v298_v13  ;;  %v297_v24 = vld [vmem:[%s1154_s22 + $0x80] sm:$0xff]  ;;  %v299_v25 = vld [vmem:[%s1154_s22 + $0x90] sm:$0xff]  ;;  %v286_v26 = vld [vmem:[%s1154_s22 + $0x28] sm:$0xff]  ;;  %v313_v30 = vpack.c.bf16 %v283_v23, %v281_v22 }
  0x13   : > { %941 = vmatpush3.bf16.msra.mxu0 %v1029_v7  ;;  %1009 = vmatpush3.bf16.msra.mxu1 %v1029_v7  ;;  %v288_v27 = vld [vmem:[%s1154_s22 + $0x38] sm:$0xff]  ;;  %v302_v28 = vld [vmem:[%s1154_s22 + $0xa8] sm:$0xff]  ;;  %v321_v31 = vpack.c.bf16 %v299_v25, %v297_v24  ;;  %v285_v34 = vld [vmem:[%s1154_s22 + $0x20] sm:$0xff] }
  0x14   : > { %942 = vmatprep.subr.bf16.mxu0 %v1030_v8  ;;  %1002 = vmatprep.subr.bf16.mxu1 %v1030_v8  ;;  %v304_v29 = vld [vmem:[%s1154_s22 + $0xb8] sm:$0xff]  ;;  %v316_v32 = vpack.c.bf16 %v288_v27, %v286_v26  ;;  %v287_v35 = vld [vmem:[%s1154_s22 + $0x30] sm:$0xff]  ;;  %v301_v36 = vld [vmem:[%s1154_s22 + $0xa0] sm:$0xff] }
  0x15   : > { %496 = vmatprep.mubr.bf16.mxu0 %v314_v14  ;;  %528 = vmatprep.mubr.bf16.mxu1 %v322_v16  ;;  %v324_v33 = vpack.c.bf16 %v304_v29, %v302_v28  ;;  %v303_v37 = vld [vmem:[%s1154_s22 + $0xb0] sm:$0xff]  ;;  %v290_v38 = vld [vmem:[%s1154_s22 + $0x48] sm:$0xff]  ;;  %v292_v39 = vld [vmem:[%s1154_s22 + $0x58] sm:$0xff]  ;;  %v315_v42 = vpack.c.bf16 %v287_v35, %v285_v34 }
  0x16   : > { %v306_v40 = vld [vmem:[%s1154_s22 + $0xc8] sm:$0xff]  ;;  %v308_v41 = vld [vmem:[%s1154_s22 + $0xd8] sm:$0xff]  ;;  %v323_v43 = vpack.c.bf16 %v303_v37, %v301_v36  ;;  %v318_v44 = vpack.c.bf16 %v292_v39, %v290_v38  ;;  %v289_v46 = vld [vmem:[%s1154_s22 + $0x40] sm:$0xff] }
  0x17   : > { %943 = vmatpush3.bf16.msra.mxu0 %v1031_v9  ;;  %1010 = vmatpush3.bf16.msra.mxu1 %v1031_v9  ;;  %v326_v45 = vpack.c.bf16 %v308_v41, %v306_v40  ;;  %v291_v47 = vld [vmem:[%s1154_s22 + $0x50] sm:$0xff]  ;;  %v305_v48 = vld [vmem:[%s1154_s22 + $0xc0] sm:$0xff]  ;;  %v294_v50 = vld [vmem:[%s1154_s22 + $0x68] sm:$0xff] }
  0x18   : > { %944 = vmatprep.subr.bf16.mxu0 %v1032_v10  ;;  %1003 = vmatprep.subr.bf16.mxu1 %v1032_v10  ;;  %v307_v49 = vld [vmem:[%s1154_s22 + $0xd0] sm:$0xff]  ;;  %v296_v51 = vld [vmem:[%s1154_s22 + $0x78] sm:$0xff]  ;;  %v310_v52 = vld [vmem:[%s1154_s22 + $0xe8] sm:$0xff]  ;;  %v317_v54 = vpack.c.bf16 %v291_v47, %v289_v46 }
  0x19   : > { %v312_v53 = vld [vmem:[%s1154_s22 + $0xf8] sm:$0xff]  ;;  %v325_v55 = vpack.c.bf16 %v307_v49, %v305_v48  ;;  %v320_v56 = vpack.c.bf16 %v296_v51, %v294_v50  ;;  %v293_v58 = vld [vmem:[%s1154_s22 + $0x60] sm:$0xff]  ;;  %v295_v59 = vld [vmem:[%s1154_s22 + $0x70] sm:$0xff] }
  0x1a   : > { %v328_v57 = vpack.c.bf16 %v312_v53, %v310_v52  ;;  %v309_v60 = vld [vmem:[%s1154_s22 + $0xe0] sm:$0xff]  ;;  %v311_v61 = vld [vmem:[%s1154_s22 + $0xf0] sm:$0xff]  ;;  %v319_v62 = vpack.c.bf16 %v295_v59, %v293_v58  ;;  %v570_v16 = vld [vmem:[%s1215_s17 + $0x48] sm:$0xff] }
  0x1b   : > { %945 = vmatpush3.bf16.msra.mxu0 %v1033_v17  ;;  %1011 = vmatpush3.bf16.msra.mxu1 %v1033_v17  ;;  %v327_v63 = vpack.c.bf16 %v311_v61, %v309_v60  ;;  %v561_v11 = vld [vmem:[%s1215_s17] sm:$0xff]  ;;  %v564_v39 = vld [vmem:[%s1215_s17 + $0x18] sm:$0xff]  ;;  %v571_v40 = vld [vmem:[%s1215_s17 + $0x50] sm:$0xff] }
  0x1c   : > { %946 = vmatprep.subr.bf16.mxu0 %v1034_v18  ;;  %1004 = vmatprep.subr.bf16.mxu1 %v1034_v18  ;;  %v569_v17 = vld [vmem:[%s1215_s17 + $0x40] sm:$0xff]  ;;  %v572_v49 = vld [vmem:[%s1215_s17 + $0x58] sm:$0xff] }
  0x1d   : > { %v565_v58 = vld [vmem:[%s1215_s17 + $0x20] sm:$0xff] }
  0x1f   : > { %947 = vmatpush3.bf16.msra.mxu0 %v1035_v19  ;;  %1012 = vmatpush3.bf16.msra.mxu1 %v1035_v19 }
  0x20   : > { %948 = vmatprep.subr.bf16.mxu0 %v1036_v20  ;;  %1005 = vmatprep.subr.bf16.mxu1 %v1036_v20 }
  0x23   : > { %949 = vmatpush3.bf16.msra.mxu0 %v1037_v21  ;;  %1013 = vmatpush3.bf16.msra.mxu1 %v1037_v21 }
  0x26   : > { %497 = vmatmul.mubr.bf16.vlgmr.msra.gmra.mrb[0].mxu0 %v313_v30  ;;  %529 = vmatmul.mubr.bf16.vlgmr.msra.gmra.mrb[0].mxu1 %v321_v31 }
  0x27   : > { %504 = vmatprep.mubr.bf16.mxu0 %v316_v32  ;;  %536 = vmatprep.mubr.bf16.mxu1 %v324_v33  ;;  %v563_v32 = vld [vmem:[%s1215_s17 + $0x10] sm:$0xff]  ;;  %v562_v33 = vld [vmem:[%s1215_s17 + $0x8] sm:$0xff] }
  0x2e   : > { %505 = vmatmul.mubr.bf16.gmra.mrb[4].mxu0 %v315_v42  ;;  %537 = vmatmul.mubr.bf16.gmra.mrb[4].mxu1 %v323_v43 }
  0x2f   : > { %512 = vmatprep.mubr.bf16.mxu0 %v318_v44  ;;  %544 = vmatprep.mubr.bf16.mxu1 %v326_v45 }
  0x36   : > { %513 = vmatmul.mubr.bf16.gmra.mrb[8].mxu0 %v317_v54  ;;  %545 = vmatmul.mubr.bf16.gmra.mrb[8].mxu1 %v325_v55 }
  0x37   : > { %520 = vmatprep.mubr.bf16.mxu0 %v320_v56  ;;  %552 = vmatprep.mubr.bf16.mxu1 %v328_v57 }
  0x3e   : > { %521 = vmatmul.mubr.bf16.gmra.mrb[12].mxu0 %v319_v62  ;;  %553 = vmatmul.mubr.bf16.gmra.mrb[12].mxu1 %v327_v63 }
  0xf9   : > { %v950_v0 = vpop.f32.mrb[0].mxu0  ;;  %v974_v1 = vpop.f32.mrb[0].mxu1 }
  0xfa   : > { %v951_v3 = vpop.f32.mrb[1].mxu0  ;;  %v975_v4 = vpop.f32.mrb[1].mxu1 }
  0xfb   : > { %v952_v5 = vadd.f32 %v951_v3, %v950_v0  ;;  %v976_v6 = vadd.f32 %v975_v4, %v974_v1  ;;  %v953_v7 = vpop.f32.mrb[2].mxu0  ;;  %v977_v8 = vpop.f32.mrb[2].mxu1  ;;  %v566_v0 = vld [vmem:[%s1215_s17 + $0x28] sm:$0xff]  ;;  %v573_v1 = vld [vmem:[%s1215_s17 + $0x60] sm:$0xff] }
  0xfc   : > { %v954_v9 = vpop.f32.mrb[3].mxu0  ;;  %v978_v10 = vpop.f32.mrb[3].mxu1 }
  0xfd   : > { %v499_v12 = vadd.f32 %v952_v5, %v1220_v2  ;;  %v531_v13 = vadd.f32 %v976_v6, %v1220_v2  ;;  %v955_v14 = vadd.f32 %v954_v9, %v953_v7  ;;  %v979_v15 = vadd.f32 %v978_v10, %v977_v8  ;;  %v574_v10 = vld [vmem:[%s1215_s17 + $0x68] sm:$0xff] }
  0xff   : > { %v534_v18 = vadd.f32 %v979_v15, %v1220_v2  ;;  %v1228_v19 = vadd.f32 %v561_v11, %v499_v12  ;;  %v1233_v23 = vadd.f32 %v569_v17, %v531_v13  ;;  %v502_v26 = vadd.f32 %v955_v14, %v1220_v2 }
 0x101   : > { %v956_v20 = vpop.f32.mrb[4].mxu0  ;;  %593 = vadd.xlane.f32.xlu0 %v1228_v19  ;;  %v1231_v21 = vadd.f32 %v570_v16, %v534_v18  ;;  %v980_v22 = vpop.f32.mrb[4].mxu1  ;;  %v1247_v43 = vadd.f32 %v562_v33, %v502_v26 }
 0x102   : > { %v957_v24 = vpop.f32.mrb[5].mxu0  ;;  %v981_v25 = vpop.f32.mrb[5].mxu1 }
 0x103   : > { %v958_v27 = vadd.f32 %v957_v24, %v956_v20  ;;  %611 = vadd.xlane.f32.xlu1 %v1231_v21  ;;  %v959_v28 = vpop.f32.mrb[6].mxu0  ;;  %v982_v29 = vadd.f32 %v981_v25, %v980_v22  ;;  %v983_v30 = vpop.f32.mrb[6].mxu1  ;;  %v567_v20 = vld [vmem:[%s1215_s17 + $0x30] sm:$0xff] }
 0x104   : > { %v960_v31 = vpop.f32.mrb[7].mxu0  ;;  %v984_v34 = vpop.f32.mrb[7].mxu1 }
 0x105   : > { %v507_v35 = vadd.f32 %v958_v27, %v1220_v2  ;;  %v961_v36 = vadd.f32 %v960_v31, %v959_v28  ;;  %609 = vadd.xlane.f32.xlu0 %v1233_v23  ;;  %v539_v37 = vadd.f32 %v982_v29, %v1220_v2  ;;  %v985_v38 = vadd.f32 %v984_v34, %v983_v30  ;;  %v568_v28 = vld [vmem:[%s1215_s17 + $0x38] sm:$0xff]  ;;  %v575_v29 = vld [vmem:[%s1215_s17 + $0x70] sm:$0xff] }
 0x107   : > { %v510_v41 = vadd.f32 %v961_v36, %v1220_v2  ;;  %v1245_v42 = vadd.f32 %v563_v32, %v507_v35  ;;  %v542_v44 = vadd.f32 %v985_v38, %v1220_v2  ;;  %v1254_v48 = vadd.f32 %v571_v40, %v539_v37  ;;  %v576_v35 = vld [vmem:[%s1215_s17 + $0x78] sm:$0xff] }
 0x109   : > { %v962_v45 = vpop.f32.mrb[8].mxu0  ;;  %597 = vadd.xlane.f32.xlu1 %v1245_v42  ;;  %595 = vadd.xlane.f32.xlu0 %v1247_v43  ;;  %v986_v46 = vpop.f32.mrb[8].mxu1  ;;  %v1252_v47 = vadd.f32 %v564_v39, %v510_v41  ;;  %v1257_v57 = vadd.f32 %v572_v49, %v542_v44 }
 0x10a   : > { %v963_v50 = vpop.f32.mrb[9].mxu0  ;;  %v987_v51 = vpop.f32.mrb[9].mxu1 }
 0x10b   : > { %v964_v52 = vadd.f32 %v963_v50, %v962_v45  ;;  %v965_v53 = vpop.f32.mrb[10].mxu0  ;;  %v988_v54 = vadd.f32 %v987_v51, %v986_v46  ;;  %v989_v55 = vpop.f32.mrb[10].mxu1 }
 0x10c   : > { %v966_v56 = vpop.f32.mrb[11].mxu0  ;;  %v990_v59 = vpop.f32.mrb[11].mxu1 }
 0x10d   : > { %v515_v60 = vadd.f32 %v964_v52, %v1220_v2  ;;  %599 = vadd.xlane.f32.xlu1 %v1252_v47  ;;  %613 = vadd.xlane.f32.xlu0 %v1254_v48  ;;  %v967_v61 = vadd.f32 %v966_v56, %v965_v53  ;;  %v547_v62 = vadd.f32 %v988_v54, %v1220_v2 }
 0x10e   : > { %v991_v63 = vadd.f32 %v990_v59, %v989_v55 }
 0x10f   : > { %v518_v3 = vadd.f32 %v967_v61, %v1220_v2  ;;  %v1267_v4 = vadd.f32 %v565_v58, %v515_v60  ;;  %v1274_v9 = vadd.f32 %v573_v1, %v547_v62 }
 0x110   : > { %v550_v5 = vadd.f32 %v991_v63, %v1220_v2 }
 0x111   : > { %v968_v6 = vpop.f32.mrb[12].mxu0  ;;  %615 = vadd.xlane.f32.xlu1 %v1257_v57  ;;  %601 = vadd.xlane.f32.xlu0 %v1267_v4  ;;  %v992_v7 = vpop.f32.mrb[12].mxu1  ;;  %v1272_v8 = vadd.f32 %v566_v0, %v518_v3 }
 0x112   : > { %v969_v11 = vpop.f32.mrb[13].mxu0  ;;  %v993_v12 = vpop.f32.mrb[13].mxu1  ;;  %v1277_v18 = vadd.f32 %v574_v10, %v550_v5 }
 0x113   : > { %v970_v13 = vadd.f32 %v969_v11, %v968_v6  ;;  %v971_v14 = vpop.f32.mrb[14].mxu0  ;;  %v994_v15 = vadd.f32 %v993_v12, %v992_v7  ;;  %v995_v16 = vpop.f32.mrb[14].mxu1 }
 0x114   : > { %v972_v17 = vpop.f32.mrb[15].mxu0  ;;  %v996_v22 = vpop.f32.mrb[15].mxu1 }
 0x115   : > { %v523_v24 = vadd.f32 %v970_v13, %v1220_v2  ;;  %603 = vadd.xlane.f32.xlu1 %v1272_v8  ;;  %617 = vadd.xlane.f32.xlu0 %v1274_v9  ;;  %v973_v25 = vadd.f32 %v972_v17, %v971_v14  ;;  %v555_v26 = vadd.f32 %v994_v15, %v1220_v2 }
 0x116   : > { %v997_v27 = vadd.f32 %v996_v22, %v995_v16 }
 0x117   : > { %v526_v30 = vadd.f32 %v973_v25, %v1220_v2  ;;  %v1287_v31 = vadd.f32 %v567_v20, %v523_v24  ;;  %v1294_v34 = vadd.f32 %v575_v29, %v555_v26 }
 0x118   : > { %v558_v32 = vadd.f32 %v997_v27, %v1220_v2 }
 0x119   : > { %619 = vadd.xlane.f32.xlu1 %v1277_v18  ;;  %605 = vadd.xlane.f32.xlu0 %v1287_v31  ;;  %v1292_v33 = vadd.f32 %v568_v28, %v526_v30 }
 0x11a   : > { %v1299_v36 = vadd.f32 %v576_v35, %v558_v32 }
 0x11d   : > { %607 = vadd.xlane.f32.xlu1 %v1292_v33  ;;  %621 = vadd.xlane.f32.xlu0 %v1294_v34 }
 0x121   : > { %623 = vadd.xlane.f32.xlu1 %v1299_v36 }
 0x18e   : > { %v594_v37 = vpop.xlane.xlu0 %593 }
 0x18f   : > { %v626_v38 = vmul.f32 0.0078125, %v594_v37 }
 0x190   : > { %v612_v40 = vpop.xlane.xlu1 %611 }
 0x191   : > { %v1303_v39 = vsub.f32 %v1228_v19, %v626_v38  ;;  %v635_v46 = vmul.f32 0.0078125, %v612_v40 }
 0x192   : > { %v610_v2 = vpop.xlane.xlu0 %609 }
 0x193   : > { %v634_v41 = vmul.f32 0.0078125, %v610_v2  ;;  %v658_v44 = vmul.f32 %v1303_v39, %v1303_v39  ;;  %v1319_v55 = vsub.f32 %v1231_v21, %v635_v46 }
 0x195   : > { %v1308_v45 = vsub.f32 %v1233_v23, %v634_v41  ;;  %674 = vadd.xlane.f32.xlu0 %v658_v44  ;;  %v667_v1 = vmul.f32 %v1319_v55, %v1319_v55 }
 0x196   : > { %v598_v49 = vpop.xlane.xlu1 %597  ;;  %v596_v50 = vpop.xlane.xlu0 %595 }
 0x197   : > { %v628_v51 = vmul.f32 0.0078125, %v598_v49  ;;  %v627_v52 = vmul.f32 0.0078125, %v596_v50  ;;  %v666_v53 = vmul.f32 %v1308_v45, %v1308_v45 }
 0x199   : > { %v1313_v19 = vsub.f32 %v1245_v42, %v628_v51  ;;  %v1316_v54 = vsub.f32 %v1247_v43, %v627_v52  ;;  %690 = vadd.xlane.f32.xlu0 %v666_v53 }
 0x19a   : > { %v600_v23 = vpop.xlane.xlu1 %599  ;;  %v614_v56 = vpop.xlane.xlu0 %613 }
 0x19b   : > { %v629_v58 = vmul.f32 0.0078125, %v600_v23  ;;  %v636_v59 = vmul.f32 0.0078125, %v614_v56  ;;  %v660_v60 = vmul.f32 %v1313_v19, %v1313_v19  ;;  %v659_v61 = vmul.f32 %v1316_v54, %v1316_v54 }
 0x19d   : > { %v1326_v42 = vsub.f32 %v1254_v48, %v636_v59  ;;  %678 = vadd.xlane.f32.xlu0 %v660_v60  ;;  %676 = vadd.xlane.f32.xlu1 %v659_v61  ;;  %v1329_v43 = vsub.f32 %v1252_v47, %v629_v58  ;;  %v1385_v61 = vld [vmem:[%s1470_s4] ss:$0 sm:$0xff] }
 0x19e   : > { %v616_v21 = vpop.xlane.xlu1 %615  ;;  %v602_v62 = vpop.xlane.xlu0 %601 }
 0x19f   : > { %v637_v63 = vmul.f32 0.0078125, %v616_v21  ;;  %v630_v0 = vmul.f32 0.0078125, %v602_v62  ;;  %v668_v3 = vmul.f32 %v1326_v42, %v1326_v42  ;;  %v661_v47 = vmul.f32 %v1329_v43, %v1329_v43 }
 0x1a1   : > { %v1336_v5 = vsub.f32 %v1267_v4, %v630_v0  ;;  %692 = vadd.xlane.f32.xlu1 %v667_v1  ;;  %694 = vadd.xlane.f32.xlu0 %v668_v3  ;;  %v1341_v7 = vsub.f32 %v1257_v57, %v637_v63  ;;  %v1391_v3 = vld [vmem:[%s1471_s5] ss:$0 sm:$0xff] }
 0x1a2   : > { %v604_v48 = vpop.xlane.xlu1 %603  ;;  %v618_v6 = vpop.xlane.xlu0 %617 }
 0x1a3   : > { %v631_v10 = vmul.f32 0.0078125, %v604_v48  ;;  %v638_v11 = vmul.f32 0.0078125, %v618_v6  ;;  %v662_v12 = vmul.f32 %v1336_v5, %v1336_v5  ;;  %v669_v57 = vmul.f32 %v1341_v7, %v1341_v7 }
 0x1a5   : > { %v1346_v13 = vsub.f32 %v1274_v9, %v638_v11  ;;  %680 = vadd.xlane.f32.xlu1 %v661_v47  ;;  %682 = vadd.xlane.f32.xlu0 %v662_v12  ;;  %v1349_v4 = vsub.f32 %v1272_v8, %v631_v10 }
 0x1a6   : > { %v620_v14 = vpop.xlane.xlu1 %619  ;;  %v606_v15 = vpop.xlane.xlu0 %605 }
 0x1a7   : > { %v639_v16 = vmul.f32 0.0078125, %v620_v14  ;;  %v632_v17 = vmul.f32 0.0078125, %v606_v15  ;;  %v670_v20 = vmul.f32 %v1346_v13, %v1346_v13  ;;  %v663_v8 = vmul.f32 %v1349_v4, %v1349_v4 }
 0x1a9   : > { %v1356_v22 = vsub.f32 %v1287_v31, %v632_v17  ;;  %696 = vadd.xlane.f32.xlu1 %v669_v57  ;;  %698 = vadd.xlane.f32.xlu0 %v670_v20  ;;  %v1361_v25 = vsub.f32 %v1277_v18, %v639_v16 }
 0x1aa   : > { %v608_v9 = vpop.xlane.xlu1 %607  ;;  %v622_v24 = vpop.xlane.xlu0 %621 }
 0x1ab   : > { %v633_v26 = vmul.f32 0.0078125, %v608_v9  ;;  %v640_v27 = vmul.f32 0.0078125, %v622_v24  ;;  %v664_v28 = vmul.f32 %v1356_v22, %v1356_v22  ;;  %v671_v35 = vmul.f32 %v1361_v25, %v1361_v25 }
 0x1ad   : > { %v1366_v29 = vsub.f32 %v1294_v34, %v640_v27  ;;  %684 = vadd.xlane.f32.xlu1 %v663_v8  ;;  %686 = vadd.xlane.f32.xlu0 %v664_v28  ;;  %v1369_v31 = vsub.f32 %v1292_v33, %v633_v26 }
 0x1ae   : > { %v624_v30 = vpop.xlane.xlu1 %623 }
 0x1af   : > { %v641_v32 = vmul.f32 0.0078125, %v624_v30  ;;  %v672_v18 = vmul.f32 %v1366_v29, %v1366_v29  ;;  %v665_v34 = vmul.f32 %v1369_v31, %v1369_v31 }
 0x1b1   : > { %700 = vadd.xlane.f32.xlu1 %v671_v35  ;;  %702 = vadd.xlane.f32.xlu0 %v672_v18  ;;  %v1376_v37 = vsub.f32 %v1299_v36, %v641_v32 }
 0x1b3   : > { %v673_v33 = vmul.f32 %v1376_v37, %v1376_v37 }
 0x1b5   : > { %688 = vadd.xlane.f32.xlu1 %v665_v34 }
 0x1b9   : > { %704 = vadd.xlane.f32.xlu1 %v673_v33 }
 0x222   : > { %v675_v38 = vpop.xlane.xlu0 %674 }
 0x223   : > { %v706_v40 = vmul.f32 0.0078125, %v675_v38 }
 0x225   : > { %v722_v2 = vadd.f32 1e-12, %v706_v40 }
 0x226   : > { %v691_v41 = vpop.xlane.xlu0 %690 }
 0x227   : > { %1038 = vrsqrt.f32 %v722_v2  ;;  %v714_v44 = vmul.f32 0.0078125, %v691_v41 }
 0x229   : > { %v730_v46 = vadd.f32 1e-12, %v714_v44 }
 0x22a   : > { %v677_v49 = vpop.xlane.xlu1 %676  ;;  %v679_v50 = vpop.xlane.xlu0 %678 }
 0x22b   : > { %1040 = vrsqrt.f32 %v730_v46  ;;  %v707_v36 = vmul.f32 0.0078125, %v677_v49  ;;  %v708_v51 = vmul.f32 0.0078125, %v679_v50 }
 0x22d   : > { %v723_v52 = vadd.f32 1e-12, %v707_v36  ;;  %v724_v53 = vadd.f32 1e-12, %v708_v51 }
 0x22e   : > { %v693_v23 = vpop.xlane.xlu1 %692  ;;  %v695_v56 = vpop.xlane.xlu0 %694 }
 0x22f   : > { %1042 = vrsqrt.f32 %v723_v52  ;;  %v715_v58 = vmul.f32 0.0078125, %v693_v23  ;;  %v716_v59 = vmul.f32 0.0078125, %v695_v56 }
 0x230   : > { %1044 = vrsqrt.f32 %v724_v53 }
 0x231   : > { %v1039_v60 = vpop.eup %1038  ;;  %v731_v21 = vadd.f32 1e-12, %v715_v58  ;;  %v732_v62 = vadd.f32 1e-12, %v716_v59 }
 0x232   : > { %v754_v63 = vmul.f32 %v1039_v60, %v1303_v39  ;;  %v681_v0 = vpop.xlane.xlu1 %680  ;;  %v683_v1 = vpop.xlane.xlu0 %682 }
 0x233   : > { %1046 = vrsqrt.f32 %v731_v21  ;;  %v709_v48 = vmul.f32 0.0078125, %v681_v0  ;;  %v710_v6 = vmul.f32 0.0078125, %v683_v1 }
 0x234   : > { %v777_v47 = vmul.f32 %v1385_v61, %v754_v63  ;;  %1048 = vrsqrt.f32 %v732_v62 }
 0x235   : > { %v1041_v10 = vpop.eup %1040  ;;  %v725_v39 = vadd.f32 1e-12, %v709_v48  ;;  %v726_v11 = vadd.f32 1e-12, %v710_v6 }
 0x236   : > { %v800_v12 = vadd.f32 %v1391_v3, %v777_v47  ;;  %v762_v14 = vmul.f32 %v1041_v10, %v1308_v45  ;;  %v697_v15 = vpop.xlane.xlu1 %696  ;;  %v699_v16 = vpop.xlane.xlu0 %698 }
 0x237   : > { %1050 = vrsqrt.f32 %v725_v39  ;;  %v717_v17 = vmul.f32 0.0078125, %v697_v15  ;;  %v718_v57 = vmul.f32 0.0078125, %v699_v16 }
 0x238   : > { %816 = vst [vmem:[%s1399_s28] sm:$0xff] %v800_v12  ;;  %v785_v20 = vmul.f32 %v1385_v61, %v762_v14  ;;  %1052 = vrsqrt.f32 %v726_v11 }
 0x239   : > { %v1043_v9 = vpop.eup %1042  ;;  %v733_v24 = vadd.f32 1e-12, %v717_v17  ;;  %v734_v8 = vadd.f32 1e-12, %v718_v57 }
 0x23a   : > { %v1045_v26 = vpop.eup %1044  ;;  %v808_v27 = vadd.f32 %v1391_v3, %v785_v20  ;;  %v755_v28 = vmul.f32 %v1043_v9, %v1316_v54  ;;  %v685_v30 = vpop.xlane.xlu1 %684 }
 0x23b   : > { %v687_v45 = vpop.xlane.xlu0 %686  ;;  %v756_v32 = vmul.f32 %v1045_v26, %v1313_v19  ;;  %1054 = vrsqrt.f32 %v733_v24  ;;  %v711_v35 = vmul.f32 0.0078125, %v685_v30 }
 0x23c   : > { %v712_v18 = vmul.f32 0.0078125, %v687_v45  ;;  %824 = vst [vmem:[%s1399_s28 + $0x40] sm:$0xff] %v808_v27  ;;  %v778_v34 = vmul.f32 %v1385_v61, %v755_v28  ;;  %1056 = vrsqrt.f32 %v734_v8 }
 0x23d   : > { %v1047_v33 = vpop.eup %1046  ;;  %v779_v38 = vmul.f32 %v1385_v61, %v756_v32  ;;  %v727_v40 = vadd.f32 1e-12, %v711_v35 }
 0x23e   : > { %v728_v2 = vadd.f32 1e-12, %v712_v18  ;;  %v1049_v41 = vpop.eup %1048  ;;  %v801_v54 = vadd.f32 %v1391_v3, %v778_v34  ;;  %v763_v44 = vmul.f32 %v1047_v33, %v1319_v55  ;;  %v701_v19 = vpop.xlane.xlu1 %700 }
 0x23f   : > { %v703_v46 = vpop.xlane.xlu0 %702  ;;  %v802_v49 = vadd.f32 %v1391_v3, %v779_v38  ;;  %v764_v50 = vmul.f32 %v1049_v41, %v1326_v42  ;;  %1058 = vrsqrt.f32 %v727_v40  ;;  %v719_v36 = vmul.f32 0.0078125, %v701_v19 }
 0x240   : > { %817 = vst [vmem:[%s1399_s28 + $0x8] sm:$0xff] %v801_v54  ;;  %v786_v51 = vmul.f32 %v1385_v61, %v763_v44  ;;  %1060 = vrsqrt.f32 %v728_v2  ;;  %v720_v52 = vmul.f32 0.0078125, %v703_v46 }
 0x241   : > { %v1051_v53 = vpop.eup %1050  ;;  %818 = vst [vmem:[%s1399_s28 + $0x10] sm:$0xff] %v802_v49  ;;  %v787_v23 = vmul.f32 %v1385_v61, %v764_v50  ;;  %v735_v55 = vadd.f32 1e-12, %v719_v36 }
 0x242   : > { %v1053_v56 = vpop.eup %1052  ;;  %v809_v58 = vadd.f32 %v1391_v3, %v786_v51  ;;  %v757_v59 = vmul.f32 %v1051_v53, %v1329_v43  ;;  %v736_v42 = vadd.f32 1e-12, %v720_v52  ;;  %v689_v60 = vpop.xlane.xlu1 %688 }
 0x243   : > { %v810_v21 = vadd.f32 %v1391_v3, %v787_v23  ;;  %v758_v62 = vmul.f32 %v1053_v56, %v1336_v5  ;;  %1062 = vrsqrt.f32 %v735_v55  ;;  %v713_v63 = vmul.f32 0.0078125, %v689_v60 }
 0x244   : > { %825 = vst [vmem:[%s1399_s28 + $0x48] sm:$0xff] %v809_v58  ;;  %v780_v0 = vmul.f32 %v1385_v61, %v757_v59  ;;  %1064 = vrsqrt.f32 %v736_v42 }
 0x245   : > { %v1055_v1 = vpop.eup %1054  ;;  %826 = vst [vmem:[%s1399_s28 + $0x50] sm:$0xff] %v810_v21  ;;  %v781_v48 = vmul.f32 %v1385_v61, %v758_v62  ;;  %v729_v6 = vadd.f32 1e-12, %v713_v63 }
 0x246   : > { %v1057_v43 = vpop.eup %1056  ;;  %v803_v47 = vadd.f32 %v1391_v3, %v780_v0  ;;  %v765_v10 = vmul.f32 %v1055_v1, %v1341_v7  ;;  %v705_v39 = vpop.xlane.xlu1 %704 }
 0x247   : > { %v804_v5 = vadd.f32 %v1391_v3, %v781_v48  ;;  %v766_v11 = vmul.f32 %v1057_v43, %v1346_v13  ;;  %1066 = vrsqrt.f32 %v729_v6  ;;  %v721_v12 = vmul.f32 0.0078125, %v705_v39 }
 0x248   : > { %819 = vst [vmem:[%s1399_s28 + $0x18] sm:$0xff] %v803_v47  ;;  %v788_v14 = vmul.f32 %v1385_v61, %v765_v10 }
 0x249   : > { %v1059_v15 = vpop.eup %1058  ;;  %820 = vst [vmem:[%s1399_s28 + $0x20] sm:$0xff] %v804_v5  ;;  %v789_v16 = vmul.f32 %v1385_v61, %v766_v11  ;;  %v737_v17 = vadd.f32 1e-12, %v721_v12 }
 0x24a   : > { %v1061_v57 = vpop.eup %1060  ;;  %v811_v7 = vadd.f32 %v1391_v3, %v788_v14  ;;  %v759_v20 = vmul.f32 %v1059_v15, %v1349_v4 }
 0x24b   : > { %v812_v9 = vadd.f32 %v1391_v3, %v789_v16  ;;  %v760_v13 = vmul.f32 %v1061_v57, %v1356_v22  ;;  %1068 = vrsqrt.f32 %v737_v17 }
 0x24c   : > { %827 = vst [vmem:[%s1399_s28 + $0x58] sm:$0xff] %v811_v7  ;;  %v782_v24 = vmul.f32 %v1385_v61, %v759_v20 }
 0x24d   : > { %v1063_v8 = vpop.eup %1062  ;;  %828 = vst [vmem:[%s1399_s28 + $0x60] sm:$0xff] %v812_v9  ;;  %v783_v26 = vmul.f32 %v1385_v61, %v760_v13 }
 0x24e   : > { %v1065_v27 = vpop.eup %1064  ;;  %v805_v28 = vadd.f32 %v1391_v3, %v782_v24  ;;  %v767_v4 = vmul.f32 %v1063_v8, %v1361_v25 }
 0x24f   : > { %v806_v30 = vadd.f32 %v1391_v3, %v783_v26  ;;  %v768_v22 = vmul.f32 %v1065_v27, %v1366_v29 }
 0x250   : > { %821 = vst [vmem:[%s1399_s28 + $0x28] sm:$0xff] %v805_v28  ;;  %v790_v45 = vmul.f32 %v1385_v61, %v767_v4 }
 0x251   : > { %v1067_v32 = vpop.eup %1066  ;;  %822 = vst [vmem:[%s1399_s28 + $0x30] sm:$0xff] %v806_v30  ;;  %v791_v35 = vmul.f32 %v1385_v61, %v768_v22 }
 0x252   : > { %v813_v18 = vadd.f32 %v1391_v3, %v790_v45  ;;  %v761_v34 = vmul.f32 %v1067_v32, %v1369_v31 }
 0x253   : > { %v814_v33 = vadd.f32 %v1391_v3, %v791_v35 }
 0x254   : > { %829 = vst [vmem:[%s1399_s28 + $0x68] sm:$0xff] %v813_v18  ;;  %v784_v25 = vmul.f32 %v1385_v61, %v761_v34 }
 0x255   : > { %v1069_v38 = vpop.eup %1068  ;;  %830 = vst [vmem:[%s1399_s28 + $0x70] sm:$0xff] %v814_v33 }
 0x256   : > { %v807_v29 = vadd.f32 %v1391_v3, %v784_v25  ;;  %v769_v40 = vmul.f32 %v1069_v38, %v1376_v37 }
 0x258   : > { %823 = vst [vmem:[%s1399_s28 + $0x38] sm:$0xff] %v807_v29  ;;  %v792_v2 = vmul.f32 %v1385_v61, %v769_v40 }
 0x25a   : > { %v815_v41 = vadd.f32 %v1391_v3, %v792_v2 }
 0x25c   : > { %831 = vst [vmem:[%s1399_s28 + $0x78] sm:$0xff] %v815_v41 }
 0x25d PF: > { %s16_s21 = sadd.s32 1, %s1076_s21  }
 0x25e   : > { %p13_p4 = scmp.ge.s32.totalorder %s16_s21, 4  }
 0x260   :  { %15 = sbr.rel (!%p13_p4) target bundleno = 1 (0x1), region = 77 }

// kernel: bert_legal_pretraining_forward.34
= control target key start
LH: loop header
LB: loop body
LE: loop exit
PB: predicated region body
PF: predicated region fallthrough
CT: control target
= control target key end

     0   :  { %9 = vsyncpa [#allocation3], 0  ;;  %vm17_vm0 = vcmask 1041408   ;;  %v161_v2 = vmov 0   ;;  %s220_s0 = inlined_call_operand.vmem [shape: f32[2,128], index: 0, kind: input, shape index: {}]   ;;  %s221_s1 = inlined_call_operand.vmem [shape: s32[2,1], index: 1, kind: input, shape index: {}]   ;;  %s222_s2 = inlined_call_operand.hbm [shape: f32[1,1], index: 2, kind: output, shape index: {0}]   ;;  %s223_s3 = inlined_call_operand.hbm [shape: f32[1,1], index: 3, kind: output, shape index: {1}]  }
   0x1   :  { %v15_v0 = vld [vmem:[%s220_s0] sm:$0x3]  ;;  %108 = vset.pattern.permute.xlu0 %v161_v2 }
   0x2   :  { %v18_v1 = vsel %vm17_vm0, %v15_v0, -inf }
   0x3   :  { %10 = vsyncpa [#allocation5], 0  ;;  %19 = vmax.xlane.f32.xlu0 %v18_v1  ;;  %v16_v3 = vld [vmem:[%s221_s1] sm:$0x3]  ;;  %v30_v7 = vlaneseq  ;;  %v162_v19 = vmov 0.0   ;;  %vm45_vm3 = vcmask 1024  }
   0x4   :  { %vm40_vm2 = vcmp.ne.s32.totalorder %v16_v3, 128  ;;  %s163_s0 = smov [#allocation2]   ;;  %vm57_vm4 = vcmask 0   ;;  %s164_s17 = smov [#allocation4]  }
   0x5   :  { %v31_v8 = vand.u32 127, %v30_v7  ;;  %v99_v20 = vsel %vm40_vm2, 1.0, %v162_v19  ;;  %s77_s1 = sshll.u32 %s163_s0, 4  ;;  %s87_s18 = sshll.u32 %s164_s17, 4  ;;  %s78_s1 = int_to_ptr.vmem [resolvable:$true] %s77_s1  ;;  %s88_s18 = int_to_ptr.vmem [resolvable:$true] %s87_s18 }
   0x6   :  { %v59_v24 = vsel %vm45_vm3, %v99_v20, 0.0  ;;  %s113_s19 = scalar_lea.vmem %s78_s1, 16  ;;  %s117_s20 = scalar_lea.vmem %s78_s1, 32 }
   0x7   :  { %p114_p0 = scmp.ne.s32.totalorder %s78_s1, %s113_s19  ;;  %p118_p1 = scmp.lt.s32.totalorder %s78_s1, %s78_s1 }
   0x8   :  { %p119_p2 = scmp.lt.s32.totalorder %s117_s20, %s113_s19 }
   0xa   :  { %p120_p3 = por %p119_p2, %p118_p1 }
   0xc   :  { %p121_p4 = pnand %p120_p3, %p114_p0 }
  0x19   :  { %33 = vperm.xlu0 %108, %v16_v3  }
  0x90   :  { %v20_v4 = vpop.xlane.xlu0 %19 }
  0x91   :  { %v21_v5 = vsub.f32 %v15_v0, %v20_v4 }
  0x93   :  { %v22_v6 = vmul.f32 1.442695, %v21_v5 }
  0x95   :  { %109 = vpow2.f32 %v22_v6 }
  0x98   :  { %v34_v9 = vpop.permute.xlu0 %33 }
  0x99   :  { %vm35_vm1 = vcmp.eq.s32.totalorder %v31_v8, %v34_v9 }
  0x9a   :  { %v36_v11 = vsel %vm35_vm1, %v15_v0, 0.0 }
  0x9b   :  { %v37_v13 = vsel %vm17_vm0, %v36_v11, 0.0 }
  0x9f   :  { %v110_v10 = vpop.eup %109 }
  0xa0   :  { %v24_v12 = vsel %vm17_vm0, %v110_v10, 0.0 }
  0xa1   :  { %25 = vadd.xlane.f32.xlu1 %v24_v12 }
  0xa5   :  { %38 = vadd.xlane.f32.xlu1 %v37_v13 }
 0x12e   :  { %v26_v14 = vpop.xlane.xlu1 %25 }
 0x12f   :  { %111 = vlog2.f32 %v26_v14 }
 0x132   :  { %v39_v17 = vpop.xlane.xlu1 %38 }
 0x139   :  { %v112_v15 = vpop.eup %111 }
 0x13a   :  { %v28_v16 = vmul.f32 0.6931472, %v112_v15 }
 0x13c   :  { %v29_v18 = vadd.f32 %v28_v16, %v20_v4 }
 0x13e   :  { %v43_v21 = vsub.f32 %v29_v18, %v39_v17 }
 0x140   :  { %v44_v22 = vmul.f32 %v99_v20, %v43_v21 }
 0x142   :  { %v46_v23 = vsel %vm45_vm3, %v44_v22, 0.0 }
 0x143   :  { %47 = vadd.xlane.f32.xlu1 %v46_v23 }
 0x147   :  { %60 = vadd.xlane.f32.xlu1 %v59_v24 }
 0x1d0   :  { %v48_v25 = vpop.xlane.xlu1 %47 }
 0x1d1   :  { %v49_v26 = vrot.slane %v48_v25, 4 }
 0x1d3   :  { %v50_v27 = vadd.f32 %v49_v26, %v48_v25 }
 0x1d4   :  { %v61_v28 = vpop.xlane.xlu1 %60 }
 0x1d5   :  { %v51_v29 = vrot.slane %v50_v27, 2  ;;  %v62_v30 = vrot.slane %v61_v28, 4 }
 0x1d7   :  { %v63_v31 = vadd.f32 %v62_v30, %v61_v28  ;;  %v52_v32 = vadd.f32 %v51_v29, %v50_v27 }
 0x1d9   :  { %v64_v33 = vrot.slane %v63_v31, 2  ;;  %v53_v34 = vrot.slane %v52_v32, 1 }
 0x1db   :  { %v65_v35 = vadd.f32 %v64_v33, %v63_v31  ;;  %v54_v36 = vadd.f32 %v53_v34, %v52_v32 }
 0x1dd   :  { %100 = vpush %v54_v36  ;;  %v66_v37 = vrot.slane %v65_v35, 1 }
 0x1df   :  { %v67_v38 = vadd.f32 %v66_v37, %v65_v35 }
 0x1e1   :  { %102 = vpush %v67_v38 }
 0x20e   :  { %s101_s16 = spop %100 }
 0x20f   :  { %v56_v39 = vstv %s101_s16 }
 0x210   :  { %58 = vst.msk [vmem:[#allocation2] sm:$0x1] %vm57_vm4, %v56_v39 }
 0x211   :  { %124 = shalt.err (!%p121_p4)
}
 0x212   :  { %s125_s23 = scalar_lea.hbm %s222_s2, 16 }
 0x213   :  { %p126_p5 = scmp.ne.s32.totalorder %s222_s2, %s125_s23  ;;  %p129_p6 = scmp.lt.u32.totalorder %s125_s23, %s222_s2 }
 0x215   :  { %p131_p7 = pnand %p129_p6, %p126_p5 }
 0x217   :  { %134 = shalt.err (!%p131_p7)
}
 0x218   :  { %80 = dma.vmem_to_hbm [thread:$0]  %s78_s1, 16, %s222_s2, [#allocation3]  }
 0x219   :  { %s103_s30 = spop %102  ;;  %s135_s4 = scalar_lea.vmem %s88_s18, 16 }
 0x21a   :  { %v69_v40 = vstv %s103_s30  ;;  %p136_p8 = scmp.ne.s32.totalorder %s88_s18, %s135_s4  ;;  %s139_s5 = scalar_lea.vmem %s88_s18, 32 }
 0x21b   :  { %70 = vst.msk [vmem:[#allocation4] sm:$0x1] %vm57_vm4, %v69_v40  ;;  %p140_p9 = scmp.lt.s32.totalorder %s88_s18, %s88_s18  ;;  %p141_p10 = scmp.lt.s32.totalorder %s139_s5, %s135_s4 }
 0x21d   :  { %p142_p11 = por %p141_p10, %p140_p9 }
 0x21f   :  { %p143_p12 = pnand %p142_p11, %p136_p8 }
 0x221   :  { %146 = shalt.err (!%p143_p12)
}
 0x222   :  { %s147_s8 = scalar_lea.hbm %s223_s3, 16 }
 0x223   :  { %p148_p13 = scmp.ne.s32.totalorder %s223_s3, %s147_s8  ;;  %p151_p0 = scmp.lt.u32.totalorder %s147_s8, %s223_s3 }
 0x225   :  { %p153_p1 = pnand %p151_p0, %p148_p13 }
 0x227   :  { %156 = shalt.err (!%p153_p1)
}
 0x228   :  { %90 = dma.vmem_to_hbm [thread:$0]  %s88_s18, 16, %s223_s3, [#allocation5]  }
 0x229   :  { %157 = dma.done.wait [#allocation3], 16  }
 0x22a   :  { %158 = vsyncadd [#allocation3], 4294967280 }
 0x22b   :  { %159 = dma.done.wait [#allocation5], 16  }
 0x22c   :  { %160 = vsyncadd [#allocation5], 4294967280 }
 0x22d   :  { %97 = vsyncpa [#allocation3], 1 }
 0x22e   :  { %98 = vsyncpa [#allocation5], 1 }

// kernel: bert_legal_pretraining_forward.29
= control target key start
LH: loop header
LB: loop body
LE: loop exit
PB: predicated region body
PF: predicated region fallthrough
CT: control target
= control target key end

     0   :  { %s1064_s18 = smov 0   ;;  %s1455_s0 = inlined_call_operand.vmem [shape: f32[256,128], index: 0, kind: input, shape index: {}]   ;;  %s1456_s1 = inlined_call_operand.vmem [shape: bf16[128,128], index: 1, kind: input, shape index: {}]   ;;  %s1457_s2 = inlined_call_operand.vmem [shape: f32[1,128], index: 2, kind: input, shape index: {}]   ;;  %s1458_s3 = inlined_call_operand.vmem [shape: f32[1,128], index: 3, kind: input, shape index: {}]   ;;  %s1459_s4 = inlined_call_operand.vmem [shape: f32[1,128], index: 4, kind: input, shape index: {}]   ;;  %s1460_s5 = inlined_call_operand.vmem [shape: f32[256,128], index: 5, kind: output, shape index: {}]  }
   0x1 LB: > { %s860_s19 = sadd.s32 4294967295, %s1032_s18   ;;  %p864_p0 = scmp.ge.s32.totalorder %s1032_s18, 1  ;;  %s1032_s18 = sphi %s1064_s18, %s15_s18  }
   0x2   : > { %p188_p1 = scmp.lt.s32.totalorder %s1032_s18, 3 }
   0x4   : > { %p189_p2 = pnand %p864_p0, %p188_p1 }
   0x5   : > { %v954_v0 = vld [vmem:[%s1456_s1] sm:$0xff] (!%p189_p2)   ;;  %s865_s22 = sshll.u32 (!%p189_p2), %s860_s19, 4  ;;  %v955_v1 = vld [vmem:[%s1456_s1 + $0x8] sm:$0xff] (!%p189_p2)   ;;  %v956_v2 = vld [vmem:[%s1456_s1 + $0x10] sm:$0xff] (!%p189_p2)  }
   0x6   : > { %192 = sbr.rel (%p189_p2) target bundleno = 623 (0x26f), region = 40  ;;  %p217_p3 = scmp.lt.s32.totalorder (!%p189_p2), %s865_s22, 31  ;;  %898 = vmatprep.subr.bf16.mxu0 (!%p189_p2), %v954_v0  ;;  %930 = vmatprep.subr.bf16.mxu1 (!%p189_p2), %v954_v0  ;;  %v957_v3 = vld [vmem:[%s1456_s1 + $0x18] sm:$0xff] (!%p189_p2)   ;;  %v958_v10 = vld [vmem:[%s1456_s1 + $0x20] sm:$0xff] (!%p189_p2)   ;;  %v959_v11 = vld [vmem:[%s1456_s1 + $0x28] sm:$0xff] (!%p189_p2)  }
   0x7   : > { %899 = vmatpush3.bf16.msra.mxu0 (!%p189_p2), %v954_v0  ;;  %938 = vmatpush3.bf16.msra.mxu1 (!%p189_p2), %v954_v0  ;;  %v960_v12 = vld [vmem:[%s1456_s1 + $0x30] sm:$0xff] (!%p189_p2)   ;;  %v961_v13 = vld [vmem:[%s1456_s1 + $0x38] sm:$0xff] (!%p189_p2)   ;;  %v1125_v32 = vld [vmem:[%s1457_s2] ss:$0 sm:$0xff] (!%p189_p2) }
   0x8   : > { %900 = vmatprep.subr.bf16.mxu0 (!%p189_p2), %v955_v1  ;;  %931 = vmatprep.subr.bf16.mxu1 (!%p189_p2), %v955_v1 }
   0xb   : > { %901 = vmatpush3.bf16.msra.mxu0 (!%p189_p2), %v955_v1  ;;  %939 = vmatpush3.bf16.msra.mxu1 (!%p189_p2), %v955_v1 }
   0xc   : > { %902 = vmatprep.subr.bf16.mxu0 (!%p189_p2), %v956_v2  ;;  %932 = vmatprep.subr.bf16.mxu1 (!%p189_p2), %v956_v2 }
   0xd   : > { %s1462_s22 = smov (!%p217_p3, %s865_s22), 31 }
   0xe   : > { %s866_s27 = sshll.u32 %s1462_s22, 3 }
   0xf   : > { %s1089_s30 = scalar_lea.vmem %s1455_s0, %s866_s27  ;;  %903 = vmatpush3.bf16.msra.mxu0 %v956_v2  ;;  %940 = vmatpush3.bf16.msra.mxu1 %v956_v2  ;;  %s1388_s26 = scalar_lea.vmem %s1460_s5, %s866_s27 }
  0x10   : > { %v229_v4 = vld [vmem:[%s1089_s30] sm:$0xff]  ;;  %v230_v5 = vld [vmem:[%s1089_s30 + $0x8] sm:$0xff]  ;;  %904 = vmatprep.subr.bf16.mxu0 %v957_v3  ;;  %933 = vmatprep.subr.bf16.mxu1 %v957_v3  ;;  %v231_v14 = vld [vmem:[%s1089_s30 + $0x10] sm:$0xff] }
  0x11   : > { %v237_v6 = vld [vmem:[%s1089_s30 + $0x40] sm:$0xff]  ;;  %v245_v7 = vpack.c.bf16 %v230_v5, %v229_v4  ;;  %v238_v8 = vld [vmem:[%s1089_s30 + $0x48] sm:$0xff]  ;;  %v232_v15 = vld [vmem:[%s1089_s30 + $0x18] sm:$0xff] }
  0x12   : > { %v249_v9 = vpack.c.bf16 %v238_v8, %v237_v6  ;;  %v239_v16 = vld [vmem:[%s1089_s30 + $0x50] sm:$0xff]  ;;  %v240_v17 = vld [vmem:[%s1089_s30 + $0x58] sm:$0xff]  ;;  %v233_v18 = vld [vmem:[%s1089_s30 + $0x20] sm:$0xff]  ;;  %v246_v22 = vpack.c.bf16 %v232_v15, %v231_v14 }
  0x13   : > { %914 = vmatprep.mubr.bf16.mxu0 %v245_v7  ;;  %905 = vmatpush3.bf16.msra.mxu0 %v957_v3  ;;  %v234_v19 = vld [vmem:[%s1089_s30 + $0x28] sm:$0xff]  ;;  %v241_v20 = vld [vmem:[%s1089_s30 + $0x60] sm:$0xff]  ;;  %v250_v23 = vpack.c.bf16 %v240_v17, %v239_v16  ;;  %v235_v26 = vld [vmem:[%s1089_s30 + $0x30] sm:$0xff] }
  0x14   : > { %922 = vmatprep.mubr.bf16.mxu1 %v249_v9  ;;  %941 = vmatpush3.bf16.msra.mxu1 %v957_v3  ;;  %v242_v21 = vld [vmem:[%s1089_s30 + $0x68] sm:$0xff]  ;;  %v247_v24 = vpack.c.bf16 %v234_v19, %v233_v18  ;;  %v236_v27 = vld [vmem:[%s1089_s30 + $0x38] sm:$0xff]  ;;  %v243_v28 = vld [vmem:[%s1089_s30 + $0x70] sm:$0xff] }
  0x15   : > { %906 = vmatprep.subr.bf16.mxu0 %v958_v10  ;;  %934 = vmatprep.subr.bf16.mxu1 %v958_v10  ;;  %v251_v25 = vpack.c.bf16 %v242_v21, %v241_v20  ;;  %v244_v29 = vld [vmem:[%s1089_s30 + $0x78] sm:$0xff]  ;;  %v248_v30 = vpack.c.bf16 %v236_v27, %v235_v26 }
  0x16   : > { %v252_v31 = vpack.c.bf16 %v244_v29, %v243_v28 }
  0x17   : > { %907 = vmatpush3.bf16.msra.mxu0 %v958_v10 }
  0x18   : > { %942 = vmatpush3.bf16.msra.mxu1 %v958_v10  ;;  %908 = vmatprep.subr.bf16.mxu0 %v959_v11 }
  0x19   : > { %935 = vmatprep.subr.bf16.mxu1 %v959_v11 }
  0x1b   : > { %909 = vmatpush3.bf16.msra.mxu0 %v959_v11 }
  0x1c   : > { %943 = vmatpush3.bf16.msra.mxu1 %v959_v11  ;;  %910 = vmatprep.subr.bf16.mxu0 %v960_v12 }
  0x1d   : > { %936 = vmatprep.subr.bf16.mxu1 %v960_v12 }
  0x1f   : > { %911 = vmatpush3.bf16.msra.mxu0 %v960_v12 }
  0x20   : > { %944 = vmatpush3.bf16.msra.mxu1 %v960_v12  ;;  %912 = vmatprep.subr.bf16.mxu0 %v961_v13 }
  0x21   : > { %937 = vmatprep.subr.bf16.mxu1 %v961_v13 }
  0x23   : > { %913 = vmatpush3.bf16.msra.mxu0 %v961_v13 }
  0x24   : > { %945 = vmatpush3.bf16.msra.mxu1 %v961_v13 }
  0x26   : > { %915 = vmatmul.mubr.bf16.vlgmr.msra.gmra.mrb[0].mxu0 %v246_v22 }
  0x27   : > { %923 = vmatmul.mubr.bf16.vlgmr.msra.gmra.mrb[0].mxu1 %v250_v23  ;;  %918 = vmatprep.mubr.bf16.mxu0 %v247_v24 }
  0x28   : > { %926 = vmatprep.mubr.bf16.mxu1 %v251_v25 }
  0x2e   : > { %919 = vmatmul.mubr.bf16.gmra.mrb[4].mxu0 %v248_v30 }
  0x2f   : > { %927 = vmatmul.mubr.bf16.gmra.mrb[4].mxu1 %v252_v31 }
  0xf9   : > { %v916_v33 = vpop.f32.mrb[0].mxu0 }
  0xfa   : > { %v924_v34 = vpop.f32.mrb[0].mxu1  ;;  %v367_v35 = vadd.f32 %v916_v33, %v1125_v32  ;;  %v358_v37 = vpop.f32.mrb[1].mxu0 }
  0xfb   : > { %v399_v36 = vadd.f32 %v924_v34, %v1125_v32  ;;  %v390_v38 = vpop.f32.mrb[1].mxu1  ;;  %v359_v39 = vadd.f32 %v1125_v32, %v358_v37  ;;  %v917_v40 = vpop.f32.mrb[2].mxu0 }
  0xfc   : > { %v925_v41 = vpop.f32.mrb[2].mxu1  ;;  %v439_v42 = vmul.f32 0.044715, %v367_v35  ;;  %v1131_v44 = vadd.f32 %v917_v40, %v1125_v32  ;;  %v361_v46 = vpop.f32.mrb[3].mxu0  ;;  %v1138_v51 = vadd.f32 %v1125_v32, %v390_v38  ;;  %v1164_v16 = vmul.f32 0.5, %v367_v35 }
  0xfd   : > { %v447_v43 = vmul.f32 0.044715, %v399_v36  ;;  %v1134_v45 = vadd.f32 %v925_v41, %v1125_v32  ;;  %v393_v47 = vpop.f32.mrb[3].mxu1  ;;  %v437_v48 = vmul.f32 0.044715, %v359_v39  ;;  %v1142_v54 = vadd.f32 %v1125_v32, %v361_v46 }
  0xfe   : > { %v440_v49 = vmul.f32 0.044715, %v1131_v44  ;;  %v455_v52 = vmul.f32 %v439_v42, %v367_v35  ;;  %v1146_v57 = vadd.f32 %v1125_v32, %v393_v47  ;;  %v445_v2 = vmul.f32 0.044715, %v1138_v51 }
  0xff   : > { %v463_v50 = vmul.f32 %v447_v43, %v399_v36  ;;  %v448_v53 = vmul.f32 0.044715, %v1134_v45  ;;  %v453_v61 = vmul.f32 %v437_v48, %v359_v39  ;;  %v438_v8 = vmul.f32 0.044715, %v1142_v54 }
 0x100   : > { %v456_v56 = vmul.f32 %v440_v49, %v1131_v44  ;;  %v471_v60 = vmul.f32 %v455_v52, %v367_v35  ;;  %v1157_v12 = vmul.f32 0.5, %v399_v36  ;;  %v446_v14 = vmul.f32 0.044715, %v1146_v57 }
 0x101   : > { %v479_v55 = vmul.f32 %v463_v50, %v399_v36  ;;  %v920_v58 = vpop.f32.mrb[4].mxu0  ;;  %v469_v7 = vmul.f32 %v453_v61, %v359_v39  ;;  %v464_v13 = vmul.f32 %v448_v53, %v1134_v45  ;;  %v1166_v17 = vmul.f32 0.5, %v359_v39 }
 0x102   : > { %v928_v59 = vpop.f32.mrb[4].mxu1  ;;  %v374_v62 = vpop.f32.mrb[5].mxu0  ;;  %v472_v1 = vmul.f32 %v456_v56, %v1131_v44  ;;  %v1151_v3 = vadd.f32 %v920_v58, %v1125_v32  ;;  %v487_v6 = vadd.f32 %v471_v60, %v367_v35  ;;  %v461_v31 = vmul.f32 %v445_v2, %v1138_v51 }
 0x103   : > { %v406_v63 = vpop.f32.mrb[5].mxu1  ;;  %v495_v0 = vadd.f32 %v479_v55, %v399_v36  ;;  %v921_v4 = vpop.f32.mrb[6].mxu0  ;;  %v1162_v15 = vadd.f32 %v928_v59, %v1125_v32  ;;  %v1169_v18 = vadd.f32 %v1125_v32, %v374_v62  ;;  %v485_v25 = vadd.f32 %v469_v7, %v359_v39 }
 0x104   : > { %v929_v5 = vpop.f32.mrb[6].mxu1  ;;  %v1155_v9 = vadd.f32 %v921_v4, %v1125_v32  ;;  %v377_v10 = vpop.f32.mrb[7].mxu0  ;;  %v488_v21 = vadd.f32 %v472_v1, %v1131_v44  ;;  %v443_v22 = vmul.f32 0.044715, %v1151_v3  ;;  %v1177_v23 = vadd.f32 %v1125_v32, %v406_v63 }
 0x105   : > { %v409_v11 = vpop.f32.mrb[7].mxu1  ;;  %v1172_v19 = vadd.f32 %v1125_v32, %v377_v10  ;;  %v511_v20 = vmul.f32 0.7978846, %v495_v0  ;;  %v503_v24 = vmul.f32 0.7978846, %v487_v6  ;;  %v480_v28 = vmul.f32 %v464_v13, %v1134_v45 }
 0x106   : > { %v444_v26 = vmul.f32 0.044715, %v1155_v9  ;;  %v504_v27 = vmul.f32 0.7978846, %v488_v21  ;;  %v1182_v29 = vadd.f32 %v929_v5, %v1125_v32  ;;  %v501_v30 = vmul.f32 0.7978846, %v485_v25 }
 0x107   : > { %962 = vtanh.f32 %v511_v20  ;;  %v442_v33 = vmul.f32 0.044715, %v1172_v19  ;;  %v496_v34 = vadd.f32 %v480_v28, %v1134_v45  ;;  %v462_v35 = vmul.f32 %v446_v14, %v1146_v57 }
 0x108   : > { %964 = vtanh.f32 %v503_v24  ;;  %v1189_v36 = vadd.f32 %v1125_v32, %v409_v11  ;;  %v477_v37 = vmul.f32 %v461_v31, %v1138_v51  ;;  %v454_v38 = vmul.f32 %v438_v8, %v1142_v54 }
 0x109   : > { %966 = vtanh.f32 %v504_v27  ;;  %v441_v39 = vmul.f32 0.044715, %v1169_v18  ;;  %v512_v40 = vmul.f32 0.7978846, %v496_v34  ;;  %v478_v41 = vmul.f32 %v462_v35, %v1146_v57 }
 0x10a   : > { %968 = vtanh.f32 %v501_v30  ;;  %v460_v42 = vmul.f32 %v444_v26, %v1155_v9  ;;  %v449_v43 = vmul.f32 0.044715, %v1177_v23  ;;  %v493_v46 = vadd.f32 %v477_v37, %v1138_v51 }
 0x10b   : > { %v470_v47 = vmul.f32 %v454_v38, %v1142_v54  ;;  %v459_v32 = vmul.f32 %v443_v22, %v1151_v3  ;;  %970 = vtanh.f32 %v512_v40  ;;  %v494_v48 = vadd.f32 %v478_v41, %v1146_v57 }
 0x10c   : > { %v476_v49 = vmul.f32 %v460_v42, %v1155_v9  ;;  %v458_v50 = vmul.f32 %v442_v33, %v1172_v19  ;;  %v450_v52 = vmul.f32 0.044715, %v1189_v36  ;;  %v509_v53 = vmul.f32 0.7978846, %v493_v46 }
 0x10d   : > { %v486_v55 = vadd.f32 %v470_v47, %v1142_v54  ;;  %v475_v56 = vmul.f32 %v459_v32, %v1151_v3  ;;  %v510_v58 = vmul.f32 0.7978846, %v494_v48  ;;  %v457_v61 = vmul.f32 %v441_v39, %v1169_v18 }
 0x10e   : > { %v492_v59 = vadd.f32 %v476_v49, %v1155_v9  ;;  %v474_v60 = vmul.f32 %v458_v50, %v1172_v19  ;;  %v452_v62 = vmul.f32 0.044715, %v1182_v29  ;;  %972 = vtanh.f32 %v509_v53 }
 0x10f   : > { %v502_v63 = vmul.f32 0.7978846, %v486_v55  ;;  %v491_v0 = vadd.f32 %v475_v56, %v1151_v3  ;;  %974 = vtanh.f32 %v510_v58  ;;  %v473_v5 = vmul.f32 %v457_v61, %v1169_v18 }
 0x110   : > { %v508_v2 = vmul.f32 0.7978846, %v492_v59  ;;  %v490_v4 = vadd.f32 %v474_v60, %v1172_v19  ;;  %v466_v10 = vmul.f32 %v450_v52, %v1189_v36  ;;  %v451_v22 = vmul.f32 0.044715, %v1162_v15 }
 0x111   : > { %v963_v1 = vpop.eup %962  ;;  %976 = vtanh.f32 %v502_v63  ;;  %v507_v8 = vmul.f32 0.7978846, %v491_v0  ;;  %v489_v20 = vadd.f32 %v473_v5, %v1169_v18  ;;  %v465_v33 = vmul.f32 %v449_v43, %v1177_v23 }
 0x112   : > { %v965_v6 = vpop.eup %964  ;;  %v543_v7 = vadd.f32 1.0, %v963_v1  ;;  %978 = vtanh.f32 %v508_v2  ;;  %v506_v14 = vmul.f32 0.7978846, %v490_v4  ;;  %v482_v25 = vmul.f32 %v466_v10, %v1189_v36 }
 0x113   : > { %v967_v11 = vpop.eup %966  ;;  %v535_v13 = vadd.f32 1.0, %v965_v6  ;;  %980 = vtanh.f32 %v507_v8  ;;  %v505_v30 = vmul.f32 0.7978846, %v489_v20  ;;  %v481_v39 = vmul.f32 %v465_v33, %v1177_v23 }
 0x114   : > { %v969_v21 = vpop.eup %968  ;;  %v1217_v24 = vmul.f32 %v543_v7, %v1157_v12  ;;  %v536_v27 = vadd.f32 1.0, %v967_v11  ;;  %v498_v31 = vadd.f32 %v482_v25, %v1189_v36  ;;  %v424_v12 = vmul.f32 0.5, %v1131_v44 }
 0x115   : > { %v1221_v26 = vmul.f32 %v535_v13, %v1164_v16  ;;  %v533_v28 = vadd.f32 1.0, %v969_v21  ;;  %v971_v34 = vpop.eup %970  ;;  %982 = vtanh.f32 %v506_v14  ;;  %v468_v16 = vmul.f32 %v452_v62, %v1182_v29 }
 0x116   : > { %585 = vadd.xlane.f32.xlu0 %v1217_v24  ;;  %v544_v37 = vadd.f32 1.0, %v971_v34  ;;  %984 = vtanh.f32 %v505_v30  ;;  %v514_v38 = vmul.f32 0.7978846, %v498_v31  ;;  %v1233_v40 = vmul.f32 %v536_v27, %v424_v12 }
 0x117   : > { %569 = vadd.xlane.f32.xlu1 %v1221_v26  ;;  %v1229_v35 = vmul.f32 %v533_v28, %v1166_v17  ;;  %v484_v41 = vmul.f32 %v468_v16, %v1182_v29  ;;  %v467_v42 = vmul.f32 %v451_v22, %v1162_v15  ;;  %v432_v44 = vmul.f32 0.5, %v1134_v45 }
 0x118   : > { %v973_v43 = vpop.eup %972  ;;  %v497_v17 = vadd.f32 %v481_v39, %v1177_v23  ;;  %v429_v47 = vmul.f32 0.5, %v1138_v51  ;;  %986 = vtanh.f32 %v514_v38  ;;  %v430_v51 = vmul.f32 0.5, %v1146_v57 }
 0x119   : > { %v975_v46 = vpop.eup %974  ;;  %v541_v32 = vadd.f32 1.0, %v973_v43  ;;  %v500_v48 = vadd.f32 %v484_v41, %v1182_v29  ;;  %v483_v49 = vmul.f32 %v467_v42, %v1162_v15  ;;  %v1244_v52 = vmul.f32 %v544_v37, %v432_v44 }
 0x11a   : > { %565 = vadd.xlane.f32.xlu0 %v1229_v35  ;;  %v542_v53 = vadd.f32 1.0, %v975_v46  ;;  %v513_v55 = vmul.f32 0.7978846, %v497_v17  ;;  %v422_v62 = vmul.f32 0.5, %v1142_v54  ;;  %v428_v57 = vmul.f32 0.5, %v1155_v9 }
 0x11b   : > { %571 = vadd.xlane.f32.xlu1 %v1233_v40  ;;  %v977_v50 = vpop.eup %976  ;;  %v1246_v45 = vmul.f32 %v541_v32, %v429_v47  ;;  %v516_v59 = vmul.f32 0.7978846, %v500_v48  ;;  %v499_v60 = vadd.f32 %v483_v49, %v1162_v15  ;;  %v427_v7 = vmul.f32 0.5, %v1151_v3 }
 0x11c   : > { %v979_v56 = vpop.eup %978  ;;  %v534_v58 = vadd.f32 1.0, %v977_v50  ;;  %988 = vtanh.f32 %v513_v55  ;;  %v1253_v0 = vmul.f32 %v542_v53, %v430_v51  ;;  %v426_v14 = vmul.f32 0.5, %v1172_v19 }
 0x11d   : > { %v981_v61 = vpop.eup %980  ;;  %v515_v63 = vmul.f32 0.7978846, %v499_v60  ;;  %990 = vtanh.f32 %v516_v59  ;;  %v540_v4 = vadd.f32 1.0, %v979_v56  ;;  %v425_v20 = vmul.f32 0.5, %v1169_v18 }
 0x11e   : > { %581 = vadd.xlane.f32.xlu0 %v1246_v45  ;;  %v1255_v2 = vmul.f32 %v534_v58, %v422_v62  ;;  %v539_v5 = vadd.f32 1.0, %v981_v61  ;;  %v434_v30 = vmul.f32 0.5, %v1189_v36  ;;  %v433_v31 = vmul.f32 0.5, %v1177_v23 }
 0x11f   : > { %587 = vadd.xlane.f32.xlu1 %v1244_v52  ;;  %v983_v1 = vpop.eup %982  ;;  %992 = vtanh.f32 %v515_v63  ;;  %v1261_v54 = vmul.f32 %v540_v4, %v428_v57  ;;  %v436_v12 = vmul.f32 0.5, %v1182_v29  ;;  %v435_v16 = vmul.f32 0.5, %v1162_v15 }
 0x120   : > { %v985_v6 = vpop.eup %984  ;;  %v1263_v8 = vmul.f32 %v539_v5, %v427_v7  ;;  %v538_v10 = vadd.f32 1.0, %v983_v1 }
 0x121   : > { %v537_v11 = vadd.f32 1.0, %v985_v6 }
 0x122   : > { %567 = vadd.xlane.f32.xlu0 %v1255_v2  ;;  %v987_v13 = vpop.eup %986  ;;  %v1269_v22 = vmul.f32 %v538_v10, %v426_v14 }
 0x123   : > { %583 = vadd.xlane.f32.xlu1 %v1253_v0  ;;  %v1271_v9 = vmul.f32 %v537_v11, %v425_v20  ;;  %v546_v3 = vadd.f32 1.0, %v987_v13 }
 0x125   : > { %v1277_v19 = vmul.f32 %v546_v3, %v434_v30 }
 0x126   : > { %577 = vadd.xlane.f32.xlu0 %v1263_v8  ;;  %v989_v21 = vpop.eup %988 }
 0x127   : > { %579 = vadd.xlane.f32.xlu1 %v1261_v54  ;;  %v545_v25 = vadd.f32 1.0, %v989_v21  ;;  %v991_v27 = vpop.eup %990 }
 0x128   : > { %v548_v33 = vadd.f32 1.0, %v991_v27 }
 0x129   : > { %v993_v28 = vpop.eup %992  ;;  %v1279_v18 = vmul.f32 %v545_v25, %v433_v31 }
 0x12a   : > { %573 = vadd.xlane.f32.xlu0 %v1271_v9  ;;  %v547_v34 = vadd.f32 1.0, %v993_v28  ;;  %v1285_v37 = vmul.f32 %v548_v33, %v436_v12 }
 0x12b   : > { %575 = vadd.xlane.f32.xlu1 %v1269_v22 }
 0x12c   : > { %v1287_v38 = vmul.f32 %v547_v34, %v435_v16 }
 0x12e   : > { %589 = vadd.xlane.f32.xlu0 %v1279_v18 }
 0x12f   : > { %591 = vadd.xlane.f32.xlu1 %v1277_v19 }
 0x132   : > { %593 = vadd.xlane.f32.xlu0 %v1287_v38 }
 0x133   : > { %595 = vadd.xlane.f32.xlu1 %v1285_v37 }
 0x1a3   : > { %v586_v23 = vpop.xlane.xlu0 %585 }
 0x1a4   : > { %v570_v36 = vpop.xlane.xlu1 %569  ;;  %v608_v39 = vmul.f32 0.0078125, %v586_v23 }
 0x1a5   : > { %v600_v41 = vmul.f32 0.0078125, %v570_v36 }
 0x1a6   : > { %v1295_v15 = vsub.f32 %v1217_v24, %v608_v39 }
 0x1a7   : > { %v1292_v42 = vsub.f32 %v1221_v26, %v600_v41  ;;  %v566_v43 = vpop.xlane.xlu0 %565 }
 0x1a8   : > { %v572_v44 = vpop.xlane.xlu1 %571  ;;  %v598_v29 = vmul.f32 0.0078125, %v566_v43  ;;  %v640_v24 = vmul.f32 %v1295_v15, %v1295_v15 }
 0x1a9   : > { %v601_v17 = vmul.f32 0.0078125, %v572_v44  ;;  %v632_v46 = vmul.f32 %v1292_v42, %v1292_v42 }
 0x1aa   : > { %v1303_v32 = vsub.f32 %v1229_v35, %v598_v29 }
 0x1ab   : > { %v1300_v47 = vsub.f32 %v1233_v40, %v601_v17  ;;  %650 = vadd.xlane.f32.xlu0 %v632_v46  ;;  %v582_v26 = vpop.xlane.xlu0 %581 }
 0x1ac   : > { %v588_v48 = vpop.xlane.xlu1 %587  ;;  %v606_v50 = vmul.f32 0.0078125, %v582_v26  ;;  %v630_v35 = vmul.f32 %v1303_v32, %v1303_v32 }
 0x1ad   : > { %v609_v49 = vmul.f32 0.0078125, %v588_v48  ;;  %v633_v53 = vmul.f32 %v1300_v47, %v1300_v47 }
 0x1ae   : > { %v1315_v58 = vsub.f32 %v1246_v45, %v606_v50 }
 0x1af   : > { %v1310_v55 = vsub.f32 %v1244_v52, %v609_v49  ;;  %652 = vadd.xlane.f32.xlu1 %v633_v53  ;;  %666 = vadd.xlane.f32.xlu0 %v640_v24  ;;  %v568_v56 = vpop.xlane.xlu0 %567 }
 0x1b0   : > { %v584_v40 = vpop.xlane.xlu1 %583  ;;  %v599_v60 = vmul.f32 0.0078125, %v568_v56  ;;  %v638_v45 = vmul.f32 %v1315_v58, %v1315_v58 }
 0x1b1   : > { %v607_v59 = vmul.f32 0.0078125, %v584_v40  ;;  %v641_v61 = vmul.f32 %v1310_v55, %v1310_v55 }
 0x1b2   : > { %v1320_v51 = vsub.f32 %v1255_v2, %v599_v60 }
 0x1b3   : > { %668 = vadd.xlane.f32.xlu1 %v641_v61  ;;  %646 = vadd.xlane.f32.xlu0 %v630_v35  ;;  %v1323_v52 = vsub.f32 %v1253_v0, %v607_v59  ;;  %v578_v63 = vpop.xlane.xlu0 %577  ;;  %v1374_v61 = vld [vmem:[%s1458_s3] ss:$0 sm:$0xff] }
 0x1b4   : > { %v580_v62 = vpop.xlane.xlu1 %579  ;;  %v604_v4 = vmul.f32 0.0078125, %v578_v63  ;;  %v631_v5 = vmul.f32 %v1320_v51, %v1320_v51 }
 0x1b5   : > { %v605_v1 = vmul.f32 0.0078125, %v580_v62  ;;  %v639_v0 = vmul.f32 %v1323_v52, %v1323_v52 }
 0x1b6   : > { %v1330_v6 = vsub.f32 %v1263_v8, %v604_v4 }
 0x1b7   : > { %662 = vadd.xlane.f32.xlu0 %v638_v45  ;;  %648 = vadd.xlane.f32.xlu1 %v631_v5  ;;  %v574_v57 = vpop.xlane.xlu0 %573  ;;  %v1335_v7 = vsub.f32 %v1261_v54, %v605_v1  ;;  %v1380_v5 = vld [vmem:[%s1459_s4] ss:$0 sm:$0xff] }
 0x1b8   : > { %v576_v2 = vpop.xlane.xlu1 %575  ;;  %v602_v11 = vmul.f32 0.0078125, %v574_v57  ;;  %v636_v13 = vmul.f32 %v1330_v6, %v1330_v6 }
 0x1b9   : > { %v603_v10 = vmul.f32 0.0078125, %v576_v2  ;;  %v637_v54 = vmul.f32 %v1335_v7, %v1335_v7 }
 0x1ba   : > { %v1340_v14 = vsub.f32 %v1271_v9, %v602_v11 }
 0x1bb   : > { %664 = vadd.xlane.f32.xlu1 %v639_v0  ;;  %658 = vadd.xlane.f32.xlu0 %v636_v13  ;;  %v1343_v8 = vsub.f32 %v1269_v22, %v603_v10  ;;  %v590_v21 = vpop.xlane.xlu0 %589 }
 0x1bc   : > { %v592_v20 = vpop.xlane.xlu1 %591  ;;  %v610_v25 = vmul.f32 0.0078125, %v590_v21  ;;  %v634_v27 = vmul.f32 %v1340_v14, %v1340_v14 }
 0x1bd   : > { %v611_v3 = vmul.f32 0.0078125, %v592_v20  ;;  %v635_v22 = vmul.f32 %v1343_v8, %v1343_v8 }
 0x1be   : > { %v1350_v28 = vsub.f32 %v1279_v18, %v610_v25 }
 0x1bf   : > { %660 = vadd.xlane.f32.xlu1 %v637_v54  ;;  %654 = vadd.xlane.f32.xlu0 %v634_v27  ;;  %v594_v30 = vpop.xlane.xlu0 %593  ;;  %v1355_v31 = vsub.f32 %v1277_v19, %v611_v3 }
 0x1c0   : > { %v596_v9 = vpop.xlane.xlu1 %595  ;;  %v612_v34 = vmul.f32 0.0078125, %v594_v30  ;;  %v642_v12 = vmul.f32 %v1350_v28, %v1350_v28 }
 0x1c1   : > { %v613_v33 = vmul.f32 0.0078125, %v596_v9  ;;  %v643_v23 = vmul.f32 %v1355_v31, %v1355_v31 }
 0x1c2   : > { %v1360_v16 = vsub.f32 %v1287_v38, %v612_v34 }
 0x1c3   : > { %656 = vadd.xlane.f32.xlu1 %v635_v22  ;;  %670 = vadd.xlane.f32.xlu0 %v642_v12  ;;  %v1363_v18 = vsub.f32 %v1285_v37, %v613_v33 }
 0x1c4   : > { %v644_v19 = vmul.f32 %v1360_v16, %v1360_v16 }
 0x1c5   : > { %v645_v36 = vmul.f32 %v1363_v18, %v1363_v18 }
 0x1c7   : > { %672 = vadd.xlane.f32.xlu1 %v643_v23  ;;  %674 = vadd.xlane.f32.xlu0 %v644_v19 }
 0x1cb   : > { %676 = vadd.xlane.f32.xlu1 %v645_v36 }
 0x238   : > { %v651_v39 = vpop.xlane.xlu0 %650 }
 0x239   : > { %v680_v38 = vmul.f32 0.0078125, %v651_v39 }
 0x23b   : > { %v696_v41 = vadd.f32 1e-12, %v680_v38 }
 0x23c   : > { %v653_v43 = vpop.xlane.xlu1 %652  ;;  %v667_v44 = vpop.xlane.xlu0 %666 }
 0x23d   : > { %994 = vrsqrt.f32 %v696_v41  ;;  %v681_v37 = vmul.f32 0.0078125, %v653_v43  ;;  %v688_v29 = vmul.f32 0.0078125, %v667_v44 }
 0x23f   : > { %v697_v17 = vadd.f32 1e-12, %v681_v37  ;;  %v704_v46 = vadd.f32 1e-12, %v688_v29 }
 0x240   : > { %v669_v48 = vpop.xlane.xlu1 %668  ;;  %v647_v26 = vpop.xlane.xlu0 %646 }
 0x241   : > { %996 = vrsqrt.f32 %v697_v17  ;;  %v689_v49 = vmul.f32 0.0078125, %v669_v48  ;;  %v678_v50 = vmul.f32 0.0078125, %v647_v26 }
 0x242   : > { %998 = vrsqrt.f32 %v704_v46 }
 0x243   : > { %v705_v53 = vadd.f32 1e-12, %v689_v49  ;;  %v694_v24 = vadd.f32 1e-12, %v678_v50 }
 0x244   : > { %v649_v40 = vpop.xlane.xlu1 %648  ;;  %v663_v56 = vpop.xlane.xlu0 %662 }
 0x245   : > { %1000 = vrsqrt.f32 %v705_v53  ;;  %v679_v35 = vmul.f32 0.0078125, %v649_v40  ;;  %v686_v59 = vmul.f32 0.0078125, %v663_v56 }
 0x246   : > { %1002 = vrsqrt.f32 %v694_v24 }
 0x247   : > { %v995_v60 = vpop.eup %994  ;;  %v695_v62 = vadd.f32 1e-12, %v679_v35  ;;  %v702_v63 = vadd.f32 1e-12, %v686_v59 }
 0x248   : > { %v728_v1 = vmul.f32 %v995_v60, %v1292_v42  ;;  %v665_v4 = vpop.xlane.xlu1 %664  ;;  %v659_v45 = vpop.xlane.xlu0 %658 }
 0x249   : > { %1004 = vrsqrt.f32 %v695_v62  ;;  %v687_v2 = vmul.f32 0.0078125, %v665_v4  ;;  %v684_v57 = vmul.f32 0.0078125, %v659_v45 }
 0x24a   : > { %v751_v0 = vmul.f32 %v1374_v61, %v728_v1  ;;  %1006 = vrsqrt.f32 %v702_v63 }
 0x24b   : > { %v997_v10 = vpop.eup %996  ;;  %v703_v42 = vadd.f32 1e-12, %v687_v2  ;;  %v700_v11 = vadd.f32 1e-12, %v684_v57 }
 0x24c   : > { %v999_v13 = vpop.eup %998  ;;  %v774_v20 = vadd.f32 %v1380_v5, %v751_v0  ;;  %v729_v21 = vmul.f32 %v997_v10, %v1300_v47  ;;  %v661_v3 = vpop.xlane.xlu1 %660 }
 0x24d   : > { %v655_v25 = vpop.xlane.xlu0 %654  ;;  %v736_v54 = vmul.f32 %v999_v13, %v1295_v15  ;;  %1008 = vrsqrt.f32 %v703_v42  ;;  %v685_v27 = vmul.f32 0.0078125, %v661_v3 }
 0x24e   : > { %v682_v9 = vmul.f32 0.0078125, %v655_v25  ;;  %790 = vst [vmem:[%s1388_s26 + $0x10] sm:$0xff] %v774_v20  ;;  %v752_v30 = vmul.f32 %v1374_v61, %v729_v21  ;;  %1010 = vrsqrt.f32 %v700_v11 }
 0x24f   : > { %v1001_v22 = vpop.eup %1000  ;;  %v759_v33 = vmul.f32 %v1374_v61, %v736_v54  ;;  %v701_v34 = vadd.f32 1e-12, %v685_v27 }
 0x250   : > { %v698_v12 = vadd.f32 1e-12, %v682_v9  ;;  %v1003_v23 = vpop.eup %1002  ;;  %v775_v47 = vadd.f32 %v1380_v5, %v752_v30  ;;  %v737_v19 = vmul.f32 %v1001_v22, %v1310_v55  ;;  %v657_v15 = vpop.xlane.xlu1 %656 }
 0x251   : > { %v671_v36 = vpop.xlane.xlu0 %670  ;;  %v782_v39 = vadd.f32 %v1380_v5, %v759_v33  ;;  %v726_v38 = vmul.f32 %v1003_v23, %v1303_v32  ;;  %1012 = vrsqrt.f32 %v701_v34  ;;  %v683_v41 = vmul.f32 0.0078125, %v657_v15 }
 0x252   : > { %791 = vst [vmem:[%s1388_s26 + $0x18] sm:$0xff] %v775_v47  ;;  %v760_v43 = vmul.f32 %v1374_v61, %v737_v19  ;;  %1014 = vrsqrt.f32 %v698_v12  ;;  %v690_v44 = vmul.f32 0.0078125, %v671_v36 }
 0x253   : > { %v1005_v37 = vpop.eup %1004  ;;  %798 = vst [vmem:[%s1388_s26 + $0x50] sm:$0xff] %v782_v39  ;;  %v749_v29 = vmul.f32 %v1374_v61, %v726_v38  ;;  %v699_v17 = vadd.f32 1e-12, %v683_v41 }
 0x254   : > { %v1007_v55 = vpop.eup %1006  ;;  %v783_v46 = vadd.f32 %v1380_v5, %v760_v43  ;;  %v727_v48 = vmul.f32 %v1005_v37, %v1320_v51  ;;  %v706_v32 = vadd.f32 1e-12, %v690_v44  ;;  %v673_v26 = vpop.xlane.xlu1 %672 }
 0x255   : > { %v675_v49 = vpop.xlane.xlu0 %674  ;;  %v772_v50 = vadd.f32 %v1380_v5, %v749_v29  ;;  %v734_v53 = vmul.f32 %v1007_v55, %v1315_v58  ;;  %1016 = vrsqrt.f32 %v699_v17  ;;  %v691_v24 = vmul.f32 0.0078125, %v673_v26 }
 0x256   : > { %799 = vst [vmem:[%s1388_s26 + $0x58] sm:$0xff] %v783_v46  ;;  %v750_v40 = vmul.f32 %v1374_v61, %v727_v48  ;;  %1018 = vrsqrt.f32 %v706_v32  ;;  %v692_v56 = vmul.f32 0.0078125, %v675_v49 }
 0x257   : > { %v1009_v35 = vpop.eup %1008  ;;  %788 = vst [vmem:[%s1388_s26] sm:$0xff] %v772_v50  ;;  %v757_v51 = vmul.f32 %v1374_v61, %v734_v53  ;;  %v707_v59 = vadd.f32 1e-12, %v691_v24 }
 0x258   : > { %v1011_v60 = vpop.eup %1010  ;;  %v773_v62 = vadd.f32 %v1380_v5, %v750_v40  ;;  %v735_v63 = vmul.f32 %v1009_v35, %v1323_v52  ;;  %v708_v58 = vadd.f32 1e-12, %v692_v56  ;;  %v677_v1 = vpop.xlane.xlu1 %676 }
 0x259   : > { %v780_v4 = vadd.f32 %v1380_v5, %v757_v51  ;;  %v732_v45 = vmul.f32 %v1011_v60, %v1330_v6  ;;  %1020 = vrsqrt.f32 %v707_v59  ;;  %v693_v2 = vmul.f32 0.0078125, %v677_v1 }
 0x25a   : > { %789 = vst [vmem:[%s1388_s26 + $0x8] sm:$0xff] %v773_v62  ;;  %v758_v57 = vmul.f32 %v1374_v61, %v735_v63  ;;  %1022 = vrsqrt.f32 %v708_v58 }
 0x25b   : > { %v1013_v0 = vpop.eup %1012  ;;  %796 = vst [vmem:[%s1388_s26 + $0x40] sm:$0xff] %v780_v4  ;;  %v755_v10 = vmul.f32 %v1374_v61, %v732_v45  ;;  %v709_v42 = vadd.f32 1e-12, %v693_v2 }
 0x25c   : > { %v1015_v52 = vpop.eup %1014  ;;  %v781_v11 = vadd.f32 %v1380_v5, %v758_v57  ;;  %v733_v13 = vmul.f32 %v1013_v0, %v1335_v7 }
 0x25d   : > { %v778_v6 = vadd.f32 %v1380_v5, %v755_v10  ;;  %v730_v20 = vmul.f32 %v1015_v52, %v1340_v14  ;;  %1024 = vrsqrt.f32 %v709_v42 }
 0x25e   : > { %797 = vst [vmem:[%s1388_s26 + $0x48] sm:$0xff] %v781_v11  ;;  %v756_v21 = vmul.f32 %v1374_v61, %v733_v13 }
 0x25f   : > { %v1017_v3 = vpop.eup %1016  ;;  %794 = vst [vmem:[%s1388_s26 + $0x30] sm:$0xff] %v778_v6  ;;  %v753_v25 = vmul.f32 %v1374_v61, %v730_v20 }
 0x260   : > { %v1019_v54 = vpop.eup %1018  ;;  %v779_v27 = vadd.f32 %v1380_v5, %v756_v21  ;;  %v731_v9 = vmul.f32 %v1017_v3, %v1343_v8 }
 0x261   : > { %v776_v7 = vadd.f32 %v1380_v5, %v753_v25  ;;  %v738_v30 = vmul.f32 %v1019_v54, %v1350_v28 }
 0x262   : > { %795 = vst [vmem:[%s1388_s26 + $0x38] sm:$0xff] %v779_v27  ;;  %v754_v14 = vmul.f32 %v1374_v61, %v731_v9 }
 0x263   : > { %v1021_v22 = vpop.eup %1020  ;;  %792 = vst [vmem:[%s1388_s26 + $0x20] sm:$0xff] %v776_v7  ;;  %v761_v33 = vmul.f32 %v1374_v61, %v738_v30 }
 0x264   : > { %v1023_v34 = vpop.eup %1022  ;;  %v777_v12 = vadd.f32 %v1380_v5, %v754_v14  ;;  %v739_v8 = vmul.f32 %v1021_v22, %v1355_v31 }
 0x265   : > { %v784_v23 = vadd.f32 %v1380_v5, %v761_v33  ;;  %v740_v47 = vmul.f32 %v1023_v34, %v1360_v16 }
 0x266   : > { %793 = vst [vmem:[%s1388_s26 + $0x28] sm:$0xff] %v777_v12  ;;  %v762_v28 = vmul.f32 %v1374_v61, %v739_v8 }
 0x267   : > { %v1025_v19 = vpop.eup %1024  ;;  %800 = vst [vmem:[%s1388_s26 + $0x60] sm:$0xff] %v784_v23  ;;  %v763_v15 = vmul.f32 %v1374_v61, %v740_v47 }
 0x268   : > { %v785_v36 = vadd.f32 %v1380_v5, %v762_v28  ;;  %v741_v39 = vmul.f32 %v1025_v19, %v1363_v18 }
 0x269   : > { %v786_v38 = vadd.f32 %v1380_v5, %v763_v15 }
 0x26a   : > { %801 = vst [vmem:[%s1388_s26 + $0x68] sm:$0xff] %v785_v36  ;;  %v764_v31 = vmul.f32 %v1374_v61, %v741_v39 }
 0x26b   : > { %802 = vst [vmem:[%s1388_s26 + $0x70] sm:$0xff] %v786_v38 }
 0x26c   : > { %v787_v41 = vadd.f32 %v1380_v5, %v764_v31 }
 0x26e   : > { %803 = vst [vmem:[%s1388_s26 + $0x78] sm:$0xff] %v787_v41 }
 0x26f PF: > { %s15_s18 = sadd.s32 1, %s1032_s18  }
 0x270   : > { %p12_p4 = scmp.ge.s32.totalorder %s15_s18, 4  }
 0x272   :  { %14 = sbr.rel (!%p12_p4) target bundleno = 1 (0x1), region = 70 }

// kernel: bert_legal_pretraining_forward.30
= control target key start
LH: loop header
LB: loop body
LE: loop exit
PB: predicated region body
PF: predicated region fallthrough
CT: control target
= control target key end

     0   :  { %s619_s12 = smov 0   ;;  %s787_s0 = inlined_call_operand.vmem [shape: f32[256,128], index: 0, kind: input, shape index: {}]   ;;  %s788_s1 = inlined_call_operand.vmem [shape: bf16[128,256], index: 1, kind: input, shape index: {}]   ;;  %s789_s2 = inlined_call_operand.vmem [shape: f32[1,256], index: 2, kind: input, shape index: {}]   ;;  %s790_s3 = inlined_call_operand.vmem [shape: f32[256,256], index: 3, kind: output, shape index: {}]  }
   0x1 LB: > { %s512_s13 = sadd.s32 4294967295, %s596_s12   ;;  %p516_p0 = scmp.ge.s32.totalorder %s596_s12, 1  ;;  %s596_s12 = sphi %s619_s12, %s13_s12  }
   0x2   : > { %p138_p1 = scmp.lt.s32.totalorder %s596_s12, 3 }
   0x4   : > { %p139_p2 = pnand %p516_p0, %p138_p1 }
   0x5   : > { %v566_v0 = vld [vmem:[%s788_s1 + $0x4] ss:$8 sps:$4 sm:$0xff] (!%p139_p2)   ;;  %v568_v1 = vld [vmem:[%s788_s1] ss:$8 sps:$4 sm:$0xff] (!%p139_p2)   ;;  %v598_v2 = vmov (!%p139_p2), 0   ;;  %s517_s28 = sshll.u32 (!%p139_p2), %s512_s13, 4  ;;  %v219_v41 = vlaneseq (!%p139_p2) }
   0x6   : > { %142 = sbr.rel (%p139_p2) target bundleno = 281 (0x119), region = 32  ;;  %341 = vmatprep.mubr.bf16.mxu0 (!%p139_p2), %v598_v2  ;;  %381 = vmatprep.mubr.bf16.mxu1 (!%p139_p2), %v598_v2  ;;  %v569_v3 = vld [vmem:[%s788_s1 + $0x14] ss:$8 sps:$4 sm:$0xff] (!%p139_p2)   ;;  %v571_v4 = vld [vmem:[%s788_s1 + $0x10] ss:$8 sps:$4 sm:$0xff] (!%p139_p2)   ;;  %p164_p3 = scmp.lt.s32.totalorder (!%p139_p2), %s517_s28, 31 }
   0x7   : > { %309 = vmatprep.subr.bf16.mxu0 (!%p139_p2), %v566_v0  ;;  %541 = vmatprep.subr.bf16.mxu1 (!%p139_p2), %v566_v0  ;;  %v572_v5 = vld [vmem:[%s788_s1 + $0x24] ss:$8 sps:$4 sm:$0xff] (!%p139_p2)   ;;  %v574_v6 = vld [vmem:[%s788_s1 + $0x20] ss:$8 sps:$4 sm:$0xff] (!%p139_p2)   ;;  %v575_v7 = vld [vmem:[%s788_s1 + $0x34] ss:$8 sps:$4 sm:$0xff] (!%p139_p2)  }
   0x8   : > { %310 = vmatpush1.bf16.msra.mxu0 (!%p139_p2), %v568_v1  ;;  %549 = vmatpush1.bf16.msra.mxu1 (!%p139_p2), %v568_v1  ;;  %v577_v8 = vld [vmem:[%s788_s1 + $0x30] ss:$8 sps:$4 sm:$0xff] (!%p139_p2)   ;;  %v578_v9 = vld [vmem:[%s788_s1 + $0x44] ss:$8 sps:$4 sm:$0xff] (!%p139_p2)   ;;  %v580_v10 = vld [vmem:[%s788_s1 + $0x40] ss:$8 sps:$4 sm:$0xff] (!%p139_p2)  }
   0x9   : > { %311 = vmatprep.subr.bf16.mxu0 (!%p139_p2), %v569_v3  ;;  %542 = vmatprep.subr.bf16.mxu1 (!%p139_p2), %v569_v3  ;;  %v581_v11 = vld [vmem:[%s788_s1 + $0x54] ss:$8 sps:$4 sm:$0xff] (!%p139_p2)   ;;  %v583_v12 = vld [vmem:[%s788_s1 + $0x50] ss:$8 sps:$4 sm:$0xff] (!%p139_p2)   ;;  %v584_v13 = vld [vmem:[%s788_s1 + $0x64] ss:$8 sps:$4 sm:$0xff] (!%p139_p2)  }
   0xa   : > { %v586_v14 = vld [vmem:[%s788_s1 + $0x60] ss:$8 sps:$4 sm:$0xff] (!%p139_p2)   ;;  %v587_v15 = vld [vmem:[%s788_s1 + $0x74] ss:$8 sps:$4 sm:$0xff] (!%p139_p2)   ;;  %v589_v16 = vld [vmem:[%s788_s1 + $0x70] ss:$8 sps:$4 sm:$0xff] (!%p139_p2)  }
   0xb   : > { %v220_v42 = vshrl.u32 (!%p139_p2), %v219_v41, 7  ;;  %v217_v44 = vld [vmem:[%s789_s2] sm:$0x3] (!%p139_p2) }
   0xc   : > { %312 = vmatpush1.bf16.msra.mxu0 (!%p139_p2), %v571_v4  ;;  %550 = vmatpush1.bf16.msra.mxu1 (!%p139_p2), %v571_v4 }
   0xd   : > { %313 = vmatprep.subr.bf16.mxu0 %v572_v5  ;;  %543 = vmatprep.subr.bf16.mxu1 %v572_v5  ;;  %s792_s28 = smov (!%p164_p3, %s517_s28), 31  ;;  %v221_v43 = vsub.s32 0, %v220_v42  ;;  %v225_v45 = vsub.s32 1, %v220_v42 }
   0xe   : > { %s518_s15 = sshll.u32 %s792_s28, 3  ;;  %s540_s27 = sshll.u32 %s792_s28, 4 }
   0xf   : > { %s677_s20 = scalar_lea.vmem %s787_s0, %s518_s15  ;;  %v711_v46 = vrot.slane %v217_v44, %v221_v43  ;;  %v713_v47 = vrot.slane %v217_v44, %v225_v45  ;;  %s718_s4 = scalar_lea.vmem %s790_s3, %s540_s27 }
  0x10   : > { %314 = vmatpush1.bf16.msra.mxu0 %v574_v6  ;;  %551 = vmatpush1.bf16.msra.mxu1 %v574_v6  ;;  %v177_v17 = vld [vmem:[%s677_s20] sm:$0xff]  ;;  %v178_v18 = vld [vmem:[%s677_s20 + $0x8] sm:$0xff]  ;;  %v179_v23 = vld [vmem:[%s677_s20 + $0x10] sm:$0xff] }
  0x11   : > { %315 = vmatprep.subr.bf16.mxu0 %v575_v7  ;;  %544 = vmatprep.subr.bf16.mxu1 %v575_v7  ;;  %v185_v19 = vld [vmem:[%s677_s20 + $0x40] sm:$0xff]  ;;  %v186_v20 = vld [vmem:[%s677_s20 + $0x48] sm:$0xff]  ;;  %v193_v21 = vpack.c.bf16 %v178_v18, %v177_v17  ;;  %v180_v24 = vld [vmem:[%s677_s20 + $0x18] sm:$0xff] }
  0x12   : > { %v197_v22 = vpack.c.bf16 %v186_v20, %v185_v19  ;;  %v187_v25 = vld [vmem:[%s677_s20 + $0x50] sm:$0xff]  ;;  %v188_v26 = vld [vmem:[%s677_s20 + $0x58] sm:$0xff]  ;;  %v194_v27 = vpack.c.bf16 %v180_v24, %v179_v23  ;;  %v181_v29 = vld [vmem:[%s677_s20 + $0x20] sm:$0xff] }
  0x13   : > { %v198_v28 = vpack.c.bf16 %v188_v26, %v187_v25  ;;  %v182_v30 = vld [vmem:[%s677_s20 + $0x28] sm:$0xff]  ;;  %v189_v31 = vld [vmem:[%s677_s20 + $0x60] sm:$0xff]  ;;  %v183_v35 = vld [vmem:[%s677_s20 + $0x30] sm:$0xff] }
  0x14   : > { %316 = vmatpush1.bf16.msra.mxu0 %v577_v8  ;;  %552 = vmatpush1.bf16.msra.mxu1 %v577_v8  ;;  %v190_v32 = vld [vmem:[%s677_s20 + $0x68] sm:$0xff]  ;;  %v195_v33 = vpack.c.bf16 %v182_v30, %v181_v29  ;;  %v184_v36 = vld [vmem:[%s677_s20 + $0x38] sm:$0xff]  ;;  %v191_v37 = vld [vmem:[%s677_s20 + $0x70] sm:$0xff] }
  0x15   : > { %317 = vmatprep.subr.bf16.mxu0 %v578_v9  ;;  %545 = vmatprep.subr.bf16.mxu1 %v578_v9  ;;  %v199_v34 = vpack.c.bf16 %v190_v32, %v189_v31  ;;  %v192_v38 = vld [vmem:[%s677_s20 + $0x78] sm:$0xff]  ;;  %v196_v39 = vpack.c.bf16 %v184_v36, %v183_v35 }
  0x16   : > { %v200_v40 = vpack.c.bf16 %v192_v38, %v191_v37 }
  0x18   : > { %318 = vmatpush1.bf16.msra.mxu0 %v580_v10  ;;  %553 = vmatpush1.bf16.msra.mxu1 %v580_v10 }
  0x19   : > { %319 = vmatprep.subr.bf16.mxu0 %v581_v11  ;;  %546 = vmatprep.subr.bf16.mxu1 %v581_v11 }
  0x1c   : > { %320 = vmatpush1.bf16.msra.mxu0 %v583_v12  ;;  %554 = vmatpush1.bf16.msra.mxu1 %v583_v12 }
  0x1d   : > { %321 = vmatprep.subr.bf16.mxu0 %v584_v13  ;;  %547 = vmatprep.subr.bf16.mxu1 %v584_v13 }
  0x20   : > { %322 = vmatpush1.bf16.msra.mxu0 %v586_v14  ;;  %555 = vmatpush1.bf16.msra.mxu1 %v586_v14 }
  0x21   : > { %323 = vmatprep.subr.bf16.mxu0 %v587_v15  ;;  %548 = vmatprep.subr.bf16.mxu1 %v587_v15 }
  0x24   : > { %324 = vmatpush1.bf16.msra.mxu0 %v589_v16  ;;  %556 = vmatpush1.bf16.msra.mxu1 %v589_v16 }
  0x27   : > { %342 = vmatmul.mubr.bf16.vlgmr.msra.gmra.mrb[0].mxu0 %v193_v21  ;;  %382 = vmatmul.mubr.bf16.vlgmr.msra.gmra.mrb[0].mxu1 %v197_v22 }
  0x28   : > { %351 = vmatprep.mubr.bf16.mxu0 %v598_v2  ;;  %391 = vmatprep.mubr.bf16.mxu1 %v598_v2 }
  0x2f   : > { %352 = vmatmul.mubr.bf16.gmra.mrb[4].mxu0 %v194_v27  ;;  %392 = vmatmul.mubr.bf16.gmra.mrb[4].mxu1 %v198_v28 }
  0x30   : > { %361 = vmatprep.mubr.bf16.mxu0 %v598_v2  ;;  %401 = vmatprep.mubr.bf16.mxu1 %v598_v2 }
  0x37   : > { %362 = vmatmul.mubr.bf16.gmra.mrb[8].mxu0 %v195_v33  ;;  %402 = vmatmul.mubr.bf16.gmra.mrb[8].mxu1 %v199_v34 }
  0x38   : > { %371 = vmatprep.mubr.bf16.mxu0 %v598_v2  ;;  %411 = vmatprep.mubr.bf16.mxu1 %v598_v2 }
  0x3f   : > { %372 = vmatmul.mubr.bf16.gmra.mrb[12].mxu0 %v196_v39  ;;  %412 = vmatmul.mubr.bf16.gmra.mrb[12].mxu1 %v200_v40 }
  0xfa   : > { %v343_v48 = vpop.f32.mrb[0].mxu0  ;;  %v383_v49 = vpop.f32.mrb[0].mxu1 }
  0xfb   : > { %v344_v50 = vadd.f32 %v343_v48, %v711_v46  ;;  %v384_v51 = vadd.f32 %v383_v49, %v711_v46  ;;  %v345_v52 = vpop.f32.mrb[1].mxu0  ;;  %v385_v53 = vpop.f32.mrb[1].mxu1 }
  0xfc   : > { %v346_v54 = vadd.f32 %v345_v52, %v713_v47  ;;  %v386_v55 = vadd.f32 %v385_v53, %v713_v47  ;;  %v347_v56 = vpop.f32.mrb[2].mxu0  ;;  %v387_v57 = vpop.f32.mrb[2].mxu1 }
  0xfd   : > { %422 = vst [vmem:[%s718_s4] sm:$0xff] %v344_v50  ;;  %438 = vst [vmem:[%s718_s4 + $0x80] sm:$0xff] %v384_v51  ;;  %v348_v58 = vadd.f32 %v347_v56, %v711_v46  ;;  %v388_v59 = vadd.f32 %v387_v57, %v711_v46  ;;  %v349_v60 = vpop.f32.mrb[3].mxu0  ;;  %v389_v61 = vpop.f32.mrb[3].mxu1 }
  0xfe   : > { %423 = vst [vmem:[%s718_s4 + $0x8] sm:$0xff] %v346_v54  ;;  %439 = vst [vmem:[%s718_s4 + $0x88] sm:$0xff] %v386_v55  ;;  %v350_v62 = vadd.f32 %v349_v60, %v713_v47  ;;  %v390_v63 = vadd.f32 %v389_v61, %v713_v47 }
  0xff   : > { %424 = vst [vmem:[%s718_s4 + $0x10] sm:$0xff] %v348_v58  ;;  %440 = vst [vmem:[%s718_s4 + $0x90] sm:$0xff] %v388_v59 }
 0x100   : > { %425 = vst [vmem:[%s718_s4 + $0x18] sm:$0xff] %v350_v62  ;;  %441 = vst [vmem:[%s718_s4 + $0x98] sm:$0xff] %v390_v63 }
 0x102   : > { %v353_v0 = vpop.f32.mrb[4].mxu0  ;;  %v393_v1 = vpop.f32.mrb[4].mxu1 }
 0x103   : > { %v354_v2 = vadd.f32 %v353_v0, %v711_v46  ;;  %v394_v3 = vadd.f32 %v393_v1, %v711_v46  ;;  %v355_v4 = vpop.f32.mrb[5].mxu0  ;;  %v395_v5 = vpop.f32.mrb[5].mxu1 }
 0x104   : > { %v356_v6 = vadd.f32 %v355_v4, %v713_v47  ;;  %v396_v7 = vadd.f32 %v395_v5, %v713_v47  ;;  %v357_v8 = vpop.f32.mrb[6].mxu0  ;;  %v397_v9 = vpop.f32.mrb[6].mxu1 }
 0x105   : > { %426 = vst [vmem:[%s718_s4 + $0x20] sm:$0xff] %v354_v2  ;;  %442 = vst [vmem:[%s718_s4 + $0xa0] sm:$0xff] %v394_v3  ;;  %v358_v10 = vadd.f32 %v357_v8, %v711_v46  ;;  %v398_v11 = vadd.f32 %v397_v9, %v711_v46  ;;  %v359_v12 = vpop.f32.mrb[7].mxu0  ;;  %v399_v13 = vpop.f32.mrb[7].mxu1 }
 0x106   : > { %427 = vst [vmem:[%s718_s4 + $0x28] sm:$0xff] %v356_v6  ;;  %443 = vst [vmem:[%s718_s4 + $0xa8] sm:$0xff] %v396_v7  ;;  %v360_v14 = vadd.f32 %v359_v12, %v713_v47  ;;  %v400_v15 = vadd.f32 %v399_v13, %v713_v47 }
 0x107   : > { %428 = vst [vmem:[%s718_s4 + $0x30] sm:$0xff] %v358_v10  ;;  %444 = vst [vmem:[%s718_s4 + $0xb0] sm:$0xff] %v398_v11 }
 0x108   : > { %429 = vst [vmem:[%s718_s4 + $0x38] sm:$0xff] %v360_v14  ;;  %445 = vst [vmem:[%s718_s4 + $0xb8] sm:$0xff] %v400_v15 }
 0x10a   : > { %v363_v16 = vpop.f32.mrb[8].mxu0  ;;  %v403_v17 = vpop.f32.mrb[8].mxu1 }
 0x10b   : > { %v364_v18 = vadd.f32 %v363_v16, %v711_v46  ;;  %v404_v19 = vadd.f32 %v403_v17, %v711_v46  ;;  %v365_v20 = vpop.f32.mrb[9].mxu0  ;;  %v405_v21 = vpop.f32.mrb[9].mxu1 }
 0x10c   : > { %v366_v22 = vadd.f32 %v365_v20, %v713_v47  ;;  %v406_v23 = vadd.f32 %v405_v21, %v713_v47  ;;  %v367_v24 = vpop.f32.mrb[10].mxu0  ;;  %v407_v25 = vpop.f32.mrb[10].mxu1 }
 0x10d   : > { %430 = vst [vmem:[%s718_s4 + $0x40] sm:$0xff] %v364_v18  ;;  %446 = vst [vmem:[%s718_s4 + $0xc0] sm:$0xff] %v404_v19  ;;  %v368_v26 = vadd.f32 %v367_v24, %v711_v46  ;;  %v408_v27 = vadd.f32 %v407_v25, %v711_v46  ;;  %v369_v28 = vpop.f32.mrb[11].mxu0  ;;  %v409_v29 = vpop.f32.mrb[11].mxu1 }
 0x10e   : > { %431 = vst [vmem:[%s718_s4 + $0x48] sm:$0xff] %v366_v22  ;;  %447 = vst [vmem:[%s718_s4 + $0xc8] sm:$0xff] %v406_v23  ;;  %v370_v30 = vadd.f32 %v369_v28, %v713_v47  ;;  %v410_v31 = vadd.f32 %v409_v29, %v713_v47 }
 0x10f   : > { %432 = vst [vmem:[%s718_s4 + $0x50] sm:$0xff] %v368_v26  ;;  %448 = vst [vmem:[%s718_s4 + $0xd0] sm:$0xff] %v408_v27 }
 0x110   : > { %433 = vst [vmem:[%s718_s4 + $0x58] sm:$0xff] %v370_v30  ;;  %449 = vst [vmem:[%s718_s4 + $0xd8] sm:$0xff] %v410_v31 }
 0x112   : > { %v373_v32 = vpop.f32.mrb[12].mxu0  ;;  %v413_v33 = vpop.f32.mrb[12].mxu1 }
 0x113   : > { %v374_v34 = vadd.f32 %v373_v32, %v711_v46  ;;  %v414_v35 = vadd.f32 %v413_v33, %v711_v46  ;;  %v375_v36 = vpop.f32.mrb[13].mxu0  ;;  %v415_v37 = vpop.f32.mrb[13].mxu1 }
 0x114   : > { %v376_v38 = vadd.f32 %v375_v36, %v713_v47  ;;  %v416_v39 = vadd.f32 %v415_v37, %v713_v47  ;;  %v377_v40 = vpop.f32.mrb[14].mxu0  ;;  %v417_v41 = vpop.f32.mrb[14].mxu1 }
 0x115   : > { %434 = vst [vmem:[%s718_s4 + $0x60] sm:$0xff] %v374_v34  ;;  %450 = vst [vmem:[%s718_s4 + $0xe0] sm:$0xff] %v414_v35  ;;  %v378_v42 = vadd.f32 %v377_v40, %v711_v46  ;;  %v418_v43 = vadd.f32 %v417_v41, %v711_v46  ;;  %v379_v44 = vpop.f32.mrb[15].mxu0  ;;  %v419_v45 = vpop.f32.mrb[15].mxu1 }
 0x116   : > { %435 = vst [vmem:[%s718_s4 + $0x68] sm:$0xff] %v376_v38  ;;  %451 = vst [vmem:[%s718_s4 + $0xe8] sm:$0xff] %v416_v39  ;;  %v380_v48 = vadd.f32 %v379_v44, %v713_v47  ;;  %v420_v49 = vadd.f32 %v419_v45, %v713_v47 }
 0x117   : > { %436 = vst [vmem:[%s718_s4 + $0x70] sm:$0xff] %v378_v42  ;;  %452 = vst [vmem:[%s718_s4 + $0xf0] sm:$0xff] %v418_v43 }
 0x118   : > { %437 = vst [vmem:[%s718_s4 + $0x78] sm:$0xff] %v380_v48  ;;  %453 = vst [vmem:[%s718_s4 + $0xf8] sm:$0xff] %v420_v49 }
 0x119 PF: > { %s13_s12 = sadd.s32 1, %s596_s12  }
 0x11a   : > { %p10_p4 = scmp.ge.s32.totalorder %s13_s12, 4  }
 0x11c   :  { %12 = sbr.rel (!%p10_p4) target bundleno = 1 (0x1), region = 62 }

// kernel: bert_legal_pretraining_forward.35
= control target key start
LH: loop header
LB: loop body
LE: loop exit
PB: predicated region body
PF: predicated region fallthrough
CT: control target
= control target key end

     0   :  { %v217_v1 = vmov 0.0   ;;  %vm218_vm0 = vmmov 0   ;;  %s282_s0 = inlined_call_operand.vmem [shape: f32[2,128], index: 0, kind: input, shape index: {}]   ;;  %s283_s1 = inlined_call_operand.vmem [shape: bf16[128,128], index: 1, kind: input, shape index: {}]   ;;  %s284_s2 = inlined_call_operand.vmem [shape: f32[1,128], index: 2, kind: input, shape index: {}]   ;;  %s285_s3 = inlined_call_operand.hbm [shape: f32[2,128], index: 3, kind: output, shape index: {}]  }
   0x1   :  { %v185_v0 = vld [vmem:[%s283_s1] sm:$0xff]   ;;  %162 = vmatprep.subr.bf16.mxu0 %v217_v1  ;;  %v186_v2 = vld [vmem:[%s283_s1 + $0x8] sm:$0xff]   ;;  %178 = vmatprep.mubr.msk.bf16.mxu0 %vm218_vm0, %v217_v1  ;;  %v187_v3 = vld [vmem:[%s283_s1 + $0x10] sm:$0xff]  }
   0x2   :  { %163 = vmatpush3.bf16.msra.mxu0 %v185_v0 }
   0x3   :  { %164 = vmatprep.subr.bf16.mxu0 %v217_v1 }
   0x6   :  { %165 = vmatpush3.bf16.msra.mxu0 %v186_v2 }
   0x7   :  { %166 = vmatprep.subr.bf16.mxu0 %v217_v1 }
   0x8   :  { %8 = vsyncpa [#allocation3], 0  ;;  %v188_v4 = vld [vmem:[%s283_s1 + $0x18] sm:$0xff]   ;;  %v189_v5 = vld [vmem:[%s283_s1 + $0x20] sm:$0xff]   ;;  %s219_s5 = smov [#allocation2]  }
   0x9   :  { %v190_v6 = vld [vmem:[%s283_s1 + $0x28] sm:$0xff]   ;;  %v191_v7 = vld [vmem:[%s283_s1 + $0x30] sm:$0xff]   ;;  %v192_v8 = vld [vmem:[%s283_s1 + $0x38] sm:$0xff]   ;;  %s136_s6 = sshll.u32 %s219_s5, 4  ;;  %s137_s6 = int_to_ptr.vmem [resolvable:$true] %s136_s6 }
   0xa   :  { %167 = vmatpush3.bf16.msra.mxu0 %v187_v3  ;;  %v16_v9 = vld [vmem:[%s282_s0] sm:$0x3]  ;;  %s193_s1 = scalar_lea.vmem %s137_s6, 32  ;;  %p198_p1 = scmp.lt.s32.totalorder %s137_s6, %s137_s6 }
   0xb   :  { %168 = vmatprep.subr.bf16.mxu0 %v217_v1  ;;  %v17_v10 = vpack.c.bf16 %v16_v9, %v16_v9  ;;  %v144_v11 = vld [vmem:[%s284_s2] ss:$0 sm:$0xff]  ;;  %p194_p0 = scmp.ne.s32.totalorder %s137_s6, %s193_s1  ;;  %p199_p2 = scmp.lt.s32.totalorder %s193_s1, %s193_s1 }
   0xd   :  { %p200_p3 = por %p199_p2, %p198_p1 }
   0xe   :  { %169 = vmatpush3.bf16.msra.mxu0 %v188_v4 }
   0xf   :  { %170 = vmatprep.subr.bf16.mxu0 %v217_v1  ;;  %p201_p4 = pnand %p200_p3, %p194_p0 }
  0x12   :  { %171 = vmatpush3.bf16.msra.mxu0 %v189_v5 }
  0x13   :  { %172 = vmatprep.subr.bf16.mxu0 %v217_v1 }
  0x16   :  { %173 = vmatpush3.bf16.msra.mxu0 %v190_v6 }
  0x17   :  { %174 = vmatprep.subr.bf16.mxu0 %v217_v1 }
  0x1a   :  { %175 = vmatpush3.bf16.msra.mxu0 %v191_v7 }
  0x1b   :  { %176 = vmatprep.subr.bf16.mxu0 %v217_v1 }
  0x1e   :  { %177 = vmatpush3.bf16.msra.mxu0 %v192_v8 }
  0x21   :  { %179 = vmatmul.mubr.bf16.vlgmr.msra.gmra.mrb[0].mxu0 %v17_v10 }
  0xf4   :  { %v123_v12 = vpop.f32.mrb[0].mxu0 }
  0xf5   :  { %v124_v13 = vadd.f32 %v144_v11, %v123_v12  ;;  %v180_v14 = vpop.f32.mrb[1].mxu0 }
  0xf6   :  { %v126_v15 = vpop.f32.mrb[2].mxu0 }
  0xf7   :  { %129 = vst [vmem:[#allocation2] sm:$0x3] %v124_v13  ;;  %v181_v16 = vpop.f32.mrb[3].mxu0 }
  0xf8   :  { %204 = shalt.err (!%p201_p4)
}
  0xf9   :  { %s205_s2 = scalar_lea.hbm %s285_s3, 32 }
  0xfa   :  { %p206_p5 = scmp.ne.s32.totalorder %s285_s3, %s205_s2  ;;  %p209_p6 = scmp.lt.u32.totalorder %s205_s2, %s285_s3 }
  0xfc   :  { %p211_p7 = pnand %p209_p6, %p206_p5 }
  0xfe   :  { %214 = shalt.err (!%p211_p7)
}
  0xff   :  { %139 = dma.vmem_to_hbm [thread:$0]  %s137_s6, 32, %s285_s3, [#allocation3]  }
 0x100   :  { %215 = dma.done.wait [#allocation3], 32  }
 0x101   :  { %216 = vsyncadd [#allocation3], 4294967264 }
 0x102   :  { %143 = vsyncpa [#allocation3], 1 }

// kernel: bert_legal_pretraining_forward.31
= control target key start
LH: loop header
LB: loop body
LE: loop exit
PB: predicated region body
PF: predicated region fallthrough
CT: control target
= control target key end

     0   :  { %9 = vsyncpa [#allocation3], 0  ;;  %s3093_s0 = inlined_call_operand.vmem [shape: f32[256,256], index: 0, kind: input, shape index: {}]   ;;  %s3094_s1 = inlined_call_operand.vmem [shape: s32[256,1], index: 1, kind: input, shape index: {}]   ;;  %s3095_s2 = inlined_call_operand.hbm [shape: f32[1,1], index: 2, kind: output, shape index: {0}]   ;;  %s3096_s3 = inlined_call_operand.hbm [shape: f32[1,1], index: 3, kind: output, shape index: {1}]  }
   0x1   :  { %v1612_v0 = vld [vmem:[%s3093_s0 + $0x20] sm:$0xff]  ;;  %v1617_v1 = vld [vmem:[%s3093_s0 + $0x28] sm:$0xff]  ;;  %v1634_v5 = vld [vmem:[%s3093_s0 + $0x30] sm:$0xff] }
   0x2   :  { %v1622_v2 = vld [vmem:[%s3093_s0] sm:$0xff]  ;;  %v117_v3 = vmax.f32 %v1612_v0, %v1617_v1  ;;  %v1629_v4 = vld [vmem:[%s3093_s0 + $0x8] sm:$0xff]  ;;  %v1639_v6 = vld [vmem:[%s3093_s0 + $0x38] sm:$0xff] }
   0x3   :  { %v111_v7 = vmax.f32 %v1622_v2, %v1629_v4  ;;  %v1646_v8 = vld [vmem:[%s3093_s0 + $0x10] sm:$0xff]  ;;  %v1651_v9 = vld [vmem:[%s3093_s0 + $0x18] sm:$0xff]  ;;  %v120_v10 = vmax.f32 %v1634_v5, %v1639_v6  ;;  %v1670_v14 = vld [vmem:[%s3093_s0 + $0x40] sm:$0xff] }
   0x4   :  { %118 = vmax.xlane.f32.xlu1 %v117_v3  ;;  %v114_v11 = vmax.f32 %v1646_v8, %v1651_v9  ;;  %v1660_v12 = vld [vmem:[%s3093_s0 + $0x50] sm:$0xff]  ;;  %v1665_v13 = vld [vmem:[%s3093_s0 + $0x58] sm:$0xff]  ;;  %v1675_v15 = vld [vmem:[%s3093_s0 + $0x48] sm:$0xff] }
   0x5   :  { %112 = vmax.xlane.f32.xlu0 %v111_v7  ;;  %v126_v16 = vmax.f32 %v1660_v12, %v1665_v13  ;;  %v123_v17 = vmax.f32 %v1670_v14, %v1675_v15  ;;  %v1684_v18 = vld [vmem:[%s3093_s0 + $0x70] sm:$0xff]  ;;  %v1689_v19 = vld [vmem:[%s3093_s0 + $0x78] sm:$0xff]  ;;  %v1694_v20 = vld [vmem:[%s3093_s0 + $0x60] sm:$0xff] }
   0x6   :  { %v1699_v21 = vld [vmem:[%s3093_s0 + $0x68] sm:$0xff]  ;;  %v132_v22 = vmax.f32 %v1684_v18, %v1689_v19  ;;  %v1708_v24 = vld [vmem:[%s3093_s0 + $0x90] sm:$0xff]  ;;  %v1713_v25 = vld [vmem:[%s3093_s0 + $0x98] sm:$0xff] }
   0x7   :  { %v129_v23 = vmax.f32 %v1694_v20, %v1699_v21  ;;  %v1718_v26 = vld [vmem:[%s3093_s0 + $0x80] sm:$0xff]  ;;  %v1723_v27 = vld [vmem:[%s3093_s0 + $0x88] sm:$0xff]  ;;  %v138_v28 = vmax.f32 %v1708_v24, %v1713_v25 }
   0x8   :  { %121 = vmax.xlane.f32.xlu1 %v120_v10 }
   0x9   :  { %115 = vmax.xlane.f32.xlu0 %v114_v11 }
   0xc   :  { %127 = vmax.xlane.f32.xlu1 %v126_v16 }
   0xd   :  { %124 = vmax.xlane.f32.xlu0 %v123_v17 }
  0x10   :  { %133 = vmax.xlane.f32.xlu1 %v132_v22 }
  0x11   :  { %10 = vsyncpa [#allocation5], 0  ;;  %130 = vmax.xlane.f32.xlu0 %v129_v23  ;;  %v135_v29 = vmax.f32 %v1718_v26, %v1723_v27  ;;  %v1732_v30 = vld [vmem:[%s3093_s0 + $0xb0] sm:$0xff]  ;;  %v1737_v31 = vld [vmem:[%s3093_s0 + $0xb8] sm:$0xff]  ;;  %s1588_s8 = smov [#allocation4]  }
  0x12   :  { %v1742_v32 = vld [vmem:[%s3093_s0 + $0xa0] sm:$0xff]  ;;  %v1747_v33 = vld [vmem:[%s3093_s0 + $0xa8] sm:$0xff]  ;;  %v144_v34 = vmax.f32 %v1732_v30, %v1737_v31  ;;  %v1756_v36 = vld [vmem:[%s3093_s0 + $0xd0] sm:$0xff]  ;;  %s1240_s9 = sshll.u32 %s1588_s8, 4  ;;  %s3061_s9 = int_to_ptr.vmem [resolvable:$true] %s1240_s9 }
  0x13   :  { %v141_v35 = vmax.f32 %v1742_v32, %v1747_v33  ;;  %v1761_v37 = vld [vmem:[%s3093_s0 + $0xd8] sm:$0xff]  ;;  %v1766_v38 = vld [vmem:[%s3093_s0 + $0xc0] sm:$0xff]  ;;  %v1771_v39 = vld [vmem:[%s3093_s0 + $0xc8] sm:$0xff] }
  0x14   :  { %139 = vmax.xlane.f32.xlu1 %v138_v28  ;;  %v150_v40 = vmax.f32 %v1756_v36, %v1761_v37  ;;  %v147_v41 = vmax.f32 %v1766_v38, %v1771_v39  ;;  %v1780_v42 = vld [vmem:[%s3093_s0 + $0xf0] sm:$0xff]  ;;  %v1785_v43 = vld [vmem:[%s3093_s0 + $0xf8] sm:$0xff]  ;;  %v1790_v44 = vld [vmem:[%s3093_s0 + $0xe0] sm:$0xff] }
  0x15   :  { %136 = vmax.xlane.f32.xlu0 %v135_v29  ;;  %v1795_v45 = vld [vmem:[%s3093_s0 + $0xe8] sm:$0xff]  ;;  %v156_v46 = vmax.f32 %v1780_v42, %v1785_v43  ;;  %v1804_v48 = vld [vmem:[%s3093_s0 + $0x110] sm:$0xff]  ;;  %v1809_v49 = vld [vmem:[%s3093_s0 + $0x118] sm:$0xff] }
  0x16   :  { %v153_v47 = vmax.f32 %v1790_v44, %v1795_v45  ;;  %3181 = vst [vmem:[#allocation8_spill] sm:$0xff] %v1809_v49  ;;  %v1814_v50 = vld [vmem:[%s3093_s0 + $0x100] sm:$0xff]  ;;  %v1819_v51 = vld [vmem:[%s3093_s0 + $0x108] sm:$0xff]  ;;  %v162_v52 = vmax.f32 %v1804_v48, %v1809_v49  ;;  %v1828_v54 = vld [vmem:[%s3093_s0 + $0x130] sm:$0xff] }
  0x17   :  { %v159_v53 = vmax.f32 %v1814_v50, %v1819_v51  ;;  %3182 = vst [vmem:[#allocation9_spill] sm:$0xff] %v1828_v54  ;;  %v1833_v55 = vld [vmem:[%s3093_s0 + $0x138] sm:$0xff]  ;;  %v1838_v56 = vld [vmem:[%s3093_s0 + $0x120] sm:$0xff]  ;;  %v1843_v57 = vld [vmem:[%s3093_s0 + $0x128] sm:$0xff] }
  0x18   :  { %145 = vmax.xlane.f32.xlu1 %v144_v34  ;;  %3183 = vst [vmem:[#allocation10_spill] sm:$0xff] %v1833_v55  ;;  %3184 = vst [vmem:[#allocation11_spill] sm:$0xff] %v1838_v56  ;;  %v168_v58 = vmax.f32 %v1828_v54, %v1833_v55  ;;  %v165_v59 = vmax.f32 %v1838_v56, %v1843_v57  ;;  %v1852_v60 = vld [vmem:[%s3093_s0 + $0x150] sm:$0xff]  ;;  %v1857_v61 = vld [vmem:[%s3093_s0 + $0x158] sm:$0xff] }
  0x19   :  { %142 = vmax.xlane.f32.xlu0 %v141_v35  ;;  %3185 = vst [vmem:[#allocation12_spill] sm:$0xff] %v1843_v57  ;;  %3186 = vst [vmem:[#allocation13_spill] sm:$0xff] %v1852_v60  ;;  %v1862_v62 = vld [vmem:[%s3093_s0 + $0x140] sm:$0xff]  ;;  %v1867_v63 = vld [vmem:[%s3093_s0 + $0x148] sm:$0xff]  ;;  %v174_v3 = vmax.f32 %v1852_v60, %v1857_v61 }
  0x1a   :  { %3187 = vst [vmem:[#allocation14_spill] sm:$0xff] %v1857_v61  ;;  %3188 = vst [vmem:[#allocation15_spill] sm:$0xff] %v1862_v62  ;;  %v171_v7 = vmax.f32 %v1862_v62, %v1867_v63  ;;  %v1876_v10 = vld [vmem:[%s3093_s0 + $0x170] sm:$0xff]  ;;  %v1881_v11 = vld [vmem:[%s3093_s0 + $0x178] sm:$0xff] }
  0x1b   :  { %3189 = vst [vmem:[#allocation16_spill] sm:$0xff] %v1867_v63  ;;  %3190 = vst [vmem:[#allocation17_spill] sm:$0xff] %v1876_v10  ;;  %v1886_v16 = vld [vmem:[%s3093_s0 + $0x160] sm:$0xff]  ;;  %v1891_v17 = vld [vmem:[%s3093_s0 + $0x168] sm:$0xff]  ;;  %v180_v22 = vmax.f32 %v1876_v10, %v1881_v11 }
  0x1c   :  { %151 = vmax.xlane.f32.xlu1 %v150_v40  ;;  %3191 = vst [vmem:[#allocation18_spill] sm:$0xff] %v1881_v11  ;;  %3192 = vst [vmem:[#allocation19_spill] sm:$0xff] %v1886_v16  ;;  %v177_v23 = vmax.f32 %v1886_v16, %v1891_v17  ;;  %v65_v28 = vld [vmem:[%s3093_s0 + $0x190] sm:$0xff]  ;;  %v66_v29 = vld [vmem:[%s3093_s0 + $0x198] sm:$0xff]  ;;  %v1585_v40 = vmov 0  }
  0x1d   :  { %148 = vmax.xlane.f32.xlu0 %v147_v41  ;;  %3193 = vst [vmem:[#allocation20_spill] sm:$0xff] %v1891_v17  ;;  %v1906_v34 = vld [vmem:[%s3093_s0 + $0x180] sm:$0xff]  ;;  %v1911_v35 = vld [vmem:[%s3093_s0 + $0x188] sm:$0xff]  ;;  %1292 = vset.pattern.permute.xlu1 %v1585_v40  ;;  %v186_v41 = vmax.f32 %v65_v28, %v66_v29 }
  0x1e   :  { %3194 = vst [vmem:[#allocation21_spill] sm:$0xff] %v1906_v34  ;;  %3195 = vst [vmem:[#allocation22_spill] sm:$0xff] %v1911_v35  ;;  %1293 = vset.pattern.permute.xlu0 %v1585_v40  ;;  %v72_v28 = vld [vmem:[%s3093_s0 + $0x1c8] sm:$0xff] }
  0x20   :  { %157 = vmax.xlane.f32.xlu1 %v156_v46  ;;  %v183_v46 = vmax.f32 %v1906_v34, %v1911_v35 }
  0x21   :  { %154 = vmax.xlane.f32.xlu0 %v153_v47  ;;  %v69_v47 = vld [vmem:[%s3093_s0 + $0x1b0] sm:$0xff] }
  0x24   :  { %163 = vmax.xlane.f32.xlu1 %v162_v52  ;;  %v70_v52 = vld [vmem:[%s3093_s0 + $0x1b8] sm:$0xff] }
  0x25   :  { %160 = vmax.xlane.f32.xlu0 %v159_v53  ;;  %v67_v53 = vld [vmem:[%s3093_s0 + $0x1a0] sm:$0xff] }
  0x28   :  { %169 = vmax.xlane.f32.xlu1 %v168_v58  ;;  %v68_v58 = vld [vmem:[%s3093_s0 + $0x1a8] sm:$0xff] }
  0x29   :  { %166 = vmax.xlane.f32.xlu0 %v165_v59  ;;  %v192_v59 = vmax.f32 %v69_v47, %v70_v52  ;;  %v75_v47 = vld [vmem:[%s3093_s0 + $0x1e0] sm:$0xff]  ;;  %v76_v52 = vld [vmem:[%s3093_s0 + $0x1e8] sm:$0xff] }
  0x2c   :  { %175 = vmax.xlane.f32.xlu1 %v174_v3  ;;  %v189_v3 = vmax.f32 %v67_v53, %v68_v58  ;;  %v201_v58 = vmax.f32 %v75_v47, %v76_v52 }
  0x2d   :  { %172 = vmax.xlane.f32.xlu0 %v171_v7  ;;  %v73_v7 = vld [vmem:[%s3093_s0 + $0x1d0] sm:$0xff] }
  0x30   :  { %181 = vmax.xlane.f32.xlu1 %v180_v22  ;;  %v74_v22 = vld [vmem:[%s3093_s0 + $0x1d8] sm:$0xff] }
  0x31   :  { %178 = vmax.xlane.f32.xlu0 %v177_v23  ;;  %v71_v23 = vld [vmem:[%s3093_s0 + $0x1c0] sm:$0xff]  ;;  %v198_v29 = vmax.f32 %v73_v7, %v74_v22 }
  0x32   :  { %v195_v40 = vmax.f32 %v71_v23, %v72_v28 }
  0x34   :  { %187 = vmax.xlane.f32.xlu1 %v186_v41  ;;  %v77_v41 = vld [vmem:[%s3093_s0 + $0x1f0] sm:$0xff] }
  0x35   :  { %184 = vmax.xlane.f32.xlu0 %v183_v46  ;;  %v78_v46 = vld [vmem:[%s3093_s0 + $0x1f8] sm:$0xff] }
  0x36   :  { %v204_v53 = vmax.f32 %v77_v41, %v78_v46 }
  0x38   :  { %193 = vmax.xlane.f32.xlu1 %v192_v59 }
  0x39   :  { %190 = vmax.xlane.f32.xlu0 %v189_v3 }
  0x3c   :  { %199 = vmax.xlane.f32.xlu1 %v198_v29 }
  0x3d   :  { %196 = vmax.xlane.f32.xlu0 %v195_v40 }
  0x40   :  { %205 = vmax.xlane.f32.xlu1 %v204_v53 }
  0x41   :  { %202 = vmax.xlane.f32.xlu0 %v201_v58 }
  0x91   :  { %v1951_v59 = vpop.xlane.xlu1 %118 }
  0x92   :  { %3196 = vst [vmem:[#allocation23_spill] sm:$0xff] %v1951_v59  ;;  %v1953_v3 = vpop.xlane.xlu0 %112  ;;  %v211_v29 = vsub.f32 %v1612_v0, %v1951_v59  ;;  %v212_v47 = vsub.f32 %v1617_v1, %v1951_v59 }
  0x93   :  { %3197 = vst [vmem:[#allocation24_spill] sm:$0xff] %v1953_v3  ;;  %v207_v7 = vsub.f32 %v1622_v2, %v1953_v3  ;;  %v208_v22 = vsub.f32 %v1629_v4, %v1953_v3 }
  0x94   :  { %v279_v34 = vmul.f32 1.442695, %v211_v29 }
  0x95   :  { %v271_v23 = vmul.f32 1.442695, %v207_v7  ;;  %v273_v28 = vmul.f32 1.442695, %v208_v22  ;;  %v1959_v35 = vpop.xlane.xlu1 %121 }
  0x96   :  { %3198 = vst [vmem:[#allocation25_spill] sm:$0xff] %v1959_v35  ;;  %v213_v40 = vsub.f32 %v1634_v5, %v1959_v35  ;;  %v214_v41 = vsub.f32 %v1639_v6, %v1959_v35  ;;  %v1967_v46 = vpop.xlane.xlu0 %115  ;;  %v281_v35 = vmul.f32 1.442695, %v212_v47  ;;  %v2031_v47 = vld [vmem:[%s3094_s1 + $0x40] sm:$0xff] }
  0x97   :  { %3199 = vst [vmem:[#allocation26_spill] sm:$0xff] %v1967_v46  ;;  %v209_v52 = vsub.f32 %v1646_v8, %v1967_v46  ;;  %v210_v53 = vsub.f32 %v1651_v9, %v1967_v46  ;;  %1294 = vpow2.f32 %v271_v23  ;;  %3207 = vst [vmem:[#allocation34_spill] sm:$0xff] %v2031_v47 }
  0x98   :  { %v283_v58 = vmul.f32 1.442695, %v213_v40  ;;  %v285_v7 = vmul.f32 1.442695, %v214_v41  ;;  %1296 = vpow2.f32 %v273_v28 }
  0x99   :  { %v275_v22 = vmul.f32 1.442695, %v209_v52  ;;  %v277_v3 = vmul.f32 1.442695, %v210_v53  ;;  %v2038_v53 = vld [vmem:[%s3094_s1 + $0x58] sm:$0xff] }
  0x9a   :  { %1298 = vpow2.f32 %v283_v58  ;;  %3208 = vst [vmem:[#allocation35_spill] sm:$0xff] %v2038_v53  ;;  %v2043_v58 = vld [vmem:[%s3094_s1 + $0x50] sm:$0xff] }
  0x9b   :  { %1300 = vpow2.f32 %v285_v7  ;;  %3209 = vst [vmem:[#allocation36_spill] sm:$0xff] %v2043_v58  ;;  %v2050_v7 = vld [vmem:[%s3094_s1 + $0x68] sm:$0xff] }
  0x9c   :  { %1302 = vpow2.f32 %v275_v22  ;;  %3210 = vst [vmem:[#allocation37_spill] sm:$0xff] %v2050_v7  ;;  %v2055_v22 = vld [vmem:[%s3094_s1 + $0x60] sm:$0xff] }
  0x9d   :  { %1304 = vpow2.f32 %v277_v3  ;;  %v2019_v3 = vld [vmem:[%s3094_s1 + $0x30] sm:$0xff]  ;;  %3211 = vst [vmem:[#allocation38_spill] sm:$0xff] %v2055_v22 }
  0x9e   :  { %1306 = vpow2.f32 %v279_v34  ;;  %v1978_v34 = vld [vmem:[%s3094_s1] sm:$0xff]  ;;  %3205 = vst [vmem:[#allocation32_spill] sm:$0xff] %v2019_v3 }
  0x9f   :  { %1308 = vpow2.f32 %v281_v35  ;;  %v2007_v35 = vld [vmem:[%s3094_s1 + $0x20] sm:$0xff] }
  0xa0   :  { %3203 = vst [vmem:[#allocation30_spill] sm:$0xff] %v2007_v35 }
  0xa1   :  { %v1295_v59 = vpop.eup %1294 }
  0xa2   :  { %v1297_v17 = vpop.eup %1296 }
  0xa3   :  { %v399_v16 = vadd.f32 %v1297_v17, %v1295_v59  ;;  %v1983_v17 = vld [vmem:[%s3094_s1 + $0x8] sm:$0xff]  ;;  %v2014_v59 = vld [vmem:[%s3094_s1 + $0x38] sm:$0xff] }
  0xa4   :  { %v1299_v11 = vpop.eup %1298  ;;  %3204 = vst [vmem:[#allocation31_spill] sm:$0xff] %v2014_v59 }
  0xa5   :  { %v1301_v10 = vpop.eup %1300  ;;  %400 = vadd.xlane.f32.xlu0 %v399_v16  ;;  %v2002_v16 = vld [vmem:[%s3094_s1 + $0x28] sm:$0xff] }
  0xa6   :  { %v1303_v46 = vpop.eup %1302  ;;  %v408_v23 = vadd.f32 %v1301_v10, %v1299_v11  ;;  %v1990_v10 = vld [vmem:[%s3094_s1 + $0x18] sm:$0xff]  ;;  %v1995_v11 = vld [vmem:[%s3094_s1 + $0x10] sm:$0xff]  ;;  %3202 = vst [vmem:[#allocation29_spill] sm:$0xff] %v2002_v16 }
  0xa7   :  { %v1305_v40 = vpop.eup %1304  ;;  %3200 = vst [vmem:[#allocation27_spill] sm:$0xff] %v1990_v10  ;;  %3201 = vst [vmem:[#allocation28_spill] sm:$0xff] %v1995_v11 }
  0xa8   :  { %v1307_v28 = vpop.eup %1306  ;;  %v402_v41 = vadd.f32 %v1305_v40, %v1303_v46  ;;  %v2026_v46 = vld [vmem:[%s3094_s1 + $0x48] sm:$0xff]  ;;  %v2065_v40 = vld [vmem:[%s3094_s1 + $0x70] sm:$0xff] }
  0xa9   :  { %v1309_v52 = vpop.eup %1308  ;;  %409 = vadd.xlane.f32.xlu0 %v408_v23  ;;  %3206 = vst [vmem:[#allocation33_spill] sm:$0xff] %v2026_v46  ;;  %v95_v23 = vld [vmem:[%s3094_s1 + $0x80] sm:$0xff]  ;;  %3212 = vst [vmem:[#allocation39_spill] sm:$0xff] %v2065_v40 }
  0xaa   :  { %403 = vadd.xlane.f32.xlu1 %v402_v41  ;;  %v405_v29 = vadd.f32 %v1309_v52, %v1307_v28  ;;  %v100_v28 = vld [vmem:[%s3094_s1 + $0xa8] sm:$0xff]  ;;  %v94_v41 = vld [vmem:[%s3094_s1 + $0x78] sm:$0xff] }
  0xab   :  { %v102_v52 = vld [vmem:[%s3094_s1 + $0xb8] sm:$0xff] }
  0xae   :  { %406 = vadd.xlane.f32.xlu1 %v405_v29  ;;  %v96_v29 = vld [vmem:[%s3094_s1 + $0x88] sm:$0xff] }
  0xbf   :  { %595 = vperm.xlu1 %1292, %v1978_v34   ;;  %598 = vperm.xlu0 %1293, %v1983_v17  }
  0xc3   :  { %604 = vperm.xlu1 %1292, %v1990_v10   ;;  %601 = vperm.xlu0 %1293, %v1995_v11  }
  0xc7   :  { %610 = vperm.xlu1 %1292, %v2002_v16   ;;  %607 = vperm.xlu0 %1293, %v2007_v35   ;;  %v110_v35 = vld [vmem:[%s3094_s1 + $0xf8] sm:$0xff] }
  0xcb   :  { %616 = vperm.xlu1 %1292, %v2014_v59   ;;  %613 = vperm.xlu0 %1293, %v2019_v3  }
  0xcf   :  { %622 = vperm.xlu1 %1292, %v2026_v46   ;;  %619 = vperm.xlu0 %1293, %v2031_v47   ;;  %v109_v46 = vld [vmem:[%s3094_s1 + $0xf0] sm:$0xff]  ;;  %v103_v47 = vld [vmem:[%s3094_s1 + $0xc0] sm:$0xff] }
  0xd3   :  { %628 = vperm.xlu1 %1292, %v2038_v53   ;;  %625 = vperm.xlu0 %1293, %v2043_v58   ;;  %v108_v53 = vld [vmem:[%s3094_s1 + $0xe8] sm:$0xff] }
  0xd7   :  { %634 = vperm.xlu1 %1292, %v2050_v7   ;;  %631 = vperm.xlu0 %1293, %v2055_v22   ;;  %v104_v7 = vld [vmem:[%s3094_s1 + $0xc8] sm:$0xff]  ;;  %v106_v22 = vld [vmem:[%s3094_s1 + $0xd8] sm:$0xff] }
  0xdb   :  { %643 = vperm.xlu1 %1292, %v95_v23   ;;  %637 = vperm.xlu0 %1293, %v2065_v40   ;;  %v2080_v23 = vpop.xlane.xlu0 %124  ;;  %v2082_v40 = vpop.xlane.xlu1 %127 }
  0xdc   :  { %3213 = vst [vmem:[#allocation40_spill] sm:$0xff] %v2080_v23  ;;  %3214 = vst [vmem:[#allocation41_spill] sm:$0xff] %v2082_v40  ;;  %v217_v16 = vsub.f32 %v1660_v12, %v2082_v40  ;;  %v218_v60 = vsub.f32 %v1665_v13, %v2082_v40 }
  0xde   :  { %v293_v55 = vmul.f32 1.442695, %v218_v60 }
  0xdf   :  { %658 = vperm.xlu1 %1292, %v100_v28   ;;  %640 = vperm.xlu0 %1293, %v94_v41   ;;  %v97_v28 = vld [vmem:[%s3094_s1 + $0x90] sm:$0xff]  ;;  %v2090_v41 = vpop.xlane.xlu0 %130 }
  0xe0   :  { %3215 = vst [vmem:[#allocation42_spill] sm:$0xff] %v2090_v41 }
  0xe3   :  { %664 = vperm.xlu1 %1292, %v102_v52   ;;  %646 = vperm.xlu0 %1293, %v96_v29   ;;  %v98_v52 = vld [vmem:[%s3094_s1 + $0x98] sm:$0xff]  ;;  %v2098_v29 = vpop.xlane.xlu1 %133 }
  0xe4   :  { %3216 = vst [vmem:[#allocation43_spill] sm:$0xff] %v2098_v29 }
  0xe7   :  { %670 = vperm.xlu1 %1292, %v104_v7   ;;  %649 = vperm.xlu0 %1293, %v97_v28   ;;  %v99_v7 = vld [vmem:[%s3094_s1 + $0xa0] sm:$0xff]  ;;  %v2106_v28 = vpop.xlane.xlu0 %136  ;;  %v2108_v58 = vpop.xlane.xlu1 %139 }
  0xe8   :  { %3217 = vst [vmem:[#allocation44_spill] sm:$0xff] %v2106_v28  ;;  %3218 = vst [vmem:[#allocation45_spill] sm:$0xff] %v2108_v58  ;;  %v224_v60 = vsub.f32 %v1723_v27, %v2106_v28 }
  0xeb   :  { %676 = vperm.xlu1 %1292, %v106_v22   ;;  %652 = vperm.xlu0 %1293, %v98_v52   ;;  %v101_v22 = vld [vmem:[%s3094_s1 + $0xb0] sm:$0xff]  ;;  %v2116_v52 = vpop.xlane.xlu0 %142 }
  0xec   :  { %3219 = vst [vmem:[#allocation46_spill] sm:$0xff] %v2116_v52 }
  0xef   :  { %682 = vperm.xlu1 %1292, %v108_v53   ;;  %655 = vperm.xlu0 %1293, %v99_v7   ;;  %v2121_v53 = vpop.xlane.xlu1 %145  ;;  %v105_v7 = vld [vmem:[%s3094_s1 + $0xd0] sm:$0xff]  ;;  %v2126_v59 = vpop.xlane.xlu0 %148 }
  0xf3   :  { %685 = vperm.xlu1 %1292, %v109_v46   ;;  %661 = vperm.xlu0 %1293, %v101_v22   ;;  %v2128_v61 = vpop.xlane.xlu1 %151  ;;  %v107_v46 = vld [vmem:[%s3094_s1 + $0xe0] sm:$0xff]  ;;  %v215_v22 = vsub.f32 %v1670_v14, %v2080_v23  ;;  %v2135_v3 = vpop.xlane.xlu0 %154 }
  0xf7   :  { %667 = vperm.xlu0 %1293, %v103_v47   ;;  %v216_v47 = vsub.f32 %v1675_v15, %v2080_v23  ;;  %v2142_v63 = vpop.xlane.xlu1 %157  ;;  %v2148_v10 = vpop.xlane.xlu0 %160  ;;  %v291_v23 = vmul.f32 1.442695, %v217_v16  ;;  %v223_v16 = vsub.f32 %v1718_v26, %v2106_v28 }
  0xf9   :  { %v289_v62 = vmul.f32 1.442695, %v216_v47  ;;  %v221_v47 = vsub.f32 %v1684_v18, %v2098_v29  ;;  %v303_v11 = vmul.f32 1.442695, %v223_v16 }
  0xfb   :  { %673 = vperm.xlu0 %1293, %v105_v7   ;;  %v287_v7 = vmul.f32 1.442695, %v215_v22  ;;  %v2152_v57 = vpop.xlane.xlu1 %163  ;;  %v220_v22 = vsub.f32 %v1699_v21, %v2090_v41 }
  0xfd   :  { %1310 = vpow2.f32 %v287_v7  ;;  %v2162_v7 = vpop.xlane.xlu0 %166  ;;  %v297_v54 = vmul.f32 1.442695, %v220_v22 }
  0xfe   :  { %1312 = vpow2.f32 %v289_v62  ;;  %v299_v62 = vmul.f32 1.442695, %v221_v47 }
  0xff   :  { %679 = vperm.xlu0 %1293, %v107_v46   ;;  %v219_v46 = vsub.f32 %v1694_v20, %v2090_v41  ;;  %1314 = vpow2.f32 %v291_v23  ;;  %v2166_v41 = vpop.xlane.xlu1 %169 }
 0x100   :  { %1316 = vpow2.f32 %v293_v55  ;;  %3220 = vst [vmem:[#allocation47_spill] sm:$0xff] %v2166_v41 }
 0x101   :  { %v295_v40 = vmul.f32 1.442695, %v219_v46  ;;  %v2168_v46 = vpop.xlane.xlu0 %172 }
 0x102   :  { %3221 = vst [vmem:[#allocation48_spill] sm:$0xff] %v2168_v46 }
 0x103   :  { %688 = vperm.xlu0 %1293, %v110_v35   ;;  %v222_v35 = vsub.f32 %v1689_v19, %v2098_v29  ;;  %1318 = vpow2.f32 %v295_v40  ;;  %v305_v29 = vmul.f32 1.442695, %v224_v60  ;;  %v2170_v55 = vpop.xlane.xlu1 %175 }
 0x104   :  { %1320 = vpow2.f32 %v297_v54  ;;  %3222 = vst [vmem:[#allocation49_spill] sm:$0xff] %v2170_v55 }
 0x105   :  { %v301_v56 = vmul.f32 1.442695, %v222_v35  ;;  %1322 = vpow2.f32 %v299_v62  ;;  %v2172_v41 = vpop.xlane.xlu0 %178 }
 0x106   :  { %3223 = vst [vmem:[#allocation50_spill] sm:$0xff] %v2172_v41 }
 0x107   :  { %v1311_v23 = vpop.eup %1310  ;;  %1324 = vpow2.f32 %v301_v56  ;;  %v2174_v54 = vpop.xlane.xlu1 %181 }
 0x108   :  { %v1313_v49 = vpop.eup %1312  ;;  %1326 = vpow2.f32 %v303_v11  ;;  %3224 = vst [vmem:[#allocation51_spill] sm:$0xff] %v2174_v54 }
 0x109   :  { %1328 = vpow2.f32 %v305_v29  ;;  %v1315_v22 = vpop.eup %1314  ;;  %v411_v28 = vadd.f32 %v1313_v49, %v1311_v23  ;;  %v2176_v11 = vpop.xlane.xlu0 %184 }
 0x10a   :  { %v1317_v47 = vpop.eup %1316  ;;  %3225 = vst [vmem:[#allocation52_spill] sm:$0xff] %v2176_v11 }
 0x10b   :  { %v414_v35 = vadd.f32 %v1317_v47, %v1315_v22  ;;  %v2178_v29 = vpop.xlane.xlu1 %187 }
 0x10c   :  { %3226 = vst [vmem:[#allocation53_spill] sm:$0xff] %v2178_v29 }
 0x10d   :  { %v1319_v40 = vpop.eup %1318  ;;  %v2180_v23 = vpop.xlane.xlu0 %190 }
 0x10e   :  { %v1321_v16 = vpop.eup %1320  ;;  %3227 = vst [vmem:[#allocation54_spill] sm:$0xff] %v2180_v23 }
 0x10f   :  { %v1323_v60 = vpop.eup %1322  ;;  %v417_v56 = vadd.f32 %v1321_v16, %v1319_v40  ;;  %v2182_v22 = vpop.xlane.xlu1 %193  ;;  %v225_v16 = vsub.f32 %v1708_v24, %v2108_v58 }
 0x110   :  { %3228 = vst [vmem:[#allocation55_spill] sm:$0xff] %v2182_v22 }
 0x111   :  { %v1325_v62 = vpop.eup %1324  ;;  %v2184_v47 = vpop.xlane.xlu0 %196 }
 0x112   :  { %v1327_v46 = vpop.eup %1326  ;;  %v420_v49 = vadd.f32 %v1325_v62, %v1323_v60  ;;  %3229 = vst [vmem:[#allocation56_spill] sm:$0xff] %v2184_v47  ;;  %v307_v62 = vmul.f32 1.442695, %v225_v16 }
 0x113   :  { %v1329_v55 = vpop.eup %1328 }
 0x114   :  { %1330 = vpow2.f32 %v307_v62 }
 0x115   :  { %v2188_v41 = vpop.xlane.xlu0 %202 }
 0x116   :  { %3231 = vst [vmem:[#allocation58_spill] sm:$0xff] %v2188_v41  ;;  %v227_v41 = vsub.f32 %v1742_v32, %v2116_v52 }
 0x117   :  { %412 = vadd.xlane.f32.xlu1 %v411_v28  ;;  %v423_v28 = vadd.f32 %v1329_v55, %v1327_v46  ;;  %v226_v46 = vsub.f32 %v1713_v25, %v2108_v58 }
 0x11b   :  { %415 = vadd.xlane.f32.xlu1 %v414_v35  ;;  %v2186_v35 = vpop.xlane.xlu1 %199 }
 0x11c   :  { %3230 = vst [vmem:[#allocation57_spill] sm:$0xff] %v2186_v35 }
 0x11f   :  { %418 = vadd.xlane.f32.xlu1 %v417_v56  ;;  %v2190_v40 = vpop.xlane.xlu1 %205  ;;  %v591_v56 = vlaneseq }
 0x120   :  { %3232 = vst [vmem:[#allocation59_spill] sm:$0xff] %v2190_v40  ;;  %v228_v40 = vsub.f32 %v1747_v33, %v2116_v52 }
 0x122   :  { %421 = vadd.xlane.f32.xlu0 %v420_v49  ;;  %v2200_v49 = vand.u32 127, %v591_v56  ;;  %v313_v16 = vmul.f32 1.442695, %v228_v40  ;;  %v229_v40 = vsub.f32 %v1732_v30, %v2121_v53 }
 0x123   :  { %424 = vadd.xlane.f32.xlu1 %v423_v28  ;;  %v309_v28 = vmul.f32 1.442695, %v226_v46 }
 0x124   :  { %v2211_v58 = vadd.s32 128, %v2200_v49  ;;  %v315_v22 = vmul.f32 1.442695, %v229_v40 }
 0x125   :  { %1332 = vpow2.f32 %v309_v28 }
 0x132   :  { %v2196_v55 = vpop.xlane.xlu0 %400 }
 0x133   :  { %3233 = vst [vmem:[#allocation60_spill] sm:$0xff] %v2196_v55  ;;  %v311_v55 = vmul.f32 1.442695, %v227_v41 }
 0x135   :  { %1334 = vpow2.f32 %v311_v55  ;;  %v233_v55 = vsub.f32 %v1756_v36, %v2128_v61 }
 0x136   :  { %v2206_v35 = vpop.xlane.xlu0 %409  ;;  %1336 = vpow2.f32 %v313_v16 }
 0x137   :  { %v2198_v60 = vpop.xlane.xlu1 %403  ;;  %3235 = vst [vmem:[#allocation62_spill] sm:$0xff] %v2206_v35  ;;  %v230_v35 = vsub.f32 %v1737_v31, %v2121_v53  ;;  %1338 = vpow2.f32 %v315_v22  ;;  %v235_v22 = vsub.f32 %v1790_v44, %v2135_v3 }
 0x138   :  { %3234 = vst [vmem:[#allocation61_spill] sm:$0xff] %v2198_v60 }
 0x13b   :  { %v2208_v47 = vpop.xlane.xlu1 %406 }
 0x13c   :  { %3236 = vst [vmem:[#allocation63_spill] sm:$0xff] %v2208_v47 }
 0x13e   :  { %v599_v60 = vpop.permute.xlu0 %598 }
 0x13f   :  { %v596_v56 = vpop.permute.xlu1 %595  ;;  %vm692_vm0 = vcmp.eq.s32.totalorder %v2200_v49, %v599_v60  ;;  %vm693_vm1 = vcmp.eq.s32.totalorder %v2211_v58, %v599_v60 }
 0x140   :  { %vm690_vm2 = vcmp.eq.s32.totalorder %v2200_v49, %v596_v56  ;;  %vm691_vm3 = vcmp.eq.s32.totalorder %v2211_v58, %v596_v56  ;;  %v756_v52 = vsel %vm692_vm0, %v1646_v8, 0.0  ;;  %v757_v28 = vsel %vm693_vm1, %v1651_v9, 0.0 }
 0x141   :  { %v754_v46 = vsel %vm690_vm2, %v1622_v2, 0.0  ;;  %v755_v62 = vsel %vm691_vm3, %v1629_v4, 0.0  ;;  %v821_v56 = vadd.f32 %v757_v28, %v756_v52  ;;  %v1331_v2 = vpop.eup %1330  ;;  %v317_v8 = vmul.f32 1.442695, %v230_v35 }
 0x142   :  { %v818_v41 = vadd.f32 %v755_v62, %v754_v46  ;;  %v602_v47 = vpop.permute.xlu0 %601  ;;  %v1333_v4 = vpop.eup %1332  ;;  %v231_v9 = vsub.f32 %v1766_v38, %v2126_v59  ;;  %v232_v46 = vsub.f32 %v1771_v39, %v2126_v59 }
 0x143   :  { %v2225_v60 = vpop.permute.xlu1 %604  ;;  %vm694_vm4 = vcmp.eq.s32.totalorder %v2200_v49, %v602_v47  ;;  %vm695_vm5 = vcmp.eq.s32.totalorder %v2211_v58, %v602_v47  ;;  %v426_v16 = vadd.f32 %v1333_v4, %v1331_v2  ;;  %v234_v47 = vsub.f32 %v1761_v37, %v2128_v61  ;;  %v1335_v2 = vpop.eup %1334 }
 0x144   :  { %819 = vadd.xlane.f32.xlu1 %v818_v41  ;;  %v319_v41 = vmul.f32 1.442695, %v231_v9  ;;  %1340 = vpow2.f32 %v317_v8  ;;  %v323_v4 = vmul.f32 1.442695, %v233_v55  ;;  %vm696_vm12 = vcmp.eq.s32.totalorder %v2200_v49, %v2225_v60 }
 0x145   :  { %vm697_vm13 = vcmp.eq.s32.totalorder %v2211_v58, %v2225_v60  ;;  %v238_v60 = vsub.f32 %v1785_v43, %v2142_v63 }
 0x146   :  { %v608_v23 = vpop.permute.xlu0 %607  ;;  %1342 = vpow2.f32 %v319_v41  ;;  %v327_v41 = vmul.f32 1.442695, %v235_v22 }
 0x147   :  { %v611_v62 = vpop.permute.xlu1 %610  ;;  %vm698_vm6 = vcmp.eq.s32.totalorder %v2200_v49, %v608_v23  ;;  %vm699_vm7 = vcmp.eq.s32.totalorder %v2211_v58, %v608_v23  ;;  %v758_v23 = vsel %vm694_vm4, %v1612_v0, 0.0  ;;  %v1337_v0 = vpop.eup %1336  ;;  %vm914_vm4 = vcmp.ne.s32.totalorder %v1978_v34, 4294967295 }
 0x148   :  { %822 = vadd.xlane.f32.xlu1 %v821_v56  ;;  %vm700_vm8 = vcmp.eq.s32.totalorder %v2200_v49, %v611_v62  ;;  %vm701_vm9 = vcmp.eq.s32.totalorder %v2211_v58, %v611_v62  ;;  %v762_v52 = vsel %vm698_vm6, %v1670_v14, 0.0  ;;  %v763_v35 = vsel %vm699_vm7, %v1675_v15, 0.0 }
 0x149   :  { %v830_v28 = vadd.f32 %v763_v35, %v762_v52  ;;  %v759_v56 = vsel %vm695_vm5, %v1617_v1, 0.0  ;;  %v764_v14 = vsel %vm700_vm8, %v1660_v12, 0.0  ;;  %v765_v15 = vsel %vm701_vm9, %v1665_v13, 0.0 }
 0x14a   :  { %v614_v40 = vpop.permute.xlu0 %613  ;;  %v321_v62 = vmul.f32 1.442695, %v232_v46  ;;  %v824_v52 = vadd.f32 %v759_v56, %v758_v23  ;;  %v325_v1 = vmul.f32 1.442695, %v234_v47  ;;  %v833_v12 = vadd.f32 %v765_v15, %v764_v14 }
 0x14b   :  { %vm702_vm10 = vcmp.eq.s32.totalorder %v2200_v49, %v614_v40  ;;  %vm703_vm11 = vcmp.eq.s32.totalorder %v2211_v58, %v614_v40  ;;  %831 = vadd.xlane.f32.xlu0 %v830_v28  ;;  %v617_v9 = vpop.permute.xlu1 %616  ;;  %v236_v46 = vsub.f32 %v1795_v45, %v2135_v3  ;;  %v237_v35 = vsub.f32 %v1780_v42, %v2142_v63  ;;  %v1339_v42 = vpop.eup %1338 }
 0x14c   :  { %427 = vadd.xlane.f32.xlu1 %v426_v16  ;;  %v766_v13 = vsel %vm702_vm10, %v1694_v20, 0.0  ;;  %v767_v8 = vsel %vm703_vm11, %v1699_v21, 0.0  ;;  %1344 = vpow2.f32 %v321_v62  ;;  %vm704_vm14 = vcmp.eq.s32.totalorder %v2200_v49, %v617_v9 }
 0x14d   :  { %vm705_vm15 = vcmp.eq.s32.totalorder %v2211_v58, %v617_v9  ;;  %v429_v16 = vadd.f32 %v1337_v0, %v1335_v2  ;;  %v836_v20 = vadd.f32 %v767_v8, %v766_v13  ;;  %v760_v21 = vsel %vm696_vm12, %v1634_v5, 0.0 }
 0x14e   :  { %v620_v55 = vpop.permute.xlu0 %619  ;;  %v761_v28 = vsel %vm697_vm13, %v1639_v6, 0.0  ;;  %1346 = vpow2.f32 %v323_v4  ;;  %v768_v47 = vsel %vm704_vm14, %v1684_v18, 0.0  ;;  %v769_v40 = vsel %vm705_vm15, %v1689_v19, 0.0  ;;  %v1341_v5 = vpop.eup %1340 }
 0x14f   :  { %834 = vadd.xlane.f32.xlu0 %v833_v12  ;;  %1348 = vpow2.f32 %v325_v1  ;;  %v329_v23 = vmul.f32 1.442695, %v236_v46  ;;  %vm706_vm0 = vcmp.eq.s32.totalorder %v2200_v49, %v620_v55  ;;  %vm707_vm1 = vcmp.eq.s32.totalorder %v2211_v58, %v620_v55  ;;  %v623_v43 = vpop.permute.xlu1 %622  ;;  %v3238_v46 = vld [vmem:[#allocation28_spill] sm:$0xff] }
 0x150   :  { %825 = vadd.xlane.f32.xlu1 %v824_v52  ;;  %v827_v56 = vadd.f32 %v761_v28, %v760_v21  ;;  %v331_v14 = vmul.f32 1.442695, %v237_v35  ;;  %v333_v6 = vmul.f32 1.442695, %v238_v60  ;;  %v241_v15 = vsub.f32 %v1804_v48, %v2152_v57  ;;  %v1343_v9 = vpop.eup %1342  ;;  %v3239_v35 = vld [vmem:[#allocation11_spill] sm:$0xff]  ;;  %v3241_v60 = vld [vmem:[#allocation9_spill] sm:$0xff] }
 0x151   :  { %v839_v62 = vadd.f32 %v769_v40, %v768_v47  ;;  %1350 = vpow2.f32 %v327_v41  ;;  %v239_v18 = vsub.f32 %v1814_v50, %v2148_v10  ;;  %v770_v2 = vsel %vm706_vm0, %v1718_v26, 0.0  ;;  %v3237_v26 = vld [vmem:[#allocation8_spill] sm:$0xff]  ;;  %v3242_v47 = vld [vmem:[#allocation10_spill] sm:$0xff] }
 0x152   :  { %v626_v19 = vpop.permute.xlu0 %625  ;;  %v771_v4 = vsel %vm707_vm1, %v1723_v27, 0.0  ;;  %1352 = vpow2.f32 %v329_v23  ;;  %v240_v52 = vsub.f32 %v1819_v51, %v2148_v10  ;;  %vm708_vm2 = vcmp.eq.s32.totalorder %v2200_v49, %v623_v43 }
 0x153   :  { %837 = vadd.xlane.f32.xlu0 %v836_v20  ;;  %vm709_vm3 = vcmp.eq.s32.totalorder %v2211_v58, %v623_v43  ;;  %v432_v48 = vadd.f32 %v1341_v5, %v1339_v42  ;;  %vm915_vm5 = vcmp.ne.s32.totalorder %v1983_v17, 4294967295  ;;  %v242_v0 = vsub.f32 %v3237_v26, %v2152_v57  ;;  %v629_v21 = vpop.permute.xlu1 %628 }
 0x154   :  { %430 = vadd.xlane.f32.xlu1 %v429_v16  ;;  %v339_v27 = vmul.f32 1.442695, %v241_v15  ;;  %v842_v1 = vadd.f32 %v771_v4, %v770_v2  ;;  %1354 = vpow2.f32 %v331_v14  ;;  %v335_v22 = vmul.f32 1.442695, %v239_v18  ;;  %v3240_v16 = vld [vmem:[#allocation47_spill] sm:$0xff]  ;;  %v3245_v18 = vld [vmem:[#allocation49_spill] sm:$0xff] }
 0x155   :  { %v772_v51 = vsel %vm708_vm2, %v1708_v24, 0.0  ;;  %v773_v12 = vsel %vm709_vm3, %v1713_v25, 0.0  ;;  %1356 = vpow2.f32 %v333_v6  ;;  %v337_v13 = vmul.f32 1.442695, %v240_v52  ;;  %v3244_v6 = vld [vmem:[#allocation27_spill] sm:$0xff] }
 0x156   :  { %v1345_v50 = vpop.eup %1344  ;;  %vm710_vm6 = vcmp.eq.s32.totalorder %v2200_v49, %v626_v19  ;;  %vm711_vm7 = vcmp.eq.s32.totalorder %v2211_v58, %v626_v19  ;;  %vm916_vm8 = vcmp.ne.s32.totalorder %v3238_v46, 4294967295  ;;  %v243_v55 = vsub.f32 %v3239_v35, %v2162_v7  ;;  %v632_v24 = vpop.permute.xlu0 %631  ;;  %v3249_v35 = vld [vmem:[#allocation29_spill] sm:$0xff] }
 0x157   :  { %840 = vadd.xlane.f32.xlu0 %v839_v62  ;;  %v245_v20 = vsub.f32 %v3241_v60, %v3240_v16  ;;  %v435_v28 = vadd.f32 %v1345_v50, %v1343_v9  ;;  %1358 = vpow2.f32 %v339_v27  ;;  %v341_v41 = vmul.f32 1.442695, %v242_v0 }
 0x158   :  { %828 = vadd.xlane.f32.xlu1 %v827_v56  ;;  %v1347_v8 = vpop.eup %1346  ;;  %v246_v40 = vsub.f32 %v3242_v47, %v3240_v16  ;;  %v845_v23 = vadd.f32 %v773_v12, %v772_v51  ;;  %1360 = vpow2.f32 %v335_v22  ;;  %v774_v42 = vsel %vm710_vm6, %v1742_v32, 0.0  ;;  %v3243_v56 = vld [vmem:[#allocation12_spill] sm:$0xff]  ;;  %v3246_v32 = vld [vmem:[#allocation13_spill] sm:$0xff]  ;;  %v3248_v51 = vld [vmem:[#allocation15_spill] sm:$0xff] }
 0x159   :  { %v1349_v25 = vpop.eup %1348  ;;  %v775_v43 = vsel %vm711_vm7, %v1747_v33, 0.0  ;;  %1362 = vpow2.f32 %v337_v13  ;;  %v244_v5 = vsub.f32 %v3243_v56, %v2162_v7  ;;  %vm712_vm9 = vcmp.eq.s32.totalorder %v2200_v49, %v629_v21  ;;  %v3247_v22 = vld [vmem:[#allocation48_spill] sm:$0xff] }
 0x15a   :  { %vm713_vm10 = vcmp.eq.s32.totalorder %v2211_v58, %v629_v21  ;;  %vm917_vm11 = vcmp.ne.s32.totalorder %v3244_v6, 4294967295  ;;  %v343_v15 = vmul.f32 1.442695, %v243_v55  ;;  %v347_v62 = vmul.f32 1.442695, %v245_v20  ;;  %v2319_v50 = vpop.permute.xlu0 %637  ;;  %v3250_v55 = vld [vmem:[#allocation16_spill] sm:$0xff] }
 0x15b   :  { %843 = vadd.xlane.f32.xlu0 %v842_v1  ;;  %v1351_v14 = vpop.eup %1350  ;;  %v249_v2 = vsub.f32 %v3246_v32, %v3245_v18  ;;  %v438_v4 = vadd.f32 %v1349_v25, %v1347_v8  ;;  %v848_v33 = vadd.f32 %v775_v43, %v774_v42  ;;  %v3161_v9 = vmov 0.0   ;;  %v3251_v42 = vld [vmem:[#allocation30_spill] sm:$0xff]  ;;  %v3252_v43 = vld [vmem:[#allocation32_spill] sm:$0xff] }
 0x15c   :  { %433 = vadd.xlane.f32.xlu1 %v432_v48  ;;  %v1353_v19 = vpop.eup %1352  ;;  %v2312_v52 = vsel %vm914_vm4, 1.0, %v3161_v9  ;;  %vm1074_vm12 = vcmask 7168   ;;  %v2317_v48 = vsel %vm915_vm5, 1.0, %v3161_v9  ;;  %v776_v26 = vsel %vm712_vm9, %v1732_v30, 0.0 }
 0x15d   :  { %v777_v0 = vsel %vm713_vm10, %v1737_v31, 0.0  ;;  %v1150_v34 = vsel %vm1074_vm12, %v2312_v52, 0.0  ;;  %v1151_v27 = vsel %vm1074_vm12, %v2317_v48, 0.0  ;;  %1364 = vpow2.f32 %v341_v41  ;;  %v635_v31 = vpop.permute.xlu1 %634 }
 0x15e   :  { %v345_v17 = vmul.f32 1.442695, %v244_v5  ;;  %vm714_vm13 = vcmp.eq.s32.totalorder %v2200_v49, %v632_v24  ;;  %vm715_vm14 = vcmp.eq.s32.totalorder %v2211_v58, %v632_v24  ;;  %v1355_v1 = vpop.eup %1354  ;;  %1366 = vpow2.f32 %v343_v15 }
 0x15f   :  { %846 = vadd.xlane.f32.xlu0 %v845_v23  ;;  %v349_v30 = vmul.f32 1.442695, %v246_v40  ;;  %v247_v12 = vsub.f32 %v3248_v51, %v3247_v22  ;;  %v441_v13 = vadd.f32 %v1353_v19, %v1351_v14  ;;  %v1357_v8 = vpop.eup %1356  ;;  %vm919_vm15 = vcmp.ne.s32.totalorder %v3249_v35, 4294967295  ;;  %v3254_v14 = vld [vmem:[#allocation31_spill] sm:$0xff] }
 0x160   :  { %436 = vadd.xlane.f32.xlu1 %v435_v28  ;;  %v248_v60 = vsub.f32 %v3250_v55, %v3247_v22  ;;  %v851_v20 = vadd.f32 %v777_v0, %v776_v26  ;;  %v1152_v21 = vadd.f32 %v1151_v27, %v1150_v34  ;;  %v2341_v28 = vsel %vm916_vm8, 1.0, %v3161_v9  ;;  %v3256_v26 = vld [vmem:[#allocation17_spill] sm:$0xff]  ;;  %v3257_v34 = vld [vmem:[#allocation50_spill] sm:$0xff]  ;;  %v3258_v27 = vld [vmem:[#allocation19_spill] sm:$0xff] }
 0x161   :  { %v355_v25 = vmul.f32 1.442695, %v249_v2  ;;  %v778_v41 = vsel %vm714_vm13, %v1766_v38, 0.0  ;;  %v779_v47 = vsel %vm715_vm14, %v1771_v39, 0.0  ;;  %v1153_v40 = vsel %vm1074_vm12, %v2341_v28, 0.0  ;;  %v1359_v23 = vpop.eup %1358  ;;  %v3253_v38 = vld [vmem:[#allocation14_spill] sm:$0xff]  ;;  %v641_v39 = vpop.permute.xlu0 %640 }
 0x162   :  { %vm918_vm0 = vcmp.ne.s32.totalorder %v3251_v42, 4294967295  ;;  %1368 = vpow2.f32 %v345_v17  ;;  %vm716_vm1 = vcmp.eq.s32.totalorder %v2200_v49, %v635_v31  ;;  %vm717_vm2 = vcmp.eq.s32.totalorder %v2211_v58, %v635_v31  ;;  %v1361_v46 = vpop.eup %1360  ;;  %v3260_v31 = vld [vmem:[#allocation18_spill] sm:$0xff] }
 0x163   :  { %849 = vadd.xlane.f32.xlu0 %v848_v33  ;;  %vm920_vm3 = vcmp.ne.s32.totalorder %v3252_v43, 4294967295  ;;  %1370 = vpow2.f32 %v347_v62  ;;  %v250_v24 = vsub.f32 %v3253_v38, %v3245_v18  ;;  %v444_v56 = vadd.f32 %v1357_v8, %v1355_v1  ;;  %v1363_v5 = vpop.eup %1362  ;;  %v3255_v33 = vld [vmem:[#allocation34_spill] sm:$0xff] }
 0x164   :  { %439 = vadd.xlane.f32.xlu1 %v438_v4  ;;  %vm921_vm4 = vcmp.ne.s32.totalorder %v3254_v14, 4294967295  ;;  %1372 = vpow2.f32 %v349_v30  ;;  %v351_v15 = vmul.f32 1.442695, %v247_v12  ;;  %v854_v32 = vadd.f32 %v779_v47, %v778_v41  ;;  %v3259_v12 = vld [vmem:[#allocation33_spill] sm:$0xff]  ;;  %v3261_v47 = vld [vmem:[#allocation20_spill] sm:$0xff] }
 0x165   :  { %v1154_v2 = vadd.f32 %v1153_v40, %v1152_v21  ;;  %v353_v4 = vmul.f32 1.442695, %v248_v60  ;;  %1374 = vpow2.f32 %v355_v25  ;;  %v780_v19 = vsel %vm716_vm1, %v1756_v36, 0.0  ;;  %v2390_v21 = vpop.permute.xlu0 %646  ;;  %v1489_v14 = vld [vmem:[%s3093_s0 + $0x108] sm:$0xff] }
 0x166   :  { %v781_v62 = vsel %vm717_vm2, %v1761_v37, 0.0  ;;  %vm922_vm5 = vcmp.ne.s32.totalorder %v3255_v33, 4294967295  ;;  %v253_v0 = vsub.f32 %v3256_v26, %v2174_v54  ;;  %vm718_vm6 = vcmp.eq.s32.totalorder %v2200_v49, %v2319_v50 }
 0x167   :  { %852 = vadd.xlane.f32.xlu0 %v851_v20  ;;  %vm719_vm7 = vcmp.eq.s32.totalorder %v2211_v58, %v2319_v50  ;;  %v2374_v36 = vsel %vm917_vm11, 1.0, %v3161_v9  ;;  %v251_v37 = vsub.f32 %v3258_v27, %v3257_v34  ;;  %v447_v17 = vadd.f32 %v1363_v5, %v1361_v46  ;;  %v1365_v51 = vpop.eup %1364  ;;  %v644_v46 = vpop.permute.xlu1 %643 }
 0x168   :  { %442 = vadd.xlane.f32.xlu1 %v441_v13  ;;  %v2381_v1 = vsel %vm918_vm0, 1.0, %v3161_v9  ;;  %v1155_v30 = vsel %vm1074_vm12, %v2374_v36, 0.0  ;;  %vm923_vm8 = vcmp.ne.s32.totalorder %v3259_v12, 4294967295  ;;  %v254_v6 = vsub.f32 %v3260_v31, %v2174_v54  ;;  %v1367_v60 = vpop.eup %1366 }
 0x169   :  { %v857_v13 = vadd.f32 %v781_v62, %v780_v19  ;;  %v1157_v8 = vsel %vm1074_vm12, %v2381_v1, 0.0  ;;  %v1156_v55 = vadd.f32 %v1155_v30, %v1154_v2  ;;  %1376 = vpow2.f32 %v351_v15 }
 0x16a   :  { %v357_v20 = vmul.f32 1.442695, %v250_v24  ;;  %v782_v25 = vsel %vm718_vm6, %v1790_v44, 0.0  ;;  %v783_v41 = vsel %vm719_vm7, %v1795_v45, 0.0  ;;  %1378 = vpow2.f32 %v353_v4  ;;  %v3262_v45 = vld [vmem:[#allocation36_spill] sm:$0xff]  ;;  %v1487_v4 = vld [vmem:[%s3093_s0 + $0xf8] sm:$0xff] }
 0x16b   :  { %855 = vadd.xlane.f32.xlu0 %v854_v32  ;;  %v252_v40 = vsub.f32 %v3261_v47, %v3257_v34  ;;  %vm720_vm9 = vcmp.eq.s32.totalorder %v2200_v49, %v641_v39  ;;  %vm721_vm10 = vcmp.eq.s32.totalorder %v2211_v58, %v641_v39  ;;  %v359_v42 = vmul.f32 1.442695, %v251_v37  ;;  %v2433_v39 = vpop.permute.xlu0 %649  ;;  %v2666_v34 = vld [vmem:[%s3093_s0 + $0x1e0] sm:$0xff] }
 0x16c   :  { %445 = vadd.xlane.f32.xlu1 %v444_v56  ;;  %v450_v38 = vadd.f32 %v1365_v51, %v1359_v23  ;;  %v2407_v44 = vsel %vm919_vm15, 1.0, %v3161_v9  ;;  %v1158_v24 = vadd.f32 %v1157_v8, %v1156_v55  ;;  %v1369_v50 = vpop.eup %1368  ;;  %vm924_vm11 = vcmp.ne.s32.totalorder %v3262_v45, 4294967295  ;;  %v1486_v23 = vld [vmem:[%s3093_s0 + $0xf0] sm:$0xff]  ;;  %v1495_v45 = vld [vmem:[%s3093_s0 + $0x120] sm:$0xff] }
 0x16d   :  { %v363_v56 = vmul.f32 1.442695, %v253_v0  ;;  %v365_v5 = vmul.f32 1.442695, %v254_v6  ;;  %v860_v15 = vadd.f32 %v783_v41, %v782_v25  ;;  %v1159_v32 = vsel %vm1074_vm12, %v2407_v44, 0.0  ;;  %v1371_v2 = vpop.eup %1370  ;;  %v3263_v51 = vld [vmem:[#allocation21_spill] sm:$0xff] }
 0x16e   :  { %1380 = vpow2.f32 %v357_v20  ;;  %v784_v35 = vsel %vm720_vm9, %v1486_v23, 0.0  ;;  %v785_v19 = vsel %vm721_vm10, %v1487_v4, 0.0  ;;  %v2425_v62 = vsel %vm920_vm3, 1.0, %v3161_v9  ;;  %v1373_v26 = vpop.eup %1372  ;;  %v3264_v6 = vld [vmem:[#allocation22_spill] sm:$0xff] }
 0x16f   :  { %858 = vadd.xlane.f32.xlu0 %v857_v13  ;;  %v361_v0 = vmul.f32 1.442695, %v252_v40  ;;  %vm722_vm13 = vcmp.eq.s32.totalorder %v2200_v49, %v644_v46  ;;  %vm723_vm14 = vcmp.eq.s32.totalorder %v2211_v58, %v644_v46  ;;  %v1161_v27 = vsel %vm1074_vm12, %v2425_v62, 0.0  ;;  %v2431_v37 = vpop.eup %1374 }
 0x170   :  { %448 = vadd.xlane.f32.xlu1 %v447_v17  ;;  %1382 = vpow2.f32 %v359_v42  ;;  %v453_v17 = vadd.f32 %v1369_v50, %v1367_v60  ;;  %v2438_v43 = vsel %vm921_vm4, 1.0, %v3161_v9  ;;  %v1160_v30 = vadd.f32 %v1159_v32, %v1158_v24  ;;  %v1488_v60 = vld [vmem:[%s3093_s0 + $0x100] sm:$0xff]  ;;  %v2473_v50 = vld [vmem:[%s3093_s0 + $0x190] sm:$0xff] }
 0x171   :  { %v255_v31 = vsub.f32 %v3263_v51, %v2176_v11  ;;  %v256_v13 = vsub.f32 %v3264_v6, %v2176_v11  ;;  %v863_v8 = vadd.f32 %v785_v19, %v784_v35  ;;  %v1163_v55 = vsel %vm1074_vm12, %v2438_v43, 0.0  ;;  %v1492_v35 = vld [vmem:[%s3093_s0 + $0x110] sm:$0xff]  ;;  %v1493_v19 = vld [vmem:[%s3093_s0 + $0x118] sm:$0xff] }
 0x172   :  { %v786_v20 = vsel %vm722_vm13, %v1488_v60, 0.0  ;;  %v787_v25 = vsel %vm723_vm14, %v1489_v14, 0.0  ;;  %v1162_v41 = vadd.f32 %v1161_v27, %v1160_v30  ;;  %v2457_v47 = vsel %vm922_vm5, 1.0, %v3161_v9  ;;  %v3265_v51 = vld [vmem:[#allocation35_spill] sm:$0xff]  ;;  %v3266_v14 = vld [vmem:[#allocation54_spill] sm:$0xff] }
 0x173   :  { %861 = vadd.xlane.f32.xlu0 %v860_v15  ;;  %1384 = vpow2.f32 %v361_v0  ;;  %vm724_vm15 = vcmp.eq.s32.totalorder %v2200_v49, %v2390_v21  ;;  %vm725_vm0 = vcmp.eq.s32.totalorder %v2211_v58, %v2390_v21  ;;  %v1165_v40 = vsel %vm1074_vm12, %v2457_v47, 0.0  ;;  %v1377_v42 = vpop.eup %1376  ;;  %v653_v0 = vpop.permute.xlu0 %652 }
 0x174   :  { %451 = vadd.xlane.f32.xlu1 %v450_v38  ;;  %1386 = vpow2.f32 %v363_v56  ;;  %v456_v46 = vadd.f32 %v1373_v26, %v1371_v2  ;;  %v1164_v38 = vadd.f32 %v1163_v55, %v1162_v41  ;;  %v2468_v33 = vsel %vm923_vm8, 1.0, %v3161_v9  ;;  %v1379_v24 = vpop.eup %1378  ;;  %v2480_v56 = vld [vmem:[%s3093_s0 + $0x198] sm:$0xff]  ;;  %v2517_v41 = vpop.permute.xlu1 %658 }
 0x175   :  { %v257_v15 = vsub.f32 %v2473_v50, %v2178_v29  ;;  %v258_v32 = vsub.f32 %v2480_v56, %v2178_v29  ;;  %v866_v12 = vadd.f32 %v787_v25, %v786_v20  ;;  %v1167_v2 = vsel %vm1074_vm12, %v2468_v33, 0.0  ;;  %v2513_v20 = vld [vmem:[%s3093_s0 + $0x1a0] sm:$0xff] }
 0x176   :  { %v367_v23 = vmul.f32 1.442695, %v255_v31  ;;  %v788_v4 = vsel %vm724_vm15, %v1492_v35, 0.0  ;;  %v789_v26 = vsel %vm725_vm0, %v1493_v19, 0.0  ;;  %v1166_v27 = vadd.f32 %v1165_v40, %v1164_v38  ;;  %v2534_v38 = vld [vmem:[%s3093_s0 + $0x1a8] sm:$0xff]  ;;  %v2550_v35 = vld [vmem:[%s3093_s0 + $0x1b0] sm:$0xff] }
 0x177   :  { %864 = vadd.xlane.f32.xlu0 %v863_v8  ;;  %1388 = vpow2.f32 %v365_v5  ;;  %vm726_vm1 = vcmp.eq.s32.totalorder %v2200_v49, %v2433_v39  ;;  %vm727_vm2 = vcmp.eq.s32.totalorder %v2211_v58, %v2433_v39  ;;  %vm925_vm3 = vcmp.ne.s32.totalorder %v3265_v51, 4294967295 }
 0x178   :  { %454 = vadd.xlane.f32.xlu1 %v453_v17  ;;  %v369_v17 = vmul.f32 1.442695, %v256_v13  ;;  %v1381_v30 = vpop.eup %1380  ;;  %v459_v31 = vadd.f32 %v1379_v24, %v1377_v42  ;;  %v1168_v6 = vadd.f32 %v1167_v2, %v1166_v27  ;;  %v2506_v21 = vsel %vm924_vm11, 1.0, %v3161_v9  ;;  %v1496_v42 = vld [vmem:[%s3093_s0 + $0x128] sm:$0xff] }
 0x179   :  { %v371_v8 = vmul.f32 1.442695, %v257_v15  ;;  %v373_v5 = vmul.f32 1.442695, %v258_v32  ;;  %v869_v13 = vadd.f32 %v789_v26, %v788_v4  ;;  %v1169_v55 = vsel %vm1074_vm12, %v2506_v21, 0.0  ;;  %v3267_v15 = vld [vmem:[#allocation38_spill] sm:$0xff]  ;;  %v656_v32 = vpop.permute.xlu0 %655 }
 0x17a   :  { %v1383_v60 = vpop.eup %1382  ;;  %1390 = vpow2.f32 %v367_v23  ;;  %v259_v25 = vsub.f32 %v2513_v20, %v3266_v14  ;;  %v790_v40 = vsel %vm726_vm1, %v1495_v45, 0.0  ;;  %v260_v24 = vsub.f32 %v2534_v38, %v3266_v14  ;;  %v3268_v4 = vld [vmem:[#allocation55_spill] sm:$0xff] }
 0x17b   :  { %867 = vadd.xlane.f32.xlu0 %v866_v12  ;;  %1392 = vpow2.f32 %v369_v17  ;;  %vm728_vm4 = vcmp.eq.s32.totalorder %v2200_v49, %v653_v0  ;;  %vm729_vm5 = vcmp.eq.s32.totalorder %v2211_v58, %v653_v0  ;;  %vm926_vm6 = vcmp.ne.s32.totalorder %v3267_v15, 4294967295  ;;  %v2557_v26 = vld [vmem:[%s3093_s0 + $0x1b8] sm:$0xff]  ;;  %v1503_v15 = vld [vmem:[%s3093_s0 + $0x140] sm:$0xff] }
 0x17c   :  { %457 = vadd.xlane.f32.xlu1 %v456_v46  ;;  %v791_v46 = vsel %vm727_vm2, %v1496_v42, 0.0  ;;  %v462_v39 = vadd.f32 %v1381_v30, %v2431_v37  ;;  %v1170_v12 = vadd.f32 %v1169_v55, %v1168_v6  ;;  %v2545_v2 = vsel %vm925_vm3, 1.0, %v3161_v9 }
 0x17d   :  { %v1385_v23 = vpop.eup %1384  ;;  %v261_v19 = vsub.f32 %v2550_v35, %v3268_v4  ;;  %v262_v37 = vsub.f32 %v2557_v26, %v3268_v4  ;;  %v872_v27 = vadd.f32 %v791_v46, %v790_v40  ;;  %v1171_v17 = vsel %vm1074_vm12, %v2545_v2, 0.0  ;;  %v3272_v4 = vld [vmem:[#allocation57_spill] sm:$0xff] }
 0x17e   :  { %v1387_v30 = vpop.eup %1386  ;;  %1394 = vpow2.f32 %v371_v8  ;;  %v375_v51 = vmul.f32 1.442695, %v259_v25  ;;  %v377_v45 = vmul.f32 1.442695, %v260_v24  ;;  %vm730_vm7 = vcmp.eq.s32.totalorder %v2200_v49, %v656_v32  ;;  %v3269_v8 = vld [vmem:[#allocation37_spill] sm:$0xff]  ;;  %v2576_v25 = vpop.permute.xlu1 %664 }
 0x17f   :  { %870 = vadd.xlane.f32.xlu0 %v869_v13  ;;  %v1501_v13 = vld [vmem:[%s3093_s0 + $0x138] sm:$0xff]  ;;  %1396 = vpow2.f32 %v373_v5  ;;  %vm731_vm8 = vcmp.eq.s32.totalorder %v2211_v58, %v656_v32  ;;  %vm927_vm9 = vcmp.ne.s32.totalorder %v3269_v8, 4294967295  ;;  %v465_v40 = vadd.f32 %v1385_v23, %v1383_v60  ;;  %v3270_v60 = vld [vmem:[#allocation56_spill] sm:$0xff] }
 0x180   :  { %460 = vadd.xlane.f32.xlu1 %v459_v31  ;;  %v1500_v31 = vld [vmem:[%s3093_s0 + $0x130] sm:$0xff]  ;;  %v793_v55 = vsel %vm729_vm5, %v1501_v13, 0.0  ;;  %v1172_v42 = vadd.f32 %v1171_v17, %v1170_v12  ;;  %v2581_v46 = vsel %vm926_vm6, 1.0, %v3161_v9  ;;  %v381_v5 = vmul.f32 1.442695, %v262_v37  ;;  %v662_v17 = vpop.permute.xlu0 %661  ;;  %v3271_v13 = vld [vmem:[#allocation39_spill] sm:$0xff] }
 0x181   :  { %v792_v6 = vsel %vm728_vm4, %v1500_v31, 0.0  ;;  %v1389_v0 = vpop.eup %1388  ;;  %v1173_v31 = vsel %vm1074_vm12, %v2581_v46, 0.0  ;;  %1398 = vpow2.f32 %v375_v51  ;;  %v794_v23 = vsel %vm730_vm7, %v1503_v15, 0.0  ;;  %v2605_v51 = vld [vmem:[%s3093_s0 + $0x1c8] sm:$0xff] }
 0x182   :  { %v875_v24 = vadd.f32 %v793_v55, %v792_v6  ;;  %1400 = vpow2.f32 %v377_v45  ;;  %v264_v6 = vsub.f32 %v2605_v51, %v3270_v60  ;;  %vm732_vm10 = vcmp.eq.s32.totalorder %v2200_v49, %v2517_v41 }
 0x183   :  { %873 = vadd.xlane.f32.xlu0 %v872_v27  ;;  %v2588_v27 = vld [vmem:[%s3093_s0 + $0x1c0] sm:$0xff]  ;;  %vm733_vm11 = vcmp.eq.s32.totalorder %v2211_v58, %v2517_v41  ;;  %vm928_vm13 = vcmp.ne.s32.totalorder %v3271_v13, 4294967295  ;;  %v468_v55 = vadd.f32 %v1389_v0, %v1387_v30  ;;  %v1174_v45 = vadd.f32 %v1173_v31, %v1172_v42  ;;  %v1508_v31 = vld [vmem:[%s3093_s0 + $0x150] sm:$0xff] }
 0x184   :  { %463 = vadd.xlane.f32.xlu1 %v462_v39  ;;  %v379_v39 = vmul.f32 1.442695, %v261_v19  ;;  %v263_v12 = vsub.f32 %v2588_v27, %v3270_v60  ;;  %v1504_v19 = vld [vmem:[%s3093_s0 + $0x148] sm:$0xff]  ;;  %v1391_v32 = vpop.eup %1390  ;;  %v1509_v60 = vld [vmem:[%s3093_s0 + $0x158] sm:$0xff]  ;;  %vm734_vm14 = vcmp.eq.s32.totalorder %v2200_v49, %v662_v17  ;;  %vm735_vm15 = vcmp.eq.s32.totalorder %v2211_v58, %v662_v17  ;;  %v1512_v13 = vld [vmem:[%s3093_s0 + $0x160] sm:$0xff] }
 0x185   :  { %v795_v37 = vsel %vm731_vm8, %v1504_v19, 0.0  ;;  %v1393_v15 = vpop.eup %1392  ;;  %v2622_v19 = vld [vmem:[%s3093_s0 + $0x1d0] sm:$0xff]  ;;  %v3273_v14 = vmov 0.0   ;;  %vm736_vm1 = vcmp.eq.s32.totalorder %v2200_v49, %v2576_v25  ;;  %vm737_vm2 = vcmp.eq.s32.totalorder %v2211_v58, %v2576_v25  ;;  %v1515_v17 = vld [vmem:[%s3094_s1 + $0x80] sm:$0xff] }
 0x186   :  { %v265_v29 = vsub.f32 %v2622_v19, %v3272_v4  ;;  %v878_v8 = vadd.f32 %v795_v37, %v794_v23  ;;  %1402 = vpow2.f32 %v379_v39  ;;  %v383_v0 = vmul.f32 1.442695, %v263_v12  ;;  %v2647_v37 = vpop.permute.xlu1 %670 }
 0x187   :  { %876 = vadd.xlane.f32.xlu0 %v875_v24  ;;  %v2629_v24 = vld [vmem:[%s3093_s0 + $0x1d8] sm:$0xff]  ;;  %v797_v23 = vsel %vm733_vm11, %v1509_v60, 0.0  ;;  %1404 = vpow2.f32 %v381_v5  ;;  %v385_v39 = vmul.f32 1.442695, %v264_v6  ;;  %v471_v41 = vadd.f32 %v1393_v15, %v1391_v32 }
 0x188   :  { %466 = vadd.xlane.f32.xlu1 %v465_v40  ;;  %v2617_v40 = vsel %vm927_vm9, 1.0, %v3161_v9  ;;  %v266_v30 = vsub.f32 %v2629_v24, %v3272_v4  ;;  %v796_v9 = vsel %vm732_vm10, %v1508_v31, 0.0  ;;  %v1395_v12 = vpop.eup %1394  ;;  %v1510_v31 = vld [vmem:[%s3094_s1 + $0x78] sm:$0xff]  ;;  %v2654_v4 = vpop.permute.xlu0 %667  ;;  %v2659_v5 = vsel %vm928_vm13, 1.0, %v3273_v14 }
 0x189   :  { %v1175_v42 = vsel %vm1074_vm12, %v2617_v40, 0.0  ;;  %vm929_vm0 = vcmp.ne.s32.totalorder %v1510_v31, 4294967295  ;;  %3274 = vst [vmem:[#allocation8_spill] sm:$0xff] %v2659_v5  ;;  %v1397_v6 = vpop.eup %1396  ;;  %v881_v54 = vadd.f32 %v797_v23, %v796_v9  ;;  %1406 = vpow2.f32 %v383_v0  ;;  %v3275_v32 = vld [vmem:[#allocation58_spill] sm:$0xff]  ;;  %v1513_v9 = vld [vmem:[%s3093_s0 + $0x168] sm:$0xff] }
 0x18a   :  { %v1176_v60 = vadd.f32 %v1175_v42, %v1174_v45  ;;  %v389_v11 = vmul.f32 1.442695, %v266_v30  ;;  %v267_v45 = vsub.f32 %v2666_v34, %v3275_v32  ;;  %v799_v15 = vsel %vm735_vm15, %v1513_v9, 0.0  ;;  %v2683_v30 = vld [vmem:[%s3093_s0 + $0x1e8] sm:$0xff]  ;;  %v2694_v23 = vpop.permute.xlu1 %676  ;;  %v2712_v31 = vld [vmem:[%s3093_s0 + $0x1f8] sm:$0xff] }
 0x18b   :  { %879 = vadd.xlane.f32.xlu0 %v878_v8  ;;  %v1177_v8 = vsel %vm1074_vm12, %v2659_v5, 0.0  ;;  %1408 = vpow2.f32 %v385_v39  ;;  %v268_v42 = vsub.f32 %v2683_v30, %v3275_v32  ;;  %v1399_v0 = vpop.eup %1398  ;;  %vm930_vm3 = vcmp.ne.s32.totalorder %v1515_v17, 4294967295  ;;  %v3277_v32 = vld [vmem:[#allocation59_spill] sm:$0xff]  ;;  %v1522_v17 = vld [vmem:[%s3093_s0 + $0x188] sm:$0xff] }
 0x18c   :  { %469 = vadd.xlane.f32.xlu1 %v468_v55  ;;  %v387_v55 = vmul.f32 1.442695, %v265_v29  ;;  %v798_v29 = vsel %vm734_vm14, %v1512_v13, 0.0  ;;  %v474_v39 = vadd.f32 %v1397_v6, %v1395_v12  ;;  %v2698_v13 = vsel %vm929_vm0, 1.0, %v3273_v14  ;;  %v1401_v9 = vpop.eup %1400  ;;  %v1518_v6 = vld [vmem:[%s3093_s0 + $0x170] sm:$0xff] }
 0x18d   :  { %3276 = vst [vmem:[#allocation28_spill] sm:$0xff] %v2698_v13  ;;  %v884_v22 = vadd.f32 %v799_v15, %v798_v29  ;;  %v1179_v16 = vsel %vm1074_vm12, %v2698_v13, 0.0  ;;  %v391_v12 = vmul.f32 1.442695, %v267_v45  ;;  %v674_v29 = vpop.permute.xlu0 %673  ;;  %v393_v15 = vmul.f32 1.442695, %v268_v42 }
 0x18e   :  { %1410 = vpow2.f32 %v387_v55  ;;  %v800_v55 = vsel %vm736_vm1, %v1518_v6, 0.0  ;;  %vm738_vm4 = vcmp.eq.s32.totalorder %v2200_v49, %v2654_v4  ;;  %vm739_vm5 = vcmp.eq.s32.totalorder %v2211_v58, %v2654_v4  ;;  %v1523_v4 = vld [vmem:[%s3094_s1 + $0x90] sm:$0xff] }
 0x18f   :  { %882 = vadd.xlane.f32.xlu0 %v881_v54  ;;  %v2703_v54 = vld [vmem:[%s3093_s0 + $0x1f0] sm:$0xff]  ;;  %1412 = vpow2.f32 %v389_v11  ;;  %v2734_v5 = vsel %vm930_vm3, 1.0, %v3273_v14  ;;  %v1520_v11 = vld [vmem:[%s3094_s1 + $0x88] sm:$0xff]  ;;  %vm742_vm7 = vcmp.eq.s32.totalorder %v2200_v49, %v674_v29  ;;  %vm743_vm8 = vcmp.eq.s32.totalorder %v2211_v58, %v674_v29 }
 0x190   :  { %472 = vadd.xlane.f32.xlu1 %v471_v41  ;;  %v1178_v41 = vadd.f32 %v1177_v8, %v1176_v60  ;;  %v269_v18 = vsub.f32 %v2703_v54, %v3277_v32  ;;  %v270_v60 = vsub.f32 %v2712_v31, %v3277_v32  ;;  %v1519_v8 = vld [vmem:[%s3093_s0 + $0x178] sm:$0xff]  ;;  %v1403_v6 = vpop.eup %1402  ;;  %v477_v32 = vadd.f32 %v1401_v9, %v1399_v0 }
 0x191   :  { %v801_v45 = vsel %vm737_vm2, %v1519_v8, 0.0  ;;  %3278 = vst [vmem:[#allocation11_spill] sm:$0xff] %v2734_v5  ;;  %v1405_v25 = vpop.eup %1404  ;;  %vm931_vm6 = vcmp.ne.s32.totalorder %v1520_v11, 4294967295  ;;  %1414 = vpow2.f32 %v391_v12  ;;  %v680_v12 = vpop.permute.xlu0 %679  ;;  %vm932_vm9 = vcmp.ne.s32.totalorder %v1523_v4, 4294967295 }
 0x192   :  { %v1180_v13 = vadd.f32 %v1179_v16, %v1178_v41  ;;  %v887_v42 = vadd.f32 %v801_v45, %v800_v55  ;;  %v395_v8 = vmul.f32 1.442695, %v269_v18  ;;  %v1521_v16 = vld [vmem:[%s3093_s0 + $0x180] sm:$0xff]  ;;  %v803_v41 = vsel %vm739_vm5, %v1522_v17, 0.0 }
 0x193   :  { %885 = vadd.xlane.f32.xlu0 %v884_v22  ;;  %v2741_v22 = vpop.permute.xlu1 %682  ;;  %v802_v0 = vsel %vm738_vm4, %v1521_v16, 0.0  ;;  %1416 = vpow2.f32 %v393_v15  ;;  %v397_v18 = vmul.f32 1.442695, %v270_v60  ;;  %v1407_v9 = vpop.eup %1406  ;;  %v480_v55 = vadd.f32 %v1405_v25, %v1403_v6 }
 0x194   :  { %475 = vadd.xlane.f32.xlu1 %v474_v39  ;;  %v1181_v39 = vsel %vm1074_vm12, %v2734_v5, 0.0  ;;  %v2759_v16 = vsel %vm931_vm6, 1.0, %v3273_v14  ;;  %1418 = vpow2.f32 %v395_v8  ;;  %v806_v29 = vsel %vm742_vm7, %v2513_v20, 0.0  ;;  %v1524_v20 = vld [vmem:[%s3094_s1 + $0x98] sm:$0xff] }
 0x195   :  { %v1182_v45 = vadd.f32 %v1181_v39, %v1180_v13  ;;  %v1409_v5 = vpop.eup %1408  ;;  %v1183_v60 = vsel %vm1074_vm12, %v2759_v16, 0.0  ;;  %v807_v15 = vsel %vm743_vm8, %v2534_v38, 0.0  ;;  %1420 = vpow2.f32 %v397_v18 }
 0x196   :  { %vm746_vm10 = vcmp.eq.s32.totalorder %v2200_v49, %v680_v12  ;;  %vm747_vm11 = vcmp.eq.s32.totalorder %v2211_v58, %v680_v12  ;;  %v483_v25 = vadd.f32 %v1409_v5, %v1407_v9  ;;  %vm933_vm13 = vcmp.ne.s32.totalorder %v1524_v20, 4294967295  ;;  %v1527_v20 = vld [vmem:[%s3094_s1 + $0xb0] sm:$0xff] }
 0x197   :  { %888 = vadd.xlane.f32.xlu0 %v887_v42  ;;  %v686_v6 = vpop.permute.xlu1 %685  ;;  %v1184_v11 = vadd.f32 %v1183_v60, %v1182_v45  ;;  %v2771_v42 = vsel %vm932_vm9, 1.0, %v3273_v14  ;;  %v896_v38 = vadd.f32 %v807_v15, %v806_v29  ;;  %v811_v17 = vsel %vm747_vm11, %v2605_v51, 0.0 }
 0x198   :  { %478 = vadd.xlane.f32.xlu1 %v477_v32  ;;  %v890_v32 = vadd.f32 %v803_v41, %v802_v0  ;;  %v1411_v13 = vpop.eup %1410  ;;  %v1185_v8 = vsel %vm1074_vm12, %v2771_v42, 0.0  ;;  %v810_v0 = vsel %vm746_vm10, %v2588_v27, 0.0  ;;  %vm750_vm14 = vcmp.eq.s32.totalorder %v2200_v49, %v686_v6 }
 0x199   :  { %v1413_v39 = vpop.eup %1412  ;;  %vm751_vm15 = vcmp.eq.s32.totalorder %v2211_v58, %v686_v6  ;;  %v1186_v18 = vadd.f32 %v1185_v8, %v1184_v11  ;;  %v2783_v9 = vsel %vm933_vm13, 1.0, %v3273_v14  ;;  %v902_v27 = vadd.f32 %v811_v17, %v810_v0  ;;  %v1526_v6 = vld [vmem:[%s3094_s1 + $0xa8] sm:$0xff] }
 0x19a   :  { %v486_v41 = vadd.f32 %v1413_v39, %v1411_v13  ;;  %v1187_v51 = vsel %vm1074_vm12, %v2783_v9, 0.0  ;;  %v814_v45 = vsel %vm750_vm14, %v2666_v34, 0.0  ;;  %v815_v4 = vsel %vm751_vm15, %v2683_v30, 0.0 }
 0x19b   :  { %891 = vadd.xlane.f32.xlu0 %v890_v32  ;;  %v1415_v5 = vpop.eup %1414  ;;  %v1188_v29 = vadd.f32 %v1187_v51, %v1186_v18  ;;  %vm935_vm1 = vcmp.ne.s32.totalorder %v1526_v6, 4294967295  ;;  %vm740_vm2 = vcmp.eq.s32.totalorder %v2200_v49, %v2647_v37  ;;  %vm741_vm3 = vcmp.eq.s32.totalorder %v2211_v58, %v2647_v37 }
 0x19c   :  { %481 = vadd.xlane.f32.xlu1 %v480_v55  ;;  %v1525_v55 = vld [vmem:[%s3094_s1 + $0xa0] sm:$0xff]  ;;  %v2805_v39 = vsel %vm935_vm1, 1.0, %v3273_v14  ;;  %vm936_vm4 = vcmp.ne.s32.totalorder %v1527_v20, 4294967295  ;;  %v805_v8 = vsel %vm741_vm3, %v2480_v56, 0.0  ;;  %vm744_vm5 = vcmp.eq.s32.totalorder %v2200_v49, %v2694_v23 }
 0x19d   :  { %v1417_v12 = vpop.eup %1416  ;;  %vm934_vm0 = vcmp.ne.s32.totalorder %v1525_v55, 4294967295  ;;  %v1191_v0 = vsel %vm1074_vm12, %v2805_v39, 0.0  ;;  %vm745_vm6 = vcmp.eq.s32.totalorder %v2211_v58, %v2694_v23  ;;  %v808_v56 = vsel %vm744_vm5, %v2550_v35, 0.0  ;;  %v689_v23 = vpop.permute.xlu0 %688  ;;  %v1529_v35 = vld [vmem:[%s3094_s1 + $0xc0] sm:$0xff] }
 0x19e   :  { %v1419_v32 = vpop.eup %1418  ;;  %v489_v60 = vadd.f32 %v1417_v12, %v1415_v5  ;;  %v2793_v15 = vsel %vm934_vm0, 1.0, %v3273_v14  ;;  %v2819_v5 = vsel %vm936_vm4, 1.0, %v3273_v14  ;;  %vm748_vm8 = vcmp.eq.s32.totalorder %v2200_v49, %v2741_v22 }
 0x19f   :  { %897 = vadd.xlane.f32.xlu0 %v896_v38  ;;  %v1421_v13 = vpop.eup %1420  ;;  %v1189_v34 = vsel %vm1074_vm12, %v2793_v15, 0.0  ;;  %v804_v38 = vsel %vm740_vm2, %v2473_v50, 0.0  ;;  %v1528_v50 = vld [vmem:[%s3094_s1 + $0xb8] sm:$0xff]  ;;  %v1193_v18 = vsel %vm1074_vm12, %v2819_v5, 0.0  ;;  %vm749_vm9 = vcmp.eq.s32.totalorder %v2211_v58, %v2741_v22 }
 0x1a0   :  { %484 = vadd.xlane.f32.xlu1 %v483_v25  ;;  %v908_v25 = vadd.f32 %v815_v4, %v814_v45  ;;  %v492_v30 = vadd.f32 %v1421_v13, %v1419_v32  ;;  %v1190_v11 = vadd.f32 %v1189_v34, %v1188_v29  ;;  %v893_v37 = vadd.f32 %v805_v8, %v804_v38  ;;  %v1533_v34 = vld [vmem:[%s3094_s1 + $0xe0] sm:$0xff]  ;;  %v1534_v38 = vld [vmem:[%s3094_s1 + $0xf0] sm:$0xff] }
 0x1a1   :  { %vm937_vm7 = vcmp.ne.s32.totalorder %v1528_v50, 4294967295  ;;  %vm938_vm10 = vcmp.ne.s32.totalorder %v1529_v35, 4294967295  ;;  %v813_v51 = vsel %vm749_vm9, %v2629_v24, 0.0  ;;  %vm752_vm11 = vcmp.eq.s32.totalorder %v2200_v49, %v689_v23  ;;  %v1530_v49 = vld [vmem:[%s3094_s1 + $0xc8] sm:$0xff]  ;;  %v1536_v35 = vld [vmem:[%s3094_s1 + $0xf8] sm:$0xff] }
 0x1a2   :  { %v1192_v17 = vadd.f32 %v1191_v0, %v1190_v11  ;;  %vm753_vm13 = vcmp.eq.s32.totalorder %v2211_v58, %v689_v23  ;;  %v2845_v32 = vsel %vm938_vm10, 1.0, %v3273_v14  ;;  %vm939_vm14 = vcmp.ne.s32.totalorder %v1530_v49, 4294967295  ;;  %v1531_v58 = vld [vmem:[%s3094_s1 + $0xd0] sm:$0xff]  ;;  %v3284_v49 = vld [vmem:[#allocation60_spill] sm:$0xff] }
 0x1a3   :  { %903 = vadd.xlane.f32.xlu0 %v902_v27  ;;  %v2833_v27 = vsel %vm937_vm7, 1.0, %v3273_v14  ;;  %v817_v29 = vsel %vm753_vm13, %v2712_v31, 0.0  ;;  %vm940_vm15 = vcmp.ne.s32.totalorder %v1531_v58, 4294967295  ;;  %v2861_v31 = vsel %vm939_vm14, 1.0, %v3273_v14 }
 0x1a4   :  { %487 = vadd.xlane.f32.xlu1 %v486_v41  ;;  %v809_v41 = vsel %vm745_vm6, %v2557_v26, 0.0  ;;  %v1194_v55 = vadd.f32 %v1193_v18, %v1192_v17  ;;  %v812_v26 = vsel %vm748_vm8, %v2622_v19, 0.0  ;;  %v1195_v45 = vsel %vm1074_vm12, %v2833_v27, 0.0  ;;  %v413_v6 = vpop.xlane.xlu1 %412  ;;  %v1535_v17 = vld [vmem:[%s3094_s1 + $0xe8] sm:$0xff] }
 0x1a5   :  { %v899_v12 = vadd.f32 %v809_v41, %v808_v56  ;;  %v905_v22 = vadd.f32 %v813_v51, %v812_v26  ;;  %v1197_v19 = vsel %vm1074_vm12, %v2845_v32, 0.0  ;;  %vm942_vm1 = vcmp.ne.s32.totalorder %v1533_v34, 4294967295  ;;  %v3286_v34 = vld [vmem:[#allocation62_spill] sm:$0xff] }
 0x1a6   :  { %v1196_v4 = vadd.f32 %v1195_v45, %v1194_v55  ;;  %v1199_v11 = vsel %vm1074_vm12, %v2861_v31, 0.0  ;;  %vm944_vm2 = vcmp.ne.s32.totalorder %v1534_v38, 4294967295  ;;  %v2877_v8 = vsel %vm942_vm1, 1.0, %v3273_v14 }
 0x1a7   :  { %909 = vadd.xlane.f32.xlu0 %v908_v25  ;;  %v1532_v25 = vld [vmem:[%s3094_s1 + $0xd8] sm:$0xff]  ;;  %vm943_vm3 = vcmp.ne.s32.totalorder %v1535_v17, 4294967295  ;;  %v1205_v56 = vsel %vm1074_vm12, %v2877_v8, 0.0  ;;  %v2890_v23 = vsel %vm944_vm2, 1.0, %v3273_v14  ;;  %vm945_vm4 = vcmp.ne.s32.totalorder %v1536_v35, 4294967295  ;;  %s1587_s1 = smov [#allocation2]  }
 0x1a8   :  { %490 = vadd.xlane.f32.xlu1 %v489_v60  ;;  %v816_v60 = vsel %vm752_vm11, %v2703_v54, 0.0  ;;  %v1198_v13 = vadd.f32 %v1197_v19, %v1196_v4  ;;  %v2858_v54 = vsel %vm940_vm15, 1.0, %v3273_v14  ;;  %vm941_vm0 = vcmp.ne.s32.totalorder %v1532_v25, 4294967295  ;;  %v416_v50 = vpop.xlane.xlu1 %415  ;;  %3280 = vst [vmem:[#allocation10_spill] sm:$0xff] %v2890_v23  ;;  %s1230_s0 = sshll.u32 %s1587_s1, 4  ;;  %s1231_s0 = int_to_ptr.vmem [resolvable:$true] %s1230_s0 }
 0x1a9   :  { %v911_v24 = vadd.f32 %v817_v29, %v816_v60  ;;  %v2880_v0 = vsel %vm941_vm0, 1.0, %v3273_v14  ;;  %v1209_v26 = vsel %vm1074_vm12, %v2890_v23, 0.0  ;;  %v2905_v4 = vsel %vm945_vm4, 1.0, %v3273_v14  ;;  %v3283_v29 = vld [vmem:[#allocation61_spill] sm:$0xff]  ;;  %s1537_s12 = scalar_lea.vmem %s1231_s0, 16  ;;  %s1541_s13 = scalar_lea.vmem %s1231_s0, 32 }
 0x1aa   :  { %v1200_v20 = vadd.f32 %v1199_v11, %v1198_v13  ;;  %3279 = vst [vmem:[#allocation9_spill] sm:$0xff] %v2880_v0  ;;  %v1203_v41 = vsel %vm1074_vm12, %v2880_v0, 0.0  ;;  %3282 = vst [vmem:[#allocation27_spill] sm:$0xff] %v2905_v4  ;;  %1422 = vlog2.f32 %v3283_v29  ;;  %v1211_v19 = vsel %vm1074_vm12, %v2905_v4, 0.0  ;;  %v3289_v29 = vld [vmem:[#allocation23_spill] sm:$0xff]  ;;  %v3297_v0 = vld [vmem:[#allocation46_spill] sm:$0xff]  ;;  %p1538_p0 = scmp.ne.s32.totalorder %s1231_s0, %s1537_s12  ;;  %p1542_p1 = scmp.lt.s32.totalorder %s1231_s0, %s1231_s0 }
 0x1ab   :  { %1424 = vlog2.f32 %v3284_v49  ;;  %p1543_p2 = scmp.lt.s32.totalorder %s1541_s13, %s1537_s12 }
 0x1ac   :  { %493 = vadd.xlane.f32.xlu1 %v492_v30  ;;  %v1201_v30 = vsel %vm1074_vm12, %v2858_v54, 0.0 }
 0x1ad   :  { %p1544_p3 = por %p1543_p2, %p1542_p1 }
 0x1af   :  { %v422_v38 = vpop.xlane.xlu0 %421  ;;  %p1545_p4 = pnand %p1544_p3, %p1538_p0 }
 0x1b0   :  { %894 = vadd.xlane.f32.xlu1 %v893_v37  ;;  %v1202_v37 = vadd.f32 %v1201_v30, %v1200_v20 }
 0x1b2   :  { %v1204_v18 = vadd.f32 %v1203_v41, %v1202_v37 }
 0x1b4   :  { %900 = vadd.xlane.f32.xlu1 %v899_v12  ;;  %v2893_v12 = vsel %vm943_vm3, 1.0, %v3273_v14  ;;  %v1206_v55 = vadd.f32 %v1205_v56, %v1204_v18  ;;  %v1423_v14 = vpop.eup %1422  ;;  %v3287_v18 = vld [vmem:[#allocation26_spill] sm:$0xff] }
 0x1b5   :  { %3281 = vst [vmem:[#allocation12_spill] sm:$0xff] %v2893_v12  ;;  %v1207_v51 = vsel %vm1074_vm12, %v2893_v12, 0.0  ;;  %v1425_v30 = vpop.eup %1424  ;;  %v498_v37 = vmul.f32 0.6931472, %v1423_v14 }
 0x1b6   :  { %v1208_v45 = vadd.f32 %v1207_v51, %v1206_v55  ;;  %v496_v17 = vmul.f32 0.6931472, %v1425_v30 }
 0x1b7   :  { %v560_v55 = vadd.f32 %v498_v37, %v3287_v18  ;;  %v3290_v18 = vld [vmem:[#allocation40_spill] sm:$0xff] }
 0x1b8   :  { %906 = vadd.xlane.f32.xlu1 %v905_v22  ;;  %v2902_v22 = vpop.xlane.xlu1 %418  ;;  %v1210_v60 = vadd.f32 %v1209_v26, %v1208_v45  ;;  %v3288_v45 = vld [vmem:[#allocation24_spill] sm:$0xff] }
 0x1ba   :  { %v1212_v58 = vadd.f32 %v1211_v19, %v1210_v60 }
 0x1bc   :  { %912 = vadd.xlane.f32.xlu1 %v911_v24  ;;  %v3285_v24 = vld [vmem:[#allocation63_spill] sm:$0xff]  ;;  %v2912_v13 = vpop.xlane.xlu1 %424 }
 0x1bd   :  { %1426 = vlog2.f32 %v3285_v24 }
 0x1be   :  { %1428 = vlog2.f32 %v413_v6  ;;  %v559_v6 = vadd.f32 %v496_v17, %v3288_v45  ;;  %v3292_v45 = vld [vmem:[#allocation25_spill] sm:$0xff] }
 0x1bf   :  { %1430 = vlog2.f32 %v3286_v34 }
 0x1c0   :  { %1213 = vadd.xlane.f32.xlu1 %v1212_v58  ;;  %1432 = vlog2.f32 %v416_v50 }
 0x1c1   :  { %1434 = vlog2.f32 %v2902_v22 }
 0x1c2   :  { %1436 = vlog2.f32 %v422_v38 }
 0x1c3   :  { %1438 = vlog2.f32 %v2912_v13 }
 0x1c7   :  { %v1427_v11 = vpop.eup %1426 }
 0x1c8   :  { %v500_v56 = vmul.f32 0.6931472, %v1427_v11  ;;  %v1429_v26 = vpop.eup %1428 }
 0x1c9   :  { %v1431_v51 = vpop.eup %1430  ;;  %v504_v58 = vmul.f32 0.6931472, %v1429_v26  ;;  %v3291_v26 = vld [vmem:[#allocation41_spill] sm:$0xff] }
 0x1ca   :  { %v561_v19 = vadd.f32 %v500_v56, %v3289_v29  ;;  %v1433_v49 = vpop.eup %1432  ;;  %v502_v14 = vmul.f32 0.6931472, %v1431_v51 }
 0x1cb   :  { %v506_v30 = vmul.f32 0.6931472, %v1433_v49  ;;  %v563_v23 = vadd.f32 %v504_v58, %v3290_v18 }
 0x1d1   :  { %v820_v25 = vpop.xlane.xlu1 %819 }
 0x1d2   :  { %v1010_v24 = vsub.f32 %v559_v6, %v820_v25  ;;  %v564_v25 = vadd.f32 %v506_v30, %v3291_v26  ;;  %v562_v6 = vadd.f32 %v502_v14, %v3292_v45 }
 0x1d4   :  { %v1042_v37 = vmul.f32 %v2312_v52, %v1010_v24 }
 0x1d5   :  { %v823_v20 = vpop.xlane.xlu1 %822 }
 0x1d6   :  { %v1011_v60 = vsub.f32 %v560_v55, %v823_v20  ;;  %v1075_v29 = vsel %vm1074_vm12, %v1042_v37, 0.0 }
 0x1d8   :  { %v832_v35 = vpop.xlane.xlu0 %831  ;;  %v1043_v11 = vmul.f32 %v2317_v48, %v1011_v60 }
 0x1d9   :  { %v428_v41 = vpop.xlane.xlu1 %427  ;;  %v1014_v55 = vsub.f32 %v563_v23, %v832_v35 }
 0x1da   :  { %v1076_v56 = vsel %vm1074_vm12, %v1043_v11, 0.0  ;;  %1440 = vlog2.f32 %v428_v41 }
 0x1db   :  { %v1077_v49 = vadd.f32 %v1076_v56, %v1075_v29  ;;  %v1435_v29 = vpop.eup %1434 }
 0x1dc   :  { %v835_v4 = vpop.xlane.xlu0 %834 }
 0x1dd   :  { %v826_v50 = vpop.xlane.xlu1 %825  ;;  %v1015_v60 = vsub.f32 %v564_v25, %v835_v4 }
 0x1de   :  { %v1012_v34 = vsub.f32 %v561_v19, %v826_v50 }
 0x1df   :  { %v1047_v35 = vmul.f32 %v2407_v44, %v1015_v60  ;;  %v1437_v60 = vpop.eup %1436 }
 0x1e0   :  { %v1044_v17 = vmul.f32 %v2341_v28, %v1012_v34  ;;  %v2922_v20 = vpop.xlane.xlu0 %837  ;;  %v1046_v28 = vmul.f32 %v2381_v1, %v1014_v55  ;;  %v510_v22 = vmul.f32 0.6931472, %v1437_v60  ;;  %v1439_v13 = vpop.eup %1438 }
 0x1e1   :  { %v431_v12 = vpop.xlane.xlu1 %430  ;;  %v1084_v37 = vsel %vm1074_vm12, %v1047_v35, 0.0 }
 0x1e2   :  { %v1078_v48 = vsel %vm1074_vm12, %v1044_v17, 0.0  ;;  %v1082_v30 = vsel %vm1074_vm12, %v1046_v28, 0.0  ;;  %1442 = vlog2.f32 %v431_v12  ;;  %v3293_v28 = vld [vmem:[#allocation42_spill] sm:$0xff] }
 0x1e3   :  { %v1079_v58 = vadd.f32 %v1078_v48, %v1077_v49 }
 0x1e4   :  { %v2929_v19 = vpop.xlane.xlu0 %840 }
 0x1e5   :  { %v829_v51 = vpop.xlane.xlu1 %828 }
 0x1e6   :  { %v1013_v52 = vsub.f32 %v562_v6, %v829_v51 }
 0x1e8   :  { %v1045_v50 = vmul.f32 %v2374_v36, %v1013_v52  ;;  %v2935_v34 = vpop.xlane.xlu0 %843  ;;  %v508_v52 = vmul.f32 0.6931472, %v1435_v29 }
 0x1e9   :  { %v434_v23 = vpop.xlane.xlu1 %433 }
 0x1ea   :  { %v1080_v24 = vsel %vm1074_vm12, %v1045_v50, 0.0  ;;  %1444 = vlog2.f32 %v434_v23  ;;  %v565_v50 = vadd.f32 %v508_v52, %v3293_v28  ;;  %v1441_v23 = vpop.eup %1440  ;;  %v3295_v52 = vld [vmem:[#allocation44_spill] sm:$0xff] }
 0x1eb   :  { %v1081_v14 = vadd.f32 %v1080_v24, %v1079_v58  ;;  %v3294_v24 = vld [vmem:[#allocation43_spill] sm:$0xff] }
 0x1ec   :  { %v2939_v18 = vpop.xlane.xlu0 %846  ;;  %v1016_v35 = vsub.f32 %v565_v50, %v2922_v20  ;;  %v566_v41 = vadd.f32 %v510_v22, %v3294_v24 }
 0x1ed   :  { %v1083_v4 = vadd.f32 %v1082_v30, %v1081_v14  ;;  %v437_v11 = vpop.xlane.xlu1 %436  ;;  %v512_v30 = vmul.f32 0.6931472, %v1439_v13 }
 0x1ee   :  { %1446 = vlog2.f32 %v437_v11  ;;  %v1443_v11 = vpop.eup %1442 }
 0x1ef   :  { %v1085_v1 = vadd.f32 %v1084_v37, %v1083_v4  ;;  %v1017_v4 = vsub.f32 %v566_v41, %v2929_v19  ;;  %v1048_v37 = vmul.f32 %v2425_v62, %v1016_v35  ;;  %v567_v20 = vadd.f32 %v512_v30, %v3295_v52  ;;  %v3296_v41 = vld [vmem:[#allocation45_spill] sm:$0xff] }
 0x1f0   :  { %v2941_v36 = vpop.xlane.xlu0 %849  ;;  %v516_v22 = vmul.f32 0.6931472, %v1443_v11 }
 0x1f1   :  { %v440_v17 = vpop.xlane.xlu1 %439  ;;  %v1086_v50 = vsel %vm1074_vm12, %v1048_v37, 0.0  ;;  %v1018_v19 = vsub.f32 %v567_v20, %v2935_v34 }
 0x1f2   :  { %1448 = vlog2.f32 %v440_v17  ;;  %v514_v17 = vmul.f32 0.6931472, %v1441_v23 }
 0x1f4   :  { %v2943_v55 = vpop.xlane.xlu0 %852  ;;  %v1445_v29 = vpop.eup %1444  ;;  %v568_v23 = vadd.f32 %v514_v17, %v3296_v41 }
 0x1f5   :  { %v443_v56 = vpop.xlane.xlu1 %442  ;;  %v518_v13 = vmul.f32 0.6931472, %v1445_v29 }
 0x1f6   :  { %1450 = vlog2.f32 %v443_v56  ;;  %v1019_v34 = vsub.f32 %v568_v23, %v2939_v18 }
 0x1f8   :  { %v2946_v26 = vpop.xlane.xlu0 %855  ;;  %v1447_v56 = vpop.eup %1446  ;;  %v1051_v18 = vmul.f32 %v2468_v33, %v1019_v34 }
 0x1f9   :  { %v446_v44 = vpop.xlane.xlu1 %445  ;;  %v520_v24 = vmul.f32 0.6931472, %v1447_v56 }
 0x1fa   :  { %1452 = vlog2.f32 %v446_v44  ;;  %v1049_v44 = vmul.f32 %v2438_v43, %v1017_v4  ;;  %v569_v43 = vadd.f32 %v516_v22, %v3297_v0  ;;  %v1050_v4 = vmul.f32 %v2457_v47, %v1018_v19 }
 0x1fb   :  { %v571_v56 = vadd.f32 %v520_v24, %v2126_v59  ;;  %v1092_v33 = vsel %vm1074_vm12, %v1051_v18, 0.0 }
 0x1fc   :  { %v2948_v45 = vpop.xlane.xlu0 %858  ;;  %v1449_v62 = vpop.eup %1448  ;;  %v1088_v11 = vsel %vm1074_vm12, %v1049_v44, 0.0  ;;  %v1020_v0 = vsub.f32 %v569_v43, %v2941_v36  ;;  %v1090_v47 = vsel %vm1074_vm12, %v1050_v4, 0.0 }
 0x1fd   :  { %v449_v25 = vpop.xlane.xlu1 %448 }
 0x1fe   :  { %1454 = vlog2.f32 %v449_v25  ;;  %v1087_v25 = vadd.f32 %v1086_v50, %v1085_v1  ;;  %v570_v1 = vadd.f32 %v518_v13, %v2121_v53 }
 0x200   :  { %v2951_v51 = vpop.xlane.xlu0 %861  ;;  %v1451_v52 = vpop.eup %1450  ;;  %v1089_v37 = vadd.f32 %v1088_v11, %v1087_v25  ;;  %v1021_v22 = vsub.f32 %v570_v1, %v2943_v55 }
 0x201   :  { %v452_v6 = vpop.xlane.xlu1 %451  ;;  %v524_v20 = vmul.f32 0.6931472, %v1451_v52 }
 0x202   :  { %1456 = vlog2.f32 %v452_v6  ;;  %v1091_v44 = vadd.f32 %v1090_v47, %v1089_v37  ;;  %v1053_v55 = vmul.f32 %v2545_v2, %v1021_v22 }
 0x203   :  { %v573_v36 = vadd.f32 %v524_v20, %v2135_v3 }
 0x204   :  { %v2953_v49 = vpop.xlane.xlu0 %864  ;;  %v1453_v6 = vpop.eup %1452  ;;  %v1093_v23 = vadd.f32 %v1092_v33, %v1091_v44 }
 0x205   :  { %v455_v48 = vpop.xlane.xlu1 %454 }
 0x206   :  { %1458 = vlog2.f32 %v455_v48  ;;  %v522_v48 = vmul.f32 0.6931472, %v1449_v62  ;;  %v1022_v62 = vsub.f32 %v571_v56, %v2946_v26 }
 0x208   :  { %v2956_v58 = vpop.xlane.xlu0 %867  ;;  %v1455_v17 = vpop.eup %1454  ;;  %v572_v53 = vadd.f32 %v522_v48, %v2128_v61 }
 0x209   :  { %v458_v38 = vpop.xlane.xlu1 %457  ;;  %v528_v13 = vmul.f32 0.6931472, %v1455_v17 }
 0x20a   :  { %1460 = vlog2.f32 %v458_v38  ;;  %v526_v38 = vmul.f32 0.6931472, %v1453_v6  ;;  %v1023_v61 = vsub.f32 %v572_v53, %v2948_v45  ;;  %v1096_v45 = vsel %vm1074_vm12, %v1053_v55, 0.0 }
 0x20b   :  { %v575_v26 = vadd.f32 %v528_v13, %v2148_v10 }
 0x20c   :  { %v2960_v12 = vpop.xlane.xlu0 %870  ;;  %v574_v25 = vadd.f32 %v526_v38, %v2142_v63  ;;  %v1024_v63 = vsub.f32 %v573_v36, %v2951_v51  ;;  %v1055_v6 = vmul.f32 %v2617_v40, %v1023_v61  ;;  %v3299_v40 = vld [vmem:[#allocation28_spill] sm:$0xff] }
 0x20d   :  { %v461_v14 = vpop.xlane.xlu1 %460  ;;  %v1026_v1 = vsub.f32 %v575_v26, %v2956_v58  ;;  %v3300_v58 = vld [vmem:[#allocation47_spill] sm:$0xff]  ;;  %v3302_v36 = vld [vmem:[#allocation48_spill] sm:$0xff] }
 0x20e   :  { %1462 = vlog2.f32 %v461_v14  ;;  %v1457_v14 = vpop.eup %1456  ;;  %v1025_v2 = vsub.f32 %v574_v25, %v2953_v49 }
 0x20f   :  { %v530_v24 = vmul.f32 0.6931472, %v1457_v14  ;;  %v3301_v14 = vld [vmem:[#allocation11_spill] sm:$0xff] }
 0x210   :  { %v2965_v28 = vpop.xlane.xlu0 %873  ;;  %v1459_v59 = vpop.eup %1458  ;;  %v1057_v38 = vmul.f32 %v3299_v40, %v1025_v2  ;;  %v1058_v44 = vmul.f32 %v3301_v14, %v1026_v1  ;;  %v3304_v2 = vld [vmem:[#allocation50_spill] sm:$0xff] }
 0x211   :  { %v464_v60 = vpop.xlane.xlu1 %463  ;;  %v532_v52 = vmul.f32 0.6931472, %v1459_v59  ;;  %v576_v34 = vadd.f32 %v530_v24, %v2152_v57  ;;  %v1100_v57 = vsel %vm1074_vm12, %v1055_v6, 0.0 }
 0x212   :  { %1464 = vlog2.f32 %v464_v60  ;;  %v1052_v60 = vmul.f32 %v2506_v21, %v1020_v0  ;;  %v1054_v21 = vmul.f32 %v2581_v46, %v1022_v62  ;;  %v1104_v55 = vsel %vm1074_vm12, %v1057_v38, 0.0 }
 0x213   :  { %v577_v46 = vadd.f32 %v532_v52, %v2162_v7  ;;  %v1027_v47 = vsub.f32 %v576_v34, %v2960_v12  ;;  %v1106_v26 = vsel %vm1074_vm12, %v1058_v44, 0.0  ;;  %v3305_v34 = vld [vmem:[#allocation51_spill] sm:$0xff] }
 0x214   :  { %v2971_v30 = vpop.xlane.xlu0 %876  ;;  %v1094_v43 = vsel %vm1074_vm12, %v1052_v60, 0.0  ;;  %v1098_v51 = vsel %vm1074_vm12, %v1054_v21, 0.0 }
 0x215   :  { %v467_v35 = vpop.xlane.xlu1 %466  ;;  %v1095_v10 = vadd.f32 %v1094_v43, %v1093_v23  ;;  %v1028_v13 = vsub.f32 %v577_v46, %v2965_v28  ;;  %v1059_v12 = vmul.f32 %v2759_v16, %v1027_v47 }
 0x216   :  { %1466 = vlog2.f32 %v467_v35  ;;  %v1461_v35 = vpop.eup %1460 }
 0x217   :  { %v534_v4 = vmul.f32 0.6931472, %v1461_v35  ;;  %v1097_v0 = vadd.f32 %v1096_v45, %v1095_v10  ;;  %v3303_v35 = vld [vmem:[#allocation49_spill] sm:$0xff]  ;;  %v1060_v21 = vmul.f32 %v2771_v42, %v1028_v13 }
 0x218   :  { %v2979_v50 = vpop.xlane.xlu0 %879  ;;  %v1463_v11 = vpop.eup %1462 }
 0x219   :  { %v470_v29 = vpop.xlane.xlu1 %469  ;;  %v536_v20 = vmul.f32 0.6931472, %v1463_v11  ;;  %v578_v22 = vadd.f32 %v534_v4, %v3300_v58  ;;  %v1099_v53 = vadd.f32 %v1098_v51, %v1097_v0  ;;  %v1110_v1 = vsel %vm1074_vm12, %v1060_v21, 0.0 }
 0x21a   :  { %1468 = vlog2.f32 %v470_v29  ;;  %v3298_v29 = vld [vmem:[#allocation8_spill] sm:$0xff] }
 0x21b   :  { %v1056_v17 = vmul.f32 %v3298_v29, %v1024_v63  ;;  %v579_v60 = vadd.f32 %v536_v20, %v3302_v36  ;;  %v1101_v33 = vadd.f32 %v1100_v57, %v1099_v53  ;;  %v1029_v61 = vsub.f32 %v578_v22, %v2971_v30 }
 0x21c   :  { %v2993_v41 = vpop.xlane.xlu0 %882  ;;  %v1465_v48 = vpop.eup %1464  ;;  %v1108_v30 = vsel %vm1074_vm12, %v1059_v12, 0.0 }
 0x21d   :  { %v473_v19 = vpop.xlane.xlu1 %472  ;;  %v538_v18 = vmul.f32 0.6931472, %v1465_v48  ;;  %v1102_v59 = vsel %vm1074_vm12, %v1056_v17, 0.0  ;;  %v1030_v11 = vsub.f32 %v579_v60, %v2979_v50  ;;  %v1061_v6 = vmul.f32 %v2783_v9, %v1029_v61  ;;  %v3309_v61 = vld [vmem:[#allocation53_spill] sm:$0xff] }
 0x21e   :  { %1470 = vlog2.f32 %v473_v19  ;;  %v1103_v28 = vadd.f32 %v1102_v59, %v1101_v33 }
 0x21f   :  { %v580_v23 = vadd.f32 %v538_v18, %v3303_v35  ;;  %v1062_v50 = vmul.f32 %v2793_v15, %v1030_v11  ;;  %v3307_v18 = vld [vmem:[#allocation54_spill] sm:$0xff] }
 0x220   :  { %v886_v49 = vpop.xlane.xlu0 %885  ;;  %v1467_v56 = vpop.eup %1466 }
 0x221   :  { %v476_v3 = vpop.xlane.xlu1 %475  ;;  %v540_v62 = vmul.f32 0.6931472, %v1467_v56  ;;  %v1031_v4 = vsub.f32 %v580_v23, %v2993_v41  ;;  %v1112_v56 = vsel %vm1074_vm12, %v1061_v6, 0.0  ;;  %v1114_v57 = vsel %vm1074_vm12, %v1062_v50, 0.0 }
 0x223   :  { %v581_v45 = vadd.f32 %v540_v62, %v3304_v2  ;;  %v1063_v9 = vmul.f32 %v2805_v39, %v1031_v4 }
 0x224   :  { %v1469_v7 = vpop.eup %1468  ;;  %v889_v52 = vpop.xlane.xlu0 %888 }
 0x225   :  { %v479_v37 = vpop.xlane.xlu1 %478  ;;  %v542_v24 = vmul.f32 0.6931472, %v1469_v7  ;;  %v1032_v46 = vsub.f32 %v581_v45, %v886_v49  ;;  %v1116_v7 = vsel %vm1074_vm12, %v1063_v9, 0.0  ;;  %v3310_v45 = vld [vmem:[#allocation55_spill] sm:$0xff] }
 0x226   :  { %1472 = vlog2.f32 %v479_v37  ;;  %v3306_v37 = vld [vmem:[#allocation52_spill] sm:$0xff] }
 0x227   :  { %1474 = vlog2.f32 %v476_v3  ;;  %v1105_v3 = vadd.f32 %v1104_v55, %v1103_v28  ;;  %v582_v48 = vadd.f32 %v542_v24, %v3305_v34  ;;  %v1064_v47 = vmul.f32 %v2819_v5, %v1032_v46  ;;  %v3308_v55 = vld [vmem:[#allocation56_spill] sm:$0xff] }
 0x228   :  { %v1471_v25 = vpop.eup %1470  ;;  %v892_v29 = vpop.xlane.xlu0 %891 }
 0x229   :  { %v482_v19 = vpop.xlane.xlu1 %481  ;;  %v544_v43 = vmul.f32 0.6931472, %v1471_v25  ;;  %v1107_v10 = vadd.f32 %v1106_v26, %v1105_v3  ;;  %v1033_v41 = vsub.f32 %v582_v48, %v889_v52  ;;  %v1118_v62 = vsel %vm1074_vm12, %v1064_v47, 0.0  ;;  %v3311_v48 = vld [vmem:[#allocation58_spill] sm:$0xff] }
 0x22b   :  { %v583_v51 = vadd.f32 %v544_v43, %v3306_v37  ;;  %v1109_v17 = vadd.f32 %v1108_v30, %v1107_v10  ;;  %v1065_v14 = vmul.f32 %v2833_v27, %v1033_v41  ;;  %v3312_v37 = vld [vmem:[#allocation9_spill] sm:$0xff] }
 0x22c   :  { %v898_v39 = vpop.xlane.xlu0 %897 }
 0x22d   :  { %v485_v63 = vpop.xlane.xlu1 %484  ;;  %v1111_v40 = vadd.f32 %v1110_v1, %v1109_v17  ;;  %v1034_v15 = vsub.f32 %v583_v51, %v892_v29  ;;  %v1120_v25 = vsel %vm1074_vm12, %v1065_v14, 0.0 }
 0x22e   :  { %1476 = vlog2.f32 %v485_v63 }
 0x22f   :  { %1478 = vlog2.f32 %v482_v19  ;;  %v1113_v49 = vadd.f32 %v1112_v56, %v1111_v40  ;;  %v1066_v5 = vmul.f32 %v2845_v32, %v1034_v15  ;;  %v3315_v15 = vld [vmem:[#allocation10_spill] sm:$0xff] }
 0x230   :  { %v1473_v16 = vpop.eup %1472  ;;  %v904_v28 = vpop.xlane.xlu0 %903 }
 0x231   :  { %v488_v42 = vpop.xlane.xlu1 %487  ;;  %v548_v20 = vmul.f32 0.6931472, %v1473_v16  ;;  %v1475_v0 = vpop.eup %1474  ;;  %v1115_v13 = vadd.f32 %v1114_v57, %v1113_v49  ;;  %v1122_v52 = vsel %vm1074_vm12, %v1066_v5, 0.0 }
 0x232   :  { %1480 = vlog2.f32 %v488_v42  ;;  %v546_v53 = vmul.f32 0.6931472, %v1475_v0 }
 0x233   :  { %v585_v58 = vadd.f32 %v548_v20, %v3307_v18  ;;  %v1117_v36 = vadd.f32 %v1116_v7, %v1115_v13 }
 0x234   :  { %v584_v24 = vadd.f32 %v546_v53, %v3309_v61  ;;  %v910_v46 = vpop.xlane.xlu0 %909 }
 0x235   :  { %v491_v38 = vpop.xlane.xlu1 %490  ;;  %v1036_v60 = vsub.f32 %v585_v58, %v898_v39  ;;  %v1119_v35 = vadd.f32 %v1118_v62, %v1117_v36 }
 0x236   :  { %1482 = vlog2.f32 %v491_v38  ;;  %v3314_v38 = vld [vmem:[#allocation59_spill] sm:$0xff] }
 0x237   :  { %v1121_v21 = vadd.f32 %v1120_v25, %v1119_v35  ;;  %v1068_v32 = vmul.f32 %v2858_v54, %v1036_v60 }
 0x238   :  { %v1477_v22 = vpop.eup %1476 }
 0x239   :  { %v1479_v44 = vpop.eup %1478  ;;  %v552_v19 = vmul.f32 0.6931472, %v1477_v22  ;;  %v494_v59 = vpop.xlane.xlu1 %493  ;;  %v1123_v16 = vadd.f32 %v1122_v52, %v1121_v21  ;;  %v1126_v50 = vsel %vm1074_vm12, %v1068_v32, 0.0 }
 0x23a   :  { %1484 = vlog2.f32 %v494_v59  ;;  %v550_v33 = vmul.f32 0.6931472, %v1479_v44  ;;  %v3317_v44 = vld [vmem:[#allocation27_spill] sm:$0xff] }
 0x23b   :  { %v587_v12 = vadd.f32 %v552_v19, %v3308_v55 }
 0x23c   :  { %v1481_v27 = vpop.eup %1480  ;;  %v586_v3 = vadd.f32 %v550_v33, %v3310_v45 }
 0x23d   :  { %v895_v23 = vpop.xlane.xlu1 %894  ;;  %v554_v11 = vmul.f32 0.6931472, %v1481_v27  ;;  %v1038_v43 = vsub.f32 %v587_v12, %v904_v28 }
 0x23e   :  { %v1035_v26 = vsub.f32 %v584_v24, %v895_v23 }
 0x23f   :  { %v1070_v54 = vmul.f32 %v2877_v8, %v1038_v43  ;;  %v3316_v8 = vld [vmem:[#allocation12_spill] sm:$0xff] }
 0x240   :  { %v1483_v63 = vpop.eup %1482  ;;  %v1067_v2 = vmul.f32 %v2861_v31, %v1035_v26  ;;  %v3313_v31 = vld [vmem:[#allocation57_spill] sm:$0xff] }
 0x241   :  { %v556_v30 = vmul.f32 0.6931472, %v1483_v63  ;;  %v901_v6 = vpop.xlane.xlu1 %900  ;;  %v588_v29 = vadd.f32 %v554_v11, %v3313_v31  ;;  %v1130_v47 = vsel %vm1074_vm12, %v1070_v54, 0.0 }
 0x242   :  { %v1124_v4 = vsel %vm1074_vm12, %v1067_v2, 0.0  ;;  %v1037_v34 = vsub.f32 %v586_v3, %v901_v6 }
 0x243   :  { %v589_v10 = vadd.f32 %v556_v30, %v3311_v48  ;;  %v1125_v42 = vadd.f32 %v1124_v4, %v1123_v16 }
 0x244   :  { %v1485_v1 = vpop.eup %1484  ;;  %v1069_v51 = vmul.f32 %v3312_v37, %v1037_v34 }
 0x245   :  { %v1040_v17 = vsub.f32 %v589_v10, %v910_v46  ;;  %v558_v20 = vmul.f32 0.6931472, %v1485_v1  ;;  %v1127_v56 = vadd.f32 %v1126_v50, %v1125_v42  ;;  %v907_v9 = vpop.xlane.xlu1 %906 }
 0x246   :  { %v1128_v41 = vsel %vm1074_vm12, %v1069_v51, 0.0  ;;  %v1039_v0 = vsub.f32 %v588_v29, %v907_v9 }
 0x247   :  { %v1129_v40 = vadd.f32 %v1128_v41, %v1127_v56  ;;  %v590_v57 = vadd.f32 %v558_v20, %v3314_v38  ;;  %v1072_v49 = vmul.f32 %v3315_v15, %v1040_v17 }
 0x248   :  { %v1071_v18 = vmul.f32 %v3316_v8, %v1039_v0 }
 0x249   :  { %v1131_v58 = vadd.f32 %v1130_v47, %v1129_v40  ;;  %v913_v22 = vpop.xlane.xlu1 %912  ;;  %v1134_v39 = vsel %vm1074_vm12, %v1072_v49, 0.0 }
 0x24a   :  { %v1132_v7 = vsel %vm1074_vm12, %v1071_v18, 0.0  ;;  %v1041_v53 = vsub.f32 %v590_v57, %v913_v22 }
 0x24b   :  { %v1133_v14 = vadd.f32 %v1132_v7, %v1131_v58 }
 0x24c   :  { %v1073_v13 = vmul.f32 %v3317_v44, %v1041_v53 }
 0x24d   :  { %v1135_v19 = vadd.f32 %v1134_v39, %v1133_v14  ;;  %v1214_v5 = vpop.xlane.xlu1 %1213 }
 0x24e   :  { %v1136_v59 = vsel %vm1074_vm12, %v1073_v13, 0.0  ;;  %v1215_v36 = vrot.slane %v1214_v5, 4  ;;  %vm1148_vm12 = vcmask 0  }
 0x24f   :  { %v1137_v62 = vadd.f32 %v1136_v59, %v1135_v19 }
 0x250   :  { %v1216_v60 = vadd.f32 %v1215_v36, %v1214_v5 }
 0x251   :  { %1138 = vadd.xlane.f32.xlu0 %v1137_v62 }
 0x252   :  { %v1217_v25 = vrot.slane %v1216_v60, 2 }
 0x254   :  { %v1218_v61 = vadd.f32 %v1217_v25, %v1216_v60 }
 0x256   :  { %v1219_v35 = vrot.slane %v1218_v61, 1 }
 0x258   :  { %v1220_v28 = vadd.f32 %v1219_v35, %v1218_v61 }
 0x2de   :  { %v1139_v33 = vpop.xlane.xlu0 %1138 }
 0x2df   :  { %v1140_v55 = vrot.slane %v1139_v33, 4 }
 0x2e1   :  { %v1141_v12 = vadd.f32 %v1140_v55, %v1139_v33 }
 0x2e3   :  { %v1142_v24 = vrot.slane %v1141_v12, 2 }
 0x2e5   :  { %v1143_v27 = vadd.f32 %v1142_v24, %v1141_v12 }
 0x2e7   :  { %v1144_v23 = vrot.slane %v1143_v27, 1 }
 0x2e9   :  { %v1145_v52 = vadd.f32 %v1144_v23, %v1143_v27 }
 0x2eb   :  { %1284 = vpush %v1145_v52 }
 0x2ec   :  { %1286 = vpush %v1220_v28 }
 0x31c   :  { %s1285_s10 = spop %1284 }
 0x31d   :  { %v1147_v26 = vstv %s1285_s10  ;;  %s1287_s11 = spop %1286 }
 0x31e   :  { %v1222_v21 = vstv %s1287_s11  ;;  %1149 = vst.msk [vmem:[#allocation2] sm:$0x1] %vm1148_vm12, %v1147_v26 }
 0x31f   :  { %1223 = vst.msk [vmem:[#allocation4] sm:$0x1] %vm1148_vm12, %v1222_v21 }
 0x320   :  { %1548 = shalt.err (!%p1545_p4)
}
 0x321   :  { %s1549_s16 = scalar_lea.hbm %s3095_s2, 16 }
 0x322   :  { %p1550_p5 = scmp.ne.s32.totalorder %s3095_s2, %s1549_s16  ;;  %p1553_p6 = scmp.lt.u32.totalorder %s1549_s16, %s3095_s2 }
 0x324   :  { %p1555_p7 = pnand %p1553_p6, %p1550_p5 }
 0x326   :  { %1558 = shalt.err (!%p1555_p7)
}
 0x327   :  { %1233 = dma.vmem_to_hbm [thread:$0]  %s1231_s0, 16, %s3095_s2, [#allocation3]  }
 0x328   :  { %s1559_s23 = scalar_lea.vmem %s3061_s9, 16  ;;  %s1563_s24 = scalar_lea.vmem %s3061_s9, 32 }
 0x329   :  { %p1560_p8 = scmp.ne.s32.totalorder %s3061_s9, %s1559_s23  ;;  %p1564_p9 = scmp.lt.s32.totalorder %s3061_s9, %s3061_s9 }
 0x32a   :  { %p1565_p10 = scmp.lt.s32.totalorder %s1563_s24, %s1559_s23 }
 0x32c   :  { %p1566_p11 = por %p1565_p10, %p1564_p9 }
 0x32e   :  { %p1567_p12 = pnand %p1566_p11, %p1560_p8 }
 0x330   :  { %1570 = shalt.err (!%p1567_p12)
}
 0x331   :  { %s1571_s27 = scalar_lea.hbm %s3096_s3, 16 }
 0x332   :  { %p1572_p13 = scmp.ne.s32.totalorder %s3096_s3, %s1571_s27  ;;  %p1575_p0 = scmp.lt.u32.totalorder %s1571_s27, %s3096_s3 }
 0x334   :  { %p1577_p1 = pnand %p1575_p0, %p1572_p13 }
 0x336   :  { %1580 = shalt.err (!%p1577_p1)
}
 0x337   :  { %1243 = dma.vmem_to_hbm [thread:$0]  %s3061_s9, 16, %s3096_s3, [#allocation5]  }
 0x338   :  { %1581 = dma.done.wait [#allocation3], 16  }
 0x339   :  { %1582 = vsyncadd [#allocation3], 4294967280 }
 0x33a   :  { %1583 = dma.done.wait [#allocation5], 16  }
 0x33b   :  { %1584 = vsyncadd [#allocation5], 4294967280 }
 0x33c   :  { %1250 = vsyncpa [#allocation3], 1 }
 0x33d   :  { %1251 = vsyncpa [#allocation5], 1 }

</bundles_post_ra>
